<compile_context>
chip_gen: v7x
topology: tpu7x:2x2x1
jax: 0.10.0
libtpu: 0.0.40
codegen_flags: <defaults>
</compile_context>

<pallas_src>
import functools

import jax
import jax.numpy as jnp
from jax import lax
from jax.experimental import pallas as pl
from jax.experimental.pallas import tpu as pltpu


# ---------------------------------------------------------------------------
# The single fused kernel
# ---------------------------------------------------------------------------
def _net_kernel(x_ref,                                  # (1, 64, 64) input image
                t1_ref, b1_ref,                         # conv1 Toeplitz + pooled bias row
                pe1_ref, po1_ref, ce1_ref, co1_ref,     # pool1 selection matrices
                t2_ref, b2_ref,                         # conv2 Toeplitz + pooled bias row
                pe2_ref, po2_ref, ce2_ref, co2_ref,     # pool2 selection matrices
                wf1_ref, bf1_ref,                       # fc1 (re-arranged) + bias
                wf2_ref, bf2_ref,                       # fc2 + bias
                wf3_ref, bf3_ref,                       # fc3 + bias
                out_ref,                                # (1, 1, 9) output
                s2_ref, s4_ref):                        # VMEM scratch
    f32 = jnp.float32
    dot = lambda a, b: jnp.dot(a, b, preferred_element_type=f32)

    # ---- conv1 (1->6, 5x5), raw accumulation : (60, 6*60), cols = co*60+ox -
    c1 = dot(x_ref[0, 0:60, :], t1_ref[0])
    for ky in range(1, 5):
        c1 = c1 + dot(x_ref[0, ky:ky + 60, :], t1_ref[ky])

    # ---- maxpool 2x2 (selection matmuls) -> bias -> relu : (30, 6*30) ------
    #      (bias is per-channel, constant in each window; relu commutes with
    #       max, so deferring them past the pool is exact and cheaper)
    r1 = jnp.maximum(dot(pe1_ref[...], c1), dot(po1_ref[...], c1))   # rows
    p1 = jnp.maximum(dot(r1, ce1_ref[...]), dot(r1, co1_ref[...]))   # cols
    s2_ref[...] = jnp.maximum(p1 + b1_ref[...], 0.0)                 # (30, 180)

    # ---- conv2 (6->16, 5x5), raw accumulation : (26, 16*26), cols = co*26+ox
    c3 = dot(s2_ref[0:26, :], t2_ref[0])
    for ky in range(1, 5):
        c3 = c3 + dot(s2_ref[ky:ky + 26, :], t2_ref[ky])

    # ---- maxpool 2x2 -> bias -> relu : (13, 16*13), cols = co*13+j ---------
    #      (torch.flatten NCHW order is recovered row-by-row in fc1 below)
    r2 = jnp.maximum(dot(pe2_ref[...], c3), dot(po2_ref[...], c3))
    p2 = jnp.maximum(dot(r2, ce2_ref[...]), dot(r2, co2_ref[...]))
    s4_ref[...] = jnp.maximum(p2 + b2_ref[...], 0.0)                 # (13, 208)

    # ---- fc1 (2704->120) + relu, contraction batched over the 13 rows ------
    f5 = bf1_ref[...]
    for i in range(13):
        f5 = f5 + dot(s4_ref[i:i + 1, :], wf1_ref[i])
    f5 = jnp.maximum(f5, 0.0)

    # ---- fc2 (120->84) + relu, fc3 (84->9) ---------------------------------
    f6 = jnp.maximum(dot(f5, wf2_ref[...]) + bf2_ref[...], 0.0)
    out_ref[0] = dot(f6, wf3_ref[...]) + bf3_ref[...]


_PREP_KEYS = ("T1", "b1", "PE1", "PO1", "CE1", "CO1",
              "T2", "b2", "PE2", "PO2", "CE2", "CO2",
              "Wfc1", "bfc1", "Wfc2", "bfc2", "Wfc3", "bfc3")


def _zero_map(nd, n):
    return (0,) * nd


def net_forward(x_nchw, prep):
    """x_nchw: (N, 1, 64, 64) f32.  prep: output of prepare_params()."""
    N, C, H, W = x_nchw.shape
    assert (C, H, W) == (1, 64, 64)
    x = x_nchw.reshape(N, 64, 64).astype(jnp.float32)

    consts = [prep[k] for k in _PREP_KEYS]
    in_specs = [pl.BlockSpec((1, 64, 64), lambda n: (n, 0, 0))]
    # Constant operands: index_map always (0,...,0) -> Pallas keeps the tile
    # resident and does not re-DMA it across grid steps.
    in_specs += [pl.BlockSpec(c.shape, functools.partial(_zero_map, c.ndim))
                 for c in consts]

    out = pl.pallas_call(
        _net_kernel,
        out_shape=jax.ShapeDtypeStruct((N, 1, 9), jnp.float32),
        grid_spec=pltpu.PrefetchScalarGridSpec(
            num_scalar_prefetch=0,
            grid=(N,),
            in_specs=in_specs,
            out_specs=pl.BlockSpec((1, 1, 9), lambda n: (n, 0, 0)),
            scratch_shapes=[
                pltpu.VMEM((30, 180), jnp.float32),   # pooled conv1 activation
                pltpu.VMEM((13, 208), jnp.float32),   # pooled conv2 activation
            ],
        ),
        compiler_params=pltpu.CompilerParams(
            dimension_semantics=("parallel",),
            vmem_limit_bytes=32 * 1024 * 1024),
    )(x, *consts)
    return out.reshape(N, 9)


# ---------------------------------------------------------------------------
# One-time weight preprocessing (runs OUTSIDE the jitted forward)
# ---------------------------------------------------------------------------
def _sel(rows, cols, cond):
    r = jnp.arange(rows)[:, None]
    c = jnp.arange(cols)[None, :]
    return cond(r, c).astype(jnp.float32)


def prepare_params(params):
    f32 = jnp.float32
    w1 = params["conv1_w"].astype(f32)       # (6, 1, 5, 5)
    b1 = params["conv1_b"].astype(f32)       # (6,)
    w2 = params["conv2_w"].astype(f32)       # (16, 6, 5, 5)
    b2 = params["conv2_b"].astype(f32)       # (16,)

    # conv1 Toeplitz: T1[ky, x, co*60+ox] = w1[co,0,ky,x-ox] for 0<=x-ox<=4
    d1 = jnp.arange(64)[:, None] - jnp.arange(60)[None, :]          # (64, 60)
    m1 = ((d1 >= 0) & (d1 <= 4)).astype(f32)
    tap1 = w1[:, 0, :, :][:, :, jnp.clip(d1, 0, 4)] * m1[None, None]  # (6,5,64,60)
    T1 = jnp.transpose(tap1, (1, 2, 0, 3)).reshape(5, 64, 6 * 60)

    # conv2 Toeplitz: T2[ky, ci*30+x, co*26+ox] = w2[co,ci,ky,x-ox]
    d2 = jnp.arange(30)[:, None] - jnp.arange(26)[None, :]          # (30, 26)
    m2 = ((d2 >= 0) & (d2 <= 4)).astype(f32)
    tap2 = w2[:, :, :, jnp.clip(d2, 0, 4)] * m2[None, None, None]   # (16,6,5,30,26)
    T2 = jnp.transpose(tap2, (2, 1, 3, 0, 4)).reshape(5, 6 * 30, 16 * 26)

    # 2x2 / stride-2 max-pool selection matrices (exact 0/1 gathers).
    PE1 = _sel(30, 60, lambda i, y: y == 2 * i)
    PO1 = _sel(30, 60, lambda i, y: y == 2 * i + 1)
    CE1 = _sel(360, 180, lambda r, c: (r // 60 == c // 30) & (r % 60 == 2 * (c % 30)))
    CO1 = _sel(360, 180, lambda r, c: (r // 60 == c // 30) & (r % 60 == 2 * (c % 30) + 1))
    PE2 = _sel(13, 26, lambda i, y: y == 2 * i)
    PO2 = _sel(13, 26, lambda i, y: y == 2 * i + 1)
    CE2 = _sel(416, 208, lambda r, c: (r // 26 == c // 13) & (r % 26 == 2 * (c % 13)))
    CO2 = _sel(416, 208, lambda r, c: (r // 26 == c // 13) & (r % 26 == 2 * (c % 13) + 1))

    # fc1 re-arranged so Wfc1[i, co*13+j, u] = fc1_w[u, co*169 + i*13 + j]
    Wfc1 = params["fc1_w"].astype(f32).reshape(120, 16, 13, 13)
    Wfc1 = jnp.transpose(Wfc1, (2, 1, 3, 0)).reshape(13, 16 * 13, 120)

    return {
        "T1": T1, "b1": jnp.repeat(b1, 30).reshape(1, 180),     # bias in pooled layout
        "PE1": PE1, "PO1": PO1, "CE1": CE1, "CO1": CO1,
        "T2": T2, "b2": jnp.repeat(b2, 13).reshape(1, 208),     # bias in pooled layout
        "PE2": PE2, "PO2": PO2, "CE2": CE2, "CO2": CO2,
        "Wfc1": Wfc1, "bfc1": params["fc1_b"].astype(f32).reshape(1, 120),
        "Wfc2": params["fc2_w"].astype(f32).T, "bfc2": params["fc2_b"].astype(f32).reshape(1, 84),
        "Wfc3": params["fc3_w"].astype(f32).T, "bfc3": params["fc3_b"].astype(f32).reshape(1, 9),
    }


# ---------------------------------------------------------------------------
# Pure-JAX reference (for verification)
# ---------------------------------------------------------------------------
def reference_forward(x_nchw, params):
    hi = lax.Precision.HIGHEST

    def conv(x, w, b):
        dn = lax.conv_dimension_numbers(x.shape, w.shape,
                                        ("NCHW", "OIHW", "NCHW"))
        y = lax.conv_general_dilated(x, w, (1, 1), "VALID",
                                     dimension_numbers=dn, precision=hi)
        return jax.nn.relu(y + b[None, :, None, None])

    def pool(x):
        return lax.reduce_window(x, -jnp.inf, lax.max,
                                 (1, 1, 2, 2), (1, 1, 2, 2), "VALID")

    h = pool(conv(x_nchw, params["conv1_w"], params["conv1_b"]))
    h = pool(conv(h, params["conv2_w"], params["conv2_b"]))
    h = h.reshape(h.shape[0], -1)
    h = jax.nn.relu(jnp.dot(h, params["fc1_w"].T, precision=hi) + params["fc1_b"])
    h = jax.nn.relu(jnp.dot(h, params["fc2_w"].T, precision=hi) + params["fc2_b"])
    return jnp.dot(h, params["fc3_w"].T, precision=hi) + params["fc3_b"]


# ---------------------------------------------------------------------------
def init_params(key):
    ks = jax.random.split(key, 10)
    n = lambda k, shape, s: (s * jax.random.normal(k, shape)).astype(jnp.float32)
    return {
        "conv1_w": n(ks[0], (6, 1, 5, 5), 0.10),
        "conv1_b": n(ks[1], (6,), 0.01),
        "conv2_w": n(ks[2], (16, 6, 5, 5), 0.08),
        "conv2_b": n(ks[3], (16,), 0.01),
        "fc1_w": n(ks[4], (120, 2704), 0.02),
        "fc1_b": n(ks[5], (120,), 0.01),
        "fc2_w": n(ks[6], (84, 120), 0.05),
        "fc2_b": n(ks[7], (84,), 0.01),
        "fc3_w": n(ks[8], (9, 84), 0.05),
        "fc3_b": n(ks[9], (9,), 0.01),
    }


if __name__ == "__main__":
    key = jax.random.PRNGKey(0)
    k_params, k_x = jax.random.split(key)
    params = init_params(k_params)

    # Input: batch=2, 1 channel, 64x64 (64 is required so fc1 input is 2704).
    x = jax.random.normal(k_x, (2, 1, 64, 64), dtype=jnp.float32)

    # One-time weight preprocessing, outside the jitted forward.
    prep = prepare_params(params)

    fwd = jax.jit(net_forward)
    out = jax.block_until_ready(fwd(x, prep))
    assert out.shape == (2, 9), out.shape

    ref = jax.block_until_ready(jax.jit(reference_forward)(x, params))
    assert jnp.allclose(out, ref, atol=2e-2, rtol=2e-2), (
        float(jnp.max(jnp.abs(out - ref))))

    print("KERNEL_OK")
</pallas_src>

<mosaic_0001>
module attributes {stable_mosaic.version = 11 : i64} {
  func.func @_net_kernel(%arg0: i32, %arg1: memref<1x64x64xf32, #tpu.memory_space<vmem>>, %arg2: memref<5x64x360xf32, #tpu.memory_space<vmem>>, %arg3: memref<1x180xf32, #tpu.memory_space<vmem>>, %arg4: memref<30x60xf32, #tpu.memory_space<vmem>>, %arg5: memref<30x60xf32, #tpu.memory_space<vmem>>, %arg6: memref<360x180xf32, #tpu.memory_space<vmem>>, %arg7: memref<360x180xf32, #tpu.memory_space<vmem>>, %arg8: memref<5x180x416xf32, #tpu.memory_space<vmem>>, %arg9: memref<1x208xf32, #tpu.memory_space<vmem>>, %arg10: memref<13x26xf32, #tpu.memory_space<vmem>>, %arg11: memref<13x26xf32, #tpu.memory_space<vmem>>, %arg12: memref<416x208xf32, #tpu.memory_space<vmem>>, %arg13: memref<416x208xf32, #tpu.memory_space<vmem>>, %arg14: memref<13x208x120xf32, #tpu.memory_space<vmem>>, %arg15: memref<1x120xf32, #tpu.memory_space<vmem>>, %arg16: memref<120x84xf32, #tpu.memory_space<vmem>>, %arg17: memref<1x84xf32, #tpu.memory_space<vmem>>, %arg18: memref<84x9xf32, #tpu.memory_space<vmem>>, %arg19: memref<1x9xf32, #tpu.memory_space<vmem>>, %arg20: memref<1x1x9xf32, #tpu.memory_space<vmem>>, %arg21: memref<30x180xf32, #tpu.memory_space<vmem>>, %arg22: memref<13x208xf32, #tpu.memory_space<vmem>>) attributes {dimension_semantics = [#tpu.dimension_semantics<parallel>], iteration_bounds = array<i64: 2>, scalar_prefetch = 0 : i64, scratch_operands = 2 : i64, tpu.core_type = #tpu.core_type<tc>, window_params = [{transform_indices = @transform_0, window_bounds = array<i64: 1, 64, 64>}, {pipeline_mode = #tpu.pipeline_mode<synchronous>, transform_indices = @transform_1, window_bounds = array<i64: 5, 64, 360>}, {pipeline_mode = #tpu.pipeline_mode<synchronous>, transform_indices = @transform_2, window_bounds = array<i64: 1, 180>}, {pipeline_mode = #tpu.pipeline_mode<synchronous>, transform_indices = @transform_3, window_bounds = array<i64: 30, 60>}, {pipeline_mode = #tpu.pipeline_mode<synchronous>, transform_indices = @transform_4, window_bounds = array<i64: 30, 60>}, {pipeline_mode = #tpu.pipeline_mode<synchronous>, transform_indices = @transform_5, window_bounds = array<i64: 360, 180>}, {pipeline_mode = #tpu.pipeline_mode<synchronous>, transform_indices = @transform_6, window_bounds = array<i64: 360, 180>}, {pipeline_mode = #tpu.pipeline_mode<synchronous>, transform_indices = @transform_7, window_bounds = array<i64: 5, 180, 416>}, {pipeline_mode = #tpu.pipeline_mode<synchronous>, transform_indices = @transform_8, window_bounds = array<i64: 1, 208>}, {pipeline_mode = #tpu.pipeline_mode<synchronous>, transform_indices = @transform_9, window_bounds = array<i64: 13, 26>}, {pipeline_mode = #tpu.pipeline_mode<synchronous>, transform_indices = @transform_10, window_bounds = array<i64: 13, 26>}, {pipeline_mode = #tpu.pipeline_mode<synchronous>, transform_indices = @transform_11, window_bounds = array<i64: 416, 208>}, {pipeline_mode = #tpu.pipeline_mode<synchronous>, transform_indices = @transform_12, window_bounds = array<i64: 416, 208>}, {pipeline_mode = #tpu.pipeline_mode<synchronous>, transform_indices = @transform_13, window_bounds = array<i64: 13, 208, 120>}, {pipeline_mode = #tpu.pipeline_mode<synchronous>, transform_indices = @transform_14, window_bounds = array<i64: 1, 120>}, {pipeline_mode = #tpu.pipeline_mode<synchronous>, transform_indices = @transform_15, window_bounds = array<i64: 120, 84>}, {pipeline_mode = #tpu.pipeline_mode<synchronous>, transform_indices = @transform_16, window_bounds = array<i64: 1, 84>}, {pipeline_mode = #tpu.pipeline_mode<synchronous>, transform_indices = @transform_17, window_bounds = array<i64: 84, 9>}, {pipeline_mode = #tpu.pipeline_mode<synchronous>, transform_indices = @transform_18, window_bounds = array<i64: 1, 9>}, {transform_indices = @transform_19, window_bounds = array<i64: 1, 1, 9>}]} {
    %c0 = arith.constant 0 : index
    %c0_0 = arith.constant 0 : index
    %c0_1 = arith.constant 0 : index
    %0 = vector.load %arg1[%c0, %c0_0, %c0_1] : memref<1x64x64xf32, #tpu.memory_space<vmem>>, vector<1x60x64xf32>
    %1 = vector.shape_cast %0 : vector<1x60x64xf32> to vector<60x64xf32>
    %c0_2 = arith.constant 0 : index
    %c0_3 = arith.constant 0 : index
    %c0_4 = arith.constant 0 : index
    %2 = vector.load %arg2[%c0_2, %c0_3, %c0_4] : memref<5x64x360xf32, #tpu.memory_space<vmem>>, vector<1x64x360xf32>
    %3 = vector.shape_cast %2 : vector<1x64x360xf32> to vector<64x360xf32>
    %cst = arith.constant dense<0.000000e+00> : vector<60x360xf32>
    %4 = tpu.matmul %1, %3, %cst {dimension_numbers = #tpu.dot_dimension_numbers<[1], [0], [0], [1], [0, 0, 1, 1], [], []>} : vector<60x64xf32>, vector<64x360xf32>, vector<60x360xf32> -> vector<60x360xf32>
    %c0_5 = arith.constant 0 : index
    %c1 = arith.constant 1 : index
    %c0_6 = arith.constant 0 : index
    %5 = vector.load %arg1[%c0_5, %c1, %c0_6] : memref<1x64x64xf32, #tpu.memory_space<vmem>>, vector<1x60x64xf32>
    %6 = vector.shape_cast %5 : vector<1x60x64xf32> to vector<60x64xf32>
    %c1_7 = arith.constant 1 : index
    %c0_8 = arith.constant 0 : index
    %c0_9 = arith.constant 0 : index
    %7 = vector.load %arg2[%c1_7, %c0_8, %c0_9] : memref<5x64x360xf32, #tpu.memory_space<vmem>>, vector<1x64x360xf32>
    %8 = vector.shape_cast %7 : vector<1x64x360xf32> to vector<64x360xf32>
    %cst_10 = arith.constant dense<0.000000e+00> : vector<60x360xf32>
    %9 = tpu.matmul %6, %8, %cst_10 {dimension_numbers = #tpu.dot_dimension_numbers<[1], [0], [0], [1], [0, 0, 1, 1], [], []>} : vector<60x64xf32>, vector<64x360xf32>, vector<60x360xf32> -> vector<60x360xf32>
    %10 = arith.addf %4, %9 : vector<60x360xf32>
    %c0_11 = arith.constant 0 : index
    %c2 = arith.constant 2 : index
    %c0_12 = arith.constant 0 : index
    %11 = vector.load %arg1[%c0_11, %c2, %c0_12] : memref<1x64x64xf32, #tpu.memory_space<vmem>>, vector<1x60x64xf32>
    %12 = vector.shape_cast %11 : vector<1x60x64xf32> to vector<60x64xf32>
    %c2_13 = arith.constant 2 : index
    %c0_14 = arith.constant 0 : index
    %c0_15 = arith.constant 0 : index
    %13 = vector.load %arg2[%c2_13, %c0_14, %c0_15] : memref<5x64x360xf32, #tpu.memory_space<vmem>>, vector<1x64x360xf32>
    %14 = vector.shape_cast %13 : vector<1x64x360xf32> to vector<64x360xf32>
    %cst_16 = arith.constant dense<0.000000e+00> : vector<60x360xf32>
    %15 = tpu.matmul %12, %14, %cst_16 {dimension_numbers = #tpu.dot_dimension_numbers<[1], [0], [0], [1], [0, 0, 1, 1], [], []>} : vector<60x64xf32>, vector<64x360xf32>, vector<60x360xf32> -> vector<60x360xf32>
    %16 = arith.addf %10, %15 : vector<60x360xf32>
    %c0_17 = arith.constant 0 : index
    %c3 = arith.constant 3 : index
    %c0_18 = arith.constant 0 : index
    %17 = vector.load %arg1[%c0_17, %c3, %c0_18] : memref<1x64x64xf32, #tpu.memory_space<vmem>>, vector<1x60x64xf32>
    %18 = vector.shape_cast %17 : vector<1x60x64xf32> to vector<60x64xf32>
    %c3_19 = arith.constant 3 : index
    %c0_20 = arith.constant 0 : index
    %c0_21 = arith.constant 0 : index
    %19 = vector.load %arg2[%c3_19, %c0_20, %c0_21] : memref<5x64x360xf32, #tpu.memory_space<vmem>>, vector<1x64x360xf32>
    %20 = vector.shape_cast %19 : vector<1x64x360xf32> to vector<64x360xf32>
    %cst_22 = arith.constant dense<0.000000e+00> : vector<60x360xf32>
    %21 = tpu.matmul %18, %20, %cst_22 {dimension_numbers = #tpu.dot_dimension_numbers<[1], [0], [0], [1], [0, 0, 1, 1], [], []>} : vector<60x64xf32>, vector<64x360xf32>, vector<60x360xf32> -> vector<60x360xf32>
    %22 = arith.addf %16, %21 : vector<60x360xf32>
    %c0_23 = arith.constant 0 : index
    %c4 = arith.constant 4 : index
    %c0_24 = arith.constant 0 : index
    %23 = vector.load %arg1[%c0_23, %c4, %c0_24] : memref<1x64x64xf32, #tpu.memory_space<vmem>>, vector<1x60x64xf32>
    %24 = vector.shape_cast %23 : vector<1x60x64xf32> to vector<60x64xf32>
    %c4_25 = arith.constant 4 : index
    %c0_26 = arith.constant 0 : index
    %c0_27 = arith.constant 0 : index
    %25 = vector.load %arg2[%c4_25, %c0_26, %c0_27] : memref<5x64x360xf32, #tpu.memory_space<vmem>>, vector<1x64x360xf32>
    %26 = vector.shape_cast %25 : vector<1x64x360xf32> to vector<64x360xf32>
    %cst_28 = arith.constant dense<0.000000e+00> : vector<60x360xf32>
    %27 = tpu.matmul %24, %26, %cst_28 {dimension_numbers = #tpu.dot_dimension_numbers<[1], [0], [0], [1], [0, 0, 1, 1], [], []>} : vector<60x64xf32>, vector<64x360xf32>, vector<60x360xf32> -> vector<60x360xf32>
    %28 = arith.addf %22, %27 : vector<60x360xf32>
    %c0_29 = arith.constant 0 : index
    %c0_30 = arith.constant 0 : index
    %29 = vector.load %arg4[%c0_29, %c0_30] : memref<30x60xf32, #tpu.memory_space<vmem>>, vector<30x60xf32>
    %cst_31 = arith.constant dense<0.000000e+00> : vector<30x360xf32>
    %30 = tpu.matmul %29, %28, %cst_31 {dimension_numbers = #tpu.dot_dimension_numbers<[1], [0], [0], [1], [0, 0, 1, 1], [], []>} : vector<30x60xf32>, vector<60x360xf32>, vector<30x360xf32> -> vector<30x360xf32>
    %c0_32 = arith.constant 0 : index
    %c0_33 = arith.constant 0 : index
    %31 = vector.load %arg5[%c0_32, %c0_33] : memref<30x60xf32, #tpu.memory_space<vmem>>, vector<30x60xf32>
    %cst_34 = arith.constant dense<0.000000e+00> : vector<30x360xf32>
    %32 = tpu.matmul %31, %28, %cst_34 {dimension_numbers = #tpu.dot_dimension_numbers<[1], [0], [0], [1], [0, 0, 1, 1], [], []>} : vector<30x60xf32>, vector<60x360xf32>, vector<30x360xf32> -> vector<30x360xf32>
    %33 = arith.maximumf %30, %32 : vector<30x360xf32>
    %c0_35 = arith.constant 0 : index
    %c0_36 = arith.constant 0 : index
    %34 = vector.load %arg6[%c0_35, %c0_36] : memref<360x180xf32, #tpu.memory_space<vmem>>, vector<360x180xf32>
    %cst_37 = arith.constant dense<0.000000e+00> : vector<30x180xf32>
    %35 = tpu.matmul %33, %34, %cst_37 {dimension_numbers = #tpu.dot_dimension_numbers<[1], [0], [0], [1], [0, 0, 1, 1], [], []>} : vector<30x360xf32>, vector<360x180xf32>, vector<30x180xf32> -> vector<30x180xf32>
    %c0_38 = arith.constant 0 : index
    %c0_39 = arith.constant 0 : index
    %36 = vector.load %arg7[%c0_38, %c0_39] : memref<360x180xf32, #tpu.memory_space<vmem>>, vector<360x180xf32>
    %cst_40 = arith.constant dense<0.000000e+00> : vector<30x180xf32>
    %37 = tpu.matmul %33, %36, %cst_40 {dimension_numbers = #tpu.dot_dimension_numbers<[1], [0], [0], [1], [0, 0, 1, 1], [], []>} : vector<30x360xf32>, vector<360x180xf32>, vector<30x180xf32> -> vector<30x180xf32>
    %38 = arith.maximumf %35, %37 : vector<30x180xf32>
    %c0_41 = arith.constant 0 : index
    %c0_42 = arith.constant 0 : index
    %39 = vector.load %arg3[%c0_41, %c0_42] : memref<1x180xf32, #tpu.memory_space<vmem>>, vector<1x180xf32>
    %40 = vector.broadcast %39 : vector<1x180xf32> to vector<30x180xf32>
    %41 = arith.addf %38, %40 : vector<30x180xf32>
    %cst_43 = arith.constant 0.000000e+00 : f32
    %42 = vector.broadcast %cst_43 : f32 to vector<30x180xf32>
    %43 = arith.maximumf %41, %42 : vector<30x180xf32>
    %c0_44 = arith.constant 0 : index
    %c0_45 = arith.constant 0 : index
    %44 = vector.load %arg21[%c0_44, %c0_45] : memref<30x180xf32, #tpu.memory_space<vmem>>, vector<30x180xf32>
    tpu.vector_store %arg21[%c0_44, %c0_45], %43 {strides = array<i32>} : memref<30x180xf32, #tpu.memory_space<vmem>>, vector<30x180xf32>,
    %c0_46 = arith.constant 0 : index
    %c0_47 = arith.constant 0 : index
    %45 = vector.load %arg21[%c0_46, %c0_47] : memref<30x180xf32, #tpu.memory_space<vmem>>, vector<26x180xf32>
    %c0_48 = arith.constant 0 : index
    %c0_49 = arith.constant 0 : index
    %c0_50 = arith.constant 0 : index
    %46 = vector.load %arg8[%c0_48, %c0_49, %c0_50] : memref<5x180x416xf32, #tpu.memory_space<vmem>>, vector<1x180x416xf32>
    %47 = vector.shape_cast %46 : vector<1x180x416xf32> to vector<180x416xf32>
    %cst_51 = arith.constant dense<0.000000e+00> : vector<26x416xf32>
    %48 = tpu.matmul %45, %47, %cst_51 {dimension_numbers = #tpu.dot_dimension_numbers<[1], [0], [0], [1], [0, 0, 1, 1], [], []>} : vector<26x180xf32>, vector<180x416xf32>, vector<26x416xf32> -> vector<26x416xf32>
    %c1_52 = arith.constant 1 : index
    %c0_53 = arith.constant 0 : index
    %49 = vector.load %arg21[%c1_52, %c0_53] : memref<30x180xf32, #tpu.memory_space<vmem>>, vector<26x180xf32>
    %c1_54 = arith.constant 1 : index
    %c0_55 = arith.constant 0 : index
    %c0_56 = arith.constant 0 : index
    %50 = vector.load %arg8[%c1_54, %c0_55, %c0_56] : memref<5x180x416xf32, #tpu.memory_space<vmem>>, vector<1x180x416xf32>
    %51 = vector.shape_cast %50 : vector<1x180x416xf32> to vector<180x416xf32>
    %cst_57 = arith.constant dense<0.000000e+00> : vector<26x416xf32>
    %52 = tpu.matmul %49, %51, %cst_57 {dimension_numbers = #tpu.dot_dimension_numbers<[1], [0], [0], [1], [0, 0, 1, 1], [], []>} : vector<26x180xf32>, vector<180x416xf32>, vector<26x416xf32> -> vector<26x416xf32>
    %53 = arith.addf %48, %52 : vector<26x416xf32>
    %c2_58 = arith.constant 2 : index
    %c0_59 = arith.constant 0 : index
    %54 = vector.load %arg21[%c2_58, %c0_59] : memref<30x180xf32, #tpu.memory_space<vmem>>, vector<26x180xf32>
    %c2_60 = arith.constant 2 : index
    %c0_61 = arith.constant 0 : index
    %c0_62 = arith.constant 0 : index
    %55 = vector.load %arg8[%c2_60, %c0_61, %c0_62] : memref<5x180x416xf32, #tpu.memory_space<vmem>>, vector<1x180x416xf32>
    %56 = vector.shape_cast %55 : vector<1x180x416xf32> to vector<180x416xf32>
    %cst_63 = arith.constant dense<0.000000e+00> : vector<26x416xf32>
    %57 = tpu.matmul %54, %56, %cst_63 {dimension_numbers = #tpu.dot_dimension_numbers<[1], [0], [0], [1], [0, 0, 1, 1], [], []>} : vector<26x180xf32>, vector<180x416xf32>, vector<26x416xf32> -> vector<26x416xf32>
    %58 = arith.addf %53, %57 : vector<26x416xf32>
    %c3_64 = arith.constant 3 : index
    %c0_65 = arith.constant 0 : index
    %59 = vector.load %arg21[%c3_64, %c0_65] : memref<30x180xf32, #tpu.memory_space<vmem>>, vector<26x180xf32>
    %c3_66 = arith.constant 3 : index
    %c0_67 = arith.constant 0 : index
    %c0_68 = arith.constant 0 : index
    %60 = vector.load %arg8[%c3_66, %c0_67, %c0_68] : memref<5x180x416xf32, #tpu.memory_space<vmem>>, vector<1x180x416xf32>
    %61 = vector.shape_cast %60 : vector<1x180x416xf32> to vector<180x416xf32>
    %cst_69 = arith.constant dense<0.000000e+00> : vector<26x416xf32>
    %62 = tpu.matmul %59, %61, %cst_69 {dimension_numbers = #tpu.dot_dimension_numbers<[1], [0], [0], [1], [0, 0, 1, 1], [], []>} : vector<26x180xf32>, vector<180x416xf32>, vector<26x416xf32> -> vector<26x416xf32>
    %63 = arith.addf %58, %62 : vector<26x416xf32>
    %c4_70 = arith.constant 4 : index
    %c0_71 = arith.constant 0 : index
    %64 = vector.load %arg21[%c4_70, %c0_71] : memref<30x180xf32, #tpu.memory_space<vmem>>, vector<26x180xf32>
    %c4_72 = arith.constant 4 : index
    %c0_73 = arith.constant 0 : index
    %c0_74 = arith.constant 0 : index
    %65 = vector.load %arg8[%c4_72, %c0_73, %c0_74] : memref<5x180x416xf32, #tpu.memory_space<vmem>>, vector<1x180x416xf32>
    %66 = vector.shape_cast %65 : vector<1x180x416xf32> to vector<180x416xf32>
    %cst_75 = arith.constant dense<0.000000e+00> : vector<26x416xf32>
    %67 = tpu.matmul %64, %66, %cst_75 {dimension_numbers = #tpu.dot_dimension_numbers<[1], [0], [0], [1], [0, 0, 1, 1], [], []>} : vector<26x180xf32>, vector<180x416xf32>, vector<26x416xf32> -> vector<26x416xf32>
    %68 = arith.addf %63, %67 : vector<26x416xf32>
    %c0_76 = arith.constant 0 : index
    %c0_77 = arith.constant 0 : index
    %69 = vector.load %arg10[%c0_76, %c0_77] : memref<13x26xf32, #tpu.memory_space<vmem>>, vector<13x26xf32>
    %cst_78 = arith.constant dense<0.000000e+00> : vector<13x416xf32>
    %70 = tpu.matmul %69, %68, %cst_78 {dimension_numbers = #tpu.dot_dimension_numbers<[1], [0], [0], [1], [0, 0, 1, 1], [], []>} : vector<13x26xf32>, vector<26x416xf32>, vector<13x416xf32> -> vector<13x416xf32>
    %c0_79 = arith.constant 0 : index
    %c0_80 = arith.constant 0 : index
    %71 = vector.load %arg11[%c0_79, %c0_80] : memref<13x26xf32, #tpu.memory_space<vmem>>, vector<13x26xf32>
    %cst_81 = arith.constant dense<0.000000e+00> : vector<13x416xf32>
    %72 = tpu.matmul %71, %68, %cst_81 {dimension_numbers = #tpu.dot_dimension_numbers<[1], [0], [0], [1], [0, 0, 1, 1], [], []>} : vector<13x26xf32>, vector<26x416xf32>, vector<13x416xf32> -> vector<13x416xf32>
    %73 = arith.maximumf %70, %72 : vector<13x416xf32>
    %c0_82 = arith.constant 0 : index
    %c0_83 = arith.constant 0 : index
    %74 = vector.load %arg12[%c0_82, %c0_83] : memref<416x208xf32, #tpu.memory_space<vmem>>, vector<416x208xf32>
    %cst_84 = arith.constant dense<0.000000e+00> : vector<13x208xf32>
    %75 = tpu.matmul %73, %74, %cst_84 {dimension_numbers = #tpu.dot_dimension_numbers<[1], [0], [0], [1], [0, 0, 1, 1], [], []>} : vector<13x416xf32>, vector<416x208xf32>, vector<13x208xf32> -> vector<13x208xf32>
    %c0_85 = arith.constant 0 : index
    %c0_86 = arith.constant 0 : index
    %76 = vector.load %arg13[%c0_85, %c0_86] : memref<416x208xf32, #tpu.memory_space<vmem>>, vector<416x208xf32>
    %cst_87 = arith.constant dense<0.000000e+00> : vector<13x208xf32>
    %77 = tpu.matmul %73, %76, %cst_87 {dimension_numbers = #tpu.dot_dimension_numbers<[1], [0], [0], [1], [0, 0, 1, 1], [], []>} : vector<13x416xf32>, vector<416x208xf32>, vector<13x208xf32> -> vector<13x208xf32>
    %78 = arith.maximumf %75, %77 : vector<13x208xf32>
    %c0_88 = arith.constant 0 : index
    %c0_89 = arith.constant 0 : index
    %79 = vector.load %arg9[%c0_88, %c0_89] : memref<1x208xf32, #tpu.memory_space<vmem>>, vector<1x208xf32>
    %80 = vector.broadcast %79 : vector<1x208xf32> to vector<13x208xf32>
    %81 = arith.addf %78, %80 : vector<13x208xf32>
    %cst_90 = arith.constant 0.000000e+00 : f32
    %82 = vector.broadcast %cst_90 : f32 to vector<13x208xf32>
    %83 = arith.maximumf %81, %82 : vector<13x208xf32>
    %c0_91 = arith.constant 0 : index
    %c0_92 = arith.constant 0 : index
    %84 = vector.load %arg22[%c0_91, %c0_92] : memref<13x208xf32, #tpu.memory_space<vmem>>, vector<13x208xf32>
    tpu.vector_store %arg22[%c0_91, %c0_92], %83 {strides = array<i32>} : memref<13x208xf32, #tpu.memory_space<vmem>>, vector<13x208xf32>,
    %c0_93 = arith.constant 0 : index
    %c0_94 = arith.constant 0 : index
    %85 = vector.load %arg15[%c0_93, %c0_94] : memref<1x120xf32, #tpu.memory_space<vmem>>, vector<1x120xf32>
    %c0_95 = arith.constant 0 : index
    %c0_96 = arith.constant 0 : index
    %86 = vector.load %arg22[%c0_95, %c0_96] : memref<13x208xf32, #tpu.memory_space<vmem>>, vector<1x208xf32>
    %c0_97 = arith.constant 0 : index
    %c0_98 = arith.constant 0 : index
    %c0_99 = arith.constant 0 : index
    %87 = vector.load %arg14[%c0_97, %c0_98, %c0_99] : memref<13x208x120xf32, #tpu.memory_space<vmem>>, vector<1x208x120xf32>
    %88 = vector.shape_cast %87 : vector<1x208x120xf32> to vector<208x120xf32>
    %cst_100 = arith.constant dense<0.000000e+00> : vector<1x120xf32>
    %89 = tpu.matmul %86, %88, %cst_100 {dimension_numbers = #tpu.dot_dimension_numbers<[1], [0], [0], [1], [0, 0, 1, 1], [], []>} : vector<1x208xf32>, vector<208x120xf32>, vector<1x120xf32> -> vector<1x120xf32>
    %90 = arith.addf %85, %89 : vector<1x120xf32>
    %c1_101 = arith.constant 1 : index
    %c0_102 = arith.constant 0 : index
    %91 = vector.load %arg22[%c1_101, %c0_102] : memref<13x208xf32, #tpu.memory_space<vmem>>, vector<1x208xf32>
    %c1_103 = arith.constant 1 : index
    %c0_104 = arith.constant 0 : index
    %c0_105 = arith.constant 0 : index
    %92 = vector.load %arg14[%c1_103, %c0_104, %c0_105] : memref<13x208x120xf32, #tpu.memory_space<vmem>>, vector<1x208x120xf32>
    %93 = vector.shape_cast %92 : vector<1x208x120xf32> to vector<208x120xf32>
    %cst_106 = arith.constant dense<0.000000e+00> : vector<1x120xf32>
    %94 = tpu.matmul %91, %93, %cst_106 {dimension_numbers = #tpu.dot_dimension_numbers<[1], [0], [0], [1], [0, 0, 1, 1], [], []>} : vector<1x208xf32>, vector<208x120xf32>, vector<1x120xf32> -> vector<1x120xf32>
    %95 = arith.addf %90, %94 : vector<1x120xf32>
    %c2_107 = arith.constant 2 : index
    %c0_108 = arith.constant 0 : index
    %96 = vector.load %arg22[%c2_107, %c0_108] : memref<13x208xf32, #tpu.memory_space<vmem>>, vector<1x208xf32>
    %c2_109 = arith.constant 2 : index
    %c0_110 = arith.constant 0 : index
    %c0_111 = arith.constant 0 : index
    %97 = vector.load %arg14[%c2_109, %c0_110, %c0_111] : memref<13x208x120xf32, #tpu.memory_space<vmem>>, vector<1x208x120xf32>
    %98 = vector.shape_cast %97 : vector<1x208x120xf32> to vector<208x120xf32>
    %cst_112 = arith.constant dense<0.000000e+00> : vector<1x120xf32>
    %99 = tpu.matmul %96, %98, %cst_112 {dimension_numbers = #tpu.dot_dimension_numbers<[1], [0], [0], [1], [0, 0, 1, 1], [], []>} : vector<1x208xf32>, vector<208x120xf32>, vector<1x120xf32> -> vector<1x120xf32>
    %100 = arith.addf %95, %99 : vector<1x120xf32>
    %c3_113 = arith.constant 3 : index
    %c0_114 = arith.constant 0 : index
    %101 = vector.load %arg22[%c3_113, %c0_114] : memref<13x208xf32, #tpu.memory_space<vmem>>, vector<1x208xf32>
    %c3_115 = arith.constant 3 : index
    %c0_116 = arith.constant 0 : index
    %c0_117 = arith.constant 0 : index
    %102 = vector.load %arg14[%c3_115, %c0_116, %c0_117] : memref<13x208x120xf32, #tpu.memory_space<vmem>>, vector<1x208x120xf32>
    %103 = vector.shape_cast %102 : vector<1x208x120xf32> to vector<208x120xf32>
    %cst_118 = arith.constant dense<0.000000e+00> : vector<1x120xf32>
    %104 = tpu.matmul %101, %103, %cst_118 {dimension_numbers = #tpu.dot_dimension_numbers<[1], [0], [0], [1], [0, 0, 1, 1], [], []>} : vector<1x208xf32>, vector<208x120xf32>, vector<1x120xf32> -> vector<1x120xf32>
    %105 = arith.addf %100, %104 : vector<1x120xf32>
    %c4_119 = arith.constant 4 : index
    %c0_120 = arith.constant 0 : index
    %106 = vector.load %arg22[%c4_119, %c0_120] : memref<13x208xf32, #tpu.memory_space<vmem>>, vector<1x208xf32>
    %c4_121 = arith.constant 4 : index
    %c0_122 = arith.constant 0 : index
    %c0_123 = arith.constant 0 : index
    %107 = vector.load %arg14[%c4_121, %c0_122, %c0_123] : memref<13x208x120xf32, #tpu.memory_space<vmem>>, vector<1x208x120xf32>
    %108 = vector.shape_cast %107 : vector<1x208x120xf32> to vector<208x120xf32>
    %cst_124 = arith.constant dense<0.000000e+00> : vector<1x120xf32>
    %109 = tpu.matmul %106, %108, %cst_124 {dimension_numbers = #tpu.dot_dimension_numbers<[1], [0], [0], [1], [0, 0, 1, 1], [], []>} : vector<1x208xf32>, vector<208x120xf32>, vector<1x120xf32> -> vector<1x120xf32>
    %110 = arith.addf %105, %109 : vector<1x120xf32>
    %c5 = arith.constant 5 : index
    %c0_125 = arith.constant 0 : index
    %111 = vector.load %arg22[%c5, %c0_125] : memref<13x208xf32, #tpu.memory_space<vmem>>, vector<1x208xf32>
    %c5_126 = arith.constant 5 : index
    %c0_127 = arith.constant 0 : index
    %c0_128 = arith.constant 0 : index
    %112 = vector.load %arg14[%c5_126, %c0_127, %c0_128] : memref<13x208x120xf32, #tpu.memory_space<vmem>>, vector<1x208x120xf32>
    %113 = vector.shape_cast %112 : vector<1x208x120xf32> to vector<208x120xf32>
    %cst_129 = arith.constant dense<0.000000e+00> : vector<1x120xf32>
    %114 = tpu.matmul %111, %113, %cst_129 {dimension_numbers = #tpu.dot_dimension_numbers<[1], [0], [0], [1], [0, 0, 1, 1], [], []>} : vector<1x208xf32>, vector<208x120xf32>, vector<1x120xf32> -> vector<1x120xf32>
    %115 = arith.addf %110, %114 : vector<1x120xf32>
    %c6 = arith.constant 6 : index
    %c0_130 = arith.constant 0 : index
    %116 = vector.load %arg22[%c6, %c0_130] : memref<13x208xf32, #tpu.memory_space<vmem>>, vector<1x208xf32>
    %c6_131 = arith.constant 6 : index
    %c0_132 = arith.constant 0 : index
    %c0_133 = arith.constant 0 : index
    %117 = vector.load %arg14[%c6_131, %c0_132, %c0_133] : memref<13x208x120xf32, #tpu.memory_space<vmem>>, vector<1x208x120xf32>
    %118 = vector.shape_cast %117 : vector<1x208x120xf32> to vector<208x120xf32>
    %cst_134 = arith.constant dense<0.000000e+00> : vector<1x120xf32>
    %119 = tpu.matmul %116, %118, %cst_134 {dimension_numbers = #tpu.dot_dimension_numbers<[1], [0], [0], [1], [0, 0, 1, 1], [], []>} : vector<1x208xf32>, vector<208x120xf32>, vector<1x120xf32> -> vector<1x120xf32>
    %120 = arith.addf %115, %119 : vector<1x120xf32>
    %c7 = arith.constant 7 : index
    %c0_135 = arith.constant 0 : index
    %121 = vector.load %arg22[%c7, %c0_135] : memref<13x208xf32, #tpu.memory_space<vmem>>, vector<1x208xf32>
    %c7_136 = arith.constant 7 : index
    %c0_137 = arith.constant 0 : index
    %c0_138 = arith.constant 0 : index
    %122 = vector.load %arg14[%c7_136, %c0_137, %c0_138] : memref<13x208x120xf32, #tpu.memory_space<vmem>>, vector<1x208x120xf32>
    %123 = vector.shape_cast %122 : vector<1x208x120xf32> to vector<208x120xf32>
    %cst_139 = arith.constant dense<0.000000e+00> : vector<1x120xf32>
    %124 = tpu.matmul %121, %123, %cst_139 {dimension_numbers = #tpu.dot_dimension_numbers<[1], [0], [0], [1], [0, 0, 1, 1], [], []>} : vector<1x208xf32>, vector<208x120xf32>, vector<1x120xf32> -> vector<1x120xf32>
    %125 = arith.addf %120, %124 : vector<1x120xf32>
    %c8 = arith.constant 8 : index
    %c0_140 = arith.constant 0 : index
    %126 = vector.load %arg22[%c8, %c0_140] : memref<13x208xf32, #tpu.memory_space<vmem>>, vector<1x208xf32>
    %c8_141 = arith.constant 8 : index
    %c0_142 = arith.constant 0 : index
    %c0_143 = arith.constant 0 : index
    %127 = vector.load %arg14[%c8_141, %c0_142, %c0_143] : memref<13x208x120xf32, #tpu.memory_space<vmem>>, vector<1x208x120xf32>
    %128 = vector.shape_cast %127 : vector<1x208x120xf32> to vector<208x120xf32>
    %cst_144 = arith.constant dense<0.000000e+00> : vector<1x120xf32>
    %129 = tpu.matmul %126, %128, %cst_144 {dimension_numbers = #tpu.dot_dimension_numbers<[1], [0], [0], [1], [0, 0, 1, 1], [], []>} : vector<1x208xf32>, vector<208x120xf32>, vector<1x120xf32> -> vector<1x120xf32>
    %130 = arith.addf %125, %129 : vector<1x120xf32>
    %c9 = arith.constant 9 : index
    %c0_145 = arith.constant 0 : index
    %131 = vector.load %arg22[%c9, %c0_145] : memref<13x208xf32, #tpu.memory_space<vmem>>, vector<1x208xf32>
    %c9_146 = arith.constant 9 : index
    %c0_147 = arith.constant 0 : index
    %c0_148 = arith.constant 0 : index
    %132 = vector.load %arg14[%c9_146, %c0_147, %c0_148] : memref<13x208x120xf32, #tpu.memory_space<vmem>>, vector<1x208x120xf32>
    %133 = vector.shape_cast %132 : vector<1x208x120xf32> to vector<208x120xf32>
    %cst_149 = arith.constant dense<0.000000e+00> : vector<1x120xf32>
    %134 = tpu.matmul %131, %133, %cst_149 {dimension_numbers = #tpu.dot_dimension_numbers<[1], [0], [0], [1], [0, 0, 1, 1], [], []>} : vector<1x208xf32>, vector<208x120xf32>, vector<1x120xf32> -> vector<1x120xf32>
    %135 = arith.addf %130, %134 : vector<1x120xf32>
    %c10 = arith.constant 10 : index
    %c0_150 = arith.constant 0 : index
    %136 = vector.load %arg22[%c10, %c0_150] : memref<13x208xf32, #tpu.memory_space<vmem>>, vector<1x208xf32>
    %c10_151 = arith.constant 10 : index
    %c0_152 = arith.constant 0 : index
    %c0_153 = arith.constant 0 : index
    %137 = vector.load %arg14[%c10_151, %c0_152, %c0_153] : memref<13x208x120xf32, #tpu.memory_space<vmem>>, vector<1x208x120xf32>
    %138 = vector.shape_cast %137 : vector<1x208x120xf32> to vector<208x120xf32>
    %cst_154 = arith.constant dense<0.000000e+00> : vector<1x120xf32>
    %139 = tpu.matmul %136, %138, %cst_154 {dimension_numbers = #tpu.dot_dimension_numbers<[1], [0], [0], [1], [0, 0, 1, 1], [], []>} : vector<1x208xf32>, vector<208x120xf32>, vector<1x120xf32> -> vector<1x120xf32>
    %140 = arith.addf %135, %139 : vector<1x120xf32>
    %c11 = arith.constant 11 : index
    %c0_155 = arith.constant 0 : index
    %141 = vector.load %arg22[%c11, %c0_155] : memref<13x208xf32, #tpu.memory_space<vmem>>, vector<1x208xf32>
    %c11_156 = arith.constant 11 : index
    %c0_157 = arith.constant 0 : index
    %c0_158 = arith.constant 0 : index
    %142 = vector.load %arg14[%c11_156, %c0_157, %c0_158] : memref<13x208x120xf32, #tpu.memory_space<vmem>>, vector<1x208x120xf32>
    %143 = vector.shape_cast %142 : vector<1x208x120xf32> to vector<208x120xf32>
    %cst_159 = arith.constant dense<0.000000e+00> : vector<1x120xf32>
    %144 = tpu.matmul %141, %143, %cst_159 {dimension_numbers = #tpu.dot_dimension_numbers<[1], [0], [0], [1], [0, 0, 1, 1], [], []>} : vector<1x208xf32>, vector<208x120xf32>, vector<1x120xf32> -> vector<1x120xf32>
    %145 = arith.addf %140, %144 : vector<1x120xf32>
    %c12 = arith.constant 12 : index
    %c0_160 = arith.constant 0 : index
    %146 = vector.load %arg22[%c12, %c0_160] : memref<13x208xf32, #tpu.memory_space<vmem>>, vector<1x208xf32>
    %c12_161 = arith.constant 12 : index
    %c0_162 = arith.constant 0 : index
    %c0_163 = arith.constant 0 : index
    %147 = vector.load %arg14[%c12_161, %c0_162, %c0_163] : memref<13x208x120xf32, #tpu.memory_space<vmem>>, vector<1x208x120xf32>
    %148 = vector.shape_cast %147 : vector<1x208x120xf32> to vector<208x120xf32>
    %cst_164 = arith.constant dense<0.000000e+00> : vector<1x120xf32>
    %149 = tpu.matmul %146, %148, %cst_164 {dimension_numbers = #tpu.dot_dimension_numbers<[1], [0], [0], [1], [0, 0, 1, 1], [], []>} : vector<1x208xf32>, vector<208x120xf32>, vector<1x120xf32> -> vector<1x120xf32>
    %150 = arith.addf %145, %149 : vector<1x120xf32>
    %cst_165 = arith.constant 0.000000e+00 : f32
    %151 = vector.broadcast %cst_165 : f32 to vector<1x120xf32>
    %152 = arith.maximumf %150, %151 : vector<1x120xf32>
    %c0_166 = arith.constant 0 : index
    %c0_167 = arith.constant 0 : index
    %153 = vector.load %arg16[%c0_166, %c0_167] : memref<120x84xf32, #tpu.memory_space<vmem>>, vector<120x84xf32>
    %cst_168 = arith.constant dense<0.000000e+00> : vector<1x84xf32>
    %154 = tpu.matmul %152, %153, %cst_168 {dimension_numbers = #tpu.dot_dimension_numbers<[1], [0], [0], [1], [0, 0, 1, 1], [], []>} : vector<1x120xf32>, vector<120x84xf32>, vector<1x84xf32> -> vector<1x84xf32>
    %c0_169 = arith.constant 0 : index
    %c0_170 = arith.constant 0 : index
    %155 = vector.load %arg17[%c0_169, %c0_170] : memref<1x84xf32, #tpu.memory_space<vmem>>, vector<1x84xf32>
    %156 = arith.addf %154, %155 : vector<1x84xf32>
    %cst_171 = arith.constant 0.000000e+00 : f32
    %157 = vector.broadcast %cst_171 : f32 to vector<1x84xf32>
    %158 = arith.maximumf %156, %157 : vector<1x84xf32>
    %c0_172 = arith.constant 0 : index
    %c0_173 = arith.constant 0 : index
    %159 = vector.load %arg18[%c0_172, %c0_173] : memref<84x9xf32, #tpu.memory_space<vmem>>, vector<84x9xf32>
    %cst_174 = arith.constant dense<0.000000e+00> : vector<1x9xf32>
    %160 = tpu.matmul %158, %159, %cst_174 {dimension_numbers = #tpu.dot_dimension_numbers<[1], [0], [0], [1], [0, 0, 1, 1], [], []>} : vector<1x84xf32>, vector<84x9xf32>, vector<1x9xf32> -> vector<1x9xf32>
    %c0_175 = arith.constant 0 : index
    %c0_176 = arith.constant 0 : index
    %161 = vector.load %arg19[%c0_175, %c0_176] : memref<1x9xf32, #tpu.memory_space<vmem>>, vector<1x9xf32>
    %162 = arith.addf %160, %161 : vector<1x9xf32>
    %c0_177 = arith.constant 0 : index
    %c0_178 = arith.constant 0 : index
    %c0_179 = arith.constant 0 : index
    %163 = vector.load %arg20[%c0_177, %c0_178, %c0_179] : memref<1x1x9xf32, #tpu.memory_space<vmem>>, vector<1x1x9xf32>
    %164 = vector.shape_cast %163 : vector<1x1x9xf32> to vector<1x9xf32>
    %165 = vector.shape_cast %162 : vector<1x9xf32> to vector<1x1x9xf32>
    tpu.vector_store %arg20[%c0_177, %c0_178, %c0_179], %165 {strides = array<i32>} : memref<1x1x9xf32, #tpu.memory_space<vmem>>, vector<1x1x9xf32>,
    return
  }
  func.func @transform_0(%arg0: i32) -> (i32, i32, i32) {
    %c0_i32 = arith.constant 0 : i32
    %c0_i32_0 = arith.constant 0 : i32
    %c0_i32_1 = arith.constant 0 : i32
    return %arg0, %c0_i32, %c0_i32_0 : i32, i32, i32
  }
  func.func @transform_1(%arg0: i32) -> (i32, i32, i32) {
    %c0_i32 = arith.constant 0 : i32
    %c0_i32_0 = arith.constant 0 : i32
    %c0_i32_1 = arith.constant 0 : i32
    %c0_i32_2 = arith.constant 0 : i32
    return %c0_i32, %c0_i32_0, %c0_i32_1 : i32, i32, i32
  }
  func.func @transform_2(%arg0: i32) -> (i32, i32) {
    %c0_i32 = arith.constant 0 : i32
    %c0_i32_0 = arith.constant 0 : i32
    %c0_i32_1 = arith.constant 0 : i32
    return %c0_i32, %c0_i32_0 : i32, i32
  }
  func.func @transform_3(%arg0: i32) -> (i32, i32) {
    %c0_i32 = arith.constant 0 : i32
    %c0_i32_0 = arith.constant 0 : i32
    %c0_i32_1 = arith.constant 0 : i32
    return %c0_i32, %c0_i32_0 : i32, i32
  }
  func.func @transform_4(%arg0: i32) -> (i32, i32) {
    %c0_i32 = arith.constant 0 : i32
    %c0_i32_0 = arith.constant 0 : i32
    %c0_i32_1 = arith.constant 0 : i32
    return %c0_i32, %c0_i32_0 : i32, i32
  }
  func.func @transform_5(%arg0: i32) -> (i32, i32) {
    %c0_i32 = arith.constant 0 : i32
    %c0_i32_0 = arith.constant 0 : i32
    %c0_i32_1 = arith.constant 0 : i32
    return %c0_i32, %c0_i32_0 : i32, i32
  }
  func.func @transform_6(%arg0: i32) -> (i32, i32) {
    %c0_i32 = arith.constant 0 : i32
    %c0_i32_0 = arith.constant 0 : i32
    %c0_i32_1 = arith.constant 0 : i32
    return %c0_i32, %c0_i32_0 : i32, i32
  }
  func.func @transform_7(%arg0: i32) -> (i32, i32, i32) {
    %c0_i32 = arith.constant 0 : i32
    %c0_i32_0 = arith.constant 0 : i32
    %c0_i32_1 = arith.constant 0 : i32
    %c0_i32_2 = arith.constant 0 : i32
    return %c0_i32, %c0_i32_0, %c0_i32_1 : i32, i32, i32
  }
  func.func @transform_8(%arg0: i32) -> (i32, i32) {
    %c0_i32 = arith.constant 0 : i32
    %c0_i32_0 = arith.constant 0 : i32
    %c0_i32_1 = arith.constant 0 : i32
    return %c0_i32, %c0_i32_0 : i32, i32
  }
  func.func @transform_9(%arg0: i32) -> (i32, i32) {
    %c0_i32 = arith.constant 0 : i32
    %c0_i32_0 = arith.constant 0 : i32
    %c0_i32_1 = arith.constant 0 : i32
    return %c0_i32, %c0_i32_0 : i32, i32
  }
  func.func @transform_10(%arg0: i32) -> (i32, i32) {
    %c0_i32 = arith.constant 0 : i32
    %c0_i32_0 = arith.constant 0 : i32
    %c0_i32_1 = arith.constant 0 : i32
    return %c0_i32, %c0_i32_0 : i32, i32
  }
  func.func @transform_11(%arg0: i32) -> (i32, i32) {
    %c0_i32 = arith.constant 0 : i32
    %c0_i32_0 = arith.constant 0 : i32
    %c0_i32_1 = arith.constant 0 : i32
    return %c0_i32, %c0_i32_0 : i32, i32
  }
  func.func @transform_12(%arg0: i32) -> (i32, i32) {
    %c0_i32 = arith.constant 0 : i32
    %c0_i32_0 = arith.constant 0 : i32
    %c0_i32_1 = arith.constant 0 : i32
    return %c0_i32, %c0_i32_0 : i32, i32
  }
  func.func @transform_13(%arg0: i32) -> (i32, i32, i32) {
    %c0_i32 = arith.constant 0 : i32
    %c0_i32_0 = arith.constant 0 : i32
    %c0_i32_1 = arith.constant 0 : i32
    %c0_i32_2 = arith.constant 0 : i32
    return %c0_i32, %c0_i32_0, %c0_i32_1 : i32, i32, i32
  }
  func.func @transform_14(%arg0: i32) -> (i32, i32) {
    %c0_i32 = arith.constant 0 : i32
    %c0_i32_0 = arith.constant 0 : i32
    %c0_i32_1 = arith.constant 0 : i32
    return %c0_i32, %c0_i32_0 : i32, i32
  }
  func.func @transform_15(%arg0: i32) -> (i32, i32) {
    %c0_i32 = arith.constant 0 : i32
    %c0_i32_0 = arith.constant 0 : i32
    %c0_i32_1 = arith.constant 0 : i32
    return %c0_i32, %c0_i32_0 : i32, i32
  }
  func.func @transform_16(%arg0: i32) -> (i32, i32) {
    %c0_i32 = arith.constant 0 : i32
    %c0_i32_0 = arith.constant 0 : i32
    %c0_i32_1 = arith.constant 0 : i32
    return %c0_i32, %c0_i32_0 : i32, i32
  }
  func.func @transform_17(%arg0: i32) -> (i32, i32) {
    %c0_i32 = arith.constant 0 : i32
    %c0_i32_0 = arith.constant 0 : i32
    %c0_i32_1 = arith.constant 0 : i32
    return %c0_i32, %c0_i32_0 : i32, i32
  }
  func.func @transform_18(%arg0: i32) -> (i32, i32) {
    %c0_i32 = arith.constant 0 : i32
    %c0_i32_0 = arith.constant 0 : i32
    %c0_i32_1 = arith.constant 0 : i32
    return %c0_i32, %c0_i32_0 : i32, i32
  }
  func.func @transform_19(%arg0: i32) -> (i32, i32, i32) {
    %c0_i32 = arith.constant 0 : i32
    %c0_i32_0 = arith.constant 0 : i32
    %c0_i32_1 = arith.constant 0 : i32
    return %arg0, %c0_i32, %c0_i32_0 : i32, i32, i32
  }
}

</mosaic_0001>

<bundles_post_ra>
// kernel: net_forward.1
= control target key start
LH: loop header
LB: loop body
LE: loop exit
PB: predicated region body
PF: predicated region fallthrough
CT: control target
= control target key end

     0   :  { %s14269_s0 = inlined_call_operand.hbm [shape: f32[2,64,64], index: 0, kind: input, shape index: {}]   ;;  %s14270_s1 = inlined_call_operand.hbm [shape: f32[5,64,360], index: 1, kind: input, shape index: {}]   ;;  %s14271_s2 = inlined_call_operand.hbm [shape: f32[1,180], index: 2, kind: input, shape index: {}]   ;;  %s14272_s3 = inlined_call_operand.hbm [shape: f32[30,60], index: 3, kind: input, shape index: {}]   ;;  %s14273_s4 = inlined_call_operand.hbm [shape: f32[30,60], index: 4, kind: input, shape index: {}]   ;;  %s14274_s5 = inlined_call_operand.vmem [shape: f32[360,180], index: 5, kind: input, shape index: {}]   ;;  %s14275_s6 = inlined_call_operand.vmem [shape: f32[360,180], index: 6, kind: input, shape index: {}]   ;;  %s14276_s7 = inlined_call_operand.hbm [shape: f32[5,180,416], index: 7, kind: input, shape index: {}]   ;;  %s14277_s8 = inlined_call_operand.hbm [shape: f32[1,208], index: 8, kind: input, shape index: {}]   ;;  %s14278_s9 = inlined_call_operand.hbm [shape: f32[13,26], index: 9, kind: input, shape index: {}]   ;;  %s14279_s10 = inlined_call_operand.hbm [shape: f32[13,26], index: 10, kind: input, shape index: {}]   ;;  %s14280_s11 = inlined_call_operand.hbm [shape: f32[416,208], index: 11, kind: input, shape index: {}]   ;;  %s14281_s12 = inlined_call_operand.hbm [shape: f32[416,208], index: 12, kind: input, shape index: {}]   ;;  %s14282_s13 = inlined_call_operand.vmem [shape: f32[13,208,120], index: 13, kind: input, shape index: {}]   ;;  %s14283_s14 = inlined_call_operand.hbm [shape: f32[1,120], index: 14, kind: input, shape index: {}]   ;;  %s14284_s15 = inlined_call_operand.vmem [shape: f32[120,84], index: 15, kind: input, shape index: {}]   ;;  %s14285_s16 = inlined_call_operand.hbm [shape: f32[1,84], index: 16, kind: input, shape index: {}]   ;;  %s14286_s17 = inlined_call_operand.vmem [shape: f32[84,9], index: 17, kind: input, shape index: {}]   ;;  %s14287_s18 = inlined_call_operand.hbm [shape: f32[1,9], index: 18, kind: input, shape index: {}]   ;;  %s14288_s19 = inlined_call_operand.hbm [shape: f32[2,1,9], index: 19, kind: output, shape index: {}]  }
   0x1   :  { %14313 = sst [smem:[#allocation40_spill]] %s14269_s0 }
   0x2   :  { %14314 = sst [smem:[#allocation41_spill]] %s14270_s1 }
   0x3   :  { %14315 = sst [smem:[#allocation42_spill]] %s14271_s2 }
   0x4   :  { %14316 = sst [smem:[#allocation43_spill]] %s14272_s3 }
   0x5   :  { %14317 = sst [smem:[#allocation44_spill]] %s14273_s4 }
   0x6   :  { %14318 = sst [smem:[#allocation45_spill]] %s14274_s5 }
   0x7   :  { %14319 = sst [smem:[#allocation46_spill]] %s14275_s6 }
   0x8   :  { %14320 = sst [smem:[#allocation47_spill]] %s14276_s7 }
   0x9   :  { %14321 = sst [smem:[#allocation48_spill]] %s14277_s8 }
   0xa   :  { %14322 = sst [smem:[#allocation49_spill]] %s14278_s9 }
   0xb   :  { %14323 = sst [smem:[#allocation50_spill]] %s14279_s10 }
   0xc   :  { %14324 = sst [smem:[#allocation51_spill]] %s14282_s13 }
   0xd   :  { %14325 = sst [smem:[#allocation52_spill]] %s14284_s15 }
   0xe   :  { %14326 = sst [smem:[#allocation53_spill]] %s14286_s17 }
   0xf   :  { %14327 = sst [smem:[#allocation54_spill]] %s14288_s19 }
  0x10   :  { %24 = vsyncpa [#allocation5], 0 }
  0x11   :  { %26 = vsyncpa [#allocation5 + $0x1], 0 }
  0x12   :  { %27 = vsyncpa [#allocation8], 0 }
  0x13   :  { %28 = vsyncpa [#allocation11], 0 }
  0x14   :  { %29 = vsyncpa [#allocation14], 0 }
  0x15   :  { %30 = vsyncpa [#allocation17], 0 }
  0x16   :  { %31 = vsyncpa [#allocation20], 0 }
  0x17   :  { %32 = vsyncpa [#allocation23], 0 }
  0x18   :  { %33 = vsyncpa [#allocation26], 0 }
  0x19   :  { %34 = vsyncpa [#allocation6], 0 }
  0x1a   :  { %36 = vsyncpa [#allocation6 + $0x1], 0  ;;  %s11190_s0 = smov 0   ;;  %s11192_s30 = smov 0  }
  0x1b   :  { %s11194_s20 = smov 0   ;;  %s11196_s21 = smov 0  }
  0x1c LB: > { %14328 = sst [smem:[#allocation37_spill]] %s11049_s0  ;;  %s11063_s1 = smov [#allocation7]   ;;  %s11061_s21 = sphi %s11196_s21, %s14388_s21   ;;  %s11057_s20 = sphi %s11194_s20, %s14387_s20   ;;  %s11053_s30 = sphi %s11192_s30, %s14386_s30   ;;  %s11049_s0 = sphi %s11190_s0, %s14385_s0  }
  0x1d   : > { %s489_s22 = sshll.u32 %s11063_s1, 4  ;;  %s11211_s2 = sadd.s32 4294967295, %s11061_s21   ;;  %s11216_s22 = int_to_ptr.vmem [resolvable:$true] %s489_s22 }
  0x1e   : > { %14329 = sst [smem:[#allocation38_spill]] %s11211_s2  ;;  %p7608_p0 = scmp.ge.s32.totalorder %s11061_s21, 1 }
  0x1f   : > { %p14303_p1 = scmp.eq.s32.totalorder %s11211_s2, 0  ;;  %p477_p2 = scmp.lt.s32.totalorder %s11061_s21, 3 }
  0x20   : > { %s11064_s24 = smov [#allocation10]   ;;  %s11065_s26 = smov [#allocation13]  }
  0x21   : > { %p11218_p3 = pnand %p7608_p0, %p477_p2  ;;  %s513_s25 = sshll.u32 %s11064_s24, 4  ;;  %s11231_s25 = int_to_ptr.vmem [resolvable:$true] %s513_s25 }
  0x22   : > { %s11233_s27 = sshll.u32 %s11065_s26, 4  ;;  %s14333_s1 = sld [smem:[#allocation41_spill]]  ;;  %s546_s27 = int_to_ptr.vmem [resolvable:$true] %s11233_s27 }
  0x23   : > { %s14330_s23 = scalar_select %p11218_p3, 1, 0 }
  0x24   : > { %p10440_p5 = pneg %p11218_p3 }
  0x25   : > { %14331 = sst [smem:[#allocation39_spill]] %s14330_s23 }
  0x26   : > { %p11227_p6 = pnand %p10440_p5, %p14303_p1 }
  0x28   : > { %s10573_s19 = scalar_lea.hbm %s14333_s1, 15360  ;;  %p11243_p8 = pneg %p11227_p6 }
  0x29   : > { %p10574_p7 = scmp.ne.s32.totalorder %s14333_s1, %s10573_s19  ;;  %p10580_p11 = scmp.lt.u32.totalorder %s10573_s19, %s14333_s1 }
  0x2b   : > { %p10576_p9 = pnand %p11243_p8, %p10574_p7 }
  0x2d   : > { %p10577_p10 = pneg %p10576_p9 }
  0x2f   : > { %p10582_p12 = pnand %p10580_p11, %p10577_p10 }
  0x31   : > { %10585 = shalt.err (!%p10582_p12)
}
  0x32   : > { %s10586_s15 = scalar_lea.vmem %s11216_s22, 15360  ;;  %p10594_p5 = scmp.lt.s32.totalorder %s11216_s22, %s11216_s22 }
  0x33   : > { %p10587_p13 = scmp.ne.s32.totalorder %s11216_s22, %s10586_s15  ;;  %p10595_p4 = scmp.lt.s32.totalorder %s10586_s15, %s10586_s15 }
  0x35   : > { %p10589_p0 = pnand %p10587_p13, %p11243_p8  ;;  %p10596_p7 = por %p10595_p4, %p10594_p5 }
  0x37   : > { %p10590_p2 = pneg %p10589_p0 }
  0x39   : > { %p10597_p9 = pnand %p10596_p7, %p10590_p2 }
  0x3b   : > { %10600 = shalt.err (!%p10597_p9)
}
  0x3c   : > { %s11066_s17 = smov 384   ;;  %s11067_s13 = smov 24  }
  0x3d   : > { %10443 = dma.hbm_to_vmem [thread:$0]  (!%p11227_p6), %s14333_s1, 15360, %s11216_s22, [#allocation8], %s11066_s17, %s11066_s17, %s11067_s13  }
  0x3e   : > { %s14335_s6 = sld [smem:[#allocation43_spill]] }
  0x44   : > { %s10601_s5 = scalar_lea.hbm %s14335_s6, 512 }
  0x45   : > { %p10602_p4 = scmp.ne.s32.totalorder %s14335_s6, %s10601_s5  ;;  %p10608_p12 = scmp.lt.u32.totalorder %s10601_s5, %s14335_s6 }
  0x47   : > { %p10604_p10 = pnand %p10602_p4, %p11243_p8 }
  0x49   : > { %p10605_p11 = pneg %p10604_p10 }
  0x4b   : > { %p10610_p13 = pnand %p10608_p12, %p10605_p11 }
  0x4d   : > { %10613 = shalt.err (!%p10610_p13)
}
  0x4e   : > { %s10614_s22 = scalar_lea.vmem %s11231_s25, 512  ;;  %p10622_p7 = scmp.lt.s32.totalorder %s11231_s25, %s11231_s25 }
  0x4f   : > { %p10615_p0 = scmp.ne.s32.totalorder %s11231_s25, %s10614_s22  ;;  %p10623_p9 = scmp.lt.s32.totalorder %s10614_s22, %s10614_s22 }
  0x51   : > { %p10617_p2 = pnand %p10615_p0, %p11243_p8  ;;  %p10624_p4 = por %p10623_p9, %p10622_p7 }
  0x53   : > { %p10618_p5 = pneg %p10617_p2 }
  0x55   : > { %p10625_p10 = pnand %p10624_p4, %p10618_p5 }
  0x57   : > { %10628 = shalt.err (!%p10625_p10)
}
  0x58   : > { %s14305_s2 = smov 128   ;;  %s14307_s5 = smov 8  }
  0x59   : > { %10449 = dma.hbm_to_vmem [thread:$0]  (!%p11227_p6), %s14335_s6, 512, %s11231_s25, [#allocation11], %s14305_s2, %s14305_s2, %s14307_s5  }
  0x5a   : > { %s14336_s7 = sld [smem:[#allocation47_spill]] }
  0x60   : > { %s10629_s19 = scalar_lea.hbm %s14336_s7, 58880 }
  0x61   : > { %p10630_p11 = scmp.ne.s32.totalorder %s14336_s7, %s10629_s19  ;;  %p10636_p0 = scmp.lt.u32.totalorder %s10629_s19, %s14336_s7 }
  0x63   : > { %p10632_p12 = pnand %p10630_p11, %p11243_p8 }
  0x65   : > { %p10633_p13 = pneg %p10632_p12 }
  0x67   : > { %p10638_p2 = pnand %p10636_p0, %p10633_p13 }
  0x69   : > { %10641 = shalt.err (!%p10638_p2)
}
  0x6a   : > { %s10642_s22 = scalar_lea.vmem %s546_s27, 58880  ;;  %p10650_p4 = scmp.lt.s32.totalorder %s546_s27, %s546_s27 }
  0x6b   : > { %p10643_p5 = scmp.ne.s32.totalorder %s546_s27, %s10642_s22  ;;  %p10651_p10 = scmp.lt.s32.totalorder %s10642_s22, %s10642_s22 }
  0x6d   : > { %p10645_p7 = pnand %p10643_p5, %p11243_p8  ;;  %p10652_p1 = por %p10651_p10, %p10650_p4 }
  0x6f   : > { %p10646_p9 = pneg %p10645_p7 }
  0x71   : > { %p10653_p3 = pnand %p10652_p1, %p10646_p9 }
  0x73   : > { %10656 = shalt.err (!%p10653_p3)
}
  0x74   : > { %s11070_s25 = smov 512   ;;  %s11071_s0 = smov 32  }
  0x75   : > { %10455 = dma.hbm_to_vmem [thread:$0]  (!%p11227_p6), %s14336_s7, 58880, %s546_s27, [#allocation14], %s11070_s25, %s11070_s25, %s11071_s0  }
  0x76   : > { %s11072_s13 = smov [#allocation16]   ;;  %s11073_s28 = smov [#allocation19]  }
  0x77   : > { %s569_s19 = sshll.u32 %s11072_s13, 4  ;;  %s595_s29 = sshll.u32 %s11073_s28, 4  ;;  %s570_s19 = int_to_ptr.vmem [resolvable:$true] %s569_s19  ;;  %s596_s29 = int_to_ptr.vmem [resolvable:$true] %s595_s29 }
  0x78   : > { %s14337_s9 = sld [smem:[#allocation49_spill]] }
  0x7e   : > { %s10657_s22 = scalar_lea.hbm %s14337_s9, 256 }
  0x7f   : > { %p10658_p1 = scmp.ne.s32.totalorder %s14337_s9, %s10657_s22  ;;  %p10664_p12 = scmp.lt.u32.totalorder %s10657_s22, %s14337_s9 }
  0x81   : > { %p10660_p3 = pnand %p10658_p1, %p11243_p8 }
  0x83   : > { %p10661_p11 = pneg %p10660_p3 }
  0x85   : > { %p10666_p13 = pnand %p10664_p12, %p10661_p11 }
  0x87   : > { %10669 = shalt.err (!%p10666_p13)
}
  0x88   : > { %s10670_s27 = scalar_lea.vmem %s570_s19, 256  ;;  %p10678_p7 = scmp.lt.s32.totalorder %s570_s19, %s570_s19 }
  0x89   : > { %p10671_p0 = scmp.ne.s32.totalorder %s570_s19, %s10670_s27  ;;  %p10679_p9 = scmp.lt.s32.totalorder %s10670_s27, %s10670_s27 }
  0x8b   : > { %p10673_p2 = pnand %p10671_p0, %p11243_p8  ;;  %p10680_p4 = por %p10679_p9, %p10678_p7 }
  0x8d   : > { %p10674_p5 = pneg %p10673_p2 }
  0x8f   : > { %p10681_p10 = pnand %p10680_p4, %p10674_p5 }
  0x91   : > { %10684 = shalt.err (!%p10681_p10)
}
  0x92   : > { %s14338_s2 = smov 8   ;;  %s14339_s5 = smov 128  }
  0x93   : > { %10461 = dma.hbm_to_vmem [thread:$0]  (!%p11227_p6), %s14337_s9, 256, %s570_s19, [#allocation17], %s14339_s5, %s14339_s5, %s14338_s2  }
  0x94   : > { %s10685_s23 = scalar_lea.hbm %s14280_s11, 13312 }
  0x95   : > { %p10686_p1 = scmp.ne.s32.totalorder %s14280_s11, %s10685_s23  ;;  %p10692_p12 = scmp.lt.u32.totalorder %s10685_s23, %s14280_s11 }
  0x97   : > { %p10688_p3 = pnand %p10686_p1, %p11243_p8 }
  0x99   : > { %p10689_p11 = pneg %p10688_p3 }
  0x9b   : > { %p10694_p13 = pnand %p10692_p12, %p10689_p11 }
  0x9d   : > { %10697 = shalt.err (!%p10694_p13)
}
  0x9e   : > { %s10698_s15 = scalar_lea.vmem %s596_s29, 13312  ;;  %p10706_p7 = scmp.lt.s32.totalorder %s596_s29, %s596_s29 }
  0x9f   : > { %p10699_p0 = scmp.ne.s32.totalorder %s596_s29, %s10698_s15  ;;  %p10707_p9 = scmp.lt.s32.totalorder %s10698_s15, %s10698_s15 }
  0xa1   : > { %p10701_p2 = pnand %p10699_p0, %p11243_p8  ;;  %p10708_p4 = por %p10707_p9, %p10706_p7 }
  0xa3   : > { %p10702_p5 = pneg %p10701_p2 }
  0xa5   : > { %p10709_p10 = pnand %p10708_p4, %p10702_p5 }
  0xa7   : > { %10712 = shalt.err (!%p10709_p10)
}
  0xa8   : > { %s11074_s19 = smov 256   ;;  %s11075_s22 = smov 16  }
  0xa9   : > { %10467 = dma.hbm_to_vmem [thread:$0]  (!%p11227_p6), %s14280_s11, 13312, %s596_s29, [#allocation20], %s11074_s19, %s11074_s19, %s11075_s22  }
  0xaa   : > { %s11076_s1 = smov [#allocation22]   ;;  %s11077_s0 = smov [#allocation9]  }
  0xab   : > { %s625_s25 = sshll.u32 %s11076_s1, 4  ;;  %s503_s23 = sshll.u32 %s11077_s0, 4  ;;  %s626_s25 = int_to_ptr.vmem [resolvable:$true] %s625_s25  ;;  %s504_s23 = int_to_ptr.vmem [resolvable:$true] %s503_s23 }
  0xac   : > { %s10713_s28 = scalar_lea.hbm %s14283_s14, 16 }
  0xad   : > { %p10714_p1 = scmp.ne.s32.totalorder %s14283_s14, %s10713_s28  ;;  %p10720_p12 = scmp.lt.u32.totalorder %s10713_s28, %s14283_s14 }
  0xaf   : > { %p10716_p3 = pnand %p10714_p1, %p11243_p8 }
  0xb1   : > { %p10717_p11 = pneg %p10716_p3 }
  0xb3   : > { %p10722_p13 = pnand %p10720_p12, %p10717_p11 }
  0xb5   : > { %10725 = shalt.err (!%p10722_p13)
}
  0xb6   : > { %s10726_s29 = scalar_lea.vmem %s626_s25, 16  ;;  %s10733_s27 = scalar_lea.vmem %s626_s25, 32 }
  0xb7   : > { %p10727_p0 = scmp.ne.s32.totalorder %s626_s25, %s10726_s29  ;;  %p10734_p7 = scmp.lt.s32.totalorder %s626_s25, %s626_s25 }
  0xb8   : > { %p10735_p9 = scmp.lt.s32.totalorder %s10733_s27, %s10726_s29 }
  0xb9   : > { %p10729_p2 = pnand %p10727_p0, %p11243_p8 }
  0xba   : > { %p10736_p4 = por %p10735_p9, %p10734_p7 }
  0xbb   : > { %p10730_p5 = pneg %p10729_p2 }
  0xbd   : > { %p10737_p10 = pnand %p10736_p4, %p10730_p5 }
  0xbf   : > { %10740 = shalt.err (!%p10737_p10)
}
  0xc0   : > { %10473 = dma.hbm_to_vmem [thread:$0]  (!%p11227_p6), %s14283_s14, 16, %s626_s25, [#allocation23]  }
  0xc1   : > { %s14340_s0 = sld [smem:[#allocation42_spill]] }
  0xc7   : > { %s14341_s17 = smov %s14340_s0  ;;  %s10741_s13 = scalar_lea.hbm %s14340_s0, 32 }
  0xc8   : > { %p10742_p1 = scmp.ne.s32.totalorder %s14341_s17, %s10741_s13  ;;  %p10748_p12 = scmp.lt.u32.totalorder %s10741_s13, %s14341_s17 }
  0xca   : > { %p10744_p3 = pnand %p10742_p1, %p11243_p8 }
  0xcc   : > { %p10745_p11 = pneg %p10744_p3 }
  0xce   : > { %p10750_p13 = pnand %p10748_p12, %p10745_p11 }
  0xd0   : > { %10753 = shalt.err (!%p10750_p13)
}
  0xd1   : > { %s10754_s27 = scalar_lea.vmem %s504_s23, 32  ;;  %p10762_p7 = scmp.lt.s32.totalorder %s504_s23, %s504_s23 }
  0xd2   : > { %p10755_p0 = scmp.ne.s32.totalorder %s504_s23, %s10754_s27  ;;  %p10763_p9 = scmp.lt.s32.totalorder %s10754_s27, %s10754_s27 }
  0xd4   : > { %p10757_p2 = pnand %p10755_p0, %p11243_p8  ;;  %p10764_p4 = por %p10763_p9, %p10762_p7 }
  0xd6   : > { %p10758_p5 = pneg %p10757_p2 }
  0xd8   : > { %p10765_p10 = pnand %p10764_p4, %p10758_p5 }
  0xda   : > { %10768 = shalt.err (!%p10765_p10)
}
  0xdb   : > { %10446 = dma.hbm_to_vmem [thread:$0]  (!%p11227_p6), %s14341_s17, 32, %s504_s23, [#allocation8]  }
  0xdc   : > { %s11078_s1 = smov [#allocation12]   ;;  %s11079_s9 = smov [#allocation15]  }
  0xdd   : > { %s526_s7 = sshll.u32 %s11078_s1, 4  ;;  %s559_s0 = sshll.u32 %s11079_s9, 4  ;;  %s527_s7 = int_to_ptr.vmem [resolvable:$true] %s526_s7  ;;  %s560_s0 = int_to_ptr.vmem [resolvable:$true] %s559_s0 }
  0xde   : > { %s14342_s4 = sld [smem:[#allocation44_spill]] }
  0xe4   : > { %s10769_s26 = scalar_lea.hbm %s14342_s4, 512 }
  0xe5   : > { %p10770_p1 = scmp.ne.s32.totalorder %s14342_s4, %s10769_s26  ;;  %p10776_p12 = scmp.lt.u32.totalorder %s10769_s26, %s14342_s4 }
  0xe7   : > { %p10772_p3 = pnand %p10770_p1, %p11243_p8 }
  0xe9   : > { %p10773_p11 = pneg %p10772_p3 }
  0xeb   : > { %p10778_p13 = pnand %p10776_p12, %p10773_p11 }
  0xed   : > { %10781 = shalt.err (!%p10778_p13)
}
  0xee   : > { %s10782_s23 = scalar_lea.vmem %s527_s7, 512  ;;  %p10790_p7 = scmp.lt.s32.totalorder %s527_s7, %s527_s7 }
  0xef   : > { %p10783_p0 = scmp.ne.s32.totalorder %s527_s7, %s10782_s23  ;;  %p10791_p9 = scmp.lt.s32.totalorder %s10782_s23, %s10782_s23 }
  0xf1   : > { %p10785_p2 = pnand %p10783_p0, %p11243_p8  ;;  %p10792_p4 = por %p10791_p9, %p10790_p7 }
  0xf3   : > { %p10786_p5 = pneg %p10785_p2 }
  0xf5   : > { %p10793_p10 = pnand %p10792_p4, %p10786_p5 }
  0xf7   : > { %10796 = shalt.err (!%p10793_p10)
}
  0xf8   : > { %10452 = dma.hbm_to_vmem [thread:$0]  (!%p11227_p6), %s14342_s4, 512, %s527_s7, [#allocation11], %s14339_s5, %s14339_s5, %s14338_s2  }
  0xf9   : > { %s14343_s8 = sld [smem:[#allocation48_spill]] }
  0xff   : > { %s10797_s28 = scalar_lea.hbm %s14343_s8, 32 }
 0x100   : > { %p10798_p1 = scmp.ne.s32.totalorder %s14343_s8, %s10797_s28  ;;  %p10804_p12 = scmp.lt.u32.totalorder %s10797_s28, %s14343_s8 }
 0x102   : > { %p10800_p3 = pnand %p10798_p1, %p11243_p8 }
 0x104   : > { %p10801_p11 = pneg %p10800_p3 }
 0x106   : > { %p10806_p13 = pnand %p10804_p12, %p10801_p11 }
 0x108   : > { %10809 = shalt.err (!%p10806_p13)
}
 0x109   : > { %s10810_s25 = scalar_lea.vmem %s560_s0, 32  ;;  %p10818_p7 = scmp.lt.s32.totalorder %s560_s0, %s560_s0 }
 0x10a   : > { %p10811_p0 = scmp.ne.s32.totalorder %s560_s0, %s10810_s25  ;;  %p10819_p9 = scmp.lt.s32.totalorder %s10810_s25, %s10810_s25 }
 0x10c   : > { %p10813_p2 = pnand %p10811_p0, %p11243_p8  ;;  %p10820_p4 = por %p10819_p9, %p10818_p7 }
 0x10e   : > { %p10814_p5 = pneg %p10813_p2 }
 0x110   : > { %p10821_p10 = pnand %p10820_p4, %p10814_p5 }
 0x112   : > { %10824 = shalt.err (!%p10821_p10)
}
 0x113   : > { %10458 = dma.hbm_to_vmem [thread:$0]  (!%p11227_p6), %s14343_s8, 32, %s560_s0, [#allocation14]  }
 0x114   : > { %s11080_s6 = smov [#allocation18]   ;;  %s11081_s9 = smov [#allocation21]  }
 0x115   : > { %s582_s1 = sshll.u32 %s11080_s6, 4  ;;  %s608_s13 = sshll.u32 %s11081_s9, 4  ;;  %s583_s1 = int_to_ptr.vmem [resolvable:$true] %s582_s1  ;;  %s609_s13 = int_to_ptr.vmem [resolvable:$true] %s608_s13 }
 0x116   : > { %s14344_s10 = sld [smem:[#allocation50_spill]] }
 0x11c   : > { %s10825_s15 = scalar_lea.hbm %s14344_s10, 256 }
 0x11d   : > { %p10826_p1 = scmp.ne.s32.totalorder %s14344_s10, %s10825_s15  ;;  %p10832_p12 = scmp.lt.u32.totalorder %s10825_s15, %s14344_s10 }
 0x11f   : > { %p10828_p3 = pnand %p10826_p1, %p11243_p8 }
 0x121   : > { %p10829_p11 = pneg %p10828_p3 }
 0x123   : > { %p10834_p13 = pnand %p10832_p12, %p10829_p11 }
 0x125   : > { %10837 = shalt.err (!%p10834_p13)
}
 0x126   : > { %s10838_s0 = scalar_lea.vmem %s583_s1, 256  ;;  %p10846_p7 = scmp.lt.s32.totalorder %s583_s1, %s583_s1 }
 0x127   : > { %p10839_p0 = scmp.ne.s32.totalorder %s583_s1, %s10838_s0  ;;  %p10847_p9 = scmp.lt.s32.totalorder %s10838_s0, %s10838_s0 }
 0x129   : > { %p10841_p2 = pnand %p10839_p0, %p11243_p8  ;;  %p10848_p4 = por %p10847_p9, %p10846_p7 }
 0x12b   : > { %p10842_p5 = pneg %p10841_p2 }
 0x12d   : > { %p10849_p10 = pnand %p10848_p4, %p10842_p5 }
 0x12f   : > { %10852 = shalt.err (!%p10849_p10)
}
 0x130   : > { %10464 = dma.hbm_to_vmem [thread:$0]  (!%p11227_p6), %s14344_s10, 256, %s583_s1, [#allocation17], %s14339_s5, %s14339_s5, %s14338_s2  }
 0x131   : > { %s10853_s26 = scalar_lea.hbm %s14281_s12, 13312 }
 0x132   : > { %p10854_p1 = scmp.ne.s32.totalorder %s14281_s12, %s10853_s26  ;;  %p10860_p12 = scmp.lt.u32.totalorder %s10853_s26, %s14281_s12 }
 0x134   : > { %p10856_p3 = pnand %p10854_p1, %p11243_p8 }
 0x136   : > { %p10857_p11 = pneg %p10856_p3 }
 0x138   : > { %p10862_p13 = pnand %p10860_p12, %p10857_p11 }
 0x13a   : > { %10865 = shalt.err (!%p10862_p13)
}
 0x13b   : > { %s10866_s7 = scalar_lea.vmem %s609_s13, 13312  ;;  %p10874_p7 = scmp.lt.s32.totalorder %s609_s13, %s609_s13 }
 0x13c   : > { %p10867_p0 = scmp.ne.s32.totalorder %s609_s13, %s10866_s7  ;;  %p10875_p9 = scmp.lt.s32.totalorder %s10866_s7, %s10866_s7 }
 0x13e   : > { %p10869_p2 = pnand %p10867_p0, %p11243_p8  ;;  %p10876_p4 = por %p10875_p9, %p10874_p7 }
 0x140   : > { %p10870_p5 = pneg %p10869_p2 }
 0x142   : > { %p10877_p10 = pnand %p10876_p4, %p10870_p5 }
 0x144   : > { %10880 = shalt.err (!%p10877_p10)
}
 0x145   : > { %10470 = dma.hbm_to_vmem [thread:$0]  (!%p11227_p6), %s14281_s12, 13312, %s609_s13, [#allocation20], %s11074_s19, %s11074_s19, %s11075_s22  }
 0x146   : > { %s11082_s23 = smov [#allocation24]   ;;  %s11083_s9 = smov [#allocation25]  }
 0x147   : > { %s639_s6 = sshll.u32 %s11082_s23, 4  ;;  %s653_s28 = sshll.u32 %s11083_s9, 4  ;;  %s640_s6 = int_to_ptr.vmem [resolvable:$true] %s639_s6  ;;  %s654_s28 = int_to_ptr.vmem [resolvable:$true] %s653_s28 }
 0x148   : > { %s10881_s29 = scalar_lea.hbm %s14285_s16, 16 }
 0x149   : > { %p10882_p1 = scmp.ne.s32.totalorder %s14285_s16, %s10881_s29  ;;  %p10888_p12 = scmp.lt.u32.totalorder %s10881_s29, %s14285_s16 }
 0x14b   : > { %p10884_p3 = pnand %p10882_p1, %p11243_p8 }
 0x14d   : > { %p10885_p11 = pneg %p10884_p3 }
 0x14f   : > { %p10890_p13 = pnand %p10888_p12, %p10885_p11 }
 0x151   : > { %10893 = shalt.err (!%p10890_p13)
}
 0x152   : > { %s10894_s19 = scalar_lea.vmem %s640_s6, 16  ;;  %s10901_s22 = scalar_lea.vmem %s640_s6, 32 }
 0x153   : > { %p10895_p0 = scmp.ne.s32.totalorder %s640_s6, %s10894_s19  ;;  %p10902_p7 = scmp.lt.s32.totalorder %s640_s6, %s640_s6 }
 0x154   : > { %p10903_p9 = scmp.lt.s32.totalorder %s10901_s22, %s10894_s19 }
 0x155   : > { %p10897_p2 = pnand %p10895_p0, %p11243_p8 }
 0x156   : > { %p10904_p4 = por %p10903_p9, %p10902_p7 }
 0x157   : > { %p10898_p5 = pneg %p10897_p2 }
 0x159   : > { %p10905_p10 = pnand %p10904_p4, %p10898_p5 }
 0x15b   : > { %10908 = shalt.err (!%p10905_p10)
}
 0x15c   : > { %10476 = dma.hbm_to_vmem [thread:$0]  (!%p11227_p6), %s14285_s16, 16, %s640_s6, [#allocation23]  }
 0x15d   : > { %s10909_s26 = scalar_lea.hbm %s14287_s18, 16 }
 0x15e   : > { %p10910_p1 = scmp.ne.s32.totalorder %s14287_s18, %s10909_s26  ;;  %p10916_p12 = scmp.lt.u32.totalorder %s10909_s26, %s14287_s18 }
 0x160   : > { %p10912_p3 = pnand %p10910_p1, %p11243_p8 }
 0x162   : > { %p10913_p11 = pneg %p10912_p3 }
 0x164   : > { %p10918_p13 = pnand %p10916_p12, %p10913_p11 }
 0x166   : > { %10921 = shalt.err (!%p10918_p13)
}
 0x167   : > { %s10922_s7 = scalar_lea.vmem %s654_s28, 16  ;;  %s10929_s6 = scalar_lea.vmem %s654_s28, 32 }
 0x168   : > { %p10923_p0 = scmp.ne.s32.totalorder %s654_s28, %s10922_s7  ;;  %p10930_p7 = scmp.lt.s32.totalorder %s654_s28, %s654_s28 }
 0x169   : > { %p10931_p9 = scmp.lt.s32.totalorder %s10929_s6, %s10922_s7 }
 0x16a   : > { %p10925_p2 = pnand %p10923_p0, %p11243_p8 }
 0x16b   : > { %p10932_p4 = por %p10931_p9, %p10930_p7 }
 0x16c   : > { %p10926_p5 = pneg %p10925_p2 }
 0x16e   : > { %p10933_p10 = pnand %p10932_p4, %p10926_p5 }
 0x170   : > { %10936 = shalt.err (!%p10933_p10)
}
 0x171   : > { %s14345_s24 = sld [smem:[#allocation37_spill]]  ;;  %s14346_s22 = sld [smem:[#allocation38_spill]] }
 0x172   : > { %10479 = dma.hbm_to_vmem [thread:$0]  (!%p11227_p6), %s14287_s18, 16, %s654_s28, [#allocation26]  }
 0x173   : > { %s7607_s13 = sadd.s32 4294967294, %s11061_s21   ;;  %s11506_s3 = sadd.s32 1, %s11061_s21  }
 0x174   : > { %s49_s0 = sadd.s32 1, %s11057_s20  ;;  %s46_s23 = ssub.s32 %s11061_s21, %s11506_s3 }
 0x175   : > { %p56_p8 = scmp.ne.s32.totalorder %s11057_s20, %s11053_s30  ;;  %p47_p1 = scmp.eq.s32.totalorder %s46_s23, 0 }
 0x176   : > { %p57_p3 = scmp.eq.s32.totalorder %s11061_s21, 0  ;;  %p470_p5 = scmp.eq.s32.totalorder %s7607_s13, 1 }
 0x177   : > { %p62_p11 = scmp.ne.s32.totalorder %s11053_s30, %s14345_s24  ;;  %p464_p12 = scmp.eq.s32.totalorder %s14346_s22, 1 }
 0x178   : > { %s11518_s9 = scalar_select %p47_p1, %s11057_s20, %s49_s0  }
 0x179   : > { %p58_p13 = por %p57_p3, %p56_p8  ;;  %p14347_p0 = scmp.eq.s32.totalorder %s14346_s22, 0 }
 0x17a   : > { %p11526_p6 = por %p464_p12, %p56_p8  ;;  %p10501_p7 = scmp.lt.s32.totalorder %s11061_s21, 2 }
 0x17b   : > { %p11522_p2 = por %p14347_p0, %p62_p11  ;;  %s664_s15 = sand.u32 1, %s11057_s20  }
 0x17c   : > { %s14349_s28 = scalar_select %p11526_p6, 1, 0 }
 0x17d   : > { %p11532_p9 = por %p470_p5, %p62_p11  ;;  %s7623_s27 = sshll.u32 %s664_s15, 6 }
 0x17e   : > { %s8162_s25 = sshll.u32 %s11061_s21, 10  ;;  %s14351_s1 = sld [smem:[#allocation40_spill]] }
 0x17f   : > { %s14350_s29 = scalar_select %p11532_p9, 1, 0 }
 0x180   : > { %s668_s24 = scalar_lea.vmem [#allocation4], %s7623_s27  ;;  %p11542_p4 = pnand %p10501_p7, %p58_p13 }
 0x181   : > { %s675_s22 = sshll.u32 %s668_s24, 4  ;;  %s11548_s0 = scalar_lea.sflag [#allocation5], %s664_s15  ;;  %s11546_s22 = int_to_ptr.vmem [resolvable:$true] %s675_s22 }
 0x182   : > { %p10939_p8 = pneg %p11542_p4 }
 0x184   : > { %s11540_s19 = scalar_lea.hbm %s14351_s1, %s8162_s25  ;;  %s10942_s7 = scalar_lea.hbm %s14351_s1, 2048 }
 0x185   : > { %s10937_s23 = scalar_lea.hbm %s11540_s19, 1024  ;;  %p10943_p11 = scmp.lt.u32.totalorder %s11540_s19, %s14351_s1 }
 0x186   : > { %p10938_p10 = scmp.ne.s32.totalorder %s11540_s19, %s10937_s23  ;;  %p10944_p12 = scmp.lt.u32.totalorder %s10942_s7, %s10937_s23 }
 0x187   : > { %p10946_p0 = scmp.lt.u32.totalorder %s10937_s23, %s11540_s19 }
 0x188   : > { %p10940_p1 = pnand %p10939_p8, %p10938_p10  ;;  %p10945_p13 = por %p10944_p12, %p10943_p11 }
 0x18a   : > { %p10941_p3 = pneg %p10940_p1  ;;  %p10947_p5 = por %p10946_p0, %p10945_p13 }
 0x18c   : > { %p10948_p7 = pnand %p10947_p5, %p10941_p3 }
 0x18e   : > { %10951 = shalt.err (!%p10948_p7)
}
 0x18f   : > { %s10952_s15 = scalar_lea.vmem %s11546_s22, 1024  ;;  %s11084_s27 = smov [#allocation4]  }
 0x190   : > { %p10953_p10 = scmp.ne.s32.totalorder %s11546_s22, %s10952_s15  ;;  %s10957_s25 = sshll.u32 %s11084_s27, 4  ;;  %s10958_s25 = int_to_ptr.vmem [resolvable:$false] %s10957_s25 }
 0x191   : > { %s10959_s6 = scalar_lea.vmem %s10958_s25, 2048  ;;  %p10960_p6 = scmp.lt.s32.totalorder %s11546_s22, %s10958_s25 }
 0x192   : > { %p10955_p1 = pnand %p10953_p10, %p10939_p8  ;;  %p10961_p11 = scmp.lt.s32.totalorder %s10959_s6, %s10952_s15 }
 0x194   : > { %p10956_p9 = pneg %p10955_p1  ;;  %p10962_p12 = por %p10961_p11, %p10960_p6 }
 0x196   : > { %p10963_p13 = pnand %p10962_p12, %p10956_p9 }
 0x198   : > { %10966 = shalt.err (!%p10963_p13)
}
 0x199   : > { %10483 = dma.hbm_to_vmem [thread:$0]  (!%p11542_p4), %s11540_s19, 1024, %s11546_s22, %s11548_s0, %s14339_s5, %s14339_s5, %s14338_s2  }
 0x19a   : > { %s14353_s23 = sld [smem:[#allocation39_spill]] }
 0x1a0   : > { %p14354_p8 = scmp.ne.s32.totalorder %s14353_s23, 0 }
 0x1a1   : > { %s11582_s7 = sand.u32 (!%p14354_p8), 1, %s11053_s30  }
 0x1a2   : > { %687 = sbr.rel (%p14354_p8) target bundleno = 3555 (0xde3), region = 96  ;;  %s7627_s24 = sshll.u32 (!%p14354_p8), %s11582_s7, 6 }
 0x1a3   : > { %s690_s15 = scalar_lea.sflag (!%p14354_p8), [#allocation5], %s11582_s7  ;;  %s11586_s27 = scalar_lea.vmem (!%p14354_p8), [#allocation4], %s7627_s24 }
 0x1a9   : > { %11012 = dma.done.wait (%p11522_p2), %s690_s15, 1024  }
 0x1aa   : > { %11014 = vsyncadd (%p11522_p2), %s690_s15, 4294966272  ;;  %s14355_s13 = sld [smem:[#allocation38_spill]] }
 0x1b0   : > { %p14356_p6 = scmp.eq.s32.totalorder %s14355_s13, 0 }
 0x1b2   : > { %11016 = dma.done.wait (%p14356_p6), [#allocation8], 15392   ;;  %p14357_p9 = pmov %p14356_p6 }
 0x1b3   : > { %p14358_p4 = pmov %p14356_p6 }
 0x1b4   : > { %11018 = vsyncadd (%p14357_p9), [#allocation8], 4294951904 }
 0x1b5   : > { %11020 = dma.done.wait (%p14358_p4), [#allocation11], 1024   ;;  %p14359_p3 = pmov %p14358_p4 }
 0x1b7   : > { %11022 = vsyncadd (%p14359_p3), [#allocation11], 4294966272  ;;  %p14360_p0 = pmov %p14359_p3 }
 0x1b9   : > { %11024 = dma.done.wait (%p14360_p0), [#allocation14], 58912   ;;  %p14361_p5 = pmov %p14360_p0 }
 0x1ba   : > { %p14362_p2 = pmov %p14360_p0 }
 0x1bb   : > { %11026 = vsyncadd (%p14361_p5), [#allocation14], 4294908384 }
 0x1bc   : > { %11028 = dma.done.wait (%p14362_p2), [#allocation17], 512   ;;  %p14363_p7 = pmov %p14360_p0 }
 0x1bd   : > { %p14364_p10 = pmov %p14360_p0 }
 0x1be   : > { %11030 = vsyncadd (%p14363_p7), [#allocation17], 4294966784 }
 0x1bf   : > { %11032 = dma.done.wait (%p14364_p10), [#allocation20], 26624   ;;  %p14365_p1 = pmov %p14360_p0 }
 0x1c0   : > { %p14366_p11 = pmov %p14360_p0 }
 0x1c1   : > { %11034 = vsyncadd (%p14365_p1), [#allocation20], 4294940672 }
 0x1c2   : > { %11036 = dma.done.wait (%p14366_p11), [#allocation23], 32   ;;  %p14367_p12 = pmov %p14360_p0 }
 0x1c3   : > { %p14368_p13 = pmov %p14360_p0 }
 0x1c4   : > { %11038 = vsyncadd (%p14367_p12), [#allocation23], 4294967264 }
 0x1c5   : > { %11040 = dma.done.wait (%p14368_p13), [#allocation26], 16   ;;  %p14369_p8 = pmov %p14360_p0 }
 0x1c6   : > { %v11085_v0 = vmov 0.0   ;;  %v841_v1 = vld [vmem:[#allocation7 + $0xc8] sm:$0xff]  ;;  %v844_v2 = vld [vmem:[#allocation7 + $0xe0] sm:$0xff]  ;;  %v843_v5 = vld [vmem:[#allocation7 + $0xd8] sm:$0xff]  ;;  %vm864_vm0 = vcmask 523264   ;;  %vm2263_vm1 = vcmask 1043456  }
 0x1c7   : > { %11042 = vsyncadd (%p14369_p8), [#allocation26], 4294967280  ;;  %953 = vmatprep.mubr.f32.mxu0 %v11085_v0  ;;  %v840_v3 = vld [vmem:[#allocation7 + $0xc0] sm:$0xff]  ;;  %v8537_v4 = vpack.c.bf16 %v844_v2, %v841_v1  ;;  %v847_v6 = vld [vmem:[#allocation7 + $0xf8] sm:$0xff]  ;;  %vm11086_vm2 = vmmov 1   ;;  %vm2250_vm4 = vcmask 490496  }
 0x1c8   : > { %v850_v7 = vld [vmem:[#allocation7 + $0x110] sm:$0xff]  ;;  %v8539_v8 = vpack.c.bf16 %v843_v5, %v840_v3  ;;  %v849_v11 = vld [vmem:[#allocation7 + $0x108] sm:$0xff]  ;;  %v856_v13 = vld [vmem:[#allocation7 + $0x140] sm:$0xff]  ;;  %s14372_s26 = sld [smem:[#allocation45_spill]]  ;;  %s14373_s0 = sld [smem:[#allocation46_spill]]  ;;  %vm2739_vm5 = vcmask 850944  }
 0x1c9   : > { %v8541_v9 = vpack.c.bf16 %v850_v7, %v847_v6  ;;  %v846_v10 = vld [vmem:[#allocation7 + $0xf0] sm:$0xff]  ;;  %v853_v12 = vld [vmem:[#allocation7 + $0x128] sm:$0xff]  ;;  %8538 = vmatprep.subr.bf16.mxu0 %v8537_v4  ;;  %v852_v16 = vld [vmem:[#allocation7 + $0x120] sm:$0xff]  ;;  %vm3235_vm6 = vcmask 424960   ;;  %vm3449_vm7 = vcmask 1046528   ;;  %vm3967_vm8 = vcmask 1045504  }
 0x1ca   : > { %8540 = vmatpush1.bf16.msra.mxu0 %v8539_v8  ;;  %v8543_v14 = vpack.c.bf16 %v849_v11, %v846_v10  ;;  %v8545_v15 = vpack.c.bf16 %v856_v13, %v853_v12  ;;  %v855_v17 = vld [vmem:[#allocation7 + $0x138] sm:$0xff]  ;;  %v831_v18 = vld [vmem:[%s11586_s27 + $0x1] sm:$0xff]  ;;  %v862_v20 = vld [vmem:[#allocation7 + $0x170] sm:$0xff]  ;;  %vm3242_vm9 = vcmask 422912   ;;  %vm4301_vm10 = vcmask 1044480   ;;  %s14377_s23 = sld [smem:[#allocation51_spill]] }
 0x1cb   : > { %8542 = vmatprep.subr.bf16.mxu0 %v8541_v9  ;;  %v859_v19 = vld [vmem:[#allocation7 + $0x158] sm:$0xff]  ;;  %8311 = vmatprep.mubr.msk.f32.mxu1 %vm864_vm0, %v831_v18  ;;  %v8547_v21 = vpack.c.bf16 %v855_v17, %v852_v16  ;;  %v858_v22 = vld [vmem:[#allocation7 + $0x150] sm:$0xff]  ;;  %v861_v23 = vld [vmem:[#allocation7 + $0x168] sm:$0xff]  ;;  %vm4876_vm11 = vcmask 1041408   ;;  %vm4869_vm13 = vcmask 211968   ;;  %vm5317_vm14 = vcmask 261120  }
 0x1cc   : > { %v8549_v24 = vpack.c.bf16 %v862_v20, %v859_v19  ;;  %v808_v25 = vld [vmem:[#allocation7 + $0x8] sm:$0xff]  ;;  %v842_v26 = vld [vmem:[#allocation7 + $0xd0] sm:$0xff]  ;;  %v811_v28 = vld [vmem:[#allocation7 + $0x20] sm:$0xff]  ;;  %v8551_v33 = vpack.c.bf16 %v861_v23, %v858_v22  ;;  %vm5761_vm15 = vcmask 654336   ;;  %s14378_s19 = sld [smem:[#allocation52_spill]]  ;;  %s14379_s22 = sld [smem:[#allocation53_spill]] }
 0x1cd   : > { %v845_v27 = vld [vmem:[#allocation7 + $0xe8] sm:$0xff]  ;;  %v848_v30 = vld [vmem:[#allocation7 + $0x100] sm:$0xff]  ;;  %v851_v31 = vld [vmem:[#allocation7 + $0x118] sm:$0xff]  ;;  %v8569_v35 = vpack.c.bf16 %v811_v28, %v808_v25  ;;  %s8159_s6 = sshll.u32 %s14355_s13, 4  ;;  %s798_s4 = scalar_lea.vmem [#allocation27], %s11582_s7 }
 0x1ce   : > { %8544 = vmatpush1.bf16.msra.mxu0 %v8543_v14  ;;  %v8553_v29 = vpack.c.bf16 %v845_v27, %v842_v26  ;;  %v8557_v32 = vpack.c.bf16 %v851_v31, %v848_v30  ;;  %v854_v34 = vld [vmem:[#allocation7 + $0x130] sm:$0xff]  ;;  %v807_v36 = vld [vmem:[#allocation7] sm:$0xff]  ;;  %v810_v37 = vld [vmem:[#allocation7 + $0x18] sm:$0xff]  ;;  %s14374_s25 = smov %s14373_s0  ;;  %s7417_s24 = sshll.u32 %s798_s4, 4  ;;  %s14227_s24 = int_to_ptr.vmem [resolvable:$true] %s7417_s24 }
 0x1cf   : > { %8546 = vmatprep.subr.bf16.mxu0 %v8545_v15  ;;  %v857_v38 = vld [vmem:[#allocation7 + $0x148] sm:$0xff]  ;;  %v814_v39 = vld [vmem:[#allocation7 + $0x38] sm:$0xff]  ;;  %v817_v40 = vld [vmem:[#allocation7 + $0x50] sm:$0xff]  ;;  %v8571_v44 = vpack.c.bf16 %v810_v37, %v807_v36  ;;  %s14380_s2 = sld [smem:[#allocation54_spill]]  ;;  %s10967_s1 = scalar_lea.vmem %s14227_s24, 16 }
 0x1d0   : > { %8554 = vmatprep.subr.bf16.mxu1 %v8553_v29  ;;  %v8561_v41 = vpack.c.bf16 %v857_v38, %v854_v34  ;;  %v860_v42 = vld [vmem:[#allocation7 + $0x160] sm:$0xff]  ;;  %v863_v43 = vld [vmem:[#allocation7 + $0x178] sm:$0xff]  ;;  %v8573_v45 = vpack.c.bf16 %v817_v40, %v814_v39  ;;  %v813_v46 = vld [vmem:[#allocation7 + $0x30] sm:$0xff]  ;;  %p10968_p6 = scmp.ne.s32.totalorder %s14227_s24, %s10967_s1  ;;  %p14381_p9 = scmp.ne.s32.totalorder %s14349_s28, 0 }
 0x1d1   : > { %8556 = vmatpush3.bf16.msra.mxu1 %v8553_v29  ;;  %v816_v47 = vld [vmem:[#allocation7 + $0x48] sm:$0xff]  ;;  %v823_v49 = vld [vmem:[#allocation7 + $0x80] sm:$0xff]  ;;  %v8565_v50 = vpack.c.bf16 %v863_v43, %v860_v42  ;;  %v809_v51 = vld [vmem:[#allocation7 + $0x10] sm:$0xff]  ;;  %s11089_s13 = smov [#allocation27]  }
 0x1d2   : > { %8548 = vmatpush1.bf16.msra.mxu0 %v8547_v21  ;;  %8558 = vmatprep.subr.bf16.mxu1 %v8557_v32  ;;  %v820_v48 = vld [vmem:[#allocation7 + $0x68] sm:$0xff]  ;;  %v8575_v54 = vpack.c.bf16 %v816_v47, %v813_v46  ;;  %v819_v56 = vld [vmem:[#allocation7 + $0x60] sm:$0xff]  ;;  %v822_v57 = vld [vmem:[#allocation7 + $0x78] sm:$0xff]  ;;  %p10969_p4 = pnand %p10968_p6, %p14381_p9  ;;  %s10971_s8 = sshll.u32 %s11089_s13, 4  ;;  %s10972_s8 = int_to_ptr.vmem [resolvable:$false] %s10971_s8 }
 0x1d3   : > { %8550 = vmatprep.subr.bf16.mxu0 %v8549_v24  ;;  %v812_v52 = vld [vmem:[#allocation7 + $0x28] sm:$0xff]  ;;  %v8577_v55 = vpack.c.bf16 %v823_v49, %v820_v48  ;;  %v826_v58 = vld [vmem:[#allocation7 + $0x98] sm:$0xff]  ;;  %v829_v59 = vld [vmem:[#allocation7 + $0xb0] sm:$0xff]  ;;  %v8579_v62 = vpack.c.bf16 %v822_v57, %v819_v56  ;;  %s10973_s10 = scalar_lea.vmem %s10972_s8, 32  ;;  %p10974_p0 = scmp.lt.s32.totalorder %s14227_s24, %s10972_s8 }
 0x1d4   : > { %v832_v53 = vld [vmem:[%s11586_s27 + $0x9] sm:$0xff]  ;;  %v8585_v60 = vpack.c.bf16 %v812_v52, %v809_v51  ;;  %v833_v61 = vld [vmem:[%s11586_s27 + $0x11] sm:$0xff]  ;;  %v815_v63 = vld [vmem:[#allocation7 + $0x40] sm:$0xff]  ;;  %v8581_v2 = vpack.c.bf16 %v829_v59, %v826_v58  ;;  %p10970_p3 = pneg %p10969_p4  ;;  %p10975_p5 = scmp.lt.s32.totalorder %s10973_s10, %s10967_s1 }
 0x1d5   : > { %8560 = vmatpush3.bf16.msra.mxu1 %v8557_v32  ;;  %v818_v1 = vld [vmem:[#allocation7 + $0x58] sm:$0xff]  ;;  %v825_v3 = vld [vmem:[#allocation7 + $0x90] sm:$0xff]  ;;  %v828_v4 = vld [vmem:[#allocation7 + $0xa8] sm:$0xff]  ;;  %s14225_s5 = scalar_lea.hbm %s14380_s2, %s8159_s6 }
 0x1d6   : > { %8552 = vmatpush1.bf16.msra.mxu0 %v8551_v33  ;;  %8562 = vmatprep.subr.bf16.mxu1 %v8561_v41  ;;  %v1359_v5 = vld [vmem:[#allocation7 + $0x188] sm:$0xff]  ;;  %v1362_v6 = vld [vmem:[#allocation7 + $0x1a0] sm:$0xff]  ;;  %v8589_v7 = vpack.c.bf16 %v818_v1, %v815_v63  ;;  %v8583_v9 = vpack.c.bf16 %v828_v4, %v825_v3  ;;  %v821_v10 = vld [vmem:[#allocation7 + $0x70] sm:$0xff]  ;;  %p10976_p2 = por %p10975_p5, %p10974_p0 }
 0x1d7   : > { %8570 = vmatprep.subr.bf16.mxu0 %v8569_v35  ;;  %v834_v8 = vld [vmem:[%s11586_s27 + $0x19] sm:$0xff]  ;;  %v824_v11 = vld [vmem:[#allocation7 + $0x88] sm:$0xff]  ;;  %v8601_v12 = vpack.c.bf16 %v1362_v6, %v1359_v5  ;;  %v1360_v19 = vld [vmem:[#allocation7 + $0x190] sm:$0xff] }
 0x1d8   : > { %v8593_v13 = vpack.c.bf16 %v824_v11, %v821_v10  ;;  %v835_v14 = vld [vmem:[%s11586_s27 + $0x21] sm:$0xff]  ;;  %v830_v16 = vld [vmem:[#allocation7 + $0xb8] sm:$0xff]  ;;  %v1372_v29 = vld [vmem:[#allocation7 + $0x1f0] sm:$0xff]  ;;  %p10977_p7 = pnand %p10976_p2, %p10970_p3 }
 0x1d9   : > { %7641 = vmatmul.mubr.msk.f32.vlgmr.msra.gmra.mrb[0].mxu0 %vm864_vm0, %v831_v18  ;;  %8564 = vmatpush3.bf16.msra.mxu1 %v8561_v41  ;;  %v827_v15 = vld [vmem:[#allocation7 + $0xa0] sm:$0xff]  ;;  %v836_v18 = vld [vmem:[%s11586_s27 + $0x29] sm:$0xff]  ;;  %v837_v21 = vld [vmem:[%s11586_s27 + $0x31] sm:$0xff] }
 0x1da   : > { %959 = vmatprep.mubr.f32.mxu0 %v11085_v0  ;;  %8572 = vmatpush1.bf16.msra.mxu0 %v8571_v44  ;;  %v8597_v17 = vpack.c.bf16 %v830_v16, %v827_v15  ;;  %v1363_v20 = vld [vmem:[#allocation7 + $0x1a8] sm:$0xff]  ;;  %v838_v23 = vld [vmem:[%s11586_s27 + $0x39] sm:$0xf]  ;;  %v1366_v24 = vld [vmem:[#allocation7 + $0x1c0] sm:$0xff] }
 0x1db   : > { %8574 = vmatprep.subr.bf16.mxu0 %v8573_v45  ;;  %8566 = vmatprep.subr.bf16.mxu1 %v8565_v50  ;;  %v8617_v22 = vpack.c.bf16 %v1363_v20, %v1360_v19  ;;  %v1369_v25 = vld [vmem:[#allocation7 + $0x1d8] sm:$0xff]  ;;  %v799_v26 = vld [vmem:[%s11586_s27] sm:$0xff]  ;;  %v800_v28 = vld [vmem:[%s11586_s27 + $0x8] sm:$0xff] }
 0x1dc   : > { %v8621_v27 = vpack.c.bf16 %v1369_v25, %v1366_v24  ;;  %v1375_v30 = vld [vmem:[#allocation7 + $0x208] sm:$0xff]  ;;  %v1358_v31 = vld [vmem:[#allocation7 + $0x180] sm:$0xff]  ;;  %v1361_v32 = vld [vmem:[#allocation7 + $0x198] sm:$0xff] }
 0x1dd   : > { %7642 = vmatmul.mubr.msk.f32.gmra.mrb[2].mxu0 %vm864_vm0, %v832_v53  ;;  %8568 = vmatpush3.bf16.msra.mxu1 %v8565_v50  ;;  %v801_v33 = vld [vmem:[%s11586_s27 + $0x10] sm:$0xff]  ;;  %v1365_v34 = vld [vmem:[#allocation7 + $0x1b8] sm:$0xff]  ;;  %v8625_v36 = vpack.c.bf16 %v1375_v30, %v1372_v29  ;;  %v8603_v37 = vpack.c.bf16 %v1361_v32, %v1358_v31  ;;  %v1378_v39 = vld [vmem:[#allocation7 + $0x220] sm:$0xff] }
 0x1de   : > { %965 = vmatprep.mubr.f32.mxu0 %v11085_v0  ;;  %8576 = vmatpush1.bf16.msra.mxu0 %v8575_v54  ;;  %v1368_v35 = vld [vmem:[#allocation7 + $0x1d0] sm:$0xff]  ;;  %v11660_v38 = vld [vmem:[%s11586_s27 + $0x18] sm:$0xff]  ;;  %v1367_v43 = vld [vmem:[#allocation7 + $0x1c8] sm:$0xff] }
 0x1df   : > { %8578 = vmatprep.subr.bf16.mxu0 %v8577_v55  ;;  %8586 = vmatprep.subr.bf16.mxu1 %v8585_v60  ;;  %v1381_v40 = vld [vmem:[#allocation7 + $0x238] sm:$0xff]  ;;  %v8605_v41 = vpack.c.bf16 %v1368_v35, %v1365_v34  ;;  %v1364_v42 = vld [vmem:[#allocation7 + $0x1b0] sm:$0xff]  ;;  %v11663_v44 = vld [vmem:[%s11586_s27 + $0x20] sm:$0xff] }
 0x1e0   : > { %8312 = vmatmul.mubr.msk.f32.vlgmr.msra.gmra.mrb[0].mxu1 %vm864_vm0, %v832_v53  ;;  %v1371_v45 = vld [vmem:[#allocation7 + $0x1e8] sm:$0xff]  ;;  %v1374_v46 = vld [vmem:[#allocation7 + $0x200] sm:$0xff]  ;;  %v8629_v47 = vpack.c.bf16 %v1381_v40, %v1378_v39  ;;  %v8607_v48 = vpack.c.bf16 %v1367_v43, %v1364_v42  ;;  %v1659_v50 = vld [vmem:[#allocation7 + $0x250] sm:$0xff] }
 0x1e1   : > { %7643 = vmatmul.mubr.msk.f32.gmra.mrb[4].mxu0 %vm864_vm0, %v833_v61  ;;  %8588 = vmatpush3.bf16.msra.mxu1 %v8585_v60  ;;  %v11672_v49 = vld [vmem:[%s11586_s27 + $0x28] sm:$0xff]  ;;  %v8609_v52 = vpack.c.bf16 %v1374_v46, %v1371_v45  ;;  %v1370_v53 = vld [vmem:[#allocation7 + $0x1e0] sm:$0xff]  ;;  %v1373_v54 = vld [vmem:[#allocation7 + $0x1f8] sm:$0xff] }
 0x1e2   : > { %971 = vmatprep.mubr.f32.mxu0 %v11085_v0  ;;  %8580 = vmatpush1.bf16.msra.mxu0 %v8579_v62  ;;  %v1662_v51 = vld [vmem:[#allocation7 + $0x268] sm:$0xff]  ;;  %v11677_v55 = vld [vmem:[%s11586_s27 + $0x30] sm:$0xff]  ;;  %v11682_v56 = vld [vmem:[%s11586_s27 + $0x38] sm:$0xf] }
 0x1e3   : > { %8582 = vmatprep.subr.bf16.mxu0 %v8581_v2  ;;  %8314 = vmatprep.mubr.msk.f32.mxu1 %vm864_vm0, %v833_v61  ;;  %v1377_v57 = vld [vmem:[#allocation7 + $0x218] sm:$0xff]  ;;  %v1380_v58 = vld [vmem:[#allocation7 + $0x230] sm:$0xff]  ;;  %v11686_v59 = vld [vmem:[%s11586_s27 + $0x2] sm:$0xff]  ;;  %v8649_v60 = vpack.c.bf16 %v1662_v51, %v1659_v50  ;;  %v8611_v61 = vpack.c.bf16 %v1373_v54, %v1370_v53 }
 0x1e4   : > { %8590 = vmatprep.subr.bf16.mxu1 %v8589_v7  ;;  %8315 = vmatmul.mubr.msk.f32.gmra.mrb[2].mxu1 %vm864_vm0, %v834_v8  ;;  %v1665_v62 = vld [vmem:[#allocation7 + $0x280] sm:$0xff]  ;;  %v1668_v63 = vld [vmem:[#allocation7 + $0x298] sm:$0xff]  ;;  %v8613_v1 = vpack.c.bf16 %v1380_v58, %v1377_v57  ;;  %v1376_v2 = vld [vmem:[#allocation7 + $0x210] sm:$0xff] }
 0x1e5   : > { %7644 = vmatmul.mubr.msk.f32.gmra.mrb[6].mxu0 %vm864_vm0, %v834_v8  ;;  %8592 = vmatpush3.bf16.msra.mxu1 %v8589_v7  ;;  %v1379_v3 = vld [vmem:[#allocation7 + $0x228] sm:$0xff]  ;;  %v1661_v6 = vld [vmem:[#allocation7 + $0x260] sm:$0xff]  ;;  %v11698_v7 = vld [vmem:[%s11586_s27 + $0x12] sm:$0xff]  ;;  %v8653_v8 = vpack.c.bf16 %v1668_v63, %v1665_v62 }
 0x1e6   : > { %977 = vmatprep.mubr.f32.mxu0 %v11085_v0  ;;  %8584 = vmatpush1.bf16.msra.mxu0 %v8583_v9  ;;  %v11694_v4 = vld [vmem:[%s11586_s27 + $0xa] sm:$0xff]  ;;  %v8615_v9 = vpack.c.bf16 %v1379_v3, %v1376_v2  ;;  %v1677_v16 = vld [vmem:[#allocation7 + $0x2e0] sm:$0xff]  ;;  %v11724_v19 = vld [vmem:[%s11586_s27 + $0x32] sm:$0xff] }
 0x1e7   : > { %8602 = vmatprep.subr.bf16.mxu0 %v8601_v12  ;;  %8317 = vmatprep.mubr.msk.f32.mxu1 %vm864_vm0, %v835_v14  ;;  %v1658_v5 = vld [vmem:[#allocation7 + $0x248] sm:$0xff]  ;;  %v1671_v10 = vld [vmem:[#allocation7 + $0x2b0] sm:$0xff]  ;;  %v1660_v34 = vld [vmem:[#allocation7 + $0x258] sm:$0xff] }
 0x1e8   : > { %8594 = vmatprep.subr.bf16.mxu1 %v8593_v13  ;;  %8318 = vmatmul.mubr.msk.f32.gmra.mrb[4].mxu1 %vm864_vm0, %v836_v18  ;;  %v1674_v11 = vld [vmem:[#allocation7 + $0x2c8] sm:$0xff]  ;;  %v8633_v12 = vpack.c.bf16 %v1661_v6, %v1658_v5  ;;  %v11750_v29 = vld [vmem:[%s11586_s27 + $0x13] sm:$0xff]  ;;  %v1669_v53 = vld [vmem:[#allocation7 + $0x2a0] sm:$0xff] }
 0x1e9   : > { %7645 = vmatmul.mubr.msk.f32.gmra.mrb[8].mxu0 %vm864_vm0, %v835_v14  ;;  %8596 = vmatpush3.bf16.msra.mxu1 %v8593_v13  ;;  %v11706_v13 = vld [vmem:[%s11586_s27 + $0x1a] sm:$0xff]  ;;  %v11711_v14 = vld [vmem:[%s11586_s27 + $0x22] sm:$0xff]  ;;  %v8657_v15 = vpack.c.bf16 %v1674_v11, %v1671_v10  ;;  %v1970_v31 = vld [vmem:[#allocation7 + $0x370] sm:$0xff] }
 0x1ea   : > { %983 = vmatprep.mubr.f32.mxu0 %v11085_v0  ;;  %8320 = vmatprep.mubr.msk.f32.mxu1 %vm864_vm0, %v837_v21  ;;  %v11737_v24 = vld [vmem:[%s11586_s27 + $0x3] sm:$0xff]  ;;  %v1664_v35 = vld [vmem:[#allocation7 + $0x278] sm:$0xff]  ;;  %v1679_v57 = vld [vmem:[#allocation7 + $0x2f0] sm:$0xff] }
 0x1eb   : > { %8598 = vmatprep.subr.bf16.mxu1 %v8597_v17  ;;  %v1973_v32 = vld [vmem:[#allocation7 + $0x388] sm:$0xff]  ;;  %v1979_v42 = vld [vmem:[#allocation7 + $0x3b8] sm:$0xff]  ;;  %v1960_v2 = vld [vmem:[#allocation7 + $0x320] sm:$0xff] }
 0x1ec   : > { %8321 = vmatmul.mubr.msk.f32.gmra.mrb[6].mxu1 %vm864_vm0, %v838_v23  ;;  %v8689_v39 = vpack.c.bf16 %v1973_v32, %v1970_v31  ;;  %v1666_v45 = vld [vmem:[#allocation7 + $0x288] sm:$0xff]  ;;  %v1672_v54 = vld [vmem:[#allocation7 + $0x2b8] sm:$0xff]  ;;  %v1956_v11 = vld [vmem:[#allocation7 + $0x300] sm:$0xff] }
 0x1ed   : > { %7646 = vmatmul.mubr.msk.f32.gmra.mrb[10].mxu0 %vm864_vm0, %v836_v18  ;;  %8600 = vmatpush3.bf16.msra.mxu1 %v8597_v17  ;;  %v1680_v17 = vld [vmem:[#allocation7 + $0x2f8] sm:$0xff]  ;;  %v11719_v18 = vld [vmem:[%s11586_s27 + $0x2a] sm:$0xff]  ;;  %vm11907_vm3 = vmpackc.low %vm2263_vm1, %vm11086_vm2 }
 0x1ee   : > { %989 = vmatprep.mubr.f32.mxu0 %v11085_v0  ;;  %8339 = vmatprep.mubr.msk.f32.mxu1 %vm864_vm0, %v799_v26  ;;  %v8661_v20 = vpack.c.bf16 %v1680_v17, %v1677_v16  ;;  %v1670_v46 = vld [vmem:[#allocation7 + $0x2a8] sm:$0xff]  ;;  %v11802_v3 = vld [vmem:[%s11586_s27 + $0x14] sm:$0xff]  ;;  %v11810_v6 = vld [vmem:[%s11586_s27 + $0x1c] sm:$0xff] }
 0x1ef   : > { %8618 = vmatprep.subr.bf16.mxu1 %v8617_v22  ;;  %v11789_v58 = vld [vmem:[%s11586_s27 + $0x4] sm:$0xff]  ;;  %v11797_v63 = vld [vmem:[%s11586_s27 + $0xc] sm:$0xff]  ;;  %v11836_v10 = vld [vmem:[%s11586_s27 + $0x3c] sm:$0xf] }
 0x1f0   : > { %8340 = vmatmul.mubr.msk.f32.vlgmr.msra.gmra.mrb[0].mxu1 %vm864_vm0, %v800_v28  ;;  %v1678_v62 = vld [vmem:[#allocation7 + $0x2e8] sm:$0xff]  ;;  %v1962_v17 = vld [vmem:[#allocation7 + $0x330] sm:$0xff]  ;;  %vm12785_vm12 = vmpackc.low %vm4876_vm11, %vm11086_vm2  ;;  %vm11088_vm2 = vmmov 0  }
 0x1f1   : > { %7647 = vmatmul.mubr.msk.f32.gmra.mrb[12].mxu0 %vm864_vm0, %v837_v21  ;;  %8620 = vmatpush3.bf16.msra.mxu1 %v8617_v22  ;;  %v1958_v21 = vld [vmem:[#allocation7 + $0x310] sm:$0xff]  ;;  %v1961_v22 = vld [vmem:[#allocation7 + $0x328] sm:$0xff] }
 0x1f2   : > { %995 = vmatprep.mubr.f32.mxu0 %v11085_v0  ;;  %8342 = vmatprep.mubr.msk.f32.mxu1 %vm864_vm0, %v801_v33  ;;  %v8681_v25 = vpack.c.bf16 %v1961_v22, %v1958_v21  ;;  %v1972_v21 = vld [vmem:[#allocation7 + $0x380] sm:$0xff]  ;;  %v1977_v32 = vld [vmem:[#allocation7 + $0x3a8] sm:$0xff] }
 0x1f3   : > { %8622 = vmatprep.subr.bf16.mxu1 %v8621_v27 }
 0x1f4   : > { %8343 = vmatmul.mubr.msk.f32.gmra.mrb[2].mxu1 %vm864_vm0, %v11660_v38 }
 0x1f5   : > { %7648 = vmatmul.mubr.msk.f32.gmra.mrb[14].mxu0 %vm864_vm0, %v838_v23  ;;  %8624 = vmatpush3.bf16.msra.mxu1 %v8621_v27  ;;  %v11732_v23 = vld [vmem:[%s11586_s27 + $0x3a] sm:$0xf] }
 0x1f6   : > { %1195 = vmatprep.mubr.f32.mxu0 %v11085_v0  ;;  %8345 = vmatprep.mubr.msk.f32.mxu1 %vm864_vm0, %v11663_v44  ;;  %v1967_v27 = vld [vmem:[#allocation7 + $0x358] sm:$0xff] }
 0x1f7   : > { %8626 = vmatprep.subr.bf16.mxu1 %v8625_v36 }
 0x1f8   : > { %8346 = vmatmul.mubr.msk.f32.gmra.mrb[4].mxu1 %vm864_vm0, %v11672_v49 }
 0x1f9   : > { %7657 = vmatmul.mubr.msk.f32.vlgmr.msra.gmra.mrb[0].mxu0 %vm864_vm0, %v799_v26  ;;  %8628 = vmatpush3.bf16.msra.mxu1 %v8625_v36  ;;  %v1964_v26 = vld [vmem:[#allocation7 + $0x340] sm:$0xff]  ;;  %v1667_v36 = vld [vmem:[#allocation7 + $0x290] sm:$0xff] }
 0x1fa   : > { %1201 = vmatprep.mubr.f32.mxu0 %v11085_v0  ;;  %8604 = vmatpush1.bf16.msra.mxu0 %v8603_v37  ;;  %v8685_v30 = vpack.c.bf16 %v1967_v27, %v1964_v26  ;;  %v11758_v37 = vld [vmem:[%s11586_s27 + $0x1b] sm:$0xff]  ;;  %v8637_v43 = vpack.c.bf16 %v1667_v36, %v1664_v35  ;;  %v1978_v27 = vld [vmem:[#allocation7 + $0x3b0] sm:$0xff] }
 0x1fb   : > { %8606 = vmatprep.subr.bf16.mxu0 %v8605_v41  ;;  %8348 = vmatprep.mubr.msk.f32.mxu1 %vm864_vm0, %v11677_v55  ;;  %v1976_v41 = vld [vmem:[#allocation7 + $0x3a0] sm:$0xff]  ;;  %v1971_v26 = vld [vmem:[#allocation7 + $0x378] sm:$0xff] }
 0x1fc   : > { %8630 = vmatprep.subr.bf16.mxu1 %v8629_v47  ;;  %8349 = vmatmul.mubr.msk.f32.gmra.mrb[6].mxu1 %vm864_vm0, %v11682_v56  ;;  %v8693_v50 = vpack.c.bf16 %v1979_v42, %v1976_v41 }
 0x1fd   : > { %7658 = vmatmul.mubr.msk.f32.gmra.mrb[2].mxu0 %vm864_vm0, %v800_v28  ;;  %8632 = vmatpush3.bf16.msra.mxu1 %v8629_v47  ;;  %v11745_v28 = vld [vmem:[%s11586_s27 + $0xb] sm:$0xff]  ;;  %v1673_v47 = vld [vmem:[#allocation7 + $0x2c0] sm:$0xff] }
 0x1fe   : > { %1207 = vmatprep.mubr.f32.mxu0 %v11085_v0  ;;  %8608 = vmatpush1.bf16.msra.mxu0 %v8607_v48  ;;  %v11771_v48 = vld [vmem:[%s11586_s27 + $0x2b] sm:$0xff] }
 0x1ff   : > { %8610 = vmatprep.subr.bf16.mxu0 %v8609_v52  ;;  %8367 = vmatprep.mubr.msk.f32.mxu1 %vm864_vm0, %v11686_v59  ;;  %v8641_v52 = vpack.c.bf16 %v1673_v47, %v1670_v46 }
 0x200   : > { %8650 = vmatprep.subr.bf16.mxu1 %v8649_v60  ;;  %8368 = vmatmul.mubr.msk.f32.vlgmr.msra.gmra.mrb[0].mxu1 %vm864_vm0, %v11694_v4 }
 0x201   : > { %7659 = vmatmul.mubr.msk.f32.gmra.mrb[4].mxu0 %vm864_vm0, %v801_v33  ;;  %8652 = vmatpush3.bf16.msra.mxu1 %v8649_v60  ;;  %v1657_v33 = vld [vmem:[#allocation7 + $0x240] sm:$0xff] }
 0x202   : > { %1213 = vmatprep.mubr.f32.mxu0 %v11085_v0  ;;  %8612 = vmatpush1.bf16.msra.mxu0 %v8611_v61  ;;  %v8635_v40 = vpack.c.bf16 %v1660_v34, %v1657_v33  ;;  %v1675_v61 = vld [vmem:[#allocation7 + $0x2d0] sm:$0xff] }
 0x203   : > { %8614 = vmatprep.subr.bf16.mxu0 %v8613_v1  ;;  %8370 = vmatprep.mubr.msk.f32.mxu1 %vm864_vm0, %v11698_v7  ;;  %v1957_v1 = vld [vmem:[#allocation7 + $0x308] sm:$0xff] }
 0x204   : > { %8654 = vmatprep.subr.bf16.mxu1 %v8653_v8  ;;  %8371 = vmatmul.mubr.msk.f32.gmra.mrb[2].mxu1 %vm864_vm0, %v11706_v13  ;;  %v8665_v5 = vpack.c.bf16 %v1960_v2, %v1957_v1 }
 0x205   : > { %7660 = vmatmul.mubr.msk.f32.gmra.mrb[6].mxu0 %vm864_vm0, %v11660_v38  ;;  %8656 = vmatpush3.bf16.msra.mxu1 %v8653_v8  ;;  %v11763_v38 = vld [vmem:[%s11586_s27 + $0x23] sm:$0xff]  ;;  %v11823_v8 = vld [vmem:[%s11586_s27 + $0x2c] sm:$0xff] }
 0x206   : > { %1219 = vmatprep.mubr.f32.mxu0 %v11085_v0  ;;  %8616 = vmatpush1.bf16.msra.mxu0 %v8615_v9  ;;  %v11828_v9 = vld [vmem:[%s11586_s27 + $0x34] sm:$0xff] }
 0x207   : > { %8634 = vmatprep.subr.bf16.mxu0 %v8633_v12  ;;  %8373 = vmatprep.mubr.msk.f32.mxu1 %vm864_vm0, %v11711_v14  ;;  %v1959_v12 = vld [vmem:[#allocation7 + $0x318] sm:$0xff] }
 0x208   : > { %8658 = vmatprep.subr.bf16.mxu1 %v8657_v15  ;;  %8374 = vmatmul.mubr.msk.f32.gmra.mrb[4].mxu1 %vm864_vm0, %v11719_v18 }
 0x209   : > { %7661 = vmatmul.mubr.msk.f32.gmra.mrb[8].mxu0 %vm864_vm0, %v11663_v44  ;;  %8660 = vmatpush3.bf16.msra.mxu1 %v8657_v15  ;;  %v1663_v44 = vld [vmem:[#allocation7 + $0x270] sm:$0xff]  ;;  %v8667_v15 = vpack.c.bf16 %v1959_v12, %v1956_v11 }
 0x20a   : > { %1225 = vmatprep.mubr.f32.mxu0 %v11085_v0  ;;  %8376 = vmatprep.mubr.msk.f32.mxu1 %vm864_vm0, %v11724_v19  ;;  %v8639_v51 = vpack.c.bf16 %v1666_v45, %v1663_v44  ;;  %v2448_v11 = vld [vmem:[#allocation12 + $0x8] sm:$0xff]  ;;  %v2449_v12 = vld [vmem:[#allocation12 + $0x10] sm:$0xff] }
 0x20b   : > { %8662 = vmatprep.subr.bf16.mxu1 %v8661_v20 }
 0x20c   : > { %8377 = vmatmul.mubr.msk.f32.gmra.mrb[6].mxu1 %vm864_vm0, %v11732_v23 }
 0x20d   : > { %7662 = vmatmul.mubr.msk.f32.gmra.mrb[10].mxu0 %vm864_vm0, %v11672_v49  ;;  %8664 = vmatpush3.bf16.msra.mxu1 %v8661_v20  ;;  %v11776_v49 = vld [vmem:[%s11586_s27 + $0x33] sm:$0xff]  ;;  %v1969_v20 = vld [vmem:[#allocation7 + $0x368] sm:$0xff] }
 0x20e   : > { %1231 = vmatprep.mubr.f32.mxu0 %v11085_v0  ;;  %8395 = vmatprep.mubr.msk.f32.mxu1 %vm864_vm0, %v11737_v24  ;;  %v8673_v22 = vpack.c.bf16 %v1972_v21, %v1969_v20  ;;  %v2654_v20 = vld [vmem:[%s14372_s26 + $0x28] sm:$0xff]  ;;  %v2656_v21 = vld [vmem:[%s14372_s26 + $0x38] sm:$0xff] }
 0x20f   : > { %8682 = vmatprep.subr.bf16.mxu1 %v8681_v25 }
 0x210   : > { %8396 = vmatmul.mubr.msk.f32.vlgmr.msra.gmra.mrb[0].mxu1 %vm864_vm0, %v11745_v28 }
 0x211   : > { %7663 = vmatmul.mubr.msk.f32.gmra.mrb[12].mxu0 %vm864_vm0, %v11677_v55  ;;  %8684 = vmatpush3.bf16.msra.mxu1 %v8681_v25  ;;  %v11784_v55 = vld [vmem:[%s11586_s27 + $0x3b] sm:$0xf]  ;;  %v1968_v25 = vld [vmem:[#allocation7 + $0x360] sm:$0xff] }
 0x212   : > { %1237 = vmatprep.mubr.f32.mxu0 %v11085_v0  ;;  %8398 = vmatprep.mubr.msk.f32.mxu1 %vm864_vm0, %v11750_v29 }
 0x213   : > { %8686 = vmatprep.subr.bf16.mxu1 %v8685_v30 }
 0x214   : > { %8399 = vmatmul.mubr.msk.f32.gmra.mrb[2].mxu1 %vm864_vm0, %v11758_v37 }
 0x215   : > { %7664 = vmatmul.mubr.msk.f32.gmra.mrb[14].mxu0 %vm864_vm0, %v11682_v56  ;;  %8688 = vmatpush3.bf16.msra.mxu1 %v8685_v30  ;;  %v1676_v56 = vld [vmem:[#allocation7 + $0x2d8] sm:$0xff]  ;;  %v8675_v30 = vpack.c.bf16 %v1971_v26, %v1968_v25  ;;  %v2653_v25 = vld [vmem:[%s14372_s26 + $0x20] sm:$0xff]  ;;  %v2655_v26 = vld [vmem:[%s14372_s26 + $0x30] sm:$0xff] }
 0x216   : > { %1470 = vmatprep.mubr.f32.mxu0 %v11085_v0  ;;  %8401 = vmatprep.mubr.msk.f32.mxu1 %vm864_vm0, %v11763_v38  ;;  %v8645_v60 = vpack.c.bf16 %v1679_v57, %v1676_v56 }
 0x217   : > { %8690 = vmatprep.subr.bf16.mxu1 %v8689_v39 }
 0x218   : > { %8402 = vmatmul.mubr.msk.f32.gmra.mrb[4].mxu1 %vm864_vm0, %v11771_v48 }
 0x219   : > { %7673 = vmatmul.mubr.msk.f32.vlgmr.msra.gmra.mrb[0].mxu0 %vm864_vm0, %v11686_v59  ;;  %8692 = vmatpush3.bf16.msra.mxu1 %v8689_v39  ;;  %v8643_v59 = vpack.c.bf16 %v1672_v54, %v1669_v53 }
 0x21a   : > { %1476 = vmatprep.mubr.f32.mxu0 %v11085_v0  ;;  %8636 = vmatpush1.bf16.msra.mxu0 %v8635_v40 }
 0x21b   : > { %8638 = vmatprep.subr.bf16.mxu0 %v8637_v43  ;;  %8404 = vmatprep.mubr.msk.f32.mxu1 %vm864_vm0, %v11776_v49 }
 0x21c   : > { %8694 = vmatprep.subr.bf16.mxu1 %v8693_v50  ;;  %8405 = vmatmul.mubr.msk.f32.gmra.mrb[6].mxu1 %vm864_vm0, %v11784_v55 }
 0x21d   : > { %7674 = vmatmul.mubr.msk.f32.gmra.mrb[2].mxu0 %vm864_vm0, %v11694_v4  ;;  %8696 = vmatpush3.bf16.msra.mxu1 %v8693_v50  ;;  %v8647_v4 = vpack.c.bf16 %v1678_v62, %v1675_v61 }
 0x21e   : > { %1482 = vmatprep.mubr.f32.mxu0 %v11085_v0  ;;  %8640 = vmatpush1.bf16.msra.mxu0 %v8639_v51 }
 0x21f   : > { %8642 = vmatprep.subr.bf16.mxu0 %v8641_v52  ;;  %8423 = vmatprep.mubr.msk.f32.mxu1 %vm864_vm0, %v11789_v58 }
 0x220   : > { %8424 = vmatmul.mubr.msk.f32.vlgmr.msra.gmra.mrb[0].mxu1 %vm864_vm0, %v11797_v63 }
 0x221   : > { %7675 = vmatmul.mubr.msk.f32.gmra.mrb[4].mxu0 %vm864_vm0, %v11698_v7  ;;  %8426 = vmatprep.mubr.msk.f32.mxu1 %vm864_vm0, %v11802_v3  ;;  %v11815_v7 = vld [vmem:[%s11586_s27 + $0x24] sm:$0xff] }
 0x222   : > { %1488 = vmatprep.mubr.f32.mxu0 %v11085_v0  ;;  %8644 = vmatpush1.bf16.msra.mxu0 %v8643_v59 }
 0x223   : > { %8646 = vmatprep.subr.bf16.mxu0 %v8645_v60 }
 0x224   : > { %8427 = vmatmul.mubr.msk.f32.gmra.mrb[2].mxu1 %vm864_vm0, %v11810_v6 }
 0x225   : > { %7676 = vmatmul.mubr.msk.f32.gmra.mrb[6].mxu0 %vm864_vm0, %v11706_v13  ;;  %8429 = vmatprep.mubr.msk.f32.mxu1 %vm864_vm0, %v11815_v7  ;;  %v1963_v13 = vld [vmem:[#allocation7 + $0x338] sm:$0xff] }
 0x226   : > { %1494 = vmatprep.mubr.f32.mxu0 %v11085_v0  ;;  %8648 = vmatpush1.bf16.msra.mxu0 %v8647_v4 }
 0x227   : > { %8666 = vmatprep.subr.bf16.mxu0 %v8665_v5 }
 0x228   : > { %8430 = vmatmul.mubr.msk.f32.gmra.mrb[4].mxu1 %vm864_vm0, %v11823_v8 }
 0x229   : > { %7677 = vmatmul.mubr.msk.f32.gmra.mrb[8].mxu0 %vm864_vm0, %v11711_v14  ;;  %8432 = vmatprep.mubr.msk.f32.mxu1 %vm864_vm0, %v11828_v9  ;;  %v1966_v14 = vld [vmem:[#allocation7 + $0x350] sm:$0xff] }
 0x22a   : > { %1500 = vmatprep.mubr.f32.mxu0 %v11085_v0  ;;  %v8669_v16 = vpack.c.bf16 %v1966_v14, %v1963_v13  ;;  %v2650_v13 = vld [vmem:[%s14372_s26 + $0x8] sm:$0xff]  ;;  %v2652_v14 = vld [vmem:[%s14372_s26 + $0x18] sm:$0xff] }
 0x22c   : > { %8433 = vmatmul.mubr.msk.f32.gmra.mrb[6].mxu1 %vm864_vm0, %v11836_v10 }
 0x22d   : > { %7678 = vmatmul.mubr.msk.f32.gmra.mrb[10].mxu0 %vm864_vm0, %v11719_v18  ;;  %2337 = vmatprep.mubr.f32.mxu1 %v11085_v0  ;;  %v1965_v18 = vld [vmem:[#allocation7 + $0x348] sm:$0xff] }
 0x22e   : > { %1506 = vmatprep.mubr.f32.mxu0 %v11085_v0 }
 0x231   : > { %7679 = vmatmul.mubr.msk.f32.gmra.mrb[12].mxu0 %vm864_vm0, %v11724_v19  ;;  %v8671_v19 = vpack.c.bf16 %v1965_v18, %v1962_v17  ;;  %v2649_v17 = vld [vmem:[%s14372_s26] sm:$0xff]  ;;  %v2651_v18 = vld [vmem:[%s14372_s26 + $0x10] sm:$0xff] }
 0x232   : > { %1512 = vmatprep.mubr.f32.mxu0 %v11085_v0 }
 0x235   : > { %7680 = vmatmul.mubr.msk.f32.gmra.mrb[14].mxu0 %vm864_vm0, %v11732_v23  ;;  %v1975_v23 = vld [vmem:[#allocation7 + $0x398] sm:$0xff] }
 0x236   : > { %1769 = vmatprep.mubr.f32.mxu0 %v11085_v0  ;;  %v8677_v31 = vpack.c.bf16 %v1978_v27, %v1975_v23  ;;  %v2658_v23 = vld [vmem:[%s14372_s26 + $0x48] sm:$0xff]  ;;  %v2660_v27 = vld [vmem:[%s14372_s26 + $0x58] sm:$0xff] }
 0x239   : > { %7689 = vmatmul.mubr.msk.f32.vlgmr.msra.gmra.mrb[0].mxu0 %vm864_vm0, %v11737_v24  ;;  %v1974_v24 = vld [vmem:[#allocation7 + $0x390] sm:$0xff] }
 0x23a   : > { %1775 = vmatprep.mubr.f32.mxu0 %v11085_v0  ;;  %8668 = vmatpush1.bf16.msra.mxu0 %v8667_v15  ;;  %v8679_v33 = vpack.c.bf16 %v1977_v32, %v1974_v24  ;;  %v2450_v15 = vld [vmem:[#allocation12 + $0x18] sm:$0x3f]  ;;  %v2657_v24 = vld [vmem:[%s14372_s26 + $0x40] sm:$0xff]  ;;  %v2659_v32 = vld [vmem:[%s14372_s26 + $0x50] sm:$0xff] }
 0x23b   : > { %8670 = vmatprep.subr.bf16.mxu0 %v8669_v16  ;;  %v8769_v16 = vpack.c.bf16 %v2652_v14, %v2650_v13  ;;  %v2689_v14 = vld [vmem:[%s14372_s26 + $0x140] sm:$0xff] }
 0x23d   : > { %7690 = vmatmul.mubr.msk.f32.gmra.mrb[2].mxu0 %vm864_vm0, %v11745_v28 }
 0x23e   : > { %1781 = vmatprep.mubr.f32.mxu0 %v11085_v0  ;;  %8672 = vmatpush1.bf16.msra.mxu0 %v8671_v19  ;;  %v8771_v19 = vpack.c.bf16 %v2651_v18, %v2649_v17  ;;  %v2694_v17 = vld [vmem:[%s14372_s26 + $0x168] sm:$0xff]  ;;  %v2696_v18 = vld [vmem:[%s14372_s26 + $0x178] sm:$0xff] }
 0x23f   : > { %8674 = vmatprep.subr.bf16.mxu0 %v8673_v22  ;;  %v8773_v22 = vpack.c.bf16 %v2656_v21, %v2654_v20  ;;  %v8813_v20 = vpack.c.bf16 %v2696_v18, %v2694_v17  ;;  %v2693_v21 = vld [vmem:[%s14372_s26 + $0x160] sm:$0xff] }
 0x241   : > { %7691 = vmatmul.mubr.msk.f32.gmra.mrb[4].mxu0 %vm864_vm0, %v11750_v29 }
 0x242   : > { %1787 = vmatprep.mubr.f32.mxu0 %v11085_v0  ;;  %8676 = vmatpush1.bf16.msra.mxu0 %v8675_v30  ;;  %v8775_v30 = vpack.c.bf16 %v2655_v26, %v2653_v25  ;;  %v2698_v25 = vld [vmem:[%s14372_s26 + $0x188] sm:$0xff]  ;;  %v2700_v26 = vld [vmem:[%s14372_s26 + $0x198] sm:$0xff] }
 0x243   : > { %8678 = vmatprep.subr.bf16.mxu0 %v8677_v31  ;;  %v8777_v31 = vpack.c.bf16 %v2660_v27, %v2658_v23  ;;  %v2697_v23 = vld [vmem:[%s14372_s26 + $0x180] sm:$0xff]  ;;  %v8817_v27 = vpack.c.bf16 %v2700_v26, %v2698_v25  ;;  %v2728_v25 = vld [vmem:[%s14372_s26 + $0x278] sm:$0xff] }
 0x245   : > { %7692 = vmatmul.mubr.msk.f32.gmra.mrb[6].mxu0 %vm864_vm0, %v11758_v37 }
 0x246   : > { %1793 = vmatprep.mubr.f32.mxu0 %v11085_v0  ;;  %8680 = vmatpush1.bf16.msra.mxu0 %v8679_v33  ;;  %v2662_v33 = vld [vmem:[%s14372_s26 + $0x68] sm:$0xff] }
 0x249   : > { %7693 = vmatmul.mubr.msk.f32.gmra.mrb[8].mxu0 %vm864_vm0, %v11763_v38 }
 0x24a   : > { %1799 = vmatprep.mubr.f32.mxu0 %v11085_v0 }
 0x24d   : > { %7694 = vmatmul.mubr.msk.f32.gmra.mrb[10].mxu0 %vm864_vm0, %v11771_v48 }
 0x24e   : > { %1805 = vmatprep.mubr.f32.mxu0 %v11085_v0 }
 0x251   : > { %7695 = vmatmul.mubr.msk.f32.gmra.mrb[12].mxu0 %vm864_vm0, %v11776_v49 }
 0x252   : > { %1811 = vmatprep.mubr.f32.mxu0 %v11085_v0 }
 0x255   : > { %7696 = vmatmul.mubr.msk.f32.gmra.mrb[14].mxu0 %vm864_vm0, %v11784_v55 }
 0x256   : > { %2068 = vmatprep.mubr.f32.mxu0 %v11085_v0 }
 0x259   : > { %7705 = vmatmul.mubr.msk.f32.vlgmr.msra.gmra.mrb[0].mxu0 %vm864_vm0, %v11789_v58 }
 0x25a   : > { %2074 = vmatprep.mubr.f32.mxu0 %v11085_v0 }
 0x25d   : > { %7706 = vmatmul.mubr.msk.f32.gmra.mrb[2].mxu0 %vm864_vm0, %v11797_v63 }
 0x25e   : > { %2080 = vmatprep.mubr.f32.mxu0 %v11085_v0 }
 0x261   : > { %7707 = vmatmul.mubr.msk.f32.gmra.mrb[4].mxu0 %vm864_vm0, %v11802_v3 }
 0x262   : > { %2086 = vmatprep.mubr.f32.mxu0 %v11085_v0 }
 0x265   : > { %7708 = vmatmul.mubr.msk.f32.gmra.mrb[6].mxu0 %vm864_vm0, %v11810_v6  ;;  %v2246_v6 = vld [vmem:[#allocation10] sm:$0xff] }
 0x266   : > { %2092 = vmatprep.mubr.f32.mxu0 %v11085_v0 }
 0x269   : > { %7709 = vmatmul.mubr.msk.f32.gmra.mrb[8].mxu0 %vm864_vm0, %v11815_v7  ;;  %v2247_v7 = vld [vmem:[#allocation10 + $0x8] sm:$0xff] }
 0x26a   : > { %2098 = vmatprep.mubr.f32.mxu0 %v11085_v0 }
 0x26d   : > { %7710 = vmatmul.mubr.msk.f32.gmra.mrb[10].mxu0 %vm864_vm0, %v11823_v8  ;;  %v2248_v8 = vld [vmem:[#allocation10 + $0x10] sm:$0xff] }
 0x26e   : > { %2104 = vmatprep.mubr.f32.mxu0 %v11085_v0 }
 0x271   : > { %7711 = vmatmul.mubr.msk.f32.gmra.mrb[12].mxu0 %vm864_vm0, %v11828_v9  ;;  %v2249_v9 = vld [vmem:[#allocation10 + $0x18] sm:$0x3f] }
 0x272   : > { %2110 = vmatprep.mubr.f32.mxu0 %v11085_v0 }
 0x275   : > { %7712 = vmatmul.mubr.msk.f32.gmra.mrb[14].mxu0 %vm864_vm0, %v11836_v10  ;;  %v2447_v10 = vld [vmem:[#allocation12] sm:$0xff]  ;;  %vm5764_vm0 = vcmask 651264  }
 0x2f3   : > { %v8425_v28 = vpop.f32.mrb[0].mxu1 }
 0x2f4   : > { %v2183_v29 = vpop.f32.mrb[1].mxu1 }
 0x2f5   : > { %v11897_v34 = vpack.c.bf16 %v8425_v28, %v2183_v29  ;;  %v2664_v28 = vld [vmem:[%s14372_s26 + $0x78] sm:$0xff]  ;;  %v8779_v29 = vpack.c.bf16 %v2659_v32, %v2657_v24 }
 0x2f6   : > { %v2704_v24 = vld [vmem:[%s14372_s26 + $0x1b8] sm:$0xff] }
 0x2f7   : > { %v8428_v35 = vpop.f32.mrb[2].mxu1 }
 0x2f8   : > { %v2193_v36 = vpop.f32.mrb[3].mxu1 }
 0x2f9   : > { %v11899_v37 = vpack.c.bf16 %v8428_v35, %v2193_v36  ;;  %v2661_v35 = vld [vmem:[%s14372_s26 + $0x60] sm:$0xff]  ;;  %v2663_v36 = vld [vmem:[%s14372_s26 + $0x70] sm:$0xff] }
 0x2fb   : > { %v8431_v38 = vpop.f32.mrb[4].mxu1 }
 0x2fc   : > { %v2203_v39 = vpop.f32.mrb[5].mxu1 }
 0x2fd   : > { %v11901_v40 = vpack.c.bf16 %v8431_v38, %v2203_v39  ;;  %v2668_v38 = vld [vmem:[%s14372_s26 + $0x98] sm:$0xff]  ;;  %v8783_v39 = vpack.c.bf16 %v2663_v36, %v2661_v35  ;;  %v2706_v35 = vld [vmem:[%s14372_s26 + $0x1c8] sm:$0xff] }
 0x2fe   : > { %v2708_v36 = vld [vmem:[%s14372_s26 + $0x1d8] sm:$0xff] }
 0x2ff   : > { %v8434_v41 = vpop.f32.mrb[6].mxu1 }
 0x300   : > { %v2213_v42 = vpop.f32.mrb[7].mxu1 }
 0x301   : > { %v11903_v43 = vpack.c.bf16 %v8434_v41, %v2213_v42  ;;  %v2665_v41 = vld [vmem:[%s14372_s26 + $0x80] sm:$0xff]  ;;  %v2667_v42 = vld [vmem:[%s14372_s26 + $0x90] sm:$0xff] }
 0x32c   : > { %v2070_v44 = vpop.f32.mrb[0].mxu0 }
 0x32d   : > { %v2072_v45 = vpop.f32.mrb[1].mxu0 }
 0x330   : > { %v2076_v46 = vpop.f32.mrb[2].mxu0 }
 0x331   : > { %v8699_v47 = vpack.c.bf16 %v2076_v46, %v2070_v44  ;;  %v2078_v48 = vpop.f32.mrb[3].mxu0  ;;  %v2672_v44 = vld [vmem:[%s14372_s26 + $0xb8] sm:$0xff] }
 0x332   : > { %v8697_v49 = vpack.c.bf16 %v2078_v48, %v2072_v45  ;;  %v8787_v45 = vpack.c.bf16 %v2667_v42, %v2665_v41  ;;  %v2671_v48 = vld [vmem:[%s14372_s26 + $0xb0] sm:$0xff]  ;;  %v2710_v41 = vld [vmem:[%s14372_s26 + $0x1e8] sm:$0xff]  ;;  %v2712_v42 = vld [vmem:[%s14372_s26 + $0x1f8] sm:$0xff] }
 0x334   : > { %v2082_v50 = vpop.f32.mrb[4].mxu0  ;;  %8698 = vmatprep.subr.bf16.mxu1 %v8697_v49 }
 0x335   : > { %v2084_v51 = vpop.f32.mrb[5].mxu0  ;;  %8700 = vmatpush1.bf16.msra.mxu1 %v8699_v47 }
 0x338   : > { %v2088_v52 = vpop.f32.mrb[6].mxu0 }
 0x339   : > { %v8703_v53 = vpack.c.bf16 %v2088_v52, %v2082_v50  ;;  %v2090_v54 = vpop.f32.mrb[7].mxu0  ;;  %v2676_v50 = vld [vmem:[%s14372_s26 + $0xd8] sm:$0xff] }
 0x33a   : > { %v8701_v55 = vpack.c.bf16 %v2090_v54, %v2084_v51  ;;  %v2675_v54 = vld [vmem:[%s14372_s26 + $0xd0] sm:$0xff] }
 0x33c   : > { %v2094_v56 = vpop.f32.mrb[8].mxu0  ;;  %8702 = vmatprep.subr.bf16.mxu1 %v8701_v55 }
 0x33d   : > { %v2096_v57 = vpop.f32.mrb[9].mxu0  ;;  %8704 = vmatpush1.bf16.msra.mxu1 %v8703_v53 }
 0x340   : > { %v2100_v58 = vpop.f32.mrb[10].mxu0 }
 0x341   : > { %v8707_v59 = vpack.c.bf16 %v2100_v58, %v2094_v56  ;;  %v2102_v60 = vpop.f32.mrb[11].mxu0  ;;  %v2678_v56 = vld [vmem:[%s14372_s26 + $0xe8] sm:$0xff] }
 0x342   : > { %v8705_v61 = vpack.c.bf16 %v2102_v60, %v2096_v57  ;;  %v2680_v57 = vld [vmem:[%s14372_s26 + $0xf8] sm:$0xff]  ;;  %v2679_v60 = vld [vmem:[%s14372_s26 + $0xf0] sm:$0xff] }
 0x343   : > { %v8797_v58 = vpack.c.bf16 %v2680_v57, %v2678_v56 }
 0x344   : > { %v2106_v62 = vpop.f32.mrb[12].mxu0  ;;  %8706 = vmatprep.subr.bf16.mxu1 %v8705_v61 }
 0x345   : > { %v2108_v63 = vpop.f32.mrb[13].mxu0  ;;  %8708 = vmatpush1.bf16.msra.mxu1 %v8707_v59 }
 0x348   : > { %v2112_v1 = vpop.f32.mrb[14].mxu0 }
 0x349   : > { %v8712_v2 = vpack.c.bf16 %v2112_v1, %v2106_v62  ;;  %v2114_v3 = vpop.f32.mrb[15].mxu0  ;;  %v2682_v62 = vld [vmem:[%s14372_s26 + $0x108] sm:$0xff] }
 0x34a   : > { %v8709_v5 = vpack.c.bf16 %v2114_v3, %v2108_v63  ;;  %v2684_v63 = vld [vmem:[%s14372_s26 + $0x118] sm:$0xff]  ;;  %v2683_v3 = vld [vmem:[%s14372_s26 + $0x110] sm:$0xff] }
 0x34b   : > { %v8801_v1 = vpack.c.bf16 %v2684_v63, %v2682_v62  ;;  %v2713_v62 = vld [vmem:[%s14372_s26 + $0x200] sm:$0xff]  ;;  %v2715_v63 = vld [vmem:[%s14372_s26 + $0x210] sm:$0xff] }
 0x34c   : > { %8711 = vmatprep.subr.msk.bf16.mxu1 %vm11907_vm3, %v8709_v5 }
 0x34d   : > { %8714 = vmatpush1.bf16.msk.msra.mxu1 %vm11907_vm3, %v8712_v2 }
 0x34e   : > { %8716 = vmatprep.subr.bf16.mxu1 %v11897_v34 }
 0x350   : > { %7723 = vmatmul.mubr.msk.f32.vlgmr.msra.gmra.mrb[8].mxu1 %vm2250_vm4, %v2246_v6 }
 0x351   : > { %8718 = vmatpush3.bf16.msra.mxu1 %v11897_v34  ;;  %2343 = vmatprep.mubr.f32.mxu1 %v11085_v0 }
 0x352   : > { %8720 = vmatprep.subr.bf16.mxu1 %v11899_v37 }
 0x354   : > { %7724 = vmatmul.mubr.msk.f32.gmra.mrb[10].mxu1 %vm2250_vm4, %v2247_v7 }
 0x355   : > { %8722 = vmatpush3.bf16.msra.mxu1 %v11899_v37  ;;  %2349 = vmatprep.mubr.f32.mxu1 %v11085_v0 }
 0x356   : > { %8724 = vmatprep.subr.bf16.mxu1 %v11901_v40 }
 0x358   : > { %7725 = vmatmul.mubr.msk.f32.gmra.mrb[12].mxu1 %vm2250_vm4, %v2248_v8 }
 0x359   : > { %8726 = vmatpush3.bf16.msra.mxu1 %v11901_v40  ;;  %2355 = vmatprep.mubr.f32.mxu1 %v11085_v0 }
 0x35a   : > { %8729 = vmatprep.subr.msk.bf16.mxu1 %vm11907_vm3, %v11903_v43 }
 0x35c   : > { %7726 = vmatmul.mubr.msk.f32.gmra.mrb[14].mxu1 %vm2250_vm4, %v2249_v9 }
 0x35d   : > { %8732 = vmatpush3.bf16.msk.msra.mxu1 %vm11907_vm3, %v11903_v43  ;;  %8451 = vmatprep.mubr.msk.f32.mxu1 %vm2250_vm4, %v2246_v6  ;;  %v2688_v6 = vld [vmem:[%s14372_s26 + $0x138] sm:$0xff] }
 0x35e   : > { %8734 = vmatprep.subr.bf16.mxu1 %v8697_v49  ;;  %v2674_v49 = vld [vmem:[%s14372_s26 + $0xc8] sm:$0xff] }
 0x35f   : > { %v8793_v52 = vpack.c.bf16 %v2676_v50, %v2674_v49 }
 0x360   : > { %8452 = vmatmul.mubr.msk.f32.vlgmr.msra.gmra.mrb[16].mxu1 %vm2250_vm4, %v2247_v7 }
 0x361   : > { %8736 = vmatpush1.bf16.msra.mxu1 %v8699_v47  ;;  %8454 = vmatprep.mubr.msk.f32.mxu1 %vm2250_vm4, %v2248_v8  ;;  %v2669_v47 = vld [vmem:[%s14372_s26 + $0xa0] sm:$0xff] }
 0x362   : > { %8738 = vmatprep.subr.bf16.mxu1 %v8701_v55  ;;  %v8791_v51 = vpack.c.bf16 %v2671_v48, %v2669_v47  ;;  %v2685_v8 = vld [vmem:[%s14372_s26 + $0x120] sm:$0xff]  ;;  %v2714_v47 = vld [vmem:[%s14372_s26 + $0x208] sm:$0xff]  ;;  %v2716_v48 = vld [vmem:[%s14372_s26 + $0x218] sm:$0xff] }
 0x363   : > { %v8833_v49 = vpack.c.bf16 %v2716_v48, %v2714_v47 }
 0x364   : > { %8455 = vmatmul.mubr.msk.f32.gmra.mrb[18].mxu1 %vm2250_vm4, %v2249_v9  ;;  %v2687_v9 = vld [vmem:[%s14372_s26 + $0x130] sm:$0xff] }
 0x365   : > { %8740 = vmatpush1.bf16.msra.mxu1 %v8703_v53  ;;  %2527 = vmatprep.mubr.f32.mxu1 %v11085_v0  ;;  %v2673_v53 = vld [vmem:[%s14372_s26 + $0xc0] sm:$0xff] }
 0x366   : > { %8742 = vmatprep.subr.bf16.mxu1 %v8705_v61  ;;  %v8795_v55 = vpack.c.bf16 %v2675_v54, %v2673_v53 }
 0x369   : > { %8744 = vmatpush1.bf16.msra.mxu1 %v8707_v59  ;;  %v2677_v59 = vld [vmem:[%s14372_s26 + $0xe0] sm:$0xff] }
 0x36a   : > { %8747 = vmatprep.subr.msk.bf16.mxu1 %vm11907_vm3, %v8709_v5  ;;  %v8799_v61 = vpack.c.bf16 %v2679_v60, %v2677_v59  ;;  %v2686_v5 = vld [vmem:[%s14372_s26 + $0x128] sm:$0xff] }
 0x36b   : > { %v8805_v7 = vpack.c.bf16 %v2688_v6, %v2686_v5 }
 0x36d   : > { %8750 = vmatpush1.bf16.msk.msra.mxu1 %vm11907_vm3, %v8712_v2  ;;  %v2681_v2 = vld [vmem:[%s14372_s26 + $0x100] sm:$0xff] }
 0x36e   : > { %8752 = vmatprep.subr.bf16.mxu1 %v11897_v34  ;;  %v8803_v4 = vpack.c.bf16 %v2683_v3, %v2681_v2  ;;  %v2718_v2 = vld [vmem:[%s14372_s26 + $0x228] sm:$0xff]  ;;  %v2720_v3 = vld [vmem:[%s14372_s26 + $0x238] sm:$0xff] }
 0x370   : > { %7734 = vmatmul.mubr.msk.f32.vlgmr.msra.gmra.mrb[20].mxu1 %vm2250_vm4, %v2447_v10 }
 0x371   : > { %8754 = vmatpush3.bf16.msra.mxu1 %v11897_v34  ;;  %2533 = vmatprep.mubr.f32.mxu1 %v11085_v0  ;;  %v8781_v34 = vpack.c.bf16 %v2664_v28, %v2662_v33  ;;  %v2701_v28 = vld [vmem:[%s14372_s26 + $0x1a0] sm:$0xff] }
 0x372   : > { %8756 = vmatprep.subr.bf16.mxu1 %v11899_v37 }
 0x374   : > { %7735 = vmatmul.mubr.msk.f32.gmra.mrb[22].mxu1 %vm2250_vm4, %v2448_v11 }
 0x375   : > { %8758 = vmatpush3.bf16.msra.mxu1 %v11899_v37  ;;  %2539 = vmatprep.mubr.f32.mxu1 %v11085_v0  ;;  %v2666_v37 = vld [vmem:[%s14372_s26 + $0x88] sm:$0xff] }
 0x376   : > { %8760 = vmatprep.subr.bf16.mxu1 %v11901_v40 }
 0x378   : > { %7736 = vmatmul.mubr.msk.f32.gmra.mrb[24].mxu1 %vm2250_vm4, %v2449_v12 }
 0x379   : > { %8762 = vmatpush3.bf16.msra.mxu1 %v11901_v40  ;;  %2545 = vmatprep.mubr.f32.mxu1 %v11085_v0  ;;  %v8785_v40 = vpack.c.bf16 %v2668_v38, %v2666_v37  ;;  %v8825_v37 = vpack.c.bf16 %v2708_v36, %v2706_v35  ;;  %v2705_v38 = vld [vmem:[%s14372_s26 + $0x1c0] sm:$0xff] }
 0x37a   : > { %8765 = vmatprep.subr.msk.bf16.mxu1 %vm11907_vm3, %v11903_v43 }
 0x37c   : > { %7737 = vmatmul.mubr.msk.f32.gmra.mrb[26].mxu1 %vm2250_vm4, %v2450_v15 }
 0x37d   : > { %8768 = vmatpush3.bf16.msk.msra.mxu1 %vm11907_vm3, %v11903_v43  ;;  %8473 = vmatprep.mubr.msk.f32.mxu1 %vm2250_vm4, %v2447_v10  ;;  %v2670_v43 = vld [vmem:[%s14372_s26 + $0xa8] sm:$0xff]  ;;  %v8807_v10 = vpack.c.bf16 %v2687_v9, %v2685_v8  ;;  %v8837_v8 = vpack.c.bf16 %v2720_v3, %v2718_v2  ;;  %v2717_v9 = vld [vmem:[%s14372_s26 + $0x220] sm:$0xff]  ;;  %vm7238_vm3 = vcmask 982016  }
 0x37e   : > { %8770 = vmatprep.subr.bf16.mxu1 %v8769_v16  ;;  %v8789_v46 = vpack.c.bf16 %v2672_v44, %v2670_v43  ;;  %v8829_v43 = vpack.c.bf16 %v2712_v42, %v2710_v41  ;;  %v2709_v44 = vld [vmem:[%s14372_s26 + $0x1e0] sm:$0xff]  ;;  %v2734_v42 = vld [vmem:[%s14372_s26 + $0x2a8] sm:$0xff] }
 0x380   : > { %8474 = vmatmul.mubr.msk.f32.vlgmr.msra.gmra.mrb[28].mxu1 %vm2250_vm4, %v2448_v11  ;;  %v2690_v11 = vld [vmem:[%s14372_s26 + $0x148] sm:$0xff] }
 0x381   : > { %8476 = vmatprep.mubr.msk.f32.mxu1 %vm2250_vm4, %v2449_v12  ;;  %8772 = vmatpush1.bf16.msra.mxu1 %v8771_v19  ;;  %v2692_v12 = vld [vmem:[%s14372_s26 + $0x158] sm:$0xff]  ;;  %v2695_v19 = vld [vmem:[%s14372_s26 + $0x170] sm:$0xff] }
 0x382   : > { %8774 = vmatprep.subr.bf16.mxu1 %v8773_v22  ;;  %v8809_v13 = vpack.c.bf16 %v2692_v12, %v2690_v11  ;;  %v8815_v22 = vpack.c.bf16 %v2695_v19, %v2693_v21  ;;  %v2722_v12 = vld [vmem:[%s14372_s26 + $0x248] sm:$0xff]  ;;  %v2723_v21 = vld [vmem:[%s14372_s26 + $0x250] sm:$0xff] }
 0x384   : > { %8477 = vmatmul.mubr.msk.f32.gmra.mrb[30].mxu1 %vm2250_vm4, %v2450_v15  ;;  %v2691_v15 = vld [vmem:[%s14372_s26 + $0x150] sm:$0xff]  ;;  %vm7325_vm4 = vcmask 687104  }
 0x385   : > { %8776 = vmatpush1.bf16.msra.mxu1 %v8775_v30  ;;  %v8811_v16 = vpack.c.bf16 %v2691_v15, %v2689_v14  ;;  %v2699_v30 = vld [vmem:[%s14372_s26 + $0x190] sm:$0xff] }
 0x386   : > { %8778 = vmatprep.subr.bf16.mxu1 %v8777_v31  ;;  %v2702_v31 = vld [vmem:[%s14372_s26 + $0x1a8] sm:$0xff]  ;;  %v8819_v32 = vpack.c.bf16 %v2699_v30, %v2697_v23 }
 0x387   : > { %v8821_v33 = vpack.c.bf16 %v2704_v24, %v2702_v31  ;;  %v2725_v24 = vld [vmem:[%s14372_s26 + $0x260] sm:$0xff] }
 0x389   : > { %8780 = vmatpush1.bf16.msra.mxu1 %v8779_v29  ;;  %v2703_v29 = vld [vmem:[%s14372_s26 + $0x1b0] sm:$0xff] }
 0x38a   : > { %8782 = vmatprep.subr.bf16.mxu1 %v8781_v34  ;;  %v8823_v34 = vpack.c.bf16 %v2703_v29, %v2701_v28  ;;  %v2730_v28 = vld [vmem:[%s14372_s26 + $0x288] sm:$0xff]  ;;  %v2732_v29 = vld [vmem:[%s14372_s26 + $0x298] sm:$0xff] }
 0x38d   : > { %8784 = vmatpush1.bf16.msra.mxu1 %v8783_v39  ;;  %v2707_v39 = vld [vmem:[%s14372_s26 + $0x1d0] sm:$0xff] }
 0x38e   : > { %8786 = vmatprep.subr.bf16.mxu1 %v8785_v40  ;;  %v8827_v40 = vpack.c.bf16 %v2707_v39, %v2705_v38  ;;  %v8849_v38 = vpack.c.bf16 %v2732_v29, %v2730_v28  ;;  %v2729_v39 = vld [vmem:[%s14372_s26 + $0x280] sm:$0xff] }
 0x391   : > { %8788 = vmatpush1.bf16.msra.mxu1 %v8787_v45  ;;  %v2711_v45 = vld [vmem:[%s14372_s26 + $0x1f0] sm:$0xff] }
 0x392   : > { %8790 = vmatprep.subr.bf16.mxu1 %v8789_v46  ;;  %v8831_v46 = vpack.c.bf16 %v2711_v45, %v2709_v44 }
 0x395   : > { %8792 = vmatpush1.bf16.msra.mxu1 %v8791_v51 }
 0x396   : > { %8794 = vmatprep.subr.bf16.mxu1 %v8793_v52 }
 0x399   : > { %8796 = vmatpush1.bf16.msra.mxu1 %v8795_v55 }
 0x39a   : > { %8798 = vmatprep.subr.bf16.mxu1 %v8797_v58 }
 0x39d   : > { %8800 = vmatpush1.bf16.msra.mxu1 %v8799_v61 }
 0x39e   : > { %8802 = vmatprep.subr.bf16.mxu1 %v8801_v1 }
 0x3a1   : > { %8804 = vmatpush1.bf16.msra.mxu1 %v8803_v4 }
 0x3a2   : > { %8806 = vmatprep.subr.bf16.mxu1 %v8805_v7  ;;  %v8835_v7 = vpack.c.bf16 %v2715_v63, %v2713_v62  ;;  %v2937_v62 = vld [vmem:[%s14374_s25 + $0x38] sm:$0xff]  ;;  %v2737_v63 = vld [vmem:[%s14372_s26 + $0x2c0] sm:$0xff] }
 0x3a5   : > { %8808 = vmatpush1.bf16.msra.mxu1 %v8807_v10  ;;  %v2719_v10 = vld [vmem:[%s14372_s26 + $0x230] sm:$0xff] }
 0x3a6   : > { %8810 = vmatprep.subr.bf16.mxu1 %v8809_v13  ;;  %v2724_v13 = vld [vmem:[%s14372_s26 + $0x258] sm:$0xff]  ;;  %v8839_v17 = vpack.c.bf16 %v2719_v10, %v2717_v9 }
 0x3a7   : > { %v8841_v18 = vpack.c.bf16 %v2724_v13, %v2722_v12  ;;  %v2941_v9 = vld [vmem:[%s14374_s25 + $0x58] sm:$0xff]  ;;  %v2938_v12 = vld [vmem:[%s14374_s25 + $0x40] sm:$0xff]  ;;  %v2940_v13 = vld [vmem:[%s14374_s25 + $0x50] sm:$0xff] }
 0x3a9   : > { %8812 = vmatpush1.bf16.msra.mxu1 %v8811_v16 }
 0x3aa   : > { %8814 = vmatprep.subr.bf16.mxu1 %v8813_v20  ;;  %v2721_v20 = vld [vmem:[%s14372_s26 + $0x240] sm:$0xff] }
 0x3ab   : > { %v8843_v30 = vpack.c.bf16 %v2723_v21, %v2721_v20  ;;  %v2942_v21 = vld [vmem:[%s14374_s25 + $0x60] sm:$0xff] }
 0x3ad   : > { %8816 = vmatpush1.bf16.msra.mxu1 %v8815_v22  ;;  %v2726_v22 = vld [vmem:[%s14372_s26 + $0x268] sm:$0xff] }
 0x3ae   : > { %8818 = vmatprep.subr.bf16.mxu1 %v8817_v27  ;;  %v8845_v31 = vpack.c.bf16 %v2728_v25, %v2726_v22  ;;  %v2947_v22 = vld [vmem:[%s14374_s25 + $0x88] sm:$0xff]  ;;  %v2949_v25 = vld [vmem:[%s14374_s25 + $0x98] sm:$0xff] }
 0x3b1   : > { %8820 = vmatpush1.bf16.msra.mxu1 %v8819_v32  ;;  %v2727_v32 = vld [vmem:[%s14372_s26 + $0x270] sm:$0xff] }
 0x3b2   : > { %8822 = vmatprep.subr.bf16.mxu1 %v8821_v33 }
 0x3b5   : > { %8824 = vmatpush1.bf16.msra.mxu1 %v8823_v34 }
 0x3b6   : > { %8826 = vmatprep.subr.bf16.mxu1 %v8825_v37  ;;  %v8847_v37 = vpack.c.bf16 %v2727_v32, %v2725_v24  ;;  %v2948_v24 = vld [vmem:[%s14374_s25 + $0x90] sm:$0xff]  ;;  %v2951_v32 = vld [vmem:[%s14374_s25 + $0xa8] sm:$0xff] }
 0x3b9   : > { %8828 = vmatpush1.bf16.msra.mxu1 %v8827_v40  ;;  %v2731_v40 = vld [vmem:[%s14372_s26 + $0x290] sm:$0xff] }
 0x3ba   : > { %8830 = vmatprep.subr.bf16.mxu1 %v8829_v43  ;;  %v2736_v43 = vld [vmem:[%s14372_s26 + $0x2b8] sm:$0xff]  ;;  %v8851_v47 = vpack.c.bf16 %v2731_v40, %v2729_v39 }
 0x3bb   : > { %v8853_v48 = vpack.c.bf16 %v2736_v43, %v2734_v42  ;;  %v2957_v39 = vld [vmem:[%s14374_s25 + $0xd8] sm:$0xff]  ;;  %v2956_v42 = vld [vmem:[%s14374_s25 + $0xd0] sm:$0xff]  ;;  %v2959_v43 = vld [vmem:[%s14374_s25 + $0xe8] sm:$0xff] }
 0x3bd   : > { %8832 = vmatpush1.bf16.msra.mxu1 %v8831_v46 }
 0x3be   : > { %8834 = vmatprep.subr.bf16.mxu1 %v8833_v49  ;;  %v2733_v49 = vld [vmem:[%s14372_s26 + $0x2a0] sm:$0xff] }
 0x423   : > { %v2339_v50 = vpop.f32.mrb[8].mxu1 }
 0x424   : > { %v2341_v51 = vpop.f32.mrb[9].mxu1 }
 0x427   : > { %v2345_v52 = vpop.f32.mrb[10].mxu1 }
 0x428   : > { %v2347_v53 = vpop.f32.mrb[11].mxu1 }
 0x42b   : > { %v2351_v54 = vpop.f32.mrb[12].mxu1 }
 0x42c   : > { %v2353_v55 = vpop.f32.mrb[13].mxu1 }
 0x42f   : > { %v2357_v56 = vpop.f32.mrb[14].mxu1 }
 0x430   : > { %v2359_v57 = vpop.f32.mrb[15].mxu1 }
 0x433   : > { %v8453_v58 = vpop.f32.mrb[16].mxu1 }
 0x434   : > { %v12164_v59 = vpop.f32.mrb[17].mxu1 }
 0x437   : > { %v12166_v60 = vpop.f32.mrb[18].mxu1 }
 0x438   : > { %v12168_v61 = vpop.f32.mrb[19].mxu1 }
 0x443   : > { %v2529_v1 = vpop.f32.mrb[20].mxu1 }
 0x444   : > { %v12182_v4 = vmax.f32 %v2339_v50, %v2529_v1  ;;  %v2531_v5 = vpop.f32.mrb[21].mxu1  ;;  %v2735_v50 = vld [vmem:[%s14372_s26 + $0x2b0] sm:$0xff] }
 0x445   : > { %v12184_v6 = vmax.f32 %v2341_v51, %v2531_v5  ;;  %v2934_v5 = vld [vmem:[%s14374_s25 + $0x20] sm:$0xff] }
 0x447   : > { %v2535_v11 = vpop.f32.mrb[22].mxu1  ;;  %2816 = vmatprep.mubr.f32.mxu1 %v12184_v6 }
 0x448   : > { %v12199_v14 = vmax.f32 %v2345_v52, %v2535_v11  ;;  %v2537_v15 = vpop.f32.mrb[23].mxu1  ;;  %2817 = vmatmul.mubr.f32.vlgmr.msra.gmra.mrb[32].mxu1 %v12182_v4 }
 0x449   : > { %v12202_v16 = vmax.f32 %v2347_v53, %v2537_v15  ;;  %8836 = vmatpush1.bf16.msra.mxu1 %v8835_v7  ;;  %v2936_v7 = vld [vmem:[%s14374_s25 + $0x30] sm:$0xff]  ;;  %v2943_v15 = vld [vmem:[%s14374_s25 + $0x68] sm:$0xff] }
 0x44a   : > { %8838 = vmatprep.subr.bf16.mxu1 %v8837_v8  ;;  %v2939_v8 = vld [vmem:[%s14374_s25 + $0x48] sm:$0xff]  ;;  %v8863_v10 = vpack.c.bf16 %v2936_v7, %v2934_v5 }
 0x44b   : > { %v2541_v19 = vpop.f32.mrb[24].mxu1  ;;  %2822 = vmatprep.mubr.f32.mxu1 %v12202_v16  ;;  %v8865_v11 = vpack.c.bf16 %v2941_v9, %v2939_v8  ;;  %v2970_v8 = vld [vmem:[%s14374_s25 + $0x140] sm:$0xff]  ;;  %v2972_v9 = vld [vmem:[%s14374_s25 + $0x150] sm:$0xff] }
 0x44c   : > { %v12217_v26 = vmax.f32 %v2351_v54, %v2541_v19  ;;  %v2543_v23 = vpop.f32.mrb[25].mxu1  ;;  %2823 = vmatmul.mubr.f32.gmra.mrb[34].mxu1 %v12199_v14  ;;  %v2944_v19 = vld [vmem:[%s14374_s25 + $0x70] sm:$0xff] }
 0x44d   : > { %v12220_v27 = vmax.f32 %v2353_v55, %v2543_v23  ;;  %8840 = vmatpush1.bf16.msra.mxu1 %v8839_v17  ;;  %v8855_v55 = vpack.c.bf16 %v2735_v50, %v2733_v49  ;;  %v2945_v17 = vld [vmem:[%s14374_s25 + $0x78] sm:$0xff]  ;;  %v8871_v23 = vpack.c.bf16 %v2944_v19, %v2942_v21  ;;  %v2958_v49 = vld [vmem:[%s14374_s25 + $0xe0] sm:$0xff]  ;;  %v2960_v50 = vld [vmem:[%s14374_s25 + $0xf0] sm:$0xff] }
 0x44e   : > { %8842 = vmatprep.subr.bf16.mxu1 %v8841_v18  ;;  %v8867_v18 = vpack.c.bf16 %v2940_v13, %v2938_v12  ;;  %v8869_v20 = vpack.c.bf16 %v2945_v17, %v2943_v15  ;;  %v8899_v12 = vpack.c.bf16 %v2972_v9, %v2970_v8  ;;  %v2974_v15 = vld [vmem:[%s14374_s25 + $0x160] sm:$0xff]  ;;  %v2976_v17 = vld [vmem:[%s14374_s25 + $0x170] sm:$0xff] }
 0x44f   : > { %v2547_v33 = vpop.f32.mrb[26].mxu1  ;;  %2828 = vmatprep.mubr.f32.mxu1 %v12220_v27  ;;  %v8903_v21 = vpack.c.bf16 %v2976_v17, %v2974_v15  ;;  %v3006_v8 = vld [vmem:[%s14374_s25 + $0x260] sm:$0xff]  ;;  %v3008_v9 = vld [vmem:[%s14374_s25 + $0x270] sm:$0xff]  ;;  %v3015_v15 = vld [vmem:[%s14374_s25 + $0x2a8] sm:$0xff] }
 0x450   : > { %v12235_v34 = vmax.f32 %v2357_v56, %v2547_v33  ;;  %v2549_v35 = vpop.f32.mrb[27].mxu1  ;;  %2829 = vmatmul.mubr.f32.gmra.mrb[36].mxu1 %v12217_v26  ;;  %v2738_v56 = vld [vmem:[%s14372_s26 + $0x2c8] sm:$0xff]  ;;  %v2953_v33 = vld [vmem:[%s14374_s25 + $0xb8] sm:$0xff] }
 0x451   : > { %v12238_v36 = vmax.f32 %v2359_v57, %v2549_v35  ;;  %8844 = vmatpush1.bf16.msra.mxu1 %v8843_v30  ;;  %v2931_v57 = vld [vmem:[%s14373_s0 + $0x8] sm:$0xff]  ;;  %v8873_v30 = vpack.c.bf16 %v2949_v25, %v2947_v22  ;;  %v8877_v29 = vpack.c.bf16 %v2953_v33, %v2951_v32  ;;  %v2950_v35 = vld [vmem:[%s14374_s25 + $0xa0] sm:$0xff]  ;;  %v2980_v25 = vld [vmem:[%s14374_s25 + $0x190] sm:$0xff]  ;;  %s7405_s0 = scalar_lea.sflag [#allocation6], %s11582_s7 }
 0x452   : > { %8846 = vmatprep.subr.bf16.mxu1 %v8845_v31  ;;  %v2946_v31 = vld [vmem:[%s14374_s25 + $0x80] sm:$0xff]  ;;  %v2984_v33 = vld [vmem:[%s14374_s25 + $0x1b0] sm:$0xff] }
 0x453   : > { %v8475_v41 = vpop.f32.mrb[28].mxu1  ;;  %2834 = vmatprep.mubr.f32.mxu1 %v12238_v36  ;;  %v8875_v28 = vpack.c.bf16 %v2948_v24, %v2946_v31  ;;  %v2978_v22 = vld [vmem:[%s14374_s25 + $0x180] sm:$0xff] }
 0x454   : > { %v12253_v44 = vmax.f32 %v8453_v58, %v8475_v41  ;;  %v2618_v45 = vpop.f32.mrb[29].mxu1  ;;  %2835 = vmatmul.mubr.f32.gmra.mrb[38].mxu1 %v12235_v34  ;;  %v2933_v58 = vld [vmem:[%s14374_s25 + $0x18] sm:$0xff]  ;;  %v2954_v41 = vld [vmem:[%s14374_s25 + $0xc0] sm:$0xff]  ;;  %v8907_v31 = vpack.c.bf16 %v2980_v25, %v2978_v22  ;;  %v3350_v22 = vld [vmem:[#allocation13 + $0x2e8] sm:$0xff] }
 0x455   : > { %v12257_v46 = vmax.f32 %v12164_v59, %v2618_v45  ;;  %8848 = vmatpush1.bf16.msra.mxu1 %v8847_v37  ;;  %2905 = vmatprep.mubr.f32.mxu1 %v11085_v0  ;;  %v2930_v59 = vld [vmem:[%s14374_s25] sm:$0xff]  ;;  %v8857_v1 = vpack.c.bf16 %v2933_v58, %v2931_v57  ;;  %v2952_v37 = vld [vmem:[%s14374_s25 + $0xb0] sm:$0xff]  ;;  %v2961_v45 = vld [vmem:[%s14374_s25 + $0xf8] sm:$0xff] }
 0x456   : > { %8850 = vmatprep.subr.bf16.mxu1 %v8849_v38  ;;  %v2955_v38 = vld [vmem:[%s14374_s25 + $0xc8] sm:$0xff]  ;;  %v2962_v57 = vld [vmem:[%s14374_s25 + $0x100] sm:$0xff]  ;;  %v2964_v58 = vld [vmem:[%s14374_s25 + $0x110] sm:$0xff] }
 0x457   : > { %v8478_v51 = vpop.f32.mrb[30].mxu1  ;;  %v8881_v40 = vpack.c.bf16 %v2957_v39, %v2955_v38  ;;  %v2982_v32 = vld [vmem:[%s14374_s25 + $0x1a0] sm:$0xff]  ;;  %v2988_v39 = vld [vmem:[%s14374_s25 + $0x1d0] sm:$0xff] }
 0x458   : > { %v12267_v52 = vmax.f32 %v12166_v60, %v8478_v51  ;;  %v2628_v53 = vpop.f32.mrb[31].mxu1  ;;  %v2932_v60 = vld [vmem:[%s14374_s25 + $0x10] sm:$0xff]  ;;  %v2963_v51 = vld [vmem:[%s14374_s25 + $0x108] sm:$0xff]  ;;  %v2986_v38 = vld [vmem:[%s14374_s25 + $0x1c0] sm:$0xff] }
 0x459   : > { %v12270_v54 = vmax.f32 %v12168_v61, %v2628_v53  ;;  %8852 = vmatpush1.bf16.msra.mxu1 %v8851_v47  ;;  %v2935_v61 = vld [vmem:[%s14374_s25 + $0x28] sm:$0xff]  ;;  %v8859_v2 = vpack.c.bf16 %v2932_v60, %v2930_v59  ;;  %v8883_v47 = vpack.c.bf16 %v2956_v42, %v2954_v41  ;;  %v2965_v53 = vld [vmem:[%s14374_s25 + $0x118] sm:$0xff]  ;;  %v8915_v41 = vpack.c.bf16 %v2988_v39, %v2986_v38 }
 0x45a   : > { %8854 = vmatprep.subr.bf16.mxu1 %v8853_v48  ;;  %v8861_v3 = vpack.c.bf16 %v2937_v62, %v2935_v61  ;;  %v8885_v48 = vpack.c.bf16 %v2961_v45, %v2959_v43  ;;  %v2967_v59 = vld [vmem:[%s14374_s25 + $0x128] sm:$0xff]  ;;  %v2969_v60 = vld [vmem:[%s14374_s25 + $0x138] sm:$0xff]  ;;  %v8891_v61 = vpack.c.bf16 %v2964_v58, %v2962_v57  ;;  %v2990_v43 = vld [vmem:[%s14374_s25 + $0x1e0] sm:$0xff] }
 0x45b   : > { %v8893_v62 = vpack.c.bf16 %v2969_v60, %v2967_v59  ;;  %v2992_v45 = vld [vmem:[%s14374_s25 + $0x1f0] sm:$0xff]  ;;  %v2998_v59 = vld [vmem:[%s14374_s25 + $0x220] sm:$0xff] }
 0x45c   : > { %v3000_v60 = vld [vmem:[%s14374_s25 + $0x230] sm:$0xff]  ;;  %v3360_v38 = vld [vmem:[#allocation13 + $0x338] sm:$0xff] }
 0x45d   : > { %8856 = vmatpush1.bf16.msra.mxu1 %v8855_v55  ;;  %v8887_v55 = vpack.c.bf16 %v2960_v50, %v2958_v49  ;;  %v8919_v49 = vpack.c.bf16 %v2992_v45, %v2990_v43  ;;  %v3354_v25 = vld [vmem:[#allocation13 + $0x308] sm:$0xff]  ;;  %v3364_v39 = vld [vmem:[#allocation13 + $0x358] sm:$0xff]  ;;  %v3359_v43 = vld [vmem:[#allocation13 + $0x330] sm:$0xff] }
 0x45e   : > { %2865 = vmatprep.subr.mxu1 %v2738_v56  ;;  %v8889_v56 = vpack.c.bf16 %v2965_v53, %v2963_v51  ;;  %v2994_v51 = vld [vmem:[%s14374_s25 + $0x200] sm:$0xff]  ;;  %v2996_v53 = vld [vmem:[%s14374_s25 + $0x210] sm:$0xff] }
 0x45f   : > { %v8923_v57 = vpack.c.bf16 %v2996_v53, %v2994_v51  ;;  %v3363_v45 = vld [vmem:[#allocation13 + $0x350] sm:$0xff]  ;;  %v3368_v51 = vld [vmem:[#allocation13 + $0x378] sm:$0xff] }
 0x460   : > { %v3372_v53 = vld [vmem:[#allocation13 + $0x398] sm:$0xff] }
 0x461   : > { %2866 = vmatpush1.msra.mxu1 %v2737_v63  ;;  %v2966_v63 = vld [vmem:[%s14374_s25 + $0x120] sm:$0xff] }
 0x462   : > { %7743 = vmatmul.mubr.msk.f32.vlgmr.msra.gmra.mrb[32].mxu1 %vm2739_vm5, %v12257_v46  ;;  %8858 = vmatprep.subr.bf16.mxu1 %v8857_v1  ;;  %v2968_v1 = vld [vmem:[%s14374_s25 + $0x130] sm:$0xff] }
 0x463   : > { %8860 = vmatpush1.bf16.msra.mxu1 %v8859_v2  ;;  %2911 = vmatprep.mubr.f32.mxu1 %v11085_v0  ;;  %v2971_v2 = vld [vmem:[%s14374_s25 + $0x148] sm:$0xff]  ;;  %v8895_v5 = vpack.c.bf16 %v2968_v1, %v2966_v63  ;;  %v8927_v63 = vpack.c.bf16 %v3000_v60, %v2998_v59  ;;  %v3371_v59 = vld [vmem:[#allocation13 + $0x390] sm:$0xff] }
 0x464   : > { %8862 = vmatprep.subr.bf16.mxu1 %v8861_v3  ;;  %v2973_v3 = vld [vmem:[%s14374_s25 + $0x158] sm:$0xff] }
 0x465   : > { %v8897_v7 = vpack.c.bf16 %v2973_v3, %v2971_v2  ;;  %v3002_v2 = vld [vmem:[%s14374_s25 + $0x240] sm:$0xff]  ;;  %v3004_v3 = vld [vmem:[%s14374_s25 + $0x250] sm:$0xff] }
 0x466   : > { %7744 = vmatmul.mubr.msk.f32.gmra.mrb[34].mxu1 %vm2739_vm5, %v12253_v44 }
 0x467   : > { %8864 = vmatpush1.bf16.msra.mxu1 %v8863_v10  ;;  %2917 = vmatprep.mubr.f32.mxu1 %v11085_v0  ;;  %v2975_v10 = vld [vmem:[%s14374_s25 + $0x168] sm:$0xff] }
 0x468   : > { %8866 = vmatprep.subr.bf16.mxu1 %v8865_v11  ;;  %v2977_v11 = vld [vmem:[%s14374_s25 + $0x178] sm:$0xff] }
 0x469   : > { %v8901_v13 = vpack.c.bf16 %v2977_v11, %v2975_v10  ;;  %v3011_v10 = vld [vmem:[%s14374_s25 + $0x288] sm:$0xff] }
 0x46a   : > { %7745 = vmatmul.mubr.msk.f32.gmra.mrb[36].mxu1 %vm2739_vm5, %v12270_v54 }
 0x46b   : > { %8868 = vmatpush1.bf16.msra.mxu1 %v8867_v18  ;;  %2923 = vmatprep.mubr.f32.mxu1 %v11085_v0  ;;  %v2979_v18 = vld [vmem:[%s14374_s25 + $0x188] sm:$0xff] }
 0x46c   : > { %8870 = vmatprep.subr.bf16.mxu1 %v8869_v20  ;;  %v2981_v20 = vld [vmem:[%s14374_s25 + $0x198] sm:$0xff] }
 0x46d   : > { %v8905_v19 = vpack.c.bf16 %v2981_v20, %v2979_v18  ;;  %v3014_v18 = vld [vmem:[%s14374_s25 + $0x2a0] sm:$0xff]  ;;  %v3016_v20 = vld [vmem:[%s14374_s25 + $0x2b0] sm:$0xff] }
 0x46e   : > { %7746 = vmatmul.mubr.msk.f32.gmra.mrb[38].mxu1 %vm2739_vm5, %v12267_v52 }
 0x46f   : > { %8872 = vmatpush1.bf16.msra.mxu1 %v8871_v23  ;;  %3084 = vmatprep.mubr.f32.mxu1 %v12184_v6  ;;  %v8879_v6 = vpack.c.bf16 %v2952_v37, %v2950_v35  ;;  %v2983_v23 = vld [vmem:[%s14374_s25 + $0x1a8] sm:$0xff]  ;;  %v8911_v35 = vpack.c.bf16 %v2984_v33, %v2982_v32 }
 0x470   : > { %8874 = vmatprep.subr.bf16.mxu1 %v8873_v30  ;;  %v2985_v30 = vld [vmem:[%s14374_s25 + $0x1b8] sm:$0xff]  ;;  %v3353_v32 = vld [vmem:[#allocation13 + $0x300] sm:$0xff] }
 0x471   : > { %v8909_v24 = vpack.c.bf16 %v2985_v30, %v2983_v23  ;;  %v3352_v23 = vld [vmem:[#allocation13 + $0x2f8] sm:$0xff]  ;;  %v8945_v30 = vpack.c.bf16 %v3354_v25, %v3350_v22 }
 0x473   : > { %8876 = vmatpush1.bf16.msra.mxu1 %v8875_v28  ;;  %v2987_v28 = vld [vmem:[%s14374_s25 + $0x1c8] sm:$0xff]  ;;  %8946 = vmatprep.subr.bf16.mxu0 %v8945_v30 }
 0x474   : > { %8878 = vmatprep.subr.bf16.mxu1 %v8877_v29  ;;  %v2989_v29 = vld [vmem:[%s14374_s25 + $0x1d8] sm:$0xff]  ;;  %v3393_v30 = vld [vmem:[#allocation13 + $0x440] sm:$0xff] }
 0x475   : > { %v8913_v37 = vpack.c.bf16 %v2989_v29, %v2987_v28  ;;  %v3355_v29 = vld [vmem:[#allocation13 + $0x310] sm:$0xff] }
 0x477   : > { %8880 = vmatpush1.bf16.msra.mxu1 %v8879_v6  ;;  %v2991_v6 = vld [vmem:[%s14374_s25 + $0x1e8] sm:$0xff] }
 0x478   : > { %8882 = vmatprep.subr.bf16.mxu1 %v8881_v40  ;;  %v2993_v40 = vld [vmem:[%s14374_s25 + $0x1f8] sm:$0xff] }
 0x479   : > { %v8917_v42 = vpack.c.bf16 %v2993_v40, %v2991_v6  ;;  %v8993_v40 = vpack.c.bf16 %v3364_v39, %v3360_v38  ;;  %v3397_v38 = vld [vmem:[#allocation13 + $0x460] sm:$0xff] }
 0x47a   : > { %v3401_v39 = vld [vmem:[#allocation13 + $0x480] sm:$0xff] }
 0x47b   : > { %8884 = vmatpush1.bf16.msra.mxu1 %v8883_v47  ;;  %v2995_v47 = vld [vmem:[%s14374_s25 + $0x208] sm:$0xff] }
 0x47c   : > { %8886 = vmatprep.subr.bf16.mxu1 %v8885_v48  ;;  %v2997_v48 = vld [vmem:[%s14374_s25 + $0x218] sm:$0xff] }
 0x47d   : > { %v8921_v50 = vpack.c.bf16 %v2997_v48, %v2995_v47  ;;  %v3366_v47 = vld [vmem:[#allocation13 + $0x368] sm:$0xff] }
 0x47e   : > { %v3370_v48 = vld [vmem:[#allocation13 + $0x388] sm:$0xff] }
 0x47f   : > { %8888 = vmatpush1.bf16.msra.mxu1 %v8887_v55  ;;  %v2999_v55 = vld [vmem:[%s14374_s25 + $0x228] sm:$0xff] }
 0x480   : > { %8890 = vmatprep.subr.bf16.mxu1 %v8889_v56  ;;  %v3001_v56 = vld [vmem:[%s14374_s25 + $0x238] sm:$0xff] }
 0x481   : > { %v8925_v58 = vpack.c.bf16 %v3001_v56, %v2999_v55  ;;  %v3365_v55 = vld [vmem:[#allocation13 + $0x360] sm:$0xff]  ;;  %v8997_v56 = vpack.c.bf16 %v3372_v53, %v3368_v51 }
 0x482   : > { %v3409_v51 = vld [vmem:[#allocation13 + $0x4c0] sm:$0xff] }
 0x483   : > { %8892 = vmatpush1.bf16.msra.mxu1 %v8891_v61  ;;  %v3003_v61 = vld [vmem:[%s14374_s25 + $0x248] sm:$0xff] }
 0x484   : > { %8894 = vmatprep.subr.bf16.mxu1 %v8893_v62  ;;  %v3005_v62 = vld [vmem:[%s14374_s25 + $0x258] sm:$0xff] }
 0x485   : > { %v8929_v1 = vpack.c.bf16 %v3005_v62, %v3003_v61  ;;  %v3374_v61 = vld [vmem:[#allocation13 + $0x3a8] sm:$0xff] }
 0x486   : > { %v3378_v62 = vld [vmem:[#allocation13 + $0x3c8] sm:$0xff] }
 0x487   : > { %8896 = vmatpush1.bf16.msra.mxu1 %v8895_v5  ;;  %v3007_v5 = vld [vmem:[%s14374_s25 + $0x268] sm:$0xff] }
 0x488   : > { %8898 = vmatprep.subr.bf16.mxu1 %v8897_v7 }
 0x48b   : > { %8900 = vmatpush1.bf16.msra.mxu1 %v8899_v12  ;;  %v3010_v12 = vld [vmem:[%s14374_s25 + $0x280] sm:$0xff] }
 0x48c   : > { %8902 = vmatprep.subr.bf16.mxu1 %v8901_v13  ;;  %v3012_v13 = vld [vmem:[%s14374_s25 + $0x290] sm:$0xff] }
 0x48f   : > { %8904 = vmatpush1.bf16.msra.mxu1 %v8903_v21  ;;  %v8943_v21 = vpack.c.bf16 %v3016_v20, %v3014_v18  ;;  %v3390_v18 = vld [vmem:[#allocation13 + $0x428] sm:$0xff] }
 0x490   : > { %8906 = vmatprep.subr.bf16.mxu1 %v8905_v19  ;;  %v3018_v19 = vld [vmem:[%s14374_s25 + $0x2c0] sm:$0xff]  ;;  %v3394_v20 = vld [vmem:[#allocation13 + $0x448] sm:$0xff] }
 0x491   : > { %v8965_v25 = vpack.c.bf16 %v3394_v20, %v3390_v18  ;;  %v3434_v18 = vld [vmem:[#allocation13 + $0x588] sm:$0xff]  ;;  %v3432_v20 = vld [vmem:[#allocation13 + $0x578] sm:$0xff] }
 0x493   : > { %8908 = vmatpush1.bf16.msra.mxu1 %v8907_v31  ;;  %v3356_v31 = vld [vmem:[#allocation13 + $0x318] sm:$0xff] }
 0x494   : > { %8910 = vmatprep.subr.bf16.mxu1 %v8909_v24  ;;  %v3349_v24 = vld [vmem:[#allocation13 + $0x2e0] sm:$0xff]  ;;  %v8989_v33 = vpack.c.bf16 %v3356_v31, %v3352_v23 }
 0x495   : > { %v8947_v28 = vpack.c.bf16 %v3353_v32, %v3349_v24  ;;  %v3389_v23 = vld [vmem:[#allocation13 + $0x420] sm:$0xff]  ;;  %v3391_v24 = vld [vmem:[#allocation13 + $0x430] sm:$0xff] }
 0x496   : > { %v3395_v32 = vld [vmem:[#allocation13 + $0x450] sm:$0xff] }
 0x497   : > { %8912 = vmatpush1.bf16.msra.mxu1 %v8911_v35  ;;  %v3358_v35 = vld [vmem:[#allocation13 + $0x328] sm:$0xff]  ;;  %8948 = vmatpush1.bf16.msra.mxu0 %v8947_v28  ;;  %v9011_v28 = vpack.c.bf16 %v3395_v32, %v3391_v24 }
 0x498   : > { %8914 = vmatprep.subr.bf16.mxu1 %v8913_v37  ;;  %v3362_v37 = vld [vmem:[#allocation13 + $0x348] sm:$0xff] }
 0x499   : > { %v8949_v6 = vpack.c.bf16 %v3362_v37, %v3358_v35  ;;  %v3400_v35 = vld [vmem:[#allocation13 + $0x478] sm:$0xff]  ;;  %v3438_v32 = vld [vmem:[#allocation13 + $0x5a8] sm:$0xf] }
 0x49a   : > { %v3404_v37 = vld [vmem:[#allocation13 + $0x498] sm:$0xff] }
 0x49b   : > { %8916 = vmatpush1.bf16.msra.mxu1 %v8915_v41  ;;  %v3357_v41 = vld [vmem:[#allocation13 + $0x320] sm:$0xff]  ;;  %8950 = vmatprep.subr.bf16.mxu0 %v8949_v6  ;;  %v9013_v6 = vpack.c.bf16 %v3404_v37, %v3400_v35  ;;  %v3257_v35 = vld [vmem:[#allocation13 + $0x28] sm:$0xff]  ;;  %v3255_v37 = vld [vmem:[#allocation13 + $0x18] sm:$0xff] }
 0x49c   : > { %8918 = vmatprep.subr.bf16.mxu1 %v8917_v42  ;;  %v3361_v42 = vld [vmem:[#allocation13 + $0x340] sm:$0xff] }
 0x49f   : > { %8920 = vmatpush1.bf16.msra.mxu1 %v8919_v49  ;;  %v8995_v49 = vpack.c.bf16 %v3363_v45, %v3359_v43  ;;  %v3410_v45 = vld [vmem:[#allocation13 + $0x4c8] sm:$0xff] }
 0x4a0   : > { %8922 = vmatprep.subr.bf16.mxu1 %v8921_v50  ;;  %v8953_v50 = vpack.c.bf16 %v3370_v48, %v3366_v47  ;;  %v3408_v47 = vld [vmem:[#allocation13 + $0x4b8] sm:$0xff] }
 0x4a2   : > { %3085 = vmatmul.mubr.f32.vlgmr.msra.gmra.mrb[40].mxu1 %v12182_v4  ;;  %v3009_v4 = vld [vmem:[%s14374_s25 + $0x278] sm:$0xff] }
 0x4a3   : > { %3090 = vmatprep.mubr.f32.mxu1 %v12202_v16  ;;  %8924 = vmatpush1.bf16.msra.mxu1 %v8923_v57  ;;  %v8931_v16 = vpack.c.bf16 %v3004_v3, %v3002_v2  ;;  %v8933_v7 = vpack.c.bf16 %v3009_v4, %v3007_v5  ;;  %v3369_v57 = vld [vmem:[#allocation13 + $0x380] sm:$0xff]  ;;  %v3380_v2 = vld [vmem:[#allocation13 + $0x3d8] sm:$0xff] }
 0x4a4   : > { %8926 = vmatprep.subr.bf16.mxu1 %v8925_v58  ;;  %v3367_v58 = vld [vmem:[#allocation13 + $0x370] sm:$0xff]  ;;  %v8955_v60 = vpack.c.bf16 %v3369_v57, %v3365_v55  ;;  %v3373_v3 = vld [vmem:[#allocation13 + $0x3a0] sm:$0xff] }
 0x4a5   : > { %v3377_v5 = vld [vmem:[#allocation13 + $0x3c0] sm:$0xff]  ;;  %v3411_v57 = vld [vmem:[#allocation13 + $0x4d0] sm:$0xff] }
 0x4a6   : > { %3091 = vmatmul.mubr.f32.gmra.mrb[42].mxu1 %v12199_v14  ;;  %v3013_v14 = vld [vmem:[%s14374_s25 + $0x298] sm:$0xff] }
 0x4a7   : > { %3096 = vmatprep.mubr.f32.mxu1 %v12220_v27  ;;  %8928 = vmatpush1.bf16.msra.mxu1 %v8927_v63  ;;  %v8935_v27 = vpack.c.bf16 %v3008_v9, %v3006_v8  ;;  %v8937_v11 = vpack.c.bf16 %v3013_v14, %v3011_v10  ;;  %v3376_v63 = vld [vmem:[#allocation13 + $0x3b8] sm:$0xff]  ;;  %v3382_v8 = vld [vmem:[#allocation13 + $0x3e8] sm:$0xff] }
 0x4a8   : > { %8930 = vmatprep.subr.bf16.mxu1 %v8929_v1  ;;  %v8999_v1 = vpack.c.bf16 %v3371_v59, %v3367_v58  ;;  %v9001_v4 = vpack.c.bf16 %v3380_v2, %v3376_v63  ;;  %v3386_v9 = vld [vmem:[#allocation13 + $0x408] sm:$0xff]  ;;  %v3384_v10 = vld [vmem:[#allocation13 + $0x3f8] sm:$0xff] }
 0x4a9   : > { %v3388_v14 = vld [vmem:[#allocation13 + $0x418] sm:$0xff]  ;;  %v3414_v59 = vld [vmem:[#allocation13 + $0x4e8] sm:$0xff] }
 0x4aa   : > { %3097 = vmatmul.mubr.f32.gmra.mrb[44].mxu1 %v12217_v26  ;;  %v3017_v26 = vld [vmem:[%s14374_s25 + $0x2b8] sm:$0xff] }
 0x4ab   : > { %3102 = vmatprep.mubr.f32.mxu1 %v12238_v36  ;;  %8932 = vmatpush1.bf16.msra.mxu1 %v8931_v16  ;;  %v8939_v36 = vpack.c.bf16 %v3012_v13, %v3010_v12  ;;  %v8941_v17 = vpack.c.bf16 %v3017_v26, %v3015_v15  ;;  %v3375_v16 = vld [vmem:[#allocation13 + $0x3b0] sm:$0xff]  ;;  %v8961_v12 = vpack.c.bf16 %v3386_v9, %v3382_v8  ;;  %v3381_v13 = vld [vmem:[#allocation13 + $0x3e0] sm:$0xff]  ;;  %v3420_v63 = vld [vmem:[#allocation13 + $0x518] sm:$0xff] }
 0x4ac   : > { %8934 = vmatprep.subr.bf16.mxu1 %v8933_v7  ;;  %v3379_v7 = vld [vmem:[#allocation13 + $0x3d0] sm:$0xff]  ;;  %v3385_v15 = vld [vmem:[#allocation13 + $0x400] sm:$0xff]  ;;  %v3426_v8 = vld [vmem:[#allocation13 + $0x548] sm:$0xff] }
 0x4ad   : > { %v3383_v26 = vld [vmem:[#allocation13 + $0x3f0] sm:$0xff]  ;;  %v3424_v9 = vld [vmem:[#allocation13 + $0x538] sm:$0xff] }
 0x4ae   : > { %3103 = vmatmul.mubr.f32.gmra.mrb[46].mxu1 %v12235_v34  ;;  %v3019_v34 = vld [vmem:[%s14374_s25 + $0x2c8] sm:$0xff] }
 0x4af   : > { %8936 = vmatpush1.bf16.msra.mxu1 %v8935_v27  ;;  %3173 = vmatprep.mubr.f32.mxu1 %v11085_v0  ;;  %v8959_v27 = vpack.c.bf16 %v3377_v5, %v3373_v3  ;;  %v3415_v5 = vld [vmem:[#allocation13 + $0x4f0] sm:$0xff] }
 0x4b0   : > { %8938 = vmatprep.subr.bf16.mxu1 %v8937_v11  ;;  %v9003_v11 = vpack.c.bf16 %v3379_v7, %v3375_v16  ;;  %v3422_v7 = vld [vmem:[#allocation13 + $0x528] sm:$0xff] }
 0x4b3   : > { %8940 = vmatpush1.bf16.msra.mxu1 %v8939_v36  ;;  %v9005_v36 = vpack.c.bf16 %v3388_v14, %v3384_v10  ;;  %v8981_v10 = vpack.c.bf16 %v3426_v8, %v3422_v7  ;;  %v3428_v14 = vld [vmem:[#allocation13 + $0x558] sm:$0xff] }
 0x4b4   : > { %8942 = vmatprep.subr.bf16.mxu1 %v8941_v17  ;;  %v3387_v17 = vld [vmem:[#allocation13 + $0x410] sm:$0xff] }
 0x4b5   : > { %v9007_v22 = vpack.c.bf16 %v3387_v17, %v3383_v26  ;;  %v3427_v26 = vld [vmem:[#allocation13 + $0x550] sm:$0xff]  ;;  %v3430_v17 = vld [vmem:[#allocation13 + $0x568] sm:$0xff] }
 0x4b7   : > { %8944 = vmatpush1.bf16.msra.mxu1 %v8943_v21  ;;  %v3392_v21 = vld [vmem:[#allocation13 + $0x438] sm:$0xff] }
 0x4b8   : > { %3133 = vmatprep.subr.mxu1 %v3019_v34  ;;  %v3396_v34 = vld [vmem:[#allocation13 + $0x458] sm:$0xff] }
 0x4b9   : > { %v9009_v31 = vpack.c.bf16 %v3396_v34, %v3392_v21  ;;  %v8985_v21 = vpack.c.bf16 %v3434_v18, %v3430_v17  ;;  %v3436_v34 = vld [vmem:[#allocation13 + $0x598] sm:$0xff] }
 0x4bb   : > { %3134 = vmatpush1.msra.mxu1 %v3018_v19  ;;  %v8963_v19 = vpack.c.bf16 %v3385_v15, %v3381_v13  ;;  %v3423_v15 = vld [vmem:[#allocation13 + $0x530] sm:$0xff] }
 0x4bc   : > { %7747 = vmatmul.mubr.msk.f32.vlgmr.msra.gmra.mrb[40].mxu1 %vm2739_vm5, %v12257_v46  ;;  %v3351_v46 = vld [vmem:[#allocation13 + $0x2f0] sm:$0xff]  ;;  %8990 = vmatprep.subr.bf16.mxu1 %v8989_v33  ;;  %v8967_v33 = vpack.c.bf16 %v3393_v30, %v3389_v23 }
 0x4bd   : > { %3179 = vmatprep.mubr.f32.mxu1 %v11085_v0  ;;  %v3431_v30 = vld [vmem:[#allocation13 + $0x570] sm:$0xff] }
 0x4c0   : > { %7748 = vmatmul.mubr.msk.f32.gmra.mrb[42].mxu1 %vm2739_vm5, %v12253_v44  ;;  %v8991_v44 = vpack.c.bf16 %v3355_v29, %v3351_v46  ;;  %v3398_v46 = vld [vmem:[#allocation13 + $0x468] sm:$0xff] }
 0x4c1   : > { %3185 = vmatprep.mubr.f32.mxu1 %v11085_v0  ;;  %v3402_v29 = vld [vmem:[#allocation13 + $0x488] sm:$0xff] }
 0x4c2   : > { %8992 = vmatpush1.bf16.msra.mxu1 %v8991_v44  ;;  %v8969_v44 = vpack.c.bf16 %v3402_v29, %v3398_v46  ;;  %v3439_v46 = vld [vmem:[#allocation13 + $0x5b0] sm:$0xf]  ;;  %v3253_v29 = vld [vmem:[#allocation13 + $0x8] sm:$0xff] }
 0x4c3   : > { %8994 = vmatprep.subr.bf16.mxu1 %v8993_v40  ;;  %v8971_v40 = vpack.c.bf16 %v3401_v39, %v3397_v38  ;;  %v3259_v38 = vld [vmem:[#allocation13 + $0x38] sm:$0xff] }
 0x4c4   : > { %7749 = vmatmul.mubr.msk.f32.gmra.mrb[44].mxu1 %vm2739_vm5, %v12270_v54  ;;  %v8951_v54 = vpack.c.bf16 %v3361_v42, %v3357_v41  ;;  %v3399_v41 = vld [vmem:[#allocation13 + $0x470] sm:$0xff]  ;;  %v9077_v39 = vpack.c.bf16 %v3259_v38, %v3255_v37 }
 0x4c5   : > { %3191 = vmatprep.mubr.f32.mxu1 %v11085_v0  ;;  %v3403_v42 = vld [vmem:[#allocation13 + $0x490] sm:$0xff] }
 0x4c6   : > { %8952 = vmatpush1.bf16.msra.mxu0 %v8951_v54  ;;  %8996 = vmatpush1.bf16.msra.mxu1 %v8995_v49  ;;  %v9015_v43 = vpack.c.bf16 %v3403_v42, %v3399_v41  ;;  %v3406_v54 = vld [vmem:[#allocation13 + $0x4a8] sm:$0xff]  ;;  %v3412_v49 = vld [vmem:[#allocation13 + $0x4d8] sm:$0xff] }
 0x4c7   : > { %8954 = vmatprep.subr.bf16.mxu0 %v8953_v50  ;;  %8998 = vmatprep.subr.bf16.mxu1 %v8997_v56  ;;  %v8973_v48 = vpack.c.bf16 %v3410_v45, %v3406_v54  ;;  %v3405_v50 = vld [vmem:[#allocation13 + $0x4a0] sm:$0xff]  ;;  %v9017_v53 = vpack.c.bf16 %v3412_v49, %v3408_v47  ;;  %v3407_v56 = vld [vmem:[#allocation13 + $0x4b0] sm:$0xff] }
 0x4c8   : > { %7750 = vmatmul.mubr.msk.f32.gmra.mrb[46].mxu1 %vm2739_vm5, %v12267_v52  ;;  %v8957_v52 = vpack.c.bf16 %v3378_v62, %v3374_v61  ;;  %v8975_v55 = vpack.c.bf16 %v3409_v51, %v3405_v50  ;;  %v9019_v58 = vpack.c.bf16 %v3411_v57, %v3407_v56  ;;  %v3416_v61 = vld [vmem:[#allocation13 + $0x4f8] sm:$0xff]  ;;  %vm7402_vm5 = vcmask 65536  }
 0x4c9   : > { %v9021_v2 = vpack.c.bf16 %v3420_v63, %v3416_v61  ;;  %v3206_v51 = vld [vmem:[#allocation9] sm:$0x3] }
 0x4ca   : > { %8956 = vmatpush1.bf16.msra.mxu0 %v8955_v60  ;;  %9000 = vmatpush1.bf16.msra.mxu1 %v8999_v1  ;;  %v3418_v60 = vld [vmem:[#allocation13 + $0x508] sm:$0xff]  ;;  %v3413_v1 = vld [vmem:[#allocation13 + $0x4e0] sm:$0xff] }
 0x4cb   : > { %8958 = vmatprep.subr.bf16.mxu0 %v8957_v52  ;;  %9002 = vmatprep.subr.bf16.mxu1 %v9001_v4  ;;  %v8977_v62 = vpack.c.bf16 %v3418_v60, %v3414_v59  ;;  %v3417_v52 = vld [vmem:[#allocation13 + $0x500] sm:$0xff]  ;;  %v3419_v4 = vld [vmem:[#allocation13 + $0x510] sm:$0xff] }
 0x4cc   : > { %v8979_v3 = vpack.c.bf16 %v3417_v52, %v3413_v1  ;;  %v9023_v16 = vpack.c.bf16 %v3419_v4, %v3415_v5 }
 0x4ce   : > { %8960 = vmatpush1.bf16.msra.mxu0 %v8959_v27  ;;  %9004 = vmatpush1.bf16.msra.mxu1 %v9003_v11  ;;  %v3421_v27 = vld [vmem:[#allocation13 + $0x520] sm:$0xff] }
 0x4cf   : > { %8962 = vmatprep.subr.bf16.mxu0 %v8961_v12  ;;  %9006 = vmatprep.subr.bf16.mxu1 %v9005_v36  ;;  %v3425_v11 = vld [vmem:[#allocation13 + $0x540] sm:$0xff]  ;;  %v9025_v12 = vpack.c.bf16 %v3428_v14, %v3424_v9  ;;  %v9027_v36 = vpack.c.bf16 %v3427_v26, %v3423_v15 }
 0x4d0   : > { %v8983_v13 = vpack.c.bf16 %v3425_v11, %v3421_v27 }
 0x4d2   : > { %8964 = vmatpush1.bf16.msra.mxu0 %v8963_v19  ;;  %9008 = vmatpush1.bf16.msra.mxu1 %v9007_v22  ;;  %v3429_v19 = vld [vmem:[#allocation13 + $0x560] sm:$0xff] }
 0x4d3   : > { %8966 = vmatprep.subr.bf16.mxu0 %v8965_v25  ;;  %9010 = vmatprep.subr.bf16.mxu1 %v9009_v31  ;;  %v3433_v22 = vld [vmem:[#allocation13 + $0x580] sm:$0xff]  ;;  %v9029_v25 = vpack.c.bf16 %v3436_v34, %v3432_v20  ;;  %v3435_v31 = vld [vmem:[#allocation13 + $0x590] sm:$0xff] }
 0x4d4   : > { %v8987_v23 = vpack.c.bf16 %v3433_v22, %v3429_v19  ;;  %v9031_v24 = vpack.c.bf16 %v3435_v31, %v3431_v30 }
 0x4d6   : > { %8968 = vmatpush1.bf16.msra.mxu0 %v8967_v33  ;;  %9012 = vmatpush1.bf16.msra.mxu1 %v9011_v28  ;;  %v3440_v33 = vld [vmem:[#allocation13 + $0x5b8] sm:$0xf]  ;;  %v3437_v28 = vld [vmem:[#allocation13 + $0x5a0] sm:$0xf] }
 0x4d7   : > { %8970 = vmatprep.subr.bf16.mxu0 %v8969_v44  ;;  %9014 = vmatprep.subr.bf16.mxu1 %v9013_v6  ;;  %v9033_v44 = vpack.c.bf16 %v3257_v35, %v3253_v29  ;;  %v3258_v29 = vld [vmem:[#allocation13 + $0x30] sm:$0xff]  ;;  %v3261_v35 = vld [vmem:[#allocation13 + $0x48] sm:$0xff] }
 0x4da   : > { %8972 = vmatpush1.bf16.msra.mxu0 %v8971_v40  ;;  %9016 = vmatpush1.bf16.msra.mxu1 %v9015_v43 }
 0x4db   : > { %8974 = vmatprep.subr.bf16.mxu0 %v8973_v48  ;;  %9018 = vmatprep.subr.bf16.mxu1 %v9017_v53  ;;  %v3208_v48 = vlaneseq }
 0x4dd   : > { %v3209_v49 = vshrl.u32 %v3208_v48, 7  ;;  %v3260_v48 = vld [vmem:[#allocation13 + $0x40] sm:$0xff] }
 0x4de   : > { %8976 = vmatpush1.bf16.msra.mxu0 %v8975_v55  ;;  %9020 = vmatpush1.bf16.msra.mxu1 %v9019_v58 }
 0x4df   : > { %8978 = vmatprep.subr.bf16.mxu0 %v8977_v62  ;;  %9022 = vmatprep.subr.bf16.mxu1 %v9021_v2  ;;  %v12583_v50 = vsub.s32 0, %v3209_v49  ;;  %v12585_v53 = vsub.s32 1, %v3209_v49  ;;  %v3264_v49 = vld [vmem:[#allocation13 + $0x60] sm:$0xff] }
 0x4e1   : > { %v3211_v55 = vrot.slane %v3206_v51, %v12583_v50  ;;  %v3215_v57 = vrot.slane %v3206_v51, %v12585_v53  ;;  %v3262_v51 = vld [vmem:[#allocation13 + $0x50] sm:$0xff] }
 0x4e2   : > { %8980 = vmatpush1.bf16.msra.mxu0 %v8979_v3  ;;  %9024 = vmatpush1.bf16.msra.mxu1 %v9023_v16 }
 0x4e3   : > { %8982 = vmatprep.subr.bf16.mxu0 %v8981_v10  ;;  %9026 = vmatprep.subr.bf16.mxu1 %v9025_v12 }
 0x4e6   : > { %8984 = vmatpush1.bf16.msra.mxu0 %v8983_v13  ;;  %9028 = vmatpush1.bf16.msra.mxu1 %v9027_v36 }
 0x4e7   : > { %8986 = vmatprep.subr.bf16.mxu0 %v8985_v21  ;;  %9030 = vmatprep.subr.bf16.mxu1 %v9029_v25  ;;  %v3252_v25 = vld [vmem:[#allocation13] sm:$0xff] }
 0x4ea   : > { %8988 = vmatpush1.bf16.msra.mxu0 %v8987_v23  ;;  %9032 = vmatpush1.bf16.msra.mxu1 %v9031_v24 }
 0x4eb   : > { %7751 = vmatprep.subr.msk.mxu0 %vm2263_vm1, %v3438_v32  ;;  %7757 = vmatprep.subr.msk.mxu1 %vm2263_vm1, %v3440_v33  ;;  %v3256_v32 = vld [vmem:[#allocation13 + $0x20] sm:$0xff]  ;;  %v3254_v33 = vld [vmem:[#allocation13 + $0x10] sm:$0xff] }
 0x4ee   : > { %7752 = vmatpush1.msk.msra.mxu0 %vm2263_vm1, %v3437_v28  ;;  %7758 = vmatpush1.msk.msra.mxu1 %vm2263_vm1, %v3439_v46 }
 0x4ef   : > { %9034 = vmatprep.subr.bf16.mxu0 %v9033_v44  ;;  %9078 = vmatprep.subr.bf16.mxu1 %v9077_v39  ;;  %v3265_v44 = vld [vmem:[#allocation13 + $0x68] sm:$0xff] }
 0x535   : > { %v2907_v6 = vpop.f32.mrb[32].mxu1 }
 0x536   : > { %v2909_v40 = vpop.f32.mrb[33].mxu1 }
 0x539   : > { %v2913_v41 = vpop.f32.mrb[34].mxu1 }
 0x53a   : > { %v2915_v42 = vpop.f32.mrb[35].mxu1 }
 0x53d   : > { %v2919_v43 = vpop.f32.mrb[36].mxu1 }
 0x53e   : > { %v2921_v54 = vpop.f32.mrb[37].mxu1 }
 0x541   : > { %v2925_v45 = vpop.f32.mrb[38].mxu1 }
 0x542   : > { %v2927_v47 = vpop.f32.mrb[39].mxu1 }
 0x58f   : > { %v3175_v56 = vpop.f32.mrb[40].mxu1 }
 0x590   : > { %v3198_v58 = vmax.f32 %v2907_v6, %v3175_v56  ;;  %v3177_v59 = vpop.f32.mrb[41].mxu1  ;;  %v3263_v6 = vld [vmem:[#allocation13 + $0x58] sm:$0xff] }
 0x591   : > { %v3199_v60 = vmax.f32 %v2909_v40, %v3177_v59  ;;  %v3267_v40 = vld [vmem:[#allocation13 + $0x78] sm:$0xff]  ;;  %v9037_v59 = vpack.c.bf16 %v3265_v44, %v3261_v35 }
 0x592   : > { %v3218_v61 = vadd.f32 %v3211_v55, %v3198_v58 }
 0x593   : > { %v3219_v62 = vadd.f32 %v3215_v57, %v3199_v60  ;;  %v3181_v63 = vpop.f32.mrb[42].mxu1  ;;  %v9081_v60 = vpack.c.bf16 %v3267_v40, %v3263_v6  ;;  %v3278_v40 = vld [vmem:[#allocation13 + $0xd0] sm:$0xff] }
 0x594   : > { %v12589_v1 = vmax.f32 %v3218_v61, 0.0  ;;  %v3200_v52 = vmax.f32 %v2913_v41, %v3181_v63  ;;  %v3183_v2 = vpop.f32.mrb[43].mxu1  ;;  %v3266_v61 = vld [vmem:[#allocation13 + $0x70] sm:$0xff]  ;;  %v3273_v63 = vld [vmem:[#allocation13 + $0xa8] sm:$0xff] }
 0x595   : > { %v3227_v3 = vmax.f32 %v3219_v62, 0.0  ;;  %v3201_v5 = vmax.f32 %v2915_v42, %v3183_v2  ;;  %v3269_v62 = vld [vmem:[#allocation13 + $0x88] sm:$0xff] }
 0x596   : > { %3234 = vst [vmem:[#allocation2] sm:$0xff] %v12589_v1  ;;  %v3220_v4 = vadd.f32 %v3211_v55, %v3200_v52 }
 0x597   : > { %3236 = vst.msk [vmem:[#allocation2 + $0x8] sm:$0xff] %vm3235_vm6, %v3227_v3  ;;  %v3221_v16 = vadd.f32 %v3215_v57, %v3201_v5  ;;  %v3187_v7 = vpop.f32.mrb[44].mxu1  ;;  %v3271_v3 = vld [vmem:[#allocation13 + $0x98] sm:$0xff] }
 0x598   : > { %v12593_v8 = vmax.f32 %v3220_v4, 0.0  ;;  %v3202_v9 = vmax.f32 %v2919_v43, %v3187_v7  ;;  %v3189_v10 = vpop.f32.mrb[45].mxu1  ;;  %v3275_v5 = vld [vmem:[#allocation13 + $0xb8] sm:$0xff] }
 0x599   : > { %v3229_v14 = vmax.f32 %v3221_v16, 0.0  ;;  %v3203_v27 = vmax.f32 %v2921_v54, %v3189_v10  ;;  %v9083_v10 = vpack.c.bf16 %v3266_v61, %v3262_v51  ;;  %v3287_v51 = vld [vmem:[#allocation13 + $0x118] sm:$0xff]  ;;  %v3284_v61 = vld [vmem:[#allocation13 + $0x100] sm:$0xff] }
 0x59a   : > { %v3222_v11 = vadd.f32 %v3211_v55, %v3202_v9  ;;  %v3451_v21 = vrot.slane %v12593_v8, 1  ;;  %v3969_v23 = vrot.slane %v12593_v8, 2  ;;  %v4303_v41 = vrot.slane %v12593_v8, 3 }
 0x59b   : > { %3238 = vst.msk [vmem:[#allocation2 + $0x18] sm:$0xff] %vm3235_vm6, %v3229_v14  ;;  %v3223_v12 = vadd.f32 %v3215_v57, %v3203_v27  ;;  %v3193_v13 = vpop.f32.mrb[46].mxu1  ;;  %v4636_v56 = vrot.slane %v12593_v8, 4  ;;  %v9039_v9 = vpack.c.bf16 %v3264_v49, %v3260_v48  ;;  %v3268_v14 = vld [vmem:[#allocation13 + $0x80] sm:$0xff]  ;;  %v3285_v48 = vld [vmem:[#allocation13 + $0x108] sm:$0xff] }
 0x59c   : > { %v12596_v15 = vmax.f32 %v3222_v11, 0.0  ;;  %v3204_v26 = vmax.f32 %v2925_v45, %v3193_v13  ;;  %v3195_v36 = vpop.f32.mrb[47].mxu1  ;;  %v9035_v45 = vpack.c.bf16 %v3256_v32, %v3252_v25  ;;  %v3272_v27 = vld [vmem:[#allocation13 + $0xa0] sm:$0xff]  ;;  %v3277_v25 = vld [vmem:[#allocation13 + $0xc8] sm:$0xff] }
 0x59d   : > { %v3231_v17 = vmax.f32 %v3223_v12, 0.0  ;;  %v3205_v18 = vmax.f32 %v2927_v47, %v3195_v36  ;;  %v3344_v22 = vld [vmem:[#allocation2] sm:$0xfe]  ;;  %v9079_v47 = vpack.c.bf16 %v3258_v29, %v3254_v33  ;;  %v9085_v36 = vpack.c.bf16 %v3275_v5, %v3271_v3  ;;  %v3281_v32 = vld [vmem:[#allocation13 + $0xe8] sm:$0xff] }
 0x59e   : > { %v3224_v20 = vadd.f32 %v3211_v55, %v3204_v26  ;;  %v3456_v34 = vrot.slane %v12596_v15, 1  ;;  %v3974_v30 = vrot.slane %v12596_v15, 2  ;;  %v3345_v24 = vld [vmem:[#allocation2 + $0x8] sm:$0xfe]  ;;  %v3450_v39 = vrot.slane %v3344_v22, 1  ;;  %v3279_v33 = vld [vmem:[#allocation13 + $0xd8] sm:$0xff] }
 0x59f   : > { %3240 = vst.msk [vmem:[#allocation2 + $0x28] sm:$0xff] %vm3235_vm6, %v3231_v17  ;;  %v3225_v19 = vadd.f32 %v3215_v57, %v3205_v18  ;;  %v4308_v42 = vrot.slane %v12596_v15, 3  ;;  %v3453_v43 = vrot.slane %v3345_v24, 1  ;;  %v4641_v57 = vrot.slane %v12596_v15, 4  ;;  %v3270_v18 = vld [vmem:[#allocation13 + $0x90] sm:$0xff]  ;;  %v3289_v49 = vld [vmem:[#allocation13 + $0x128] sm:$0xff] }
 0x5a0   : > { %v3232_v31 = vmax.f32 %v3224_v20, 0.0  ;;  %v12606_v28 = vsel %vm3449_vm7, %v3451_v21, %v3456_v34  ;;  %v12613_v37 = vsel %vm3967_vm8, %v3969_v23, %v3974_v30  ;;  %v3452_v52 = vsel %vm3449_vm7, %v3450_v39, %v3451_v21  ;;  %v3274_v20 = vld [vmem:[#allocation13 + $0xb0] sm:$0xff]  ;;  %v3276_v39 = vld [vmem:[#allocation13 + $0xc0] sm:$0xff] }
 0x5a1   : > { %v3233_v46 = vmax.f32 %v3225_v19, 0.0  ;;  %v12626_v55 = vsel %vm4301_vm10, %v4303_v41, %v4308_v42  ;;  %v12641_v4 = vsel %vm2263_vm1, %v4636_v56, %v4641_v57  ;;  %v9041_v26 = vpack.c.bf16 %v3273_v63, %v3269_v62  ;;  %v3288_v62 = vld [vmem:[#allocation13 + $0x120] sm:$0xff]  ;;  %v3286_v63 = vld [vmem:[#allocation13 + $0x110] sm:$0xff] }
 0x5a2   : > { %3241 = vst [vmem:[#allocation2 + $0x30] sm:$0x3f] %v3232_v31  ;;  %v12615_v38 = vld [vmem:[#allocation2 + $0x18] sm:$0xff]  ;;  %v9043_v35 = vpack.c.bf16 %v3272_v27, %v3268_v14  ;;  %v9087_v44 = vpack.c.bf16 %v3274_v20, %v3270_v18  ;;  %v9049_v3 = vpack.c.bf16 %v3289_v49, %v3285_v48  ;;  %v3245_v14 = vld [vmem:[#allocation2 + $0x8] sm:$0xff]  ;;  %v9051_v27 = vpack.c.bf16 %v3288_v62, %v3284_v61 }
 0x5a3   : > { %3243 = vst.msk [vmem:[#allocation2 + $0x38] sm:$0x3f] %vm3242_vm9, %v3233_v46  ;;  %v3454_v54 = vrot.slane %v12615_v38, 1  ;;  %v4306_v11 = vrot.slane %v12615_v38, 3  ;;  %v4639_v21 = vrot.slane %v12615_v38, 4  ;;  %v3283_v46 = vld [vmem:[#allocation13 + $0xf8] sm:$0xff] }
 0x5a4   : > { %v3294_v20 = vld [vmem:[#allocation13 + $0x150] sm:$0xff] }
 0x5a5   : > { %v3455_v58 = vsel %vm3449_vm7, %v3453_v43, %v3454_v54  ;;  %v3282_v43 = vld [vmem:[#allocation13 + $0xf0] sm:$0xff] }
 0x5a6   : > { %7753 = vmatprep.mubr.msk.f32.mxu0 %vm3235_vm6, %v3455_v58  ;;  %7759 = vmatprep.mubr.msk.f32.mxu1 %vm3235_vm6, %v3455_v58  ;;  %v12634_v2 = vld [vmem:[#allocation2 + $0x28] sm:$0xff]  ;;  %v3291_v58 = vld [vmem:[#allocation13 + $0x138] sm:$0xff]  ;;  %v3310_v61 = vld [vmem:[#allocation13 + $0x1d0] sm:$0xff] }
 0x5a7   : > { %3553 = vmatmul.mubr.f32.vlgmr.msra.gmra.mrb[16].mxu0 %v3452_v52  ;;  %3642 = vmatmul.mubr.f32.vlgmr.msra.gmra.mrb[48].mxu1 %v3452_v52  ;;  %v3458_v16 = vrot.slane %v12634_v2, 1  ;;  %v4310_v7 = vrot.slane %v12634_v2, 3  ;;  %v4643_v12 = vrot.slane %v12634_v2, 4  ;;  %v3293_v52 = vld [vmem:[#allocation13 + $0x148] sm:$0xff]  ;;  %v9093_v5 = vpack.c.bf16 %v3291_v58, %v3287_v51  ;;  %v3308_v51 = vld [vmem:[#allocation13 + $0x1c0] sm:$0xff]  ;;  %v3314_v62 = vld [vmem:[#allocation13 + $0x1f0] sm:$0xff] }
 0x5a8   : > { %9036 = vmatpush1.bf16.msra.mxu0 %v9035_v45  ;;  %9080 = vmatpush1.bf16.msra.mxu1 %v9079_v47  ;;  %v9045_v45 = vpack.c.bf16 %v3281_v32, %v3277_v25  ;;  %v9089_v47 = vpack.c.bf16 %v3283_v46, %v3279_v33  ;;  %v3301_v25 = vld [vmem:[#allocation13 + $0x188] sm:$0xff]  ;;  %v3307_v32 = vld [vmem:[#allocation13 + $0x1b8] sm:$0xff]  ;;  %v3312_v58 = vld [vmem:[#allocation13 + $0x1e0] sm:$0xff] }
 0x5a9   : > { %v3459_v13 = vsel %vm3449_vm7, %v3454_v54, %v3458_v16  ;;  %9038 = vmatprep.subr.bf16.mxu0 %v9037_v59  ;;  %9082 = vmatprep.subr.bf16.mxu1 %v9081_v60  ;;  %v3346_v17 = vld [vmem:[#allocation2 + $0x30] sm:$0x7]  ;;  %v12656_v31 = vsel %vm4301_vm10, %v4306_v11, %v4310_v7  ;;  %v12665_v29 = vsel %vm2263_vm1, %v4639_v21, %v4643_v12 }
 0x5aa   : > { %7754 = vmatprep.mubr.msk.f32.mxu0 %vm3235_vm6, %v3459_v13  ;;  %7760 = vmatprep.mubr.msk.f32.mxu1 %vm3235_vm6, %v3459_v13  ;;  %v3347_v19 = vld [vmem:[#allocation2 + $0x38] sm:$0x7]  ;;  %v3460_v22 = vrot.slane %v3346_v17, 1  ;;  %v9091_v60 = vpack.c.bf16 %v3282_v43, %v3278_v40  ;;  %v3309_v43 = vld [vmem:[#allocation13 + $0x1c8] sm:$0xff] }
 0x5ab   : > { %3559 = vmatmul.mubr.f32.gmra.mrb[18].mxu0 %v12606_v28  ;;  %3648 = vmatmul.mubr.f32.gmra.mrb[50].mxu1 %v12606_v28  ;;  %v3462_v24 = vrot.slane %v3347_v19, 1  ;;  %v3280_v28 = vld [vmem:[#allocation13 + $0xe0] sm:$0xff]  ;;  %v3298_v19 = vld [vmem:[#allocation13 + $0x170] sm:$0xff] }
 0x5ac   : > { %9040 = vmatpush1.bf16.msra.mxu0 %v9039_v9  ;;  %9084 = vmatpush1.bf16.msra.mxu1 %v9083_v10  ;;  %v3461_v54 = vsel %vm3449_vm7, %v3456_v34, %v3460_v22  ;;  %v9047_v59 = vpack.c.bf16 %v3280_v28, %v3276_v39  ;;  %v3290_v34 = vld [vmem:[#allocation13 + $0x130] sm:$0xff]  ;;  %v3295_v9 = vld [vmem:[#allocation13 + $0x158] sm:$0xff]  ;;  %v9099_v46 = vpack.c.bf16 %v3298_v19, %v3294_v20 }
 0x5ad   : > { %v3463_v6 = vsel %vm3449_vm7, %v3458_v16, %v3462_v24  ;;  %9042 = vmatprep.subr.bf16.mxu0 %v9041_v26  ;;  %9086 = vmatprep.subr.bf16.mxu1 %v9085_v36  ;;  %v3297_v16 = vld [vmem:[#allocation13 + $0x168] sm:$0xff]  ;;  %v3299_v10 = vld [vmem:[#allocation13 + $0x178] sm:$0xff]  ;;  %v9095_v13 = vpack.c.bf16 %v3290_v34, %v3286_v63  ;;  %v3292_v26 = vld [vmem:[#allocation13 + $0x140] sm:$0xff] }
 0x5ae   : > { %7755 = vmatprep.mubr.msk.f32.mxu0 %vm3235_vm6, %v3463_v6  ;;  %7761 = vmatprep.mubr.msk.f32.mxu1 %vm3235_vm6, %v3463_v6  ;;  %v3296_v36 = vld [vmem:[#allocation13 + $0x160] sm:$0xff]  ;;  %v9053_v17 = vpack.c.bf16 %v3297_v16, %v3293_v52  ;;  %v9097_v18 = vpack.c.bf16 %v3299_v10, %v3295_v9  ;;  %v3302_v28 = vld [vmem:[#allocation13 + $0x190] sm:$0xff]  ;;  %v3317_v63 = vld [vmem:[#allocation13 + $0x208] sm:$0xff]  ;;  %v9107_v16 = vpack.c.bf16 %v3314_v62, %v3310_v61 }
 0x5af   : > { %3565 = vmatmul.mubr.f32.gmra.mrb[20].mxu0 %v3461_v54  ;;  %3654 = vmatmul.mubr.f32.gmra.mrb[52].mxu1 %v3461_v54  ;;  %v9055_v33 = vpack.c.bf16 %v3296_v36, %v3292_v26  ;;  %v3306_v40 = vld [vmem:[#allocation13 + $0x1b0] sm:$0xff]  ;;  %v3313_v54 = vld [vmem:[#allocation13 + $0x1e8] sm:$0xff]  ;;  %v3319_v52 = vld [vmem:[#allocation13 + $0x218] sm:$0xff] }
 0x5b0   : > { %9044 = vmatpush1.bf16.msra.mxu0 %v9043_v35  ;;  %9088 = vmatpush1.bf16.msra.mxu1 %v9087_v44  ;;  %v3300_v35 = vld [vmem:[#allocation13 + $0x180] sm:$0xff]  ;;  %v9103_v49 = vpack.c.bf16 %v3306_v40, %v3302_v28  ;;  %v3321_v34 = vld [vmem:[#allocation13 + $0x228] sm:$0xff]  ;;  %v3322_v26 = vld [vmem:[#allocation13 + $0x230] sm:$0xff] }
 0x5b1   : > { %7756 = vmatprep.mubr.msk.f32.mxu0 %vm3235_vm6, %v3462_v24  ;;  %7762 = vmatprep.mubr.msk.f32.mxu1 %vm3235_vm6, %v3462_v24  ;;  %v3305_v24 = vld [vmem:[#allocation13 + $0x1a8] sm:$0xff]  ;;  %v3304_v44 = vld [vmem:[#allocation13 + $0x1a0] sm:$0xff]  ;;  %v3331_v20 = vld [vmem:[#allocation13 + $0x278] sm:$0xff] }
 0x5b2   : > { %9046 = vmatprep.subr.bf16.mxu0 %v9045_v45  ;;  %9090 = vmatprep.subr.bf16.mxu1 %v9089_v47  ;;  %v9057_v39 = vpack.c.bf16 %v3305_v24, %v3301_v25  ;;  %v3311_v45 = vld [vmem:[#allocation13 + $0x1d8] sm:$0xff]  ;;  %v9059_v48 = vpack.c.bf16 %v3304_v44, %v3300_v35  ;;  %v3316_v9 = vld [vmem:[#allocation13 + $0x200] sm:$0xff]  ;;  %v3325_v36 = vld [vmem:[#allocation13 + $0x248] sm:$0xff] }
 0x5b3   : > { %3571 = vmatmul.mubr.f32.gmra.mrb[22].mxu0 %v3460_v22  ;;  %3660 = vmatmul.mubr.f32.gmra.mrb[54].mxu1 %v3460_v22  ;;  %v3303_v22 = vld [vmem:[#allocation13 + $0x198] sm:$0xff]  ;;  %v3320_v10 = vld [vmem:[#allocation13 + $0x220] sm:$0xff]  ;;  %v3330_v35 = vld [vmem:[#allocation13 + $0x270] sm:$0xff] }
 0x5b4   : > { %9048 = vmatpush1.bf16.msra.mxu0 %v9047_v59  ;;  %9092 = vmatpush1.bf16.msra.mxu1 %v9091_v60  ;;  %v9101_v6 = vpack.c.bf16 %v3307_v32, %v3303_v22  ;;  %v3315_v47 = vld [vmem:[#allocation13 + $0x1f8] sm:$0xff]  ;;  %v9061_v59 = vpack.c.bf16 %v3313_v54, %v3309_v43  ;;  %v9067_v19 = vpack.c.bf16 %v3320_v10, %v3316_v9  ;;  %v3324_v24 = vld [vmem:[#allocation13 + $0x240] sm:$0xff]  ;;  %v3333_v44 = vld [vmem:[#allocation13 + $0x288] sm:$0xff] }
 0x5b5   : > { %7765 = vmatprep.mubr.msk.f32.mxu0 %vm3235_vm6, %v3245_v14  ;;  %7771 = vmatprep.mubr.msk.f32.mxu1 %vm3235_vm6, %v3245_v14  ;;  %v9105_v60 = vpack.c.bf16 %v3315_v47, %v3311_v45  ;;  %v9065_v14 = vpack.c.bf16 %v3321_v34, %v3317_v63  ;;  %v3328_v22 = vld [vmem:[#allocation13 + $0x260] sm:$0xff]  ;;  %v3339_v28 = vld [vmem:[#allocation13 + $0x2b8] sm:$0xff]  ;;  %v3872_v62 = vld [vmem:[#allocation13 + $0x5c8] sm:$0xff] }
 0x5b6   : > { %9050 = vmatprep.subr.bf16.mxu0 %v9049_v3  ;;  %9094 = vmatprep.subr.bf16.mxu1 %v9093_v5  ;;  %v3323_v3 = vld [vmem:[#allocation13 + $0x238] sm:$0xff]  ;;  %v9063_v5 = vpack.c.bf16 %v3312_v58, %v3308_v51  ;;  %v9071_v40 = vpack.c.bf16 %v3328_v22, %v3324_v24  ;;  %v3332_v54 = vld [vmem:[#allocation13 + $0x280] sm:$0xff]  ;;  %v3338_v51 = vld [vmem:[#allocation13 + $0x2b0] sm:$0xff] }
 0x5b7   : > { %v3343_v61 = vld [vmem:[#allocation13 + $0x2d8] sm:$0xf]  ;;  %v3876_v63 = vld [vmem:[#allocation13 + $0x5e8] sm:$0xff]  ;;  %v3875_v9 = vld [vmem:[#allocation13 + $0x5e0] sm:$0xff] }
 0x5b8   : > { %9052 = vmatpush1.bf16.msra.mxu0 %v9051_v27  ;;  %9096 = vmatpush1.bf16.msra.mxu1 %v9095_v13  ;;  %v9109_v27 = vpack.c.bf16 %v3323_v3, %v3319_v52  ;;  %v3318_v13 = vld [vmem:[#allocation13 + $0x210] sm:$0xff]  ;;  %v3874_v34 = vld [vmem:[#allocation13 + $0x5d8] sm:$0xff]  ;;  %v3340_v3 = vld [vmem:[#allocation13 + $0x2c0] sm:$0xf] }
 0x5b9   : > { %9054 = vmatprep.subr.bf16.mxu0 %v9053_v17  ;;  %9098 = vmatprep.subr.bf16.mxu1 %v9097_v18  ;;  %v3329_v17 = vld [vmem:[#allocation13 + $0x268] sm:$0xff]  ;;  %v3327_v18 = vld [vmem:[#allocation13 + $0x258] sm:$0xff]  ;;  %v9111_v25 = vpack.c.bf16 %v3322_v26, %v3318_v13  ;;  %v3873_v10 = vld [vmem:[#allocation13 + $0x5d0] sm:$0xff] }
 0x5ba   : > { %v9069_v32 = vpack.c.bf16 %v3329_v17, %v3325_v36  ;;  %v3878_v52 = vld [vmem:[#allocation13 + $0x5f8] sm:$0xff]  ;;  %v3880_v26 = vld [vmem:[#allocation13 + $0x608] sm:$0xff]  ;;  %v3883_v24 = vld [vmem:[#allocation13 + $0x620] sm:$0xff] }
 0x5bb   : > { %v9165_v13 = vpack.c.bf16 %v3878_v52, %v3874_v34  ;;  %v3884_v36 = vld [vmem:[#allocation13 + $0x628] sm:$0xff]  ;;  %v3882_v17 = vld [vmem:[#allocation13 + $0x618] sm:$0xff]  ;;  %v3881_v22 = vld [vmem:[#allocation13 + $0x610] sm:$0xff] }
 0x5bc   : > { %9056 = vmatpush1.bf16.msra.mxu0 %v9055_v33  ;;  %9100 = vmatpush1.bf16.msra.mxu1 %v9099_v46  ;;  %v9113_v33 = vpack.c.bf16 %v3331_v20, %v3327_v18  ;;  %v3326_v46 = vld [vmem:[#allocation13 + $0x250] sm:$0xff]  ;;  %v3886_v18 = vld [vmem:[#allocation13 + $0x638] sm:$0xff] }
 0x5bd   : > { %9058 = vmatprep.subr.bf16.mxu0 %v9057_v39  ;;  %9102 = vmatprep.subr.bf16.mxu1 %v9101_v6  ;;  %v3337_v39 = vld [vmem:[#allocation13 + $0x2a8] sm:$0xff]  ;;  %v3335_v6 = vld [vmem:[#allocation13 + $0x298] sm:$0xff]  ;;  %v9115_v43 = vpack.c.bf16 %v3330_v35, %v3326_v46  ;;  %v9169_v46 = vpack.c.bf16 %v3886_v18, %v3882_v17  ;;  %v3897_v34 = vld [vmem:[#allocation13 + $0x690] sm:$0xff] }
 0x5be   : > { %v9073_v45 = vpack.c.bf16 %v3337_v39, %v3333_v44  ;;  %v9117_v47 = vpack.c.bf16 %v3339_v28, %v3335_v6  ;;  %v3888_v35 = vld [vmem:[#allocation13 + $0x648] sm:$0xff]  ;;  %v3890_v39 = vld [vmem:[#allocation13 + $0x658] sm:$0xff]  ;;  %v3901_v52 = vld [vmem:[#allocation13 + $0x6b0] sm:$0xff] }
 0x5bf   : > { %v3892_v44 = vld [vmem:[#allocation13 + $0x668] sm:$0xff]  ;;  %v3894_v6 = vld [vmem:[#allocation13 + $0x678] sm:$0xff] }
 0x5c0   : > { %9060 = vmatpush1.bf16.msra.mxu0 %v9059_v48  ;;  %9104 = vmatpush1.bf16.msra.mxu1 %v9103_v49  ;;  %v3336_v48 = vld [vmem:[#allocation13 + $0x2a0] sm:$0xff]  ;;  %v3334_v49 = vld [vmem:[#allocation13 + $0x290] sm:$0xff] }
 0x5c1   : > { %9062 = vmatprep.subr.bf16.mxu0 %v9061_v59  ;;  %9106 = vmatprep.subr.bf16.mxu1 %v9105_v60  ;;  %v9075_v58 = vpack.c.bf16 %v3336_v48, %v3332_v54  ;;  %v9119_v59 = vpack.c.bf16 %v3338_v51, %v3334_v49  ;;  %v3341_v60 = vld [vmem:[#allocation13 + $0x2c8] sm:$0xf]  ;;  %v3889_v54 = vld [vmem:[#allocation13 + $0x650] sm:$0xff]  ;;  %v9173_v48 = vpack.c.bf16 %v3894_v6, %v3890_v39  ;;  %v3914_v39 = vld [vmem:[#allocation13 + $0x718] sm:$0xff] }
 0x5c2   : > { %v3896_v49 = vld [vmem:[#allocation13 + $0x688] sm:$0xff]  ;;  %v3918_v6 = vld [vmem:[#allocation13 + $0x738] sm:$0xff] }
 0x5c3   : > { %v3900_v51 = vld [vmem:[#allocation13 + $0x6a8] sm:$0xff] }
 0x5c4   : > { %9064 = vmatpush1.bf16.msra.mxu0 %v9063_v5  ;;  %9108 = vmatpush1.bf16.msra.mxu1 %v9107_v16  ;;  %v3342_v5 = vld [vmem:[#allocation13 + $0x2d0] sm:$0xf]  ;;  %v3871_v16 = vld [vmem:[#allocation13 + $0x5c0] sm:$0xff] }
 0x5c5   : > { %9066 = vmatprep.subr.bf16.mxu0 %v9065_v14  ;;  %9110 = vmatprep.subr.bf16.mxu1 %v9109_v27  ;;  %v3877_v14 = vld [vmem:[#allocation13 + $0x5f0] sm:$0xff]  ;;  %v9121_v27 = vpack.c.bf16 %v3876_v63, %v3872_v62  ;;  %v9123_v20 = vpack.c.bf16 %v3875_v9, %v3871_v16  ;;  %v3899_v63 = vld [vmem:[#allocation13 + $0x6a0] sm:$0xff]  ;;  %v3908_v16 = vld [vmem:[#allocation13 + $0x6e8] sm:$0xff] }
 0x5c6   : > { %v3251_v9 = vld [vmem:[#allocation2 + $0x38] sm:$0x3] }
 0x5c8   : > { %9068 = vmatpush1.bf16.msra.mxu0 %v9067_v19  ;;  %9112 = vmatpush1.bf16.msra.mxu1 %v9111_v25  ;;  %v9167_v19 = vpack.c.bf16 %v3877_v14, %v3873_v10  ;;  %v3879_v25 = vld [vmem:[#allocation13 + $0x600] sm:$0xff]  ;;  %v9133_v10 = vpack.c.bf16 %v3900_v51, %v3896_v49  ;;  %v3920_v49 = vld [vmem:[#allocation13 + $0x748] sm:$0xff] }
 0x5c9   : > { %9070 = vmatprep.subr.bf16.mxu0 %v9069_v32  ;;  %9114 = vmatprep.subr.bf16.mxu1 %v9113_v33  ;;  %v3885_v32 = vld [vmem:[#allocation13 + $0x630] sm:$0xff]  ;;  %v9125_v33 = vpack.c.bf16 %v3884_v36, %v3880_v26  ;;  %v3910_v26 = vld [vmem:[#allocation13 + $0x6f8] sm:$0xff]  ;;  %v3250_v36 = vld [vmem:[#allocation2 + $0x30] sm:$0x3] }
 0x5ca   : > { %v9171_v28 = vpack.c.bf16 %v3885_v32, %v3881_v22  ;;  %v3905_v32 = vld [vmem:[#allocation13 + $0x6d0] sm:$0xff]  ;;  %v3924_v51 = vld [vmem:[#allocation13 + $0x768] sm:$0xff] }
 0x5cc   : > { %9072 = vmatpush1.bf16.msra.mxu0 %v9071_v40  ;;  %9116 = vmatpush1.bf16.msra.mxu1 %v9115_v43  ;;  %v3887_v40 = vld [vmem:[#allocation13 + $0x640] sm:$0xff] }
 0x5cd   : > { %9074 = vmatprep.subr.bf16.mxu0 %v9073_v45  ;;  %9118 = vmatprep.subr.bf16.mxu1 %v9117_v47  ;;  %v3891_v43 = vld [vmem:[#allocation13 + $0x660] sm:$0xff]  ;;  %v3893_v45 = vld [vmem:[#allocation13 + $0x670] sm:$0xff]  ;;  %v9129_v47 = vpack.c.bf16 %v3892_v44, %v3888_v35  ;;  %v3916_v44 = vld [vmem:[#allocation13 + $0x728] sm:$0xff] }
 0x5ce   : > { %v9175_v62 = vpack.c.bf16 %v3893_v45, %v3889_v54  ;;  %v9185_v45 = vpack.c.bf16 %v3918_v6, %v3914_v39  ;;  %v3939_v39 = vld [vmem:[#allocation13 + $0x7e0] sm:$0xff] }
 0x5d0   : > { %9076 = vmatpush1.bf16.msra.mxu0 %v9075_v58  ;;  %9120 = vmatpush1.bf16.msra.mxu1 %v9119_v59  ;;  %v3898_v58 = vld [vmem:[#allocation13 + $0x698] sm:$0xff] }
 0x5d1   : > { %7763 = vmatprep.subr.msk.mxu0 %vm2263_vm1, %v3341_v60  ;;  %7769 = vmatprep.subr.msk.mxu1 %vm2263_vm1, %v3343_v61  ;;  %v3902_v59 = vld [vmem:[#allocation13 + $0x6b8] sm:$0xff]  ;;  %v3895_v60 = vld [vmem:[#allocation13 + $0x680] sm:$0xff]  ;;  %v9131_v61 = vpack.c.bf16 %v3891_v43, %v3887_v40 }
 0x5d2   : > { %v9177_v14 = vpack.c.bf16 %v3902_v59, %v3898_v58  ;;  %v9135_v17 = vpack.c.bf16 %v3899_v63, %v3895_v60  ;;  %v3911_v40 = vld [vmem:[#allocation13 + $0x700] sm:$0xff]  ;;  %v3922_v58 = vld [vmem:[#allocation13 + $0x758] sm:$0xff] }
 0x5d3   : > { %v3915_v43 = vld [vmem:[#allocation13 + $0x720] sm:$0xff]  ;;  %v3926_v59 = vld [vmem:[#allocation13 + $0x778] sm:$0xff] }
 0x5d4   : > { %7764 = vmatpush1.msk.msra.mxu0 %vm2263_vm1, %v3340_v3  ;;  %7770 = vmatpush1.msk.msra.mxu1 %vm2263_vm1, %v3342_v5  ;;  %v3867_v3 = vld [vmem:[#allocation2 + $0x8] sm:$0xfc]  ;;  %v9143_v60 = vpack.c.bf16 %v3915_v43, %v3911_v40  ;;  %v3923_v63 = vld [vmem:[#allocation13 + $0x760] sm:$0xff]  ;;  %v3941_v40 = vld [vmem:[#allocation13 + $0x7f0] sm:$0xff] }
 0x5d5   : > { %3753 = vmatmul.mubr.f32.vlgmr.msra.gmra.mrb[16].mxu0 %v12589_v1  ;;  %3842 = vmatmul.mubr.f32.vlgmr.msra.gmra.mrb[48].mxu1 %v12589_v1  ;;  %v9127_v1 = vpack.c.bf16 %v3883_v24, %v3879_v25  ;;  %v3904_v5 = vld [vmem:[#allocation13 + $0x6c8] sm:$0xff]  ;;  %v3971_v18 = vrot.slane %v3867_v3, 2  ;;  %v3907_v25 = vld [vmem:[#allocation13 + $0x6e0] sm:$0xff]  ;;  %v3921_v3 = vld [vmem:[#allocation13 + $0x750] sm:$0xff] }
 0x5d6   : > { %9122 = vmatprep.subr.bf16.mxu0 %v9121_v27  ;;  %9166 = vmatprep.subr.bf16.mxu1 %v9165_v13  ;;  %v3972_v27 = vrot.slane %v12615_v38, 2  ;;  %v3906_v13 = vld [vmem:[#allocation13 + $0x6d8] sm:$0xff]  ;;  %v9137_v24 = vpack.c.bf16 %v3908_v16, %v3904_v5  ;;  %v3925_v5 = vld [vmem:[#allocation13 + $0x770] sm:$0xff]  ;;  %v3928_v16 = vld [vmem:[#allocation13 + $0x788] sm:$0xff] }
 0x5d7   : > { %7766 = vmatprep.mubr.msk.f32.mxu0 %vm3235_vm6, %v12615_v38  ;;  %7772 = vmatprep.mubr.msk.f32.mxu1 %vm3235_vm6, %v12615_v38  ;;  %v9181_v22 = vpack.c.bf16 %v3910_v26, %v3906_v13  ;;  %v9191_v26 = vpack.c.bf16 %v3925_v5, %v3921_v3  ;;  %v3944_v43 = vld [vmem:[#allocation13 + $0x808] sm:$0xff]  ;;  %v3958_v3 = vld [vmem:[#allocation13 + $0x878] sm:$0xff]  ;;  %v4581_v38 = vld [vmem:[#allocation13 + $0xcd0] sm:$0xff] }
 0x5d8   : > { %9124 = vmatpush1.bf16.msra.mxu0 %v9123_v20  ;;  %9168 = vmatpush1.bf16.msra.mxu1 %v9167_v19  ;;  %v9179_v20 = vpack.c.bf16 %v3901_v52, %v3897_v34  ;;  %v3903_v19 = vld [vmem:[#allocation13 + $0x6c0] sm:$0xff]  ;;  %v3973_v35 = vsel %vm3967_vm8, %v3971_v18, %v3972_v27  ;;  %v9145_v34 = vpack.c.bf16 %v3924_v51, %v3920_v49 }
 0x5d9   : > { %3759 = vmatmul.mubr.f32.gmra.mrb[18].mxu0 %v12593_v8  ;;  %3848 = vmatmul.mubr.f32.gmra.mrb[50].mxu1 %v12593_v8  ;;  %v9189_v52 = vpack.c.bf16 %v3926_v59, %v3922_v58  ;;  %v3943_v51 = vld [vmem:[#allocation13 + $0x800] sm:$0xff] }
 0x5da   : > { %9126 = vmatprep.subr.bf16.mxu0 %v9125_v33  ;;  %9170 = vmatprep.subr.bf16.mxu1 %v9169_v46  ;;  %v3909_v33 = vld [vmem:[#allocation13 + $0x6f0] sm:$0xff]  ;;  %v3912_v46 = vld [vmem:[#allocation13 + $0x708] sm:$0xff]  ;;  %v3947_v58 = vld [vmem:[#allocation13 + $0x820] sm:$0xff] }
 0x5db   : > { %7767 = vmatprep.mubr.msk.f32.mxu0 %vm3235_vm6, %v12634_v2  ;;  %7773 = vmatprep.mubr.msk.f32.mxu1 %vm3235_vm6, %v12634_v2  ;;  %v9141_v54 = vpack.c.bf16 %v3916_v44, %v3912_v46  ;;  %v3935_v44 = vld [vmem:[#allocation13 + $0x7c0] sm:$0xff]  ;;  %v9159_v5 = vpack.c.bf16 %v3947_v58, %v3943_v51  ;;  %v3869_v51 = vld [vmem:[#allocation2 + $0x38] sm:$0xf] }
 0x5dc   : > { %9128 = vmatpush1.bf16.msra.mxu0 %v9127_v1  ;;  %9172 = vmatpush1.bf16.msra.mxu1 %v9171_v28  ;;  %v9139_v1 = vpack.c.bf16 %v3907_v25, %v3903_v19  ;;  %v9183_v28 = vpack.c.bf16 %v3909_v33, %v3905_v32  ;;  %v3929_v19 = vld [vmem:[#allocation13 + $0x790] sm:$0xff]  ;;  %v3938_v32 = vld [vmem:[#allocation13 + $0x7d8] sm:$0xff] }
 0x5dd   : > { %3765 = vmatmul.mubr.f32.gmra.mrb[20].mxu0 %v12596_v15  ;;  %3854 = vmatmul.mubr.f32.gmra.mrb[52].mxu1 %v12596_v15  ;;  %v3933_v25 = vld [vmem:[#allocation13 + $0x7b0] sm:$0xff]  ;;  %v3942_v33 = vld [vmem:[#allocation13 + $0x7f8] sm:$0xff] }
 0x5de   : > { %9130 = vmatprep.subr.bf16.mxu0 %v9129_v47  ;;  %9174 = vmatprep.subr.bf16.mxu1 %v9173_v48  ;;  %v3913_v47 = vld [vmem:[#allocation13 + $0x710] sm:$0xff] }
 0x5df   : > { %7768 = vmatprep.mubr.msk.f32.mxu0 %vm3235_vm6, %v3251_v9  ;;  %7774 = vmatprep.mubr.msk.f32.mxu1 %vm3235_vm6, %v3251_v9  ;;  %v3917_v48 = vld [vmem:[#allocation13 + $0x730] sm:$0xff]  ;;  %v3932_v9 = vld [vmem:[#allocation13 + $0x7a8] sm:$0xff] }
 0x5e0   : > { %9132 = vmatpush1.bf16.msra.mxu0 %v9131_v61  ;;  %9176 = vmatpush1.bf16.msra.mxu1 %v9175_v62  ;;  %v9187_v61 = vpack.c.bf16 %v3917_v48, %v3913_v47  ;;  %v3919_v62 = vld [vmem:[#allocation13 + $0x740] sm:$0xff]  ;;  %v9149_v18 = vpack.c.bf16 %v3932_v9, %v3928_v16  ;;  %v3950_v47 = vld [vmem:[#allocation13 + $0x838] sm:$0xff]  ;;  %v9155_v48 = vpack.c.bf16 %v3939_v39, %v3935_v44 }
 0x5e1   : > { %3771 = vmatmul.mubr.f32.gmra.mrb[22].mxu0 %v3250_v36  ;;  %3860 = vmatmul.mubr.f32.gmra.mrb[54].mxu1 %v3250_v36  ;;  %v9147_v13 = vpack.c.bf16 %v3923_v63, %v3919_v62  ;;  %v3927_v36 = vld [vmem:[#allocation13 + $0x780] sm:$0xff]  ;;  %v3949_v62 = vld [vmem:[#allocation13 + $0x830] sm:$0xff]  ;;  %v3952_v63 = vld [vmem:[#allocation13 + $0x848] sm:$0xff] }
 0x5e2   : > { %9134 = vmatprep.subr.bf16.mxu0 %v9133_v10  ;;  %9178 = vmatprep.subr.bf16.mxu1 %v9177_v14  ;;  %v3930_v10 = vld [vmem:[#allocation13 + $0x798] sm:$0xff]  ;;  %v3951_v9 = vld [vmem:[#allocation13 + $0x840] sm:$0xff] }
 0x5e3   : > { %7777 = vmatprep.mubr.msk.f32.mxu0 %vm3235_vm6, %v3973_v35  ;;  %7783 = vmatprep.mubr.msk.f32.mxu1 %vm3235_vm6, %v3973_v35  ;;  %v3934_v14 = vld [vmem:[#allocation13 + $0x7b8] sm:$0xff]  ;;  %v9195_v35 = vpack.c.bf16 %v3933_v25, %v3929_v19  ;;  %v3960_v19 = vld [vmem:[#allocation13 + $0x888] sm:$0xf]  ;;  %v4205_v39 = vld [vmem:[#allocation13 + $0x8a0] sm:$0xff] }
 0x5e4   : > { %9136 = vmatpush1.bf16.msra.mxu0 %v9135_v17  ;;  %9180 = vmatpush1.bf16.msra.mxu1 %v9179_v20  ;;  %v3931_v17 = vld [vmem:[#allocation13 + $0x7a0] sm:$0xff]  ;;  %v9193_v20 = vpack.c.bf16 %v3934_v14, %v3930_v10  ;;  %v3962_v25 = vld [vmem:[#allocation13 + $0x898] sm:$0xf] }
 0x5e5   : > { %9138 = vmatprep.subr.bf16.mxu0 %v9137_v24  ;;  %9182 = vmatprep.subr.bf16.mxu1 %v9181_v22  ;;  %v3936_v24 = vld [vmem:[#allocation13 + $0x7c8] sm:$0xff]  ;;  %v9151_v46 = vpack.c.bf16 %v3931_v17, %v3927_v36  ;;  %v3957_v36 = vld [vmem:[#allocation13 + $0x870] sm:$0xff] }
 0x5e6   : > { %v3940_v22 = vld [vmem:[#allocation13 + $0x7e8] sm:$0xff] }
 0x5e7   : > { %v9153_v6 = vpack.c.bf16 %v3940_v22, %v3936_v24  ;;  %v4206_v24 = vld [vmem:[#allocation13 + $0x8a8] sm:$0xff] }
 0x5e8   : > { %9140 = vmatpush1.bf16.msra.mxu0 %v9139_v1  ;;  %9184 = vmatpush1.bf16.msra.mxu1 %v9183_v28  ;;  %v9197_v1 = vpack.c.bf16 %v3942_v33, %v3938_v32  ;;  %v3937_v28 = vld [vmem:[#allocation13 + $0x7d0] sm:$0xff]  ;;  %v4210_v22 = vld [vmem:[#allocation13 + $0x8c8] sm:$0xff]  ;;  %v4208_v32 = vld [vmem:[#allocation13 + $0x8b8] sm:$0xff] }
 0x5e9   : > { %9142 = vmatprep.subr.bf16.mxu0 %v9141_v54  ;;  %9186 = vmatprep.subr.bf16.mxu1 %v9185_v45  ;;  %v3948_v54 = vld [vmem:[#allocation13 + $0x828] sm:$0xff]  ;;  %v3946_v45 = vld [vmem:[#allocation13 + $0x818] sm:$0xff]  ;;  %v9199_v49 = vpack.c.bf16 %v3941_v40, %v3937_v28  ;;  %v4211_v28 = vld [vmem:[#allocation13 + $0x8d0] sm:$0xff]  ;;  %v9209_v40 = vpack.c.bf16 %v4210_v22, %v4206_v24 }
 0x5ea   : > { %v9157_v59 = vpack.c.bf16 %v3948_v54, %v3944_v43  ;;  %v4212_v33 = vld [vmem:[#allocation13 + $0x8d8] sm:$0xff]  ;;  %v3976_v54 = vrot.slane %v12634_v2, 2 }
 0x5eb   : > { %v9253_v43 = vpack.c.bf16 %v4212_v33, %v4208_v32  ;;  %v4230_v32 = vld [vmem:[#allocation13 + $0x968] sm:$0xff] }
 0x5ec   : > { %9144 = vmatpush1.bf16.msra.mxu0 %v9143_v60  ;;  %9188 = vmatpush1.bf16.msra.mxu1 %v9187_v61  ;;  %v9201_v60 = vpack.c.bf16 %v3950_v47, %v3946_v45  ;;  %v3945_v61 = vld [vmem:[#allocation13 + $0x810] sm:$0xff]  ;;  %v4214_v45 = vld [vmem:[#allocation13 + $0x8e8] sm:$0xff] }
 0x5ed   : > { %9146 = vmatprep.subr.bf16.mxu0 %v9145_v34  ;;  %9190 = vmatprep.subr.bf16.mxu1 %v9189_v52  ;;  %v3956_v34 = vld [vmem:[#allocation13 + $0x868] sm:$0xff]  ;;  %v3954_v52 = vld [vmem:[#allocation13 + $0x858] sm:$0xff]  ;;  %v9203_v16 = vpack.c.bf16 %v3949_v62, %v3945_v61  ;;  %v4213_v61 = vld [vmem:[#allocation13 + $0x8e0] sm:$0xff] }
 0x5ee   : > { %v9161_v10 = vpack.c.bf16 %v3956_v34, %v3952_v63  ;;  %v9205_v14 = vpack.c.bf16 %v3958_v3, %v3954_v52  ;;  %v4218_v47 = vld [vmem:[#allocation13 + $0x908] sm:$0xff]  ;;  %v4217_v62 = vld [vmem:[#allocation13 + $0x900] sm:$0xff]  ;;  %v4215_v63 = vld [vmem:[#allocation13 + $0x8f0] sm:$0xff]  ;;  %v3977_v3 = vsel %vm3967_vm8, %v3972_v27, %v3976_v54 }
 0x5ef   : > { %v4219_v34 = vld [vmem:[#allocation13 + $0x910] sm:$0xff]  ;;  %v4225_v27 = vld [vmem:[#allocation13 + $0x940] sm:$0xff]  ;;  %v4234_v33 = vld [vmem:[#allocation13 + $0x988] sm:$0xff] }
 0x5f0   : > { %9148 = vmatpush1.bf16.msra.mxu0 %v9147_v13  ;;  %9192 = vmatpush1.bf16.msra.mxu1 %v9191_v26  ;;  %v3955_v13 = vld [vmem:[#allocation13 + $0x860] sm:$0xff]  ;;  %v3953_v26 = vld [vmem:[#allocation13 + $0x850] sm:$0xff] }
 0x5f1   : > { %9150 = vmatprep.subr.bf16.mxu0 %v9149_v18  ;;  %9194 = vmatprep.subr.bf16.mxu1 %v9193_v20  ;;  %v9163_v17 = vpack.c.bf16 %v3955_v13, %v3951_v9  ;;  %v9207_v18 = vpack.c.bf16 %v3957_v36, %v3953_v26  ;;  %v3866_v20 = vld [vmem:[#allocation2] sm:$0xfc]  ;;  %v3868_v52 = vld [vmem:[#allocation2 + $0x30] sm:$0xf]  ;;  %v3980_v9 = vrot.slane %v3869_v51, 2  ;;  %v4228_v13 = vld [vmem:[#allocation13 + $0x958] sm:$0xff]  ;;  %v9215_v26 = vpack.c.bf16 %v4217_v62, %v4213_v61 }
 0x5f2   : > { %v3968_v44 = vrot.slane %v3866_v20, 2  ;;  %v9259_v36 = vpack.c.bf16 %v4219_v34, %v4215_v63  ;;  %v4223_v20 = vld [vmem:[#allocation13 + $0x930] sm:$0xff]  ;;  %v4244_v51 = vld [vmem:[#allocation13 + $0x9d8] sm:$0xff]  ;;  %v4241_v61 = vld [vmem:[#allocation13 + $0x9c0] sm:$0xff] }
 0x5f3   : > { %v4239_v34 = vld [vmem:[#allocation13 + $0x9b0] sm:$0xff] }
 0x5f4   : > { %9152 = vmatpush1.bf16.msra.mxu0 %v9151_v46  ;;  %9196 = vmatpush1.bf16.msra.mxu1 %v9195_v35  ;;  %v3959_v46 = vld [vmem:[#allocation13 + $0x880] sm:$0xf]  ;;  %v3961_v35 = vld [vmem:[#allocation13 + $0x890] sm:$0xf]  ;;  %v3970_v58 = vsel %vm3967_vm8, %v3968_v44, %v3969_v23  ;;  %v4226_v23 = vld [vmem:[#allocation13 + $0x948] sm:$0xff] }
 0x5f5   : > { %9154 = vmatprep.subr.bf16.mxu0 %v9153_v6  ;;  %9198 = vmatprep.subr.bf16.mxu1 %v9197_v1  ;;  %v4209_v6 = vld [vmem:[#allocation13 + $0x8c0] sm:$0xff]  ;;  %v4207_v1 = vld [vmem:[#allocation13 + $0x8b0] sm:$0xff] }
 0x5f8   : > { %9156 = vmatpush1.bf16.msra.mxu0 %v9155_v48  ;;  %9200 = vmatpush1.bf16.msra.mxu1 %v9199_v49  ;;  %v4216_v48 = vld [vmem:[#allocation13 + $0x8f8] sm:$0xff] }
 0x5f9   : > { %9158 = vmatprep.subr.bf16.mxu0 %v9157_v59  ;;  %9202 = vmatprep.subr.bf16.mxu1 %v9201_v60  ;;  %v4220_v49 = vld [vmem:[#allocation13 + $0x918] sm:$0xff]  ;;  %v9211_v59 = vpack.c.bf16 %v4209_v6, %v4205_v39  ;;  %v9255_v60 = vpack.c.bf16 %v4211_v28, %v4207_v1  ;;  %v4229_v6 = vld [vmem:[#allocation13 + $0x960] sm:$0xff]  ;;  %v4231_v28 = vld [vmem:[#allocation13 + $0x970] sm:$0xff] }
 0x5fa   : > { %v4233_v1 = vld [vmem:[#allocation13 + $0x980] sm:$0xff] }
 0x5fc   : > { %9160 = vmatpush1.bf16.msra.mxu0 %v9159_v5  ;;  %9204 = vmatpush1.bf16.msra.mxu1 %v9203_v16  ;;  %v9213_v5 = vpack.c.bf16 %v4218_v47, %v4214_v45  ;;  %v9257_v16 = vpack.c.bf16 %v4220_v49, %v4216_v48  ;;  %v9221_v45 = vpack.c.bf16 %v4234_v33, %v4230_v32  ;;  %v4242_v48 = vld [vmem:[#allocation13 + $0x9c8] sm:$0xff]  ;;  %v4240_v49 = vld [vmem:[#allocation13 + $0x9b8] sm:$0xff]  ;;  %v4253_v32 = vld [vmem:[#allocation13 + $0xa20] sm:$0xff] }
 0x5fd   : > { %9162 = vmatprep.subr.bf16.mxu0 %v9161_v10  ;;  %9206 = vmatprep.subr.bf16.mxu1 %v9205_v14  ;;  %v4222_v10 = vld [vmem:[#allocation13 + $0x928] sm:$0xff]  ;;  %v4224_v14 = vld [vmem:[#allocation13 + $0x938] sm:$0xff]  ;;  %v9269_v63 = vpack.c.bf16 %v4244_v51, %v4240_v49  ;;  %v4257_v33 = vld [vmem:[#allocation13 + $0xa40] sm:$0xff] }
 0x5fe   : > { %v9217_v24 = vpack.c.bf16 %v4226_v23, %v4222_v10  ;;  %v9261_v22 = vpack.c.bf16 %v4228_v13, %v4224_v14  ;;  %v4252_v10 = vld [vmem:[#allocation13 + $0xa18] sm:$0xff]  ;;  %v4245_v13 = vld [vmem:[#allocation13 + $0x9e0] sm:$0xff]  ;;  %v4263_v49 = vld [vmem:[#allocation13 + $0xa70] sm:$0xff] }
 0x5ff   : > { %v4267_v51 = vld [vmem:[#allocation13 + $0xa90] sm:$0xff] }
 0x600   : > { %9164 = vmatpush1.bf16.msra.mxu0 %v9163_v17  ;;  %9208 = vmatpush1.bf16.msra.mxu1 %v9207_v18  ;;  %v3978_v17 = vrot.slane %v3868_v52, 2  ;;  %v4221_v18 = vld [vmem:[#allocation13 + $0x920] sm:$0xff]  ;;  %v4243_v52 = vld [vmem:[#allocation13 + $0x9d0] sm:$0xff] }
 0x601   : > { %7775 = vmatprep.subr.msk.mxu0 %vm2263_vm1, %v3960_v19  ;;  %7781 = vmatprep.subr.msk.mxu1 %vm2263_vm1, %v3962_v25  ;;  %v4227_v19 = vld [vmem:[#allocation13 + $0x950] sm:$0xff]  ;;  %v3981_v25 = vsel %vm3967_vm8, %v3976_v54, %v3980_v9  ;;  %v9219_v44 = vpack.c.bf16 %v4225_v27, %v4221_v18  ;;  %v4238_v54 = vld [vmem:[#allocation13 + $0x9a8] sm:$0xff]  ;;  %v9271_v14 = vpack.c.bf16 %v4243_v52, %v4239_v34  ;;  %v4273_v34 = vld [vmem:[#allocation13 + $0xac0] sm:$0xff] }
 0x602   : > { %v9263_v39 = vpack.c.bf16 %v4227_v19, %v4223_v20  ;;  %v9225_v62 = vpack.c.bf16 %v4242_v48, %v4238_v54  ;;  %v4247_v18 = vld [vmem:[#allocation13 + $0x9f0] sm:$0xff]  ;;  %v4258_v20 = vld [vmem:[#allocation13 + $0xa48] sm:$0xff]  ;;  %v4256_v19 = vld [vmem:[#allocation13 + $0xa38] sm:$0xff] }
 0x603   : > { %v4251_v27 = vld [vmem:[#allocation13 + $0xa10] sm:$0xff]  ;;  %v4261_v54 = vld [vmem:[#allocation13 + $0xa60] sm:$0xff] }
 0x604   : > { %7776 = vmatpush1.msk.msra.mxu0 %vm2263_vm1, %v3959_v46  ;;  %7782 = vmatpush1.msk.msra.mxu1 %vm2263_vm1, %v3961_v35  ;;  %v4232_v46 = vld [vmem:[#allocation13 + $0x978] sm:$0xff] }
 0x605   : > { %4071 = vmatmul.mubr.f32.vlgmr.msra.gmra.mrb[16].mxu0 %v3970_v58  ;;  %4160 = vmatmul.mubr.f32.vlgmr.msra.gmra.mrb[48].mxu1 %v3970_v58  ;;  %v4236_v35 = vld [vmem:[#allocation13 + $0x998] sm:$0xff] }
 0x606   : > { %9210 = vmatprep.subr.bf16.mxu0 %v9209_v40  ;;  %9254 = vmatprep.subr.bf16.mxu1 %v9253_v43  ;;  %v4201_v40 = vld [vmem:[#allocation2 + $0x8] sm:$0xf8]  ;;  %v4235_v43 = vld [vmem:[#allocation13 + $0x990] sm:$0xff]  ;;  %v9265_v47 = vpack.c.bf16 %v4236_v35, %v4232_v46 }
 0x607   : > { %7778 = vmatprep.mubr.msk.f32.mxu0 %vm3235_vm6, %v3977_v3  ;;  %7784 = vmatprep.mubr.msk.f32.mxu1 %vm3235_vm6, %v3977_v3  ;;  %v4305_v58 = vrot.slane %v4201_v40, 3  ;;  %v4246_v3 = vld [vmem:[#allocation13 + $0x9e8] sm:$0xff]  ;;  %v9235_v40 = vpack.c.bf16 %v4257_v33, %v4253_v32 }
 0x608   : > { %9212 = vmatpush1.bf16.msra.mxu0 %v9211_v59  ;;  %9256 = vmatpush1.bf16.msra.mxu1 %v9255_v60  ;;  %v9267_v59 = vpack.c.bf16 %v4235_v43, %v4231_v28  ;;  %v4237_v60 = vld [vmem:[#allocation13 + $0x9a0] sm:$0xff]  ;;  %v4268_v28 = vld [vmem:[#allocation13 + $0xa98] sm:$0xff] }
 0x609   : > { %4077 = vmatmul.mubr.f32.gmra.mrb[18].mxu0 %v12613_v37  ;;  %4166 = vmatmul.mubr.f32.gmra.mrb[50].mxu1 %v12613_v37  ;;  %v3979_v37 = vsel %vm3967_vm8, %v3974_v30, %v3978_v17  ;;  %v9223_v30 = vpack.c.bf16 %v4233_v1, %v4229_v6  ;;  %v9227_v23 = vpack.c.bf16 %v4241_v61, %v4237_v60  ;;  %v4266_v6 = vld [vmem:[#allocation13 + $0xa88] sm:$0xff]  ;;  %v4264_v1 = vld [vmem:[#allocation13 + $0xa78] sm:$0xff] }
 0x60a   : > { %9214 = vmatprep.subr.bf16.mxu0 %v9213_v5  ;;  %9258 = vmatprep.subr.bf16.mxu1 %v9257_v16  ;;  %v4307_v5 = vsel %vm4301_vm10, %v4305_v58, %v4306_v11  ;;  %v4250_v16 = vld [vmem:[#allocation13 + $0xa08] sm:$0xff]  ;;  %v9281_v48 = vpack.c.bf16 %v4268_v28, %v4264_v1  ;;  %v4276_v60 = vld [vmem:[#allocation13 + $0xad8] sm:$0xff] }
 0x60b   : > { %7779 = vmatprep.mubr.msk.f32.mxu0 %vm3235_vm6, %v3981_v25  ;;  %7785 = vmatprep.mubr.msk.f32.mxu1 %vm3235_vm6, %v3981_v25  ;;  %v4254_v11 = vld [vmem:[#allocation13 + $0xa28] sm:$0xff]  ;;  %v4260_v25 = vld [vmem:[#allocation13 + $0xa58] sm:$0xff] }
 0x60c   : > { %9216 = vmatpush1.bf16.msra.mxu0 %v9215_v26  ;;  %9260 = vmatpush1.bf16.msra.mxu1 %v9259_v36  ;;  %v4249_v26 = vld [vmem:[#allocation13 + $0xa00] sm:$0xff]  ;;  %v9229_v36 = vpack.c.bf16 %v4250_v16, %v4246_v3  ;;  %v9233_v46 = vpack.c.bf16 %v4258_v20, %v4254_v11  ;;  %v9277_v35 = vpack.c.bf16 %v4260_v25, %v4256_v19  ;;  %v4274_v58 = vld [vmem:[#allocation13 + $0xac8] sm:$0xff]  ;;  %v4275_v16 = vld [vmem:[#allocation13 + $0xad0] sm:$0xff] }
 0x60d   : > { %4083 = vmatmul.mubr.f32.gmra.mrb[20].mxu0 %v3979_v37  ;;  %4172 = vmatmul.mubr.f32.gmra.mrb[52].mxu1 %v3979_v37  ;;  %v4255_v37 = vld [vmem:[#allocation13 + $0xa30] sm:$0xff]  ;;  %v4286_v19 = vld [vmem:[#allocation13 + $0xb28] sm:$0xff] }
 0x60e   : > { %9218 = vmatprep.subr.bf16.mxu0 %v9217_v24  ;;  %9262 = vmatprep.subr.bf16.mxu1 %v9261_v22  ;;  %v9231_v24 = vpack.c.bf16 %v4249_v26, %v4245_v13  ;;  %v9275_v22 = vpack.c.bf16 %v4251_v27, %v4247_v18  ;;  %v4279_v11 = vld [vmem:[#allocation13 + $0xaf0] sm:$0xff]  ;;  %v4290_v25 = vld [vmem:[#allocation13 + $0xb48] sm:$0xff] }
 0x60f   : > { %7780 = vmatprep.mubr.msk.f32.mxu0 %vm3235_vm6, %v3980_v9  ;;  %7786 = vmatprep.mubr.msk.f32.mxu1 %vm3235_vm6, %v3980_v9  ;;  %v4248_v9 = vld [vmem:[#allocation13 + $0x9f8] sm:$0xff]  ;;  %v4283_v20 = vld [vmem:[#allocation13 + $0xb10] sm:$0xff] }
 0x610   : > { %9220 = vmatpush1.bf16.msra.mxu0 %v9219_v44  ;;  %9264 = vmatpush1.bf16.msra.mxu1 %v9263_v39  ;;  %v4259_v44 = vld [vmem:[#allocation13 + $0xa50] sm:$0xff]  ;;  %v4262_v39 = vld [vmem:[#allocation13 + $0xa68] sm:$0xff]  ;;  %v9291_v33 = vpack.c.bf16 %v4283_v20, %v4279_v11 }
 0x611   : > { %4089 = vmatmul.mubr.f32.gmra.mrb[22].mxu0 %v3978_v17  ;;  %4178 = vmatmul.mubr.f32.gmra.mrb[54].mxu1 %v3978_v17  ;;  %v9273_v17 = vpack.c.bf16 %v4252_v10, %v4248_v9  ;;  %v9279_v43 = vpack.c.bf16 %v4259_v44, %v4255_v37  ;;  %v4278_v9 = vld [vmem:[#allocation13 + $0xae8] sm:$0xff]  ;;  %v4289_v44 = vld [vmem:[#allocation13 + $0xb40] sm:$0xff] }
 0x612   : > { %9222 = vmatprep.subr.bf16.mxu0 %v9221_v45  ;;  %9266 = vmatprep.subr.bf16.mxu1 %v9265_v47  ;;  %v4265_v45 = vld [vmem:[#allocation13 + $0xa80] sm:$0xff]  ;;  %v9237_v47 = vpack.c.bf16 %v4266_v6, %v4262_v39  ;;  %v4282_v10 = vld [vmem:[#allocation13 + $0xb08] sm:$0xff]  ;;  %v4287_v39 = vld [vmem:[#allocation13 + $0xb30] sm:$0xff] }
 0x613   : > { %7789 = vmatprep.mubr.msk.f32.mxu0 %vm3235_vm6, %v4307_v5  ;;  %7795 = vmatprep.mubr.msk.f32.mxu1 %vm3235_vm6, %v4307_v5  ;;  %v9239_v61 = vpack.c.bf16 %v4265_v45, %v4261_v54  ;;  %v4271_v5 = vld [vmem:[#allocation13 + $0xab0] sm:$0xff]  ;;  %v9245_v18 = vpack.c.bf16 %v4282_v10, %v4278_v9  ;;  %v4296_v54 = vld [vmem:[#allocation13 + $0xb78] sm:$0xf]  ;;  %v4540_v45 = vld [vmem:[#allocation13 + $0xb88] sm:$0xff] }
 0x614   : > { %9224 = vmatpush1.bf16.msra.mxu0 %v9223_v30  ;;  %9268 = vmatpush1.bf16.msra.mxu1 %v9267_v59  ;;  %v4270_v30 = vld [vmem:[#allocation13 + $0xaa8] sm:$0xff]  ;;  %v4272_v59 = vld [vmem:[#allocation13 + $0xab8] sm:$0xff]  ;;  %v9287_v26 = vpack.c.bf16 %v4275_v16, %v4271_v5  ;;  %v4291_v6 = vld [vmem:[#allocation13 + $0xb50] sm:$0xff] }
 0x615   : > { %9226 = vmatprep.subr.bf16.mxu0 %v9225_v62  ;;  %9270 = vmatprep.subr.bf16.mxu1 %v9269_v63  ;;  %v9283_v62 = vpack.c.bf16 %v4267_v51, %v4263_v49  ;;  %v4269_v63 = vld [vmem:[#allocation13 + $0xaa0] sm:$0xff]  ;;  %v9241_v52 = vpack.c.bf16 %v4274_v58, %v4270_v30  ;;  %v9285_v3 = vpack.c.bf16 %v4276_v60, %v4272_v59  ;;  %v4546_v49 = vld [vmem:[#allocation13 + $0xbb8] sm:$0xff]  ;;  %v4295_v30 = vld [vmem:[#allocation13 + $0xb70] sm:$0xf] }
 0x616   : > { %v9243_v13 = vpack.c.bf16 %v4273_v34, %v4269_v63  ;;  %v9295_v28 = vpack.c.bf16 %v4291_v6, %v4287_v39  ;;  %v4293_v51 = vld [vmem:[#allocation13 + $0xb60] sm:$0xf]  ;;  %v4552_v5 = vld [vmem:[#allocation13 + $0xbe8] sm:$0xff]  ;;  %v4550_v16 = vld [vmem:[#allocation13 + $0xbd8] sm:$0xff] }
 0x617   : > { %v4539_v59 = vld [vmem:[#allocation13 + $0xb80] sm:$0xff]  ;;  %v4554_v9 = vld [vmem:[#allocation13 + $0xbf8] sm:$0xff] }
 0x618   : > { %9228 = vmatpush1.bf16.msra.mxu0 %v9227_v23  ;;  %9272 = vmatpush1.bf16.msra.mxu1 %v9271_v14  ;;  %v4280_v23 = vld [vmem:[#allocation13 + $0xaf8] sm:$0xff]  ;;  %v4543_v60 = vld [vmem:[#allocation13 + $0xba0] sm:$0xff]  ;;  %v9345_v11 = vpack.c.bf16 %v4554_v9, %v4550_v16  ;;  %v4573_v9 = vld [vmem:[#allocation13 + $0xc90] sm:$0xff] }
 0x619   : > { %9230 = vmatprep.subr.bf16.mxu0 %v9229_v36  ;;  %9274 = vmatprep.subr.bf16.mxu1 %v9273_v17  ;;  %v4284_v14 = vld [vmem:[#allocation13 + $0xb18] sm:$0xff]  ;;  %v4277_v36 = vld [vmem:[#allocation13 + $0xae0] sm:$0xff] }
 0x61a   : > { %v4281_v17 = vld [vmem:[#allocation13 + $0xb00] sm:$0xff]  ;;  %v9289_v27 = vpack.c.bf16 %v4284_v14, %v4280_v23  ;;  %v9299_v23 = vpack.c.bf16 %v4543_v60, %v4539_v59  ;;  %v4576_v60 = vld [vmem:[#allocation13 + $0xca8] sm:$0xff] }
 0x61b   : > { %v9247_v32 = vpack.c.bf16 %v4281_v17, %v4277_v36  ;;  %v4551_v36 = vld [vmem:[#allocation13 + $0xbe0] sm:$0xff]  ;;  %v4549_v17 = vld [vmem:[#allocation13 + $0xbd0] sm:$0xff] }
 0x61c   : > { %9232 = vmatpush1.bf16.msra.mxu0 %v9231_v24  ;;  %9276 = vmatpush1.bf16.msra.mxu1 %v9275_v22  ;;  %v4288_v24 = vld [vmem:[#allocation13 + $0xb38] sm:$0xff] }
 0x61d   : > { %9234 = vmatprep.subr.bf16.mxu0 %v9233_v46  ;;  %9278 = vmatprep.subr.bf16.mxu1 %v9277_v35  ;;  %v4292_v22 = vld [vmem:[#allocation13 + $0xb58] sm:$0xff]  ;;  %v4285_v46 = vld [vmem:[#allocation13 + $0xb20] sm:$0xff]  ;;  %v9249_v35 = vpack.c.bf16 %v4290_v25, %v4286_v19  ;;  %v4556_v19 = vld [vmem:[#allocation13 + $0xc08] sm:$0xff] }
 0x61e   : > { %v9293_v37 = vpack.c.bf16 %v4292_v22, %v4288_v24  ;;  %v9251_v1 = vpack.c.bf16 %v4289_v44, %v4285_v46  ;;  %v4558_v25 = vld [vmem:[#allocation13 + $0xc18] sm:$0xff]  ;;  %v4555_v46 = vld [vmem:[#allocation13 + $0xc00] sm:$0xff]  ;;  %v4561_v44 = vld [vmem:[#allocation13 + $0xc30] sm:$0xff] }
 0x61f   : > { %v4562_v24 = vld [vmem:[#allocation13 + $0xc38] sm:$0xff] }
 0x620   : > { %9236 = vmatpush1.bf16.msra.mxu0 %v9235_v40  ;;  %9280 = vmatpush1.bf16.msra.mxu1 %v9279_v43  ;;  %v4200_v40 = vld [vmem:[#allocation2] sm:$0xf8]  ;;  %v4294_v43 = vld [vmem:[#allocation13 + $0xb68] sm:$0xf]  ;;  %v9349_v6 = vpack.c.bf16 %v4562_v24, %v4558_v25  ;;  %v4590_v24 = vld [vmem:[#allocation13 + $0xd18] sm:$0xff] }
 0x621   : > { %9238 = vmatprep.subr.bf16.mxu0 %v9237_v47  ;;  %9282 = vmatprep.subr.bf16.mxu1 %v9281_v48  ;;  %v4544_v47 = vld [vmem:[#allocation13 + $0xba8] sm:$0xff]  ;;  %v4542_v48 = vld [vmem:[#allocation13 + $0xb98] sm:$0xff]  ;;  %v4302_v58 = vrot.slane %v4200_v40, 3 }
 0x622   : > { %v9297_v63 = vpack.c.bf16 %v4544_v47, %v4540_v45  ;;  %v9341_v34 = vpack.c.bf16 %v4546_v49, %v4542_v48  ;;  %v4566_v40 = vld [vmem:[#allocation13 + $0xc58] sm:$0xff]  ;;  %v4563_v47 = vld [vmem:[#allocation13 + $0xc40] sm:$0xff]  ;;  %v4535_v48 = vld [vmem:[#allocation2 + $0x8] sm:$0xf0] }
 0x623   : > { %v4304_v10 = vsel %vm4301_vm10, %v4302_v58, %v4303_v41  ;;  %v4560_v41 = vld [vmem:[#allocation13 + $0xc28] sm:$0xff]  ;;  %v4565_v49 = vld [vmem:[#allocation13 + $0xc50] sm:$0xff] }
 0x624   : > { %9240 = vmatpush1.bf16.msra.mxu0 %v9239_v61  ;;  %9284 = vmatpush1.bf16.msra.mxu1 %v9283_v62  ;;  %v4541_v61 = vld [vmem:[#allocation13 + $0xb90] sm:$0xff]  ;;  %v9305_v39 = vpack.c.bf16 %v4560_v41, %v4556_v19  ;;  %v4592_v25 = vld [vmem:[#allocation13 + $0xd28] sm:$0xff] }
 0x625   : > { %9242 = vmatprep.subr.bf16.mxu0 %v9241_v52  ;;  %9286 = vmatprep.subr.bf16.mxu1 %v9285_v3  ;;  %v4545_v62 = vld [vmem:[#allocation13 + $0xbb0] sm:$0xff]  ;;  %v4548_v52 = vld [vmem:[#allocation13 + $0xbc8] sm:$0xff] }
 0x626   : > { %v4203_v3 = vld [vmem:[#allocation2 + $0x38] sm:$0x1f]  ;;  %v9343_v14 = vpack.c.bf16 %v4545_v62, %v4541_v61 }
 0x627   : > { %v4314_v20 = vrot.slane %v4203_v3, 3  ;;  %v4574_v61 = vld [vmem:[#allocation13 + $0xc98] sm:$0xff]  ;;  %v4575_v3 = vld [vmem:[#allocation13 + $0xca0] sm:$0xff]  ;;  %v4585_v41 = vld [vmem:[#allocation13 + $0xcf0] sm:$0xff] }
 0x628   : > { %9244 = vmatpush1.bf16.msra.mxu0 %v9243_v13  ;;  %9288 = vmatpush1.bf16.msra.mxu1 %v9287_v26  ;;  %v4547_v13 = vld [vmem:[#allocation13 + $0xbc0] sm:$0xff]  ;;  %v4202_v26 = vld [vmem:[#allocation2 + $0x30] sm:$0x1f]  ;;  %v4578_v62 = vld [vmem:[#allocation13 + $0xcb8] sm:$0xff] }
 0x629   : > { %9246 = vmatprep.subr.bf16.mxu0 %v9245_v18  ;;  %9290 = vmatprep.subr.bf16.mxu1 %v9289_v27  ;;  %v4553_v18 = vld [vmem:[#allocation13 + $0xbf0] sm:$0xff]  ;;  %v9301_v27 = vpack.c.bf16 %v4552_v5, %v4548_v52  ;;  %v9303_v22 = vpack.c.bf16 %v4551_v36, %v4547_v13  ;;  %v4571_v52 = vld [vmem:[#allocation13 + $0xc80] sm:$0xff]  ;;  %v9357_v16 = vpack.c.bf16 %v4578_v62, %v4574_v61  ;;  %v4584_v13 = vld [vmem:[#allocation13 + $0xce8] sm:$0xff] }
 0x62a   : > { %v4586_v36 = vld [vmem:[#allocation13 + $0xcf8] sm:$0xff]  ;;  %v4603_v62 = vld [vmem:[#allocation13 + $0xd80] sm:$0xff] }
 0x62c   : > { %9248 = vmatpush1.bf16.msra.mxu0 %v9247_v32  ;;  %9292 = vmatpush1.bf16.msra.mxu1 %v9291_v33  ;;  %v9347_v32 = vpack.c.bf16 %v4553_v18, %v4549_v17  ;;  %v4312_v33 = vrot.slane %v4202_v26, 3  ;;  %v4582_v26 = vld [vmem:[#allocation13 + $0xcd8] sm:$0xff]  ;;  %v9315_v17 = vpack.c.bf16 %v4575_v3, %v4571_v52  ;;  %v4605_v52 = vld [vmem:[#allocation13 + $0xd90] sm:$0xff] }
 0x62d   : > { %9250 = vmatprep.subr.bf16.mxu0 %v9249_v35  ;;  %9294 = vmatprep.subr.bf16.mxu1 %v9293_v37  ;;  %v4559_v35 = vld [vmem:[#allocation13 + $0xc20] sm:$0xff]  ;;  %v4557_v37 = vld [vmem:[#allocation13 + $0xc10] sm:$0xff]  ;;  %v9361_v19 = vpack.c.bf16 %v4586_v36, %v4582_v26 }
 0x62e   : > { %v9351_v45 = vpack.c.bf16 %v4561_v44, %v4557_v37  ;;  %v4609_v3 = vld [vmem:[#allocation13 + $0xdb0] sm:$0xff]  ;;  %v4615_v26 = vld [vmem:[#allocation13 + $0xde0] sm:$0xff] }
 0x630   : > { %9252 = vmatpush1.bf16.msra.mxu0 %v9251_v1  ;;  %9296 = vmatpush1.bf16.msra.mxu1 %v9295_v28  ;;  %v4564_v1 = vld [vmem:[#allocation13 + $0xc48] sm:$0xff] }
 0x631   : > { %7787 = vmatprep.subr.msk.mxu0 %vm2263_vm1, %v4294_v43  ;;  %7793 = vmatprep.subr.msk.mxu1 %vm2263_vm1, %v4296_v54  ;;  %v4568_v28 = vld [vmem:[#allocation13 + $0xc68] sm:$0xff]  ;;  %v4570_v43 = vld [vmem:[#allocation13 + $0xc78] sm:$0xff]  ;;  %v9307_v54 = vpack.c.bf16 %v4559_v35, %v4555_v46  ;;  %v4587_v46 = vld [vmem:[#allocation13 + $0xd00] sm:$0xff] }
 0x632   : > { %v9309_v58 = vpack.c.bf16 %v4568_v28, %v4564_v1  ;;  %v9353_v59 = vpack.c.bf16 %v4570_v43, %v4566_v40  ;;  %v4591_v35 = vld [vmem:[#allocation13 + $0xd20] sm:$0xff]  ;;  %v4600_v1 = vld [vmem:[#allocation13 + $0xd68] sm:$0xff]  ;;  %v4598_v28 = vld [vmem:[#allocation13 + $0xd58] sm:$0xff] }
 0x633   : > { %v4602_v40 = vld [vmem:[#allocation13 + $0xd78] sm:$0xff]  ;;  %v9323_v43 = vpack.c.bf16 %v4591_v35, %v4587_v46  ;;  %v4625_v46 = vld [vmem:[#allocation13 + $0xe30] sm:$0xff] }
 0x634   : > { %7788 = vmatpush1.msk.msra.mxu0 %vm2263_vm1, %v4293_v51  ;;  %7794 = vmatpush1.msk.msra.mxu1 %vm2263_vm1, %v4295_v30  ;;  %v4569_v51 = vld [vmem:[#allocation13 + $0xc70] sm:$0xff]  ;;  %v4572_v30 = vld [vmem:[#allocation13 + $0xc88] sm:$0xff] }
 0x635   : > { %4405 = vmatmul.mubr.f32.vlgmr.msra.gmra.mrb[16].mxu0 %v4304_v10  ;;  %4494 = vmatmul.mubr.f32.vlgmr.msra.gmra.mrb[48].mxu1 %v4304_v10  ;;  %v9313_v5 = vpack.c.bf16 %v4576_v60, %v4572_v30  ;;  %v4577_v10 = vld [vmem:[#allocation13 + $0xcb0] sm:$0xff]  ;;  %v4608_v30 = vld [vmem:[#allocation13 + $0xda8] sm:$0xff] }
 0x636   : > { %9298 = vmatprep.subr.bf16.mxu0 %v9297_v63  ;;  %9342 = vmatprep.subr.bf16.mxu1 %v9341_v34  ;;  %v4638_v63 = vrot.slane %v4535_v48, 4  ;;  %v9355_v34 = vpack.c.bf16 %v4569_v51, %v4565_v49  ;;  %v9359_v18 = vpack.c.bf16 %v4577_v10, %v4573_v9  ;;  %v4597_v48 = vld [vmem:[#allocation13 + $0xd50] sm:$0xff]  ;;  %v4604_v51 = vld [vmem:[#allocation13 + $0xd88] sm:$0xff]  ;;  %v4614_v9 = vld [vmem:[#allocation13 + $0xdd8] sm:$0xff] }
 0x637   : > { %7790 = vmatprep.mubr.msk.f32.mxu0 %vm3235_vm6, %v12656_v31  ;;  %7796 = vmatprep.mubr.msk.f32.mxu1 %vm3235_vm6, %v12656_v31  ;;  %v4315_v31 = vsel %vm4301_vm10, %v4310_v7, %v4314_v20  ;;  %v4567_v7 = vld [vmem:[#allocation13 + $0xc60] sm:$0xff]  ;;  %v4601_v49 = vld [vmem:[#allocation13 + $0xd70] sm:$0xff]  ;;  %v4618_v10 = vld [vmem:[#allocation13 + $0xdf8] sm:$0xff] }
 0x638   : > { %9300 = vmatpush1.bf16.msra.mxu0 %v9299_v23  ;;  %9344 = vmatpush1.bf16.msra.mxu1 %v9343_v14  ;;  %v4580_v23 = vld [vmem:[#allocation13 + $0xcc8] sm:$0xff]  ;;  %v4640_v14 = vsel %vm2263_vm1, %v4638_v63, %v4639_v21  ;;  %v9371_v61 = vpack.c.bf16 %v4601_v49, %v4597_v48  ;;  %v9329_v63 = vpack.c.bf16 %v4608_v30, %v4604_v51 }
 0x639   : > { %4411 = vmatmul.mubr.f32.gmra.mrb[18].mxu0 %v12626_v55  ;;  %4500 = vmatmul.mubr.f32.gmra.mrb[50].mxu1 %v12626_v55  ;;  %v4313_v55 = vsel %vm4301_vm10, %v4308_v42, %v4312_v33  ;;  %v9311_v42 = vpack.c.bf16 %v4567_v7, %v4563_v47  ;;  %v4588_v21 = vld [vmem:[#allocation13 + $0xd08] sm:$0xff]  ;;  %v9369_v7 = vpack.c.bf16 %v4602_v40, %v4598_v28  ;;  %v4629_v28 = vld [vmem:[#allocation13 + $0xe50] sm:$0xf]  ;;  %v4537_v40 = vld [vmem:[#allocation2 + $0x38] sm:$0x3f] }
 0x63a   : > { %9302 = vmatprep.subr.bf16.mxu0 %v9301_v27  ;;  %9346 = vmatprep.subr.bf16.mxu1 %v9345_v11  ;;  %v4579_v27 = vld [vmem:[#allocation13 + $0xcc0] sm:$0xff]  ;;  %v9321_v37 = vpack.c.bf16 %v4592_v25, %v4588_v21 }
 0x63b   : > { %7791 = vmatprep.mubr.msk.f32.mxu0 %vm3235_vm6, %v4315_v31  ;;  %7797 = vmatprep.mubr.msk.f32.mxu1 %vm3235_vm6, %v4315_v31  ;;  %v4583_v11 = vld [vmem:[#allocation13 + $0xce0] sm:$0xff]  ;;  %v4589_v31 = vld [vmem:[#allocation13 + $0xd10] sm:$0xff] }
 0x63c   : > { %9304 = vmatpush1.bf16.msra.mxu0 %v9303_v22  ;;  %9348 = vmatpush1.bf16.msra.mxu1 %v9347_v32  ;;  %v4594_v22 = vld [vmem:[#allocation13 + $0xd38] sm:$0xff]  ;;  %v9319_v32 = vpack.c.bf16 %v4583_v11, %v4579_v27  ;;  %v4617_v27 = vld [vmem:[#allocation13 + $0xdf0] sm:$0xff]  ;;  %v4620_v11 = vld [vmem:[#allocation13 + $0xe08] sm:$0xff] }
 0x63d   : > { %4417 = vmatmul.mubr.f32.gmra.mrb[20].mxu0 %v4313_v55  ;;  %4506 = vmatmul.mubr.f32.gmra.mrb[52].mxu1 %v4313_v55  ;;  %v9365_v44 = vpack.c.bf16 %v4594_v22, %v4590_v24  ;;  %v4619_v25 = vld [vmem:[#allocation13 + $0xe00] sm:$0xff] }
 0x63e   : > { %9306 = vmatprep.subr.bf16.mxu0 %v9305_v39  ;;  %9350 = vmatprep.subr.bf16.mxu1 %v9349_v6  ;;  %v4593_v39 = vld [vmem:[#allocation13 + $0xd30] sm:$0xff]  ;;  %v4596_v6 = vld [vmem:[#allocation13 + $0xd48] sm:$0xff] }
 0x63f   : > { %7792 = vmatprep.mubr.msk.f32.mxu0 %vm3235_vm6, %v4314_v20  ;;  %7798 = vmatprep.mubr.msk.f32.mxu1 %vm3235_vm6, %v4314_v20  ;;  %v9317_v20 = vpack.c.bf16 %v4584_v13, %v4580_v23  ;;  %v9367_v55 = vpack.c.bf16 %v4593_v39, %v4589_v31  ;;  %v9325_v47 = vpack.c.bf16 %v4600_v1, %v4596_v6  ;;  %v4611_v13 = vld [vmem:[#allocation13 + $0xdc0] sm:$0xff]  ;;  %v4628_v31 = vld [vmem:[#allocation13 + $0xe48] sm:$0xf]  ;;  %v4630_v39 = vld [vmem:[#allocation13 + $0xe58] sm:$0xf] }
 0x640   : > { %9308 = vmatpush1.bf16.msra.mxu0 %v9307_v54  ;;  %9352 = vmatpush1.bf16.msra.mxu1 %v9351_v45  ;;  %v4595_v54 = vld [vmem:[#allocation13 + $0xd40] sm:$0xff] }
 0x641   : > { %4423 = vmatmul.mubr.f32.gmra.mrb[22].mxu0 %v4312_v33  ;;  %4512 = vmatmul.mubr.f32.gmra.mrb[54].mxu1 %v4312_v33  ;;  %v9363_v33 = vpack.c.bf16 %v4585_v41, %v4581_v38  ;;  %v4599_v45 = vld [vmem:[#allocation13 + $0xd60] sm:$0xff]  ;;  %v4626_v38 = vld [vmem:[#allocation13 + $0xe38] sm:$0xff]  ;;  %v9335_v41 = vpack.c.bf16 %v4615_v26, %v4611_v13  ;;  %v5278_v13 = vld [vmem:[#allocation19 + $0x208] sm:$0xff] }
 0x642   : > { %9310 = vmatprep.subr.bf16.mxu0 %v9309_v58  ;;  %9354 = vmatprep.subr.bf16.mxu1 %v9353_v59  ;;  %v4606_v58 = vld [vmem:[#allocation13 + $0xd98] sm:$0xff]  ;;  %v9327_v60 = vpack.c.bf16 %v4599_v45, %v4595_v54  ;;  %v4627_v1 = vld [vmem:[#allocation13 + $0xe40] sm:$0xf]  ;;  %v4536_v54 = vld [vmem:[#allocation2 + $0x30] sm:$0x3f] }
 0x643   : > { %7801 = vmatprep.mubr.msk.f32.mxu0 %vm3235_vm6, %v4640_v14  ;;  %7807 = vmatprep.mubr.msk.f32.mxu1 %vm3235_vm6, %v4640_v14  ;;  %v4610_v59 = vld [vmem:[#allocation13 + $0xdb8] sm:$0xff]  ;;  %v9375_v14 = vpack.c.bf16 %v4609_v3, %v4605_v52  ;;  %v4645_v45 = vrot.slane %v4536_v54, 4 }
 0x644   : > { %9312 = vmatpush1.bf16.msra.mxu0 %v9311_v42  ;;  %9356 = vmatpush1.bf16.msra.mxu1 %v9355_v34  ;;  %v4607_v42 = vld [vmem:[#allocation13 + $0xda0] sm:$0xff]  ;;  %v9373_v34 = vpack.c.bf16 %v4610_v59, %v4606_v58  ;;  %v5223_v54 = vld [vmem:[#allocation19 + $0x50] sm:$0xff] }
 0x645   : > { %9314 = vmatprep.subr.bf16.mxu0 %v9313_v5  ;;  %9358 = vmatprep.subr.bf16.mxu1 %v9357_v16  ;;  %v4612_v5 = vld [vmem:[#allocation13 + $0xdc8] sm:$0xff]  ;;  %v9331_v23 = vpack.c.bf16 %v4607_v42, %v4603_v62  ;;  %v5280_v26 = vld [vmem:[#allocation19 + $0x218] sm:$0xff] }
 0x646   : > { %v4616_v16 = vld [vmem:[#allocation13 + $0xde8] sm:$0xff] }
 0x647   : > { %v9333_v36 = vpack.c.bf16 %v4616_v16, %v4612_v5 }
 0x648   : > { %9316 = vmatpush1.bf16.msra.mxu0 %v9315_v17  ;;  %9360 = vmatpush1.bf16.msra.mxu1 %v9359_v18  ;;  %v9377_v17 = vpack.c.bf16 %v4618_v10, %v4614_v9  ;;  %v4613_v18 = vld [vmem:[#allocation13 + $0xdd0] sm:$0xff]  ;;  %v4867_v10 = vld [vmem:[#allocation16] sm:$0xff] }
 0x649   : > { %9318 = vmatprep.subr.bf16.mxu0 %v9317_v20  ;;  %9362 = vmatprep.subr.bf16.mxu1 %v9361_v19  ;;  %v4624_v20 = vld [vmem:[#allocation13 + $0xe28] sm:$0xff]  ;;  %v4622_v19 = vld [vmem:[#allocation13 + $0xe18] sm:$0xff]  ;;  %v9379_v21 = vpack.c.bf16 %v4617_v27, %v4613_v18 }
 0x64a   : > { %v9337_v24 = vpack.c.bf16 %v4624_v20, %v4620_v11  ;;  %v9381_v22 = vpack.c.bf16 %v4626_v38, %v4622_v19  ;;  %v5215_v18 = vld [vmem:[#allocation19 + $0x10] sm:$0xff]  ;;  %v5218_v11 = vld [vmem:[#allocation19 + $0x28] sm:$0xff]  ;;  %v9489_v20 = vpack.c.bf16 %v5280_v26, %v5278_v13  ;;  %v5277_v19 = vld [vmem:[#allocation19 + $0x200] sm:$0xff] }
 0x64b   : > { %v5279_v38 = vld [vmem:[#allocation19 + $0x210] sm:$0xff]  ;;  %v5298_v13 = vld [vmem:[#allocation19 + $0x2a8] sm:$0xff]  ;;  %v5300_v26 = vld [vmem:[#allocation19 + $0x2b8] sm:$0xff] }
 0x64c   : > { %9320 = vmatpush1.bf16.msra.mxu0 %v9319_v32  ;;  %9364 = vmatpush1.bf16.msra.mxu1 %v9363_v33  ;;  %v4623_v32 = vld [vmem:[#allocation13 + $0xe20] sm:$0xff]  ;;  %v4621_v33 = vld [vmem:[#allocation13 + $0xe10] sm:$0xff] }
 0x64d   : > { %9322 = vmatprep.subr.bf16.mxu0 %v9321_v37  ;;  %9366 = vmatprep.subr.bf16.mxu1 %v9365_v44  ;;  %v9339_v35 = vpack.c.bf16 %v4623_v32, %v4619_v25  ;;  %v9383_v37 = vpack.c.bf16 %v4625_v46, %v4621_v33  ;;  %v4534_v44 = vld [vmem:[#allocation2] sm:$0xf0]  ;;  %v5284_v25 = vld [vmem:[#allocation19 + $0x238] sm:$0xff]  ;;  %v5219_v33 = vld [vmem:[#allocation19 + $0x30] sm:$0xff]  ;;  %v9491_v46 = vpack.c.bf16 %v5279_v38, %v5277_v19 }
 0x64e   : > { %v4635_v6 = vrot.slane %v4534_v44, 4  ;;  %v5217_v32 = vld [vmem:[#allocation19 + $0x20] sm:$0xff]  ;;  %v9509_v19 = vpack.c.bf16 %v5300_v26, %v5298_v13 }
 0x64f   : > { %v5297_v38 = vld [vmem:[#allocation19 + $0x2a0] sm:$0xff] }
 0x650   : > { %9324 = vmatpush1.bf16.msra.mxu0 %v9323_v43  ;;  %9368 = vmatpush1.bf16.msra.mxu1 %v9367_v55  ;;  %v4637_v43 = vsel %vm2263_vm1, %v4635_v6, %v4636_v56  ;;  %v4647_v55 = vrot.slane %v4537_v40, 4  ;;  %v4646_v56 = vsel %vm2263_vm1, %v4641_v57, %v4645_v45  ;;  %v5224_v6 = vld [vmem:[#allocation19 + $0x58] sm:$0xff] }
 0x651   : > { %9326 = vmatprep.subr.bf16.mxu0 %v9325_v47  ;;  %9370 = vmatprep.subr.bf16.mxu1 %v9369_v7  ;;  %v5044_v40 = vld [vmem:[#allocation18 + $0x8] sm:$0x1f] }
 0x652   : > { %v4648_v8 = vsel %vm2263_vm1, %v4643_v12, %v4647_v55 }
 0x654   : > { %9328 = vmatpush1.bf16.msra.mxu0 %v9327_v60  ;;  %9372 = vmatpush1.bf16.msra.mxu1 %v9371_v61 }
 0x655   : > { %9330 = vmatprep.subr.bf16.mxu0 %v9329_v63  ;;  %9374 = vmatprep.subr.bf16.mxu1 %v9373_v34 }
 0x658   : > { %9332 = vmatpush1.bf16.msra.mxu0 %v9331_v23  ;;  %9376 = vmatpush1.bf16.msra.mxu1 %v9375_v14  ;;  %v5214_v23 = vld [vmem:[#allocation19 + $0x8] sm:$0xff]  ;;  %v5216_v14 = vld [vmem:[#allocation19 + $0x18] sm:$0xff] }
 0x659   : > { %9334 = vmatprep.subr.bf16.mxu0 %v9333_v36  ;;  %9378 = vmatprep.subr.bf16.mxu1 %v9377_v17  ;;  %v4868_v36 = vld [vmem:[#allocation16 + $0x8] sm:$0x1f]  ;;  %v5213_v17 = vld [vmem:[#allocation19] sm:$0xff]  ;;  %v9425_v27 = vpack.c.bf16 %v5216_v14, %v5214_v23  ;;  %v5295_v23 = vld [vmem:[#allocation19 + $0x290] sm:$0xff] }
 0x65a   : > { %v5236_v14 = vld [vmem:[#allocation19 + $0xb8] sm:$0xff] }
 0x65c   : > { %9336 = vmatpush1.bf16.msra.mxu0 %v9335_v41  ;;  %9380 = vmatpush1.bf16.msra.mxu1 %v9379_v21  ;;  %v5220_v41 = vld [vmem:[#allocation19 + $0x38] sm:$0xff]  ;;  %v5282_v21 = vld [vmem:[#allocation19 + $0x228] sm:$0xff] }
 0x65d   : > { %9338 = vmatprep.subr.bf16.mxu0 %v9337_v24  ;;  %9382 = vmatprep.subr.bf16.mxu1 %v9381_v22  ;;  %v5043_v24 = vld [vmem:[#allocation18] sm:$0xff]  ;;  %v9427_v22 = vpack.c.bf16 %v5215_v18, %v5213_v17  ;;  %v9493_v44 = vpack.c.bf16 %v5284_v25, %v5282_v21  ;;  %v5233_v17 = vld [vmem:[#allocation19 + $0xa0] sm:$0xff]  ;;  %v5240_v21 = vld [vmem:[#allocation19 + $0xd8] sm:$0xff] }
 0x65e   : > { %v5235_v18 = vld [vmem:[#allocation19 + $0xb0] sm:$0xff]  ;;  %v5302_v25 = vld [vmem:[#allocation19 + $0x2c8] sm:$0xff] }
 0x660   : > { %9340 = vmatpush1.bf16.msra.mxu0 %v9339_v35  ;;  %9384 = vmatpush1.bf16.msra.mxu1 %v9383_v37  ;;  %v9429_v35 = vpack.c.bf16 %v5220_v41, %v5218_v11  ;;  %v5222_v37 = vld [vmem:[#allocation19 + $0x48] sm:$0xff]  ;;  %v5299_v41 = vld [vmem:[#allocation19 + $0x2b0] sm:$0xff] }
 0x661   : > { %7799 = vmatprep.subr.msk.mxu0 %vm2263_vm1, %v4628_v31  ;;  %7805 = vmatprep.subr.msk.mxu1 %vm2263_vm1, %v4630_v39  ;;  %v5281_v31 = vld [vmem:[#allocation19 + $0x220] sm:$0xff]  ;;  %v5283_v39 = vld [vmem:[#allocation19 + $0x230] sm:$0xff] }
 0x664   : > { %7800 = vmatpush1.msk.msra.mxu0 %vm2263_vm1, %v4627_v1  ;;  %7806 = vmatpush1.msk.msra.mxu1 %vm2263_vm1, %v4629_v28  ;;  %v5286_v1 = vld [vmem:[#allocation19 + $0x248] sm:$0xff]  ;;  %v5288_v28 = vld [vmem:[#allocation19 + $0x258] sm:$0xff] }
 0x665   : > { %4738 = vmatmul.mubr.f32.vlgmr.msra.gmra.mrb[16].mxu0 %v4637_v43  ;;  %4827 = vmatmul.mubr.f32.vlgmr.msra.gmra.mrb[48].mxu1 %v4637_v43  ;;  %v9431_v43 = vpack.c.bf16 %v5219_v33, %v5217_v32  ;;  %v5237_v32 = vld [vmem:[#allocation19 + $0xc0] sm:$0xff]  ;;  %v5239_v33 = vld [vmem:[#allocation19 + $0xd0] sm:$0xff] }
 0x666   : > { %7802 = vmatprep.mubr.msk.f32.mxu0 %vm3235_vm6, %v12665_v29  ;;  %7808 = vmatprep.mubr.msk.f32.mxu1 %vm3235_vm6, %v12665_v29 }
 0x669   : > { %4744 = vmatmul.mubr.f32.gmra.mrb[18].mxu0 %v12641_v4  ;;  %4833 = vmatmul.mubr.f32.gmra.mrb[50].mxu1 %v12641_v4 }
 0x66a   : > { %7803 = vmatprep.mubr.msk.f32.mxu0 %vm3235_vm6, %v4648_v8  ;;  %7809 = vmatprep.mubr.msk.f32.mxu1 %vm3235_vm6, %v4648_v8  ;;  %v9433_v8 = vpack.c.bf16 %v5224_v6, %v5222_v37  ;;  %v5242_v37 = vld [vmem:[#allocation19 + $0xe8] sm:$0xff]  ;;  %v5244_v6 = vld [vmem:[#allocation19 + $0xf8] sm:$0xff] }
 0x66d   : > { %4750 = vmatmul.mubr.f32.gmra.mrb[20].mxu0 %v4646_v56  ;;  %4839 = vmatmul.mubr.f32.gmra.mrb[52].mxu1 %v4646_v56  ;;  %v5226_v56 = vld [vmem:[#allocation19 + $0x68] sm:$0xff] }
 0x66e   : > { %7804 = vmatprep.mubr.msk.f32.mxu0 %vm3235_vm6, %v4647_v55  ;;  %7810 = vmatprep.mubr.msk.f32.mxu1 %vm3235_vm6, %v4647_v55  ;;  %v5221_v55 = vld [vmem:[#allocation19 + $0x40] sm:$0xff] }
 0x671   : > { %4756 = vmatmul.mubr.f32.gmra.mrb[22].mxu0 %v4645_v45  ;;  %4845 = vmatmul.mubr.f32.gmra.mrb[54].mxu1 %v4645_v45  ;;  %v9495_v45 = vpack.c.bf16 %v5283_v39, %v5281_v31  ;;  %v5301_v31 = vld [vmem:[#allocation19 + $0x2c0] sm:$0xff]  ;;  %v5303_v39 = vld [vmem:[#allocation19 + $0x2d0] sm:$0xff] }
 0x672   : > { %4953 = vmatprep.mubr.f32.mxu0 %v11085_v0  ;;  %5030 = vmatprep.mubr.f32.mxu1 %v11085_v0 }
 0x738   : > { %v4739_v2 = vpop.f32.mrb[16].mxu0  ;;  %v4828_v4 = vpop.f32.mrb[48].mxu1 }
 0x739   : > { %v4741_v12 = vpop.f32.mrb[17].mxu0  ;;  %v4830_v29 = vpop.f32.mrb[49].mxu1 }
 0x73c   : > { %v4745_v47 = vpop.f32.mrb[18].mxu0  ;;  %v4834_v15 = vpop.f32.mrb[50].mxu1 }
 0x73d   : > { %v9387_v7 = vpack.c.bf16 %v4745_v47, %v4739_v2  ;;  %v9397_v57 = vpack.c.bf16 %v4834_v15, %v4828_v4  ;;  %v4747_v48 = vpop.f32.mrb[19].mxu0  ;;  %v4836_v49 = vpop.f32.mrb[51].mxu1  ;;  %v9497_v2 = vpack.c.bf16 %v5288_v28, %v5286_v1  ;;  %v5285_v4 = vld [vmem:[#allocation19 + $0x240] sm:$0xff]  ;;  %v5290_v47 = vld [vmem:[#allocation19 + $0x268] sm:$0xff]  ;;  %v5292_v15 = vld [vmem:[#allocation19 + $0x278] sm:$0xff] }
 0x73e   : > { %v9385_v51 = vpack.c.bf16 %v4747_v48, %v4741_v12  ;;  %v9395_v30 = vpack.c.bf16 %v4836_v49, %v4830_v29  ;;  %v5287_v12 = vld [vmem:[#allocation19 + $0x250] sm:$0xff]  ;;  %v5228_v29 = vld [vmem:[#allocation19 + $0x78] sm:$0xff]  ;;  %v5306_v1 = vld [vmem:[#allocation19 + $0x2e8] sm:$0xff] }
 0x73f   : > { %v5227_v48 = vld [vmem:[#allocation19 + $0x70] sm:$0xff]  ;;  %v9499_v49 = vpack.c.bf16 %v5287_v12, %v5285_v4  ;;  %v5308_v28 = vld [vmem:[#allocation19 + $0x2f8] sm:$0xff]  ;;  %v5246_v4 = vld [vmem:[#allocation19 + $0x108] sm:$0xff] }
 0x740   : > { %v4751_v58 = vpop.f32.mrb[20].mxu0  ;;  %v4840_v59 = vpop.f32.mrb[52].mxu1  ;;  %9386 = vmatprep.subr.bf16.mxu0 %v9385_v51  ;;  %9396 = vmatprep.subr.bf16.mxu1 %v9395_v30  ;;  %v5248_v12 = vld [vmem:[#allocation19 + $0x118] sm:$0xff] }
 0x741   : > { %v4753_v60 = vpop.f32.mrb[21].mxu0  ;;  %v4842_v61 = vpop.f32.mrb[53].mxu1  ;;  %9388 = vmatpush1.bf16.msra.mxu0 %v9387_v7  ;;  %9398 = vmatpush1.bf16.msra.mxu1 %v9397_v57 }
 0x744   : > { %v4757_v62 = vpop.f32.mrb[22].mxu0  ;;  %v4846_v42 = vpop.f32.mrb[54].mxu1 }
 0x745   : > { %v9392_v63 = vpack.c.bf16 %v4757_v62, %v4751_v58  ;;  %v9402_v34 = vpack.c.bf16 %v4846_v42, %v4840_v59  ;;  %v4759_v52 = vpop.f32.mrb[23].mxu0  ;;  %v4848_v3 = vpop.f32.mrb[55].mxu1  ;;  %v9501_v58 = vpack.c.bf16 %v5292_v15, %v5290_v47  ;;  %v5289_v59 = vld [vmem:[#allocation19 + $0x260] sm:$0xff]  ;;  %v5294_v62 = vld [vmem:[#allocation19 + $0x288] sm:$0xff]  ;;  %v5296_v42 = vld [vmem:[#allocation19 + $0x298] sm:$0xff]  ;;  %v9457_v15 = vpack.c.bf16 %v5248_v12, %v5246_v4 }
 0x746   : > { %v9389_v16 = vpack.c.bf16 %v4759_v52, %v4753_v60  ;;  %v9399_v9 = vpack.c.bf16 %v4848_v3, %v4842_v61  ;;  %v5291_v60 = vld [vmem:[#allocation19 + $0x270] sm:$0xff]  ;;  %v5232_v61 = vld [vmem:[#allocation19 + $0x98] sm:$0xff]  ;;  %v5479_v12 = vld [vmem:[#allocation21 + $0x8] sm:$0xff] }
 0x747   : > { %v5231_v52 = vld [vmem:[#allocation19 + $0x90] sm:$0xff]  ;;  %v9503_v3 = vpack.c.bf16 %v5291_v60, %v5289_v59  ;;  %v5254_v60 = vld [vmem:[#allocation19 + $0x148] sm:$0xff] }
 0x748   : > { %9391 = vmatprep.subr.msk.bf16.mxu0 %vm12785_vm12, %v9389_v16  ;;  %9401 = vmatprep.subr.msk.bf16.mxu1 %vm12785_vm12, %v9399_v9  ;;  %v5251_v59 = vld [vmem:[#allocation19 + $0x130] sm:$0xff] }
 0x749   : > { %9394 = vmatpush1.bf16.msk.msra.mxu0 %vm12785_vm12, %v9392_v63  ;;  %9404 = vmatpush1.bf16.msk.msra.mxu1 %vm12785_vm12, %v9402_v34 }
 0x74a   : > { %9406 = vmatprep.subr.bf16.mxu0 %v9385_v51  ;;  %9416 = vmatprep.subr.bf16.mxu1 %v9395_v30  ;;  %v9437_v51 = vpack.c.bf16 %v5228_v29, %v5226_v56  ;;  %v5230_v30 = vld [vmem:[#allocation19 + $0x88] sm:$0xff]  ;;  %v5305_v56 = vld [vmem:[#allocation19 + $0x2e0] sm:$0xff] }
 0x74b   : > { %v9441_v5 = vpack.c.bf16 %v5232_v61, %v5230_v30  ;;  %v5256_v61 = vld [vmem:[#allocation19 + $0x158] sm:$0xff] }
 0x74c   : > { %7813 = vmatmul.mubr.msk.f32.vlgmr.msra.gmra.mrb[24].mxu0 %vm4869_vm13, %v4867_v10  ;;  %7817 = vmatmul.mubr.msk.f32.vlgmr.msra.gmra.mrb[56].mxu1 %vm4869_vm13, %v4867_v10  ;;  %v5293_v10 = vld [vmem:[#allocation19 + $0x280] sm:$0xff] }
 0x74d   : > { %9408 = vmatpush1.bf16.msra.mxu0 %v9387_v7  ;;  %9418 = vmatpush1.bf16.msra.mxu1 %v9397_v57  ;;  %v9435_v7 = vpack.c.bf16 %v5223_v54, %v5221_v55  ;;  %v5225_v57 = vld [vmem:[#allocation19 + $0x60] sm:$0xff]  ;;  %v9515_v55 = vpack.c.bf16 %v5303_v39, %v5301_v31  ;;  %v9453_v54 = vpack.c.bf16 %v5244_v6, %v5242_v37  ;;  %v5311_v31 = vld [vmem:[#allocation19 + $0x310] sm:$0xff]  ;;  %v5274_v6 = vld [vmem:[#allocation19 + $0x1e8] sm:$0xff] }
 0x74e   : > { %9411 = vmatprep.subr.msk.bf16.mxu0 %vm12785_vm12, %v9389_v16  ;;  %9421 = vmatprep.subr.msk.bf16.mxu1 %vm12785_vm12, %v9399_v9  ;;  %v5234_v16 = vld [vmem:[#allocation19 + $0xa8] sm:$0xff]  ;;  %v9505_v9 = vpack.c.bf16 %v5296_v42, %v5294_v62  ;;  %v9465_v42 = vpack.c.bf16 %v5256_v61, %v5254_v60  ;;  %v5480_v60 = vld [vmem:[#allocation21 + $0x10] sm:$0xff] }
 0x74f   : > { %4959 = vmatprep.mubr.f32.mxu0 %v11085_v0  ;;  %5036 = vmatprep.mubr.f32.mxu1 %v11085_v0  ;;  %v9445_v11 = vpack.c.bf16 %v5236_v14, %v5234_v16  ;;  %v5264_v14 = vld [vmem:[#allocation19 + $0x198] sm:$0xff] }
 0x750   : > { %7814 = vmatmul.mubr.msk.f32.gmra.mrb[26].mxu0 %vm4869_vm13, %v4868_v36  ;;  %7818 = vmatmul.mubr.msk.f32.gmra.mrb[58].mxu1 %vm4869_vm13, %v4868_v36 }
 0x751   : > { %9414 = vmatpush1.bf16.msk.msra.mxu0 %vm12785_vm12, %v9392_v63  ;;  %9424 = vmatpush1.bf16.msk.msra.mxu1 %vm12785_vm12, %v9402_v34  ;;  %v9439_v63 = vpack.c.bf16 %v5227_v48, %v5225_v57  ;;  %v5229_v34 = vld [vmem:[#allocation19 + $0x80] sm:$0xff]  ;;  %v5247_v57 = vld [vmem:[#allocation19 + $0x110] sm:$0xff]  ;;  %v5250_v48 = vld [vmem:[#allocation19 + $0x128] sm:$0xff] }
 0x752   : > { %5115 = vmatprep.mubr.f32.mxu0 %v11085_v0  ;;  %5192 = vmatprep.mubr.f32.mxu1 %v11085_v0  ;;  %v9443_v36 = vpack.c.bf16 %v5231_v52, %v5229_v34  ;;  %v5255_v34 = vld [vmem:[#allocation19 + $0x150] sm:$0xff]  ;;  %v5258_v52 = vld [vmem:[#allocation19 + $0x168] sm:$0xff] }
 0x753   : > { %9426 = vmatprep.subr.bf16.mxu1 %v9425_v27  ;;  %9490 = vmatprep.subr.bf16.mxu0 %v9489_v20  ;;  %v9507_v27 = vpack.c.bf16 %v5295_v23, %v5293_v10  ;;  %v5238_v20 = vld [vmem:[#allocation19 + $0xc8] sm:$0xff]  ;;  %v5259_v10 = vld [vmem:[#allocation19 + $0x170] sm:$0xff] }
 0x754   : > { %7821 = vmatmul.mubr.msk.f32.vlgmr.msra.gmra.mrb[28].mxu0 %vm4869_vm13, %v5043_v24  ;;  %7825 = vmatmul.mubr.msk.f32.vlgmr.msra.gmra.mrb[60].mxu1 %vm4869_vm13, %v5043_v24  ;;  %v5304_v24 = vld [vmem:[#allocation19 + $0x2d8] sm:$0xff]  ;;  %v5262_v23 = vld [vmem:[#allocation19 + $0x188] sm:$0xff] }
 0x755   : > { %5121 = vmatprep.mubr.f32.mxu0 %v11085_v0  ;;  %5198 = vmatprep.mubr.f32.mxu1 %v11085_v0  ;;  %v9473_v26 = vpack.c.bf16 %v5264_v14, %v5262_v23  ;;  %v5482_v14 = vld [vmem:[#allocation21 + $0x20] sm:$0xff] }
 0x756   : > { %9428 = vmatpush1.bf16.msra.mxu1 %v9427_v22  ;;  %9492 = vmatpush1.bf16.msra.mxu0 %v9491_v46  ;;  %v9447_v22 = vpack.c.bf16 %v5235_v18, %v5233_v17  ;;  %v9511_v46 = vpack.c.bf16 %v5299_v41, %v5297_v38  ;;  %v5263_v17 = vld [vmem:[#allocation19 + $0x190] sm:$0xff]  ;;  %v5266_v18 = vld [vmem:[#allocation19 + $0x1a8] sm:$0xff] }
 0x757   : > { %9430 = vmatprep.subr.bf16.mxu1 %v9429_v35  ;;  %9494 = vmatprep.subr.bf16.mxu0 %v9493_v44  ;;  %v9449_v35 = vpack.c.bf16 %v5240_v21, %v5238_v20  ;;  %v9513_v44 = vpack.c.bf16 %v5304_v24, %v5302_v25  ;;  %v5267_v38 = vld [vmem:[#allocation19 + $0x1b0] sm:$0xff]  ;;  %v5270_v21 = vld [vmem:[#allocation19 + $0x1c8] sm:$0xff]  ;;  %v5272_v25 = vld [vmem:[#allocation19 + $0x1d8] sm:$0xff] }
 0x758   : > { %7822 = vmatmul.mubr.msk.f32.gmra.mrb[30].mxu0 %vm4869_vm13, %v5044_v40  ;;  %7826 = vmatmul.mubr.msk.f32.gmra.mrb[62].mxu1 %vm4869_vm13, %v5044_v40  ;;  %v9451_v40 = vpack.c.bf16 %v5239_v33, %v5237_v32  ;;  %v9481_v24 = vpack.c.bf16 %v5272_v25, %v5270_v21  ;;  %v5271_v32 = vld [vmem:[#allocation19 + $0x1d0] sm:$0xff]  ;;  %v5310_v33 = vld [vmem:[#allocation19 + $0x308] sm:$0xff] }
 0x75a   : > { %9432 = vmatpush1.bf16.msra.mxu1 %v9431_v43  ;;  %9496 = vmatpush1.bf16.msra.mxu0 %v9495_v45  ;;  %v5241_v43 = vld [vmem:[#allocation19 + $0xe0] sm:$0xff]  ;;  %v5243_v45 = vld [vmem:[#allocation19 + $0xf0] sm:$0xff] }
 0x75b   : > { %9434 = vmatprep.subr.bf16.mxu1 %v9433_v8  ;;  %9498 = vmatprep.subr.bf16.mxu0 %v9497_v2  ;;  %v9517_v8 = vpack.c.bf16 %v5308_v28, %v5306_v1  ;;  %v5307_v2 = vld [vmem:[#allocation19 + $0x2f0] sm:$0xff]  ;;  %v9455_v29 = vpack.c.bf16 %v5243_v45, %v5241_v43  ;;  %v5276_v1 = vld [vmem:[#allocation19 + $0x1f8] sm:$0xff] }
 0x75c   : > { %v9519_v47 = vpack.c.bf16 %v5307_v2, %v5305_v56  ;;  %v9485_v28 = vpack.c.bf16 %v5276_v1, %v5274_v6  ;;  %v5275_v43 = vld [vmem:[#allocation19 + $0x1f0] sm:$0xff]  ;;  %v5316_v45 = vld [vmem:[#allocation19 + $0x338] sm:$0xff] }
 0x75d   : > { %v5315_v56 = vld [vmem:[#allocation19 + $0x330] sm:$0xff] }
 0x75e   : > { %9436 = vmatpush1.bf16.msra.mxu1 %v9435_v7  ;;  %9500 = vmatpush1.bf16.msra.mxu0 %v9499_v49  ;;  %v5245_v7 = vld [vmem:[#allocation19 + $0x100] sm:$0xff]  ;;  %v5252_v49 = vld [vmem:[#allocation19 + $0x138] sm:$0xff] }
 0x75f   : > { %9438 = vmatprep.subr.bf16.mxu1 %v9437_v51  ;;  %9502 = vmatprep.subr.bf16.mxu0 %v9501_v58  ;;  %v9459_v51 = vpack.c.bf16 %v5247_v57, %v5245_v7  ;;  %v9461_v30 = vpack.c.bf16 %v5252_v49, %v5250_v48  ;;  %v5249_v58 = vld [vmem:[#allocation19 + $0x120] sm:$0xff] }
 0x760   : > { %v9463_v62 = vpack.c.bf16 %v5251_v59, %v5249_v58  ;;  %v5478_v59 = vld [vmem:[#allocation21] sm:$0xff] }
 0x762   : > { %9440 = vmatpush1.bf16.msra.mxu1 %v9439_v63  ;;  %9504 = vmatpush1.bf16.msra.mxu0 %v9503_v3  ;;  %v5253_v63 = vld [vmem:[#allocation19 + $0x140] sm:$0xff]  ;;  %v5260_v3 = vld [vmem:[#allocation19 + $0x178] sm:$0xff] }
 0x763   : > { %9442 = vmatprep.subr.bf16.mxu1 %v9441_v5  ;;  %9506 = vmatprep.subr.bf16.mxu0 %v9505_v9  ;;  %v9467_v5 = vpack.c.bf16 %v5255_v34, %v5253_v63  ;;  %v9469_v16 = vpack.c.bf16 %v5260_v3, %v5258_v52  ;;  %v5257_v9 = vld [vmem:[#allocation19 + $0x160] sm:$0xff]  ;;  %v5485_v63 = vld [vmem:[#allocation21 + $0x38] sm:$0xff] }
 0x764   : > { %v9471_v13 = vpack.c.bf16 %v5259_v10, %v5257_v9  ;;  %v9531_v10 = vpack.c.bf16 %v5480_v60, %v5478_v59  ;;  %v5513_v59 = vld [vmem:[#allocation21 + $0x118] sm:$0xff] }
 0x766   : > { %9444 = vmatpush1.bf16.msra.mxu1 %v9443_v36  ;;  %9508 = vmatpush1.bf16.msra.mxu0 %v9507_v27  ;;  %v5261_v36 = vld [vmem:[#allocation19 + $0x180] sm:$0xff]  ;;  %v5268_v27 = vld [vmem:[#allocation19 + $0x1b8] sm:$0xff] }
 0x767   : > { %9446 = vmatprep.subr.bf16.mxu1 %v9445_v11  ;;  %9510 = vmatprep.subr.bf16.mxu0 %v9509_v19  ;;  %v9475_v11 = vpack.c.bf16 %v5263_v17, %v5261_v36  ;;  %v9477_v20 = vpack.c.bf16 %v5268_v27, %v5266_v18  ;;  %v5265_v19 = vld [vmem:[#allocation19 + $0x1a0] sm:$0xff]  ;;  %v5487_v17 = vld [vmem:[#allocation21 + $0x48] sm:$0xff]  ;;  %v5489_v18 = vld [vmem:[#allocation21 + $0x58] sm:$0xff] }
 0x768   : > { %v9479_v41 = vpack.c.bf16 %v5267_v38, %v5265_v19  ;;  %v9537_v25 = vpack.c.bf16 %v5489_v18, %v5487_v17  ;;  %v5518_v17 = vld [vmem:[#allocation21 + $0x140] sm:$0xff]  ;;  %v5520_v18 = vld [vmem:[#allocation21 + $0x150] sm:$0xff] }
 0x76a   : > { %9448 = vmatpush1.bf16.msra.mxu1 %v9447_v22  ;;  %9512 = vmatpush1.bf16.msra.mxu0 %v9511_v46  ;;  %v5269_v22 = vld [vmem:[#allocation19 + $0x1c0] sm:$0xff] }
 0x76b   : > { %9450 = vmatprep.subr.bf16.mxu1 %v9449_v35  ;;  %9514 = vmatprep.subr.bf16.mxu0 %v9513_v44  ;;  %v9483_v46 = vpack.c.bf16 %v5271_v32, %v5269_v22  ;;  %v5312_v35 = vld [vmem:[#allocation19 + $0x318] sm:$0xff]  ;;  %v5309_v44 = vld [vmem:[#allocation19 + $0x300] sm:$0xff]  ;;  %v5488_v22 = vld [vmem:[#allocation21 + $0x50] sm:$0xff] }
 0x76c   : > { %v9521_v37 = vpack.c.bf16 %v5312_v35, %v5310_v33  ;;  %v9523_v39 = vpack.c.bf16 %v5311_v31, %v5309_v44  ;;  %v5491_v32 = vld [vmem:[#allocation21 + $0x68] sm:$0xff]  ;;  %v5493_v33 = vld [vmem:[#allocation21 + $0x78] sm:$0xff]  ;;  %v5492_v44 = vld [vmem:[#allocation21 + $0x70] sm:$0xff] }
 0x76d   : > { %v9541_v35 = vpack.c.bf16 %v5493_v33, %v5491_v32  ;;  %v5495_v31 = vld [vmem:[#allocation21 + $0x88] sm:$0xff]  ;;  %v5529_v33 = vld [vmem:[#allocation21 + $0x198] sm:$0xff] }
 0x76e   : > { %9452 = vmatpush1.bf16.msra.mxu1 %v9451_v40  ;;  %9516 = vmatpush1.bf16.msra.mxu0 %v9515_v55  ;;  %v5273_v40 = vld [vmem:[#allocation19 + $0x1e0] sm:$0xff]  ;;  %v5314_v55 = vld [vmem:[#allocation19 + $0x328] sm:$0xff] }
 0x76f   : > { %9454 = vmatprep.subr.bf16.mxu1 %v9453_v54  ;;  %9518 = vmatprep.subr.bf16.mxu0 %v9517_v8  ;;  %v9487_v54 = vpack.c.bf16 %v5275_v43, %v5273_v40  ;;  %v5313_v8 = vld [vmem:[#allocation19 + $0x320] sm:$0xff]  ;;  %v9525_v2 = vpack.c.bf16 %v5316_v45, %v5314_v55  ;;  %v5496_v40 = vld [vmem:[#allocation21 + $0x90] sm:$0xff]  ;;  %v5499_v43 = vld [vmem:[#allocation21 + $0xa8] sm:$0xff] }
 0x770   : > { %v9527_v4 = vpack.c.bf16 %v5315_v56, %v5313_v8  ;;  %v5501_v55 = vld [vmem:[#allocation21 + $0xb8] sm:$0xff]  ;;  %v5498_v8 = vld [vmem:[#allocation21 + $0xa0] sm:$0xff]  ;;  %v5500_v56 = vld [vmem:[#allocation21 + $0xb0] sm:$0xff] }
 0x771   : > { %v9549_v45 = vpack.c.bf16 %v5501_v55, %v5499_v43  ;;  %v5527_v32 = vld [vmem:[#allocation21 + $0x188] sm:$0xff]  ;;  %v5537_v55 = vld [vmem:[#allocation21 + $0x1d8] sm:$0xff] }
 0x772   : > { %9456 = vmatpush1.bf16.msra.mxu1 %v9455_v29  ;;  %9520 = vmatpush1.bf16.msra.mxu0 %v9519_v47  ;;  %v5481_v29 = vld [vmem:[#allocation21 + $0x18] sm:$0xff]  ;;  %v5535_v43 = vld [vmem:[#allocation21 + $0x1c8] sm:$0xff] }
 0x773   : > { %9458 = vmatprep.subr.bf16.mxu1 %v9457_v15  ;;  %9522 = vmatprep.subr.bf16.mxu0 %v9521_v37  ;;  %v9529_v47 = vpack.c.bf16 %v5481_v29, %v5479_v12  ;;  %v5490_v37 = vld [vmem:[#allocation21 + $0x60] sm:$0xff]  ;;  %v9551_v12 = vpack.c.bf16 %v5500_v56, %v5498_v8  ;;  %v5536_v56 = vld [vmem:[#allocation21 + $0x1d0] sm:$0xff] }
 0x774   : > { %v9543_v6 = vpack.c.bf16 %v5492_v44, %v5490_v37  ;;  %v5526_v37 = vld [vmem:[#allocation21 + $0x180] sm:$0xff]  ;;  %v5528_v44 = vld [vmem:[#allocation21 + $0x190] sm:$0xff] }
 0x775   : > { %v5534_v8 = vld [vmem:[#allocation21 + $0x1c0] sm:$0xff] }
 0x776   : > { %9460 = vmatpush1.bf16.msra.mxu1 %v9459_v51  ;;  %9524 = vmatpush1.bf16.msra.mxu0 %v9523_v39  ;;  %v5497_v39 = vld [vmem:[#allocation21 + $0x98] sm:$0xff] }
 0x777   : > { %9462 = vmatprep.subr.bf16.mxu1 %v9461_v30  ;;  %9526 = vmatprep.subr.bf16.mxu0 %v9525_v2  ;;  %v9545_v1 = vpack.c.bf16 %v5497_v39, %v5495_v31  ;;  %v5503_v2 = vld [vmem:[#allocation21 + $0xc8] sm:$0xff]  ;;  %v5533_v39 = vld [vmem:[#allocation21 + $0x1b8] sm:$0xff] }
 0x778   : > { %v5531_v31 = vld [vmem:[#allocation21 + $0x1a8] sm:$0xff] }
 0x77a   : > { %9464 = vmatpush1.bf16.msra.mxu1 %v9463_v62  ;;  %9528 = vmatpush1.bf16.msra.mxu0 %v9527_v4  ;;  %v5505_v4 = vld [vmem:[#allocation21 + $0xd8] sm:$0xff] }
 0x77b   : > { %9466 = vmatprep.subr.bf16.mxu1 %v9465_v42  ;;  %v5483_v42 = vld [vmem:[#allocation21 + $0x28] sm:$0xff]  ;;  %v9553_v29 = vpack.c.bf16 %v5505_v4, %v5503_v2  ;;  %v5541_v4 = vld [vmem:[#allocation21 + $0x1f8] sm:$0xff] }
 0x77c   : > { %v9533_v23 = vpack.c.bf16 %v5485_v63, %v5483_v42  ;;  %v5512_v42 = vld [vmem:[#allocation21 + $0x110] sm:$0xff]  ;;  %v5515_v63 = vld [vmem:[#allocation21 + $0x128] sm:$0xff] }
 0x77d   : > { %v5539_v2 = vld [vmem:[#allocation21 + $0x1e8] sm:$0xff] }
 0x77e   : > { %9468 = vmatpush1.bf16.msra.mxu1 %v9467_v5 }
 0x77f   : > { %9470 = vmatprep.subr.bf16.mxu1 %v9469_v16 }
 0x782   : > { %9472 = vmatpush1.bf16.msra.mxu1 %v9471_v13  ;;  %v5484_v13 = vld [vmem:[#allocation21 + $0x30] sm:$0xff] }
 0x783   : > { %9474 = vmatprep.subr.bf16.mxu1 %v9473_v26  ;;  %v9535_v21 = vpack.c.bf16 %v5484_v13, %v5482_v14  ;;  %v5519_v14 = vld [vmem:[#allocation21 + $0x148] sm:$0xff]  ;;  %v5521_v13 = vld [vmem:[#allocation21 + $0x158] sm:$0xff] }
 0x786   : > { %9476 = vmatpush1.bf16.msra.mxu1 %v9475_v11 }
 0x787   : > { %9478 = vmatprep.subr.bf16.mxu1 %v9477_v20 }
 0x78a   : > { %9480 = vmatpush1.bf16.msra.mxu1 %v9479_v41 }
 0x78b   : > { %9482 = vmatprep.subr.bf16.mxu1 %v9481_v24  ;;  %v5486_v24 = vld [vmem:[#allocation21 + $0x40] sm:$0xff] }
 0x78e   : > { %9484 = vmatpush1.bf16.msra.mxu1 %v9483_v46  ;;  %v9539_v46 = vpack.c.bf16 %v5488_v22, %v5486_v24  ;;  %v5522_v24 = vld [vmem:[#allocation21 + $0x160] sm:$0xff]  ;;  %v5524_v22 = vld [vmem:[#allocation21 + $0x170] sm:$0xff] }
 0x78f   : > { %9486 = vmatprep.subr.bf16.mxu1 %v9485_v28  ;;  %v5494_v28 = vld [vmem:[#allocation21 + $0x80] sm:$0xff] }
 0x792   : > { %9488 = vmatpush1.bf16.msra.mxu1 %v9487_v54  ;;  %v9547_v54 = vpack.c.bf16 %v5496_v40, %v5494_v28  ;;  %v5530_v28 = vld [vmem:[#allocation21 + $0x1a0] sm:$0xff]  ;;  %v5532_v40 = vld [vmem:[#allocation21 + $0x1b0] sm:$0xff] }
 0x793   : > { %9530 = vmatprep.subr.bf16.mxu1 %v9529_v47  ;;  %v5502_v47 = vld [vmem:[#allocation21 + $0xc0] sm:$0xff] }
 0x81f   : > { %v4955_v15 = vpop.f32.mrb[24].mxu0  ;;  %v5032_v7 = vpop.f32.mrb[56].mxu1 }
 0x820   : > { %v4957_v57 = vpop.f32.mrb[25].mxu0  ;;  %v5034_v48 = vpop.f32.mrb[57].mxu1 }
 0x823   : > { %v4961_v49 = vpop.f32.mrb[26].mxu0  ;;  %v5038_v51 = vpop.f32.mrb[58].mxu1 }
 0x824   : > { %v4963_v30 = vpop.f32.mrb[27].mxu0  ;;  %v5040_v58 = vpop.f32.mrb[59].mxu1 }
 0x827   : > { %v5117_v61 = vpop.f32.mrb[28].mxu0  ;;  %v5194_v62 = vpop.f32.mrb[60].mxu1 }
 0x828   : > { %v12819_v34 = vmax.f32 %v4955_v15, %v5117_v61  ;;  %v12821_v52 = vmax.f32 %v5032_v7, %v5194_v62  ;;  %v5119_v3 = vpop.f32.mrb[29].mxu0  ;;  %v5196_v5 = vpop.f32.mrb[61].mxu1  ;;  %v5504_v15 = vld [vmem:[#allocation21 + $0xd0] sm:$0xff]  ;;  %v5507_v7 = vld [vmem:[#allocation21 + $0xe8] sm:$0xff]  ;;  %v5510_v62 = vld [vmem:[#allocation21 + $0x100] sm:$0xff] }
 0x829   : > { %v5206_v16 = vmax.f32 %v4957_v57, %v5119_v3  ;;  %v12823_v9 = vmax.f32 %v5034_v48, %v5196_v5  ;;  %v5509_v57 = vld [vmem:[#allocation21 + $0xf8] sm:$0xff]  ;;  %v9555_v48 = vpack.c.bf16 %v5504_v15, %v5502_v47  ;;  %v9563_v5 = vpack.c.bf16 %v5512_v42, %v5510_v62  ;;  %v5538_v47 = vld [vmem:[#allocation21 + $0x1e0] sm:$0xff]  ;;  %v5540_v15 = vld [vmem:[#allocation21 + $0x1f0] sm:$0xff] }
 0x82a   : > { %v5517_v3 = vld [vmem:[#allocation21 + $0x138] sm:$0xff]  ;;  %v5546_v62 = vld [vmem:[#allocation21 + $0x220] sm:$0xff]  ;;  %v5548_v42 = vld [vmem:[#allocation21 + $0x230] sm:$0xff] }
 0x82b   : > { %v5123_v26 = vpop.f32.mrb[30].mxu0  ;;  %v5200_v36 = vpop.f32.mrb[62].mxu1  ;;  %5388 = vmatprep.mubr.f32.mxu1 %v5206_v16  ;;  %7827 = vmatprep.mubr.msk.f32.mxu0 %vm5317_vm14, %v12823_v9 }
 0x82c   : > { %v12827_v27 = vmax.f32 %v4961_v49, %v5123_v26  ;;  %v12829_v11 = vmax.f32 %v5038_v51, %v5200_v36  ;;  %v5125_v20 = vpop.f32.mrb[31].mxu0  ;;  %v5202_v19 = vpop.f32.mrb[63].mxu1  ;;  %5389 = vmatmul.mubr.f32.vlgmr.msra.gmra.mrb[64].mxu1 %v12819_v34  ;;  %5466 = vmatmul.mubr.f32.vlgmr.msra.gmra.mrb[32].mxu0 %v12821_v52  ;;  %v9557_v49 = vpack.c.bf16 %v5509_v57, %v5507_v7  ;;  %v5506_v51 = vld [vmem:[#allocation21 + $0xe0] sm:$0xff]  ;;  %v5543_v7 = vld [vmem:[#allocation21 + $0x208] sm:$0xff]  ;;  %v5545_v57 = vld [vmem:[#allocation21 + $0x218] sm:$0xff] }
 0x82d   : > { %v12833_v38 = vmax.f32 %v4963_v30, %v5125_v20  ;;  %v12835_v41 = vmax.f32 %v5040_v58, %v5202_v19  ;;  %9532 = vmatpush1.bf16.msra.mxu1 %v9531_v10  ;;  %v5508_v30 = vld [vmem:[#allocation21 + $0xf0] sm:$0xff]  ;;  %v5511_v58 = vld [vmem:[#allocation21 + $0x108] sm:$0xff]  ;;  %v5514_v10 = vld [vmem:[#allocation21 + $0x120] sm:$0xff]  ;;  %v9569_v36 = vpack.c.bf16 %v5521_v13, %v5519_v14 }
 0x82e   : > { %9534 = vmatprep.subr.bf16.mxu1 %v9533_v23  ;;  %v9559_v60 = vpack.c.bf16 %v5508_v30, %v5506_v51  ;;  %v9561_v61 = vpack.c.bf16 %v5513_v59, %v5511_v58  ;;  %v5516_v23 = vld [vmem:[#allocation21 + $0x130] sm:$0xff]  ;;  %v5523_v20 = vld [vmem:[#allocation21 + $0x168] sm:$0xff]  ;;  %v5525_v19 = vld [vmem:[#allocation21 + $0x178] sm:$0xff] }
 0x82f   : > { %5394 = vmatprep.mubr.f32.mxu1 %v12833_v38  ;;  %7828 = vmatprep.mubr.msk.f32.mxu0 %vm5317_vm14, %v12835_v41  ;;  %v9567_v26 = vpack.c.bf16 %v5516_v23, %v5514_v10  ;;  %v5542_v51 = vld [vmem:[#allocation21 + $0x200] sm:$0xff]  ;;  %v5544_v30 = vld [vmem:[#allocation21 + $0x210] sm:$0xff]  ;;  %v5547_v58 = vld [vmem:[#allocation21 + $0x228] sm:$0xff] }
 0x830   : > { %5395 = vmatmul.mubr.f32.gmra.mrb[66].mxu1 %v12827_v27  ;;  %5472 = vmatmul.mubr.f32.gmra.mrb[34].mxu0 %v12829_v11  ;;  %v5549_v59 = vld [vmem:[#allocation21 + $0x238] sm:$0xff]  ;;  %v5550_v10 = vld [vmem:[#allocation21 + $0x240] sm:$0xff]  ;;  %v5552_v23 = vld [vmem:[#allocation21 + $0x250] sm:$0xff] }
 0x831   : > { %9536 = vmatpush1.bf16.msra.mxu1 %v9535_v21  ;;  %5646 = vmatprep.mubr.f32.mxu1 %v5206_v16  ;;  %v9565_v16 = vpack.c.bf16 %v5517_v3, %v5515_v63  ;;  %v9571_v21 = vpack.c.bf16 %v5520_v18, %v5518_v17  ;;  %v5551_v63 = vld [vmem:[#allocation21 + $0x248] sm:$0xff]  ;;  %v5553_v3 = vld [vmem:[#allocation21 + $0x258] sm:$0xff]  ;;  %v5556_v17 = vld [vmem:[#allocation21 + $0x270] sm:$0xff] }
 0x832   : > { %9538 = vmatprep.subr.bf16.mxu1 %v9537_v25  ;;  %v9573_v25 = vpack.c.bf16 %v5525_v19, %v5523_v20  ;;  %v5555_v14 = vld [vmem:[#allocation21 + $0x268] sm:$0xff]  ;;  %v5557_v13 = vld [vmem:[#allocation21 + $0x278] sm:$0xff] }
 0x833   : > { %v5561_v18 = vld [vmem:[#allocation21 + $0x298] sm:$0xff] }
 0x835   : > { %9540 = vmatpush1.bf16.msra.mxu1 %v9539_v46  ;;  %v9575_v46 = vpack.c.bf16 %v5524_v22, %v5522_v24  ;;  %v5563_v24 = vld [vmem:[#allocation21 + $0x2a8] sm:$0xff]  ;;  %v5565_v22 = vld [vmem:[#allocation21 + $0x2b8] sm:$0xff] }
 0x836   : > { %9542 = vmatprep.subr.bf16.mxu1 %v9541_v35  ;;  %v9577_v35 = vpack.c.bf16 %v5529_v33, %v5527_v32  ;;  %v9613_v32 = vpack.c.bf16 %v5565_v22, %v5563_v24  ;;  %v5562_v33 = vld [vmem:[#allocation21 + $0x2a0] sm:$0xff]  ;;  %v7899_v22 = vld [vmem:[%s14377_s23 + $0x2d8] sm:$0xff] }
 0x839   : > { %9544 = vmatpush1.bf16.msra.mxu1 %v9543_v6  ;;  %v9579_v6 = vpack.c.bf16 %v5528_v44, %v5526_v37 }
 0x83a   : > { %9546 = vmatprep.subr.bf16.mxu1 %v9545_v1  ;;  %v9581_v1 = vpack.c.bf16 %v5533_v39, %v5531_v31  ;;  %v5566_v31 = vld [vmem:[#allocation21 + $0x2c0] sm:$0xff]  ;;  %v5568_v39 = vld [vmem:[#allocation21 + $0x2d0] sm:$0xff] }
 0x83d   : > { %9548 = vmatpush1.bf16.msra.mxu1 %v9547_v54  ;;  %v9583_v54 = vpack.c.bf16 %v5532_v40, %v5530_v28  ;;  %v9619_v28 = vpack.c.bf16 %v5568_v39, %v5566_v31  ;;  %v5779_v31 = vld [vmem:[%s14377_s23 + $0x58] sm:$0xff] }
 0x83e   : > { %9550 = vmatprep.subr.bf16.mxu1 %v9549_v45  ;;  %v9585_v45 = vpack.c.bf16 %v5537_v55, %v5535_v43  ;;  %v5570_v43 = vld [vmem:[#allocation21 + $0x2e0] sm:$0xff]  ;;  %v5572_v55 = vld [vmem:[#allocation21 + $0x2f0] sm:$0xff] }
 0x841   : > { %9552 = vmatpush1.bf16.msra.mxu1 %v9551_v12  ;;  %v9587_v12 = vpack.c.bf16 %v5536_v56, %v5534_v8  ;;  %v9623_v8 = vpack.c.bf16 %v5572_v55, %v5570_v43  ;;  %v5574_v56 = vld [vmem:[#allocation21 + $0x300] sm:$0xff] }
 0x842   : > { %9554 = vmatprep.subr.bf16.mxu1 %v9553_v29  ;;  %v9589_v29 = vpack.c.bf16 %v5541_v4, %v5539_v2  ;;  %v7886_v2 = vld [vmem:[%s14377_s23 + $0x270] sm:$0xff]  ;;  %v5781_v43 = vld [vmem:[%s14377_s23 + $0x68] sm:$0xff] }
 0x845   : > { %9556 = vmatpush1.bf16.msra.mxu1 %v9555_v48  ;;  %v9591_v48 = vpack.c.bf16 %v5540_v15, %v5538_v47  ;;  %v11087_v47 = vmov 0.0|0.0   ;;  %v7887_v15 = vld [vmem:[%s14377_s23 + $0x278] sm:$0xff] }
 0x846   : > { %9558 = vmatprep.subr.bf16.mxu1 %v9557_v49  ;;  %v9593_v49 = vpack.c.bf16 %v5545_v57, %v5543_v7  ;;  %9750 = vmatprep.subr.bf16.mxu0 %v11087_v47  ;;  %v5581_v7 = vld [vmem:[#allocation21 + $0x338] sm:$0xff]  ;;  %v9751_v57 = vpack.c.bf16 %v7887_v15, %v7886_v2 }
 0x847   : > { %v5784_v2 = vld [vmem:[%s14377_s23 + $0x80] sm:$0xff]  ;;  %v5787_v15 = vld [vmem:[%s14377_s23 + $0x98] sm:$0xff] }
 0x848   : > { %9752 = vmatpush1.bf16.msra.mxu0 %v9751_v57 }
 0x849   : > { %9560 = vmatpush1.bf16.msra.mxu1 %v9559_v60  ;;  %v9595_v60 = vpack.c.bf16 %v5544_v30, %v5542_v51  ;;  %v5578_v30 = vld [vmem:[#allocation21 + $0x320] sm:$0xff]  ;;  %9753 = vmatprep.subr.bf16.mxu0 %v11087_v47 }
 0x84a   : > { %9562 = vmatprep.subr.bf16.mxu1 %v9561_v61  ;;  %v9597_v61 = vpack.c.bf16 %v5549_v59, %v5547_v58 }
 0x84d   : > { %9564 = vmatpush1.bf16.msra.mxu1 %v9563_v5  ;;  %v9599_v5 = vpack.c.bf16 %v5548_v42, %v5546_v62  ;;  %v7891_v62 = vld [vmem:[%s14377_s23 + $0x298] sm:$0xff] }
 0x84e   : > { %9566 = vmatprep.subr.bf16.mxu1 %v9565_v16  ;;  %v9601_v16 = vpack.c.bf16 %v5553_v3, %v5551_v63  ;;  %v5768_v3 = vld [vmem:[%s14377_s23] sm:$0xff] }
 0x851   : > { %9568 = vmatpush1.bf16.msra.mxu1 %v9567_v26  ;;  %v9603_v26 = vpack.c.bf16 %v5552_v23, %v5550_v10  ;;  %v7893_v10 = vld [vmem:[%s14377_s23 + $0x2a8] sm:$0xff] }
 0x852   : > { %9570 = vmatprep.subr.bf16.mxu1 %v9569_v36  ;;  %v9605_v36 = vpack.c.bf16 %v5557_v13, %v5555_v14  ;;  %v5770_v14 = vld [vmem:[%s14377_s23 + $0x10] sm:$0xff]  ;;  %v5771_v13 = vld [vmem:[%s14377_s23 + $0x18] sm:$0xff] }
 0x855   : > { %9572 = vmatpush1.bf16.msra.mxu1 %v9571_v21  ;;  %v5558_v21 = vld [vmem:[#allocation21 + $0x280] sm:$0xff] }
 0x856   : > { %9574 = vmatprep.subr.bf16.mxu1 %v9573_v25  ;;  %v5560_v25 = vld [vmem:[#allocation21 + $0x290] sm:$0xff] }
 0x859   : > { %9576 = vmatpush1.bf16.msra.mxu1 %v9575_v46  ;;  %v5567_v46 = vld [vmem:[#allocation21 + $0x2c8] sm:$0xff] }
 0x85a   : > { %9578 = vmatprep.subr.bf16.mxu1 %v9577_v35  ;;  %v5569_v35 = vld [vmem:[#allocation21 + $0x2d8] sm:$0xff] }
 0x85b   : > { %v9617_v44 = vpack.c.bf16 %v5569_v35, %v5567_v46  ;;  %v7900_v46 = vld [vmem:[%s14377_s23 + $0x2e0] sm:$0xff]  ;;  %v7901_v35 = vld [vmem:[%s14377_s23 + $0x2e8] sm:$0xff] }
 0x85c   : > { %v9772_v39 = vpack.c.bf16 %v7901_v35, %v7900_v46 }
 0x85d   : > { %9580 = vmatpush1.bf16.msra.mxu1 %v9579_v6  ;;  %v5571_v6 = vld [vmem:[#allocation21 + $0x2e8] sm:$0xff] }
 0x85e   : > { %9582 = vmatprep.subr.bf16.mxu1 %v9581_v1  ;;  %v5573_v1 = vld [vmem:[#allocation21 + $0x2f8] sm:$0xff] }
 0x85f   : > { %v9621_v40 = vpack.c.bf16 %v5573_v1, %v5571_v6  ;;  %v7902_v6 = vld [vmem:[%s14377_s23 + $0x2f0] sm:$0xff]  ;;  %v7903_v1 = vld [vmem:[%s14377_s23 + $0x2f8] sm:$0xff] }
 0x860   : > { %v9775_v55 = vpack.c.bf16 %v7903_v1, %v7902_v6 }
 0x861   : > { %9584 = vmatpush1.bf16.msra.mxu1 %v9583_v54  ;;  %v5575_v54 = vld [vmem:[#allocation21 + $0x308] sm:$0xff] }
 0x862   : > { %9586 = vmatprep.subr.bf16.mxu1 %v9585_v45  ;;  %v5577_v45 = vld [vmem:[#allocation21 + $0x318] sm:$0xff] }
 0x863   : > { %v9625_v4 = vpack.c.bf16 %v5577_v45, %v5575_v54  ;;  %v5782_v45 = vld [vmem:[%s14377_s23 + $0x70] sm:$0xff] }
 0x865   : > { %9588 = vmatpush1.bf16.msra.mxu1 %v9587_v12  ;;  %v5576_v12 = vld [vmem:[#allocation21 + $0x310] sm:$0xff] }
 0x866   : > { %9590 = vmatprep.subr.bf16.mxu1 %v9589_v29  ;;  %v5579_v29 = vld [vmem:[#allocation21 + $0x328] sm:$0xff]  ;;  %v9627_v51 = vpack.c.bf16 %v5576_v12, %v5574_v56 }
 0x867   : > { %v9629_v59 = vpack.c.bf16 %v5581_v7, %v5579_v29  ;;  %v5786_v29 = vld [vmem:[%s14377_s23 + $0x90] sm:$0xff]  ;;  %v7904_v7 = vld [vmem:[%s14377_s23 + $0x300] sm:$0xff] }
 0x868   : > { %v9661_v57 = vpack.c.bf16 %v5787_v15, %v5786_v29 }
 0x869   : > { %9592 = vmatpush1.bf16.msra.mxu1 %v9591_v48  ;;  %v7888_v48 = vld [vmem:[%s14377_s23 + $0x280] sm:$0xff] }
 0x86a   : > { %9594 = vmatprep.subr.bf16.mxu1 %v9593_v49  ;;  %v7889_v49 = vld [vmem:[%s14377_s23 + $0x288] sm:$0xff] }
 0x86b   : > { %v9754_v58 = vpack.c.bf16 %v7889_v49, %v7888_v48  ;;  %v7905_v48 = vld [vmem:[%s14377_s23 + $0x308] sm:$0xff] }
 0x86c   : > { %5647 = vmatmul.mubr.f32.vlgmr.msra.gmra.mrb[68].mxu1 %v12819_v34  ;;  %v5554_v34 = vld [vmem:[#allocation21 + $0x260] sm:$0xff]  ;;  %v9778_v49 = vpack.c.bf16 %v7905_v48, %v7904_v7 }
 0x86d   : > { %5652 = vmatprep.mubr.f32.mxu1 %v12833_v38  ;;  %9596 = vmatpush1.bf16.msra.mxu1 %v9595_v60  ;;  %v5559_v38 = vld [vmem:[#allocation21 + $0x288] sm:$0xff]  ;;  %v9607_v20 = vpack.c.bf16 %v5556_v17, %v5554_v34  ;;  %v5580_v60 = vld [vmem:[#allocation21 + $0x330] sm:$0xff]  ;;  %v9637_v17 = vpack.c.bf16 %v5771_v13, %v5770_v14 }
 0x86e   : > { %9598 = vmatprep.subr.bf16.mxu1 %v9597_v61  ;;  %v9609_v19 = vpack.c.bf16 %v5561_v18, %v5559_v38  ;;  %v7890_v61 = vld [vmem:[%s14377_s23 + $0x290] sm:$0xff]  ;;  %v9631_v42 = vpack.c.bf16 %v5580_v60, %v5578_v30  ;;  %9755 = vmatpush1.bf16.msra.mxu0 %v9754_v58  ;;  %v7895_v34 = vld [vmem:[%s14377_s23 + $0x2b8] sm:$0xff]  ;;  %v5772_v38 = vld [vmem:[%s14377_s23 + $0x20] sm:$0xff] }
 0x86f   : > { %v9757_v63 = vpack.c.bf16 %v7891_v62, %v7890_v61  ;;  %9756 = vmatprep.subr.bf16.mxu0 %v11087_v47  ;;  %v5773_v18 = vld [vmem:[%s14377_s23 + $0x28] sm:$0xff]  ;;  %v7906_v58 = vld [vmem:[%s14377_s23 + $0x310] sm:$0xff]  ;;  %v7907_v60 = vld [vmem:[%s14377_s23 + $0x318] sm:$0xff] }
 0x870   : > { %5653 = vmatmul.mubr.f32.gmra.mrb[70].mxu1 %v12827_v27  ;;  %v9611_v27 = vpack.c.bf16 %v5560_v25, %v5558_v21  ;;  %v5774_v21 = vld [vmem:[%s14377_s23 + $0x30] sm:$0xff]  ;;  %v5775_v25 = vld [vmem:[%s14377_s23 + $0x38] sm:$0xff]  ;;  %v5789_v30 = vld [vmem:[%s14377_s23 + $0xa8] sm:$0xff] }
 0x871   : > { %9600 = vmatpush1.bf16.msra.mxu1 %v9599_v5  ;;  %7829 = vmatprep.mubr.msk.f32.mxu1 %vm5317_vm14, %v12823_v9  ;;  %v5564_v9 = vld [vmem:[#allocation21 + $0x2b0] sm:$0xff]  ;;  %v5769_v5 = vld [vmem:[%s14377_s23 + $0x8] sm:$0xff] }
 0x872   : > { %9602 = vmatprep.subr.bf16.mxu1 %v9601_v16  ;;  %v9615_v37 = vpack.c.bf16 %v5564_v9, %v5562_v33  ;;  %v7892_v16 = vld [vmem:[%s14377_s23 + $0x2a0] sm:$0xff]  ;;  %v9634_v23 = vpack.c.bf16 %v5769_v5, %v5768_v3  ;;  %9758 = vmatpush1.bf16.msra.mxu0 %v9757_v63  ;;  %v5777_v33 = vld [vmem:[%s14377_s23 + $0x48] sm:$0xff]  ;;  %v5790_v61 = vld [vmem:[%s14377_s23 + $0xb0] sm:$0xff] }
 0x873   : > { %9759 = vmatprep.subr.bf16.mxu0 %v11087_v47  ;;  %v5791_v62 = vld [vmem:[%s14377_s23 + $0xb8] sm:$0xff]  ;;  %v7908_v63 = vld [vmem:[%s14377_s23 + $0x320] sm:$0xff]  ;;  %v7909_v3 = vld [vmem:[%s14377_s23 + $0x328] sm:$0xff] }
 0x874   : > { %v9667_v5 = vpack.c.bf16 %v5791_v62, %v5790_v61  ;;  %v7910_v14 = vld [vmem:[%s14377_s23 + $0x330] sm:$0xff]  ;;  %v7911_v13 = vld [vmem:[%s14377_s23 + $0x338] sm:$0xff] }
 0x875   : > { %9604 = vmatpush1.bf16.msra.mxu1 %v9603_v26  ;;  %v9760_v26 = vpack.c.bf16 %v7893_v10, %v7892_v16  ;;  %v9784_v16 = vpack.c.bf16 %v7909_v3, %v7908_v63  ;;  %v5792_v10 = vld [vmem:[%s14377_s23 + $0xc0] sm:$0xff]  ;;  %v7915_v61 = vld [vmem:[%s14377_s23 + $0x350] sm:$0xff]  ;;  %v7916_v62 = vld [vmem:[%s14377_s23 + $0x358] sm:$0xff] }
 0x876   : > { %9606 = vmatprep.subr.bf16.mxu1 %v9605_v36  ;;  %v7894_v36 = vld [vmem:[%s14377_s23 + $0x2b0] sm:$0xff] }
 0x877   : > { %9761 = vmatpush1.bf16.msra.mxu0 %v9760_v26 }
 0x878   : > { %9762 = vmatprep.subr.bf16.mxu0 %v11087_v47 }
 0x879   : > { %9608 = vmatpush1.bf16.msra.mxu1 %v9607_v20  ;;  %v9763_v20 = vpack.c.bf16 %v7895_v34, %v7894_v36  ;;  %v9787_v36 = vpack.c.bf16 %v7911_v13, %v7910_v14  ;;  %v7918_v14 = vld [vmem:[%s14377_s23 + $0x368] sm:$0xff] }
 0x87a   : > { %9610 = vmatprep.subr.bf16.mxu1 %v9609_v19  ;;  %v9640_v19 = vpack.c.bf16 %v5773_v18, %v5772_v38 }
 0x87b   : > { %9764 = vmatpush1.bf16.msra.mxu0 %v9763_v20 }
 0x87c   : > { %9765 = vmatprep.subr.bf16.mxu0 %v11087_v47 }
 0x87d   : > { %9612 = vmatpush1.bf16.msra.mxu1 %v9611_v27  ;;  %v9643_v27 = vpack.c.bf16 %v5775_v25, %v5774_v21 }
 0x87e   : > { %9614 = vmatprep.subr.bf16.mxu1 %v9613_v32  ;;  %v5776_v32 = vld [vmem:[%s14377_s23 + $0x40] sm:$0xff] }
 0x881   : > { %9616 = vmatpush1.bf16.msra.mxu1 %v9615_v37  ;;  %v9646_v37 = vpack.c.bf16 %v5777_v33, %v5776_v32 }
 0x882   : > { %9618 = vmatprep.subr.bf16.mxu1 %v9617_v44  ;;  %v5778_v44 = vld [vmem:[%s14377_s23 + $0x50] sm:$0xff] }
 0x885   : > { %9620 = vmatpush1.bf16.msra.mxu1 %v9619_v28  ;;  %v9649_v28 = vpack.c.bf16 %v5779_v31, %v5778_v44 }
 0x886   : > { %9622 = vmatprep.subr.bf16.mxu1 %v9621_v40  ;;  %v5780_v40 = vld [vmem:[%s14377_s23 + $0x60] sm:$0xff] }
 0x887   : > { %v9652_v54 = vpack.c.bf16 %v5781_v43, %v5780_v40 }
 0x889   : > { %9624 = vmatpush1.bf16.msra.mxu1 %v9623_v8  ;;  %v5783_v8 = vld [vmem:[%s14377_s23 + $0x78] sm:$0xff] }
 0x88a   : > { %9626 = vmatprep.subr.bf16.mxu1 %v9625_v4  ;;  %v9655_v56 = vpack.c.bf16 %v5783_v8, %v5782_v45  ;;  %v5785_v4 = vld [vmem:[%s14377_s23 + $0x88] sm:$0xff]  ;;  %v7832_v8 = vld [vmem:[%s14377_s23 + $0xd0] sm:$0xff] }
 0x88b   : > { %v9658_v12 = vpack.c.bf16 %v5785_v4, %v5784_v2  ;;  %v7913_v2 = vld [vmem:[%s14377_s23 + $0x340] sm:$0xff]  ;;  %v7914_v4 = vld [vmem:[%s14377_s23 + $0x348] sm:$0xff] }
 0x88c   : > { %v9790_v7 = vpack.c.bf16 %v7914_v4, %v7913_v2 }
 0x88d   : > { %9628 = vmatpush1.bf16.msra.mxu1 %v9627_v51  ;;  %v5788_v51 = vld [vmem:[%s14377_s23 + $0xa0] sm:$0xff] }
 0x88e   : > { %9630 = vmatprep.subr.bf16.mxu1 %v9629_v59  ;;  %v9664_v59 = vpack.c.bf16 %v5789_v30, %v5788_v51 }
 0x891   : > { %9632 = vmatpush1.bf16.msra.mxu1 %v9631_v42  ;;  %v9781_v42 = vpack.c.bf16 %v7907_v60, %v7906_v58  ;;  %v7835_v60 = vld [vmem:[%s14377_s23 + $0xe8] sm:$0xff] }
 0x892   : > { %9633 = vmatprep.subr.bf16.mxu1 %v11087_v47 }
 0x894   : > { %5724 = vmatmul.mubr.f32.vlgmr.msra.gmra.mrb[68].mxu1 %v12821_v52  ;;  %v7896_v52 = vld [vmem:[%s14377_s23 + $0x2c0] sm:$0xff] }
 0x895   : > { %7830 = vmatprep.mubr.msk.f32.mxu1 %vm5317_vm14, %v12835_v41  ;;  %9635 = vmatpush1.bf16.msra.mxu1 %v9634_v23  ;;  %v7897_v41 = vld [vmem:[%s14377_s23 + $0x2c8] sm:$0xff] }
 0x896   : > { %9636 = vmatprep.subr.bf16.mxu1 %v11087_v47  ;;  %v9766_v24 = vpack.c.bf16 %v7897_v41, %v7896_v52  ;;  %v5793_v23 = vld [vmem:[%s14377_s23 + $0xc8] sm:$0xff] }
 0x897   : > { %v9670_v26 = vpack.c.bf16 %v5793_v23, %v5792_v10  ;;  %v7837_v10 = vld [vmem:[%s14377_s23 + $0xf8] sm:$0xff]  ;;  %v7917_v23 = vld [vmem:[%s14377_s23 + $0x360] sm:$0xff] }
 0x898   : > { %5730 = vmatmul.mubr.f32.gmra.mrb[70].mxu1 %v12829_v11  ;;  %v7898_v11 = vld [vmem:[%s14377_s23 + $0x2d0] sm:$0xff]  ;;  %9767 = vmatpush1.bf16.msra.mxu0 %v9766_v24 }
 0x899   : > { %9638 = vmatpush1.bf16.msra.mxu1 %v9637_v17  ;;  %v9769_v9 = vpack.c.bf16 %v7899_v22, %v7898_v11  ;;  %9768 = vmatprep.subr.bf16.mxu0 %v11087_v47  ;;  %v5740_v22 = vld [vmem:[#allocation15] sm:$0x3] }
 0x89a   : > { %9639 = vmatprep.subr.bf16.mxu1 %v11087_v47  ;;  %v5749_v33 = vrot.slane %v5740_v22, %v12585_v53 }
 0x89c   : > { %9770 = vmatpush1.bf16.msra.mxu0 %v9769_v9 }
 0x89d   : > { %9641 = vmatpush1.bf16.msra.mxu1 %v9640_v19  ;;  %9771 = vmatprep.subr.bf16.mxu0 %v11087_v47 }
 0x89e   : > { %9642 = vmatprep.subr.bf16.mxu1 %v11087_v47 }
 0x8a0   : > { %9773 = vmatpush1.bf16.msra.mxu0 %v9772_v39 }
 0x8a1   : > { %9644 = vmatpush1.bf16.msra.mxu1 %v9643_v27  ;;  %9774 = vmatprep.subr.bf16.mxu0 %v11087_v47  ;;  %v5745_v27 = vrot.slane %v5740_v22, %v12583_v50  ;;  %v7843_v22 = vld [vmem:[%s14377_s23 + $0x128] sm:$0xff] }
 0x8a2   : > { %9645 = vmatprep.subr.bf16.mxu1 %v11087_v47 }
 0x8a4   : > { %9776 = vmatpush1.bf16.msra.mxu0 %v9775_v55 }
 0x8a5   : > { %9647 = vmatpush1.bf16.msra.mxu1 %v9646_v37  ;;  %9777 = vmatprep.subr.bf16.mxu0 %v11087_v47 }
 0x8a6   : > { %9648 = vmatprep.subr.bf16.mxu1 %v11087_v47 }
 0x8a8   : > { %9779 = vmatpush1.bf16.msra.mxu0 %v9778_v49 }
 0x8a9   : > { %9650 = vmatpush1.bf16.msra.mxu1 %v9649_v28  ;;  %9780 = vmatprep.subr.bf16.mxu0 %v11087_v47 }
 0x8aa   : > { %9651 = vmatprep.subr.bf16.mxu1 %v11087_v47 }
 0x8ac   : > { %9782 = vmatpush1.bf16.msra.mxu0 %v9781_v42 }
 0x8ad   : > { %9653 = vmatpush1.bf16.msra.mxu1 %v9652_v54  ;;  %9783 = vmatprep.subr.bf16.mxu0 %v11087_v47 }
 0x8ae   : > { %9654 = vmatprep.subr.bf16.mxu1 %v11087_v47 }
 0x8b0   : > { %9785 = vmatpush1.bf16.msra.mxu0 %v9784_v16  ;;  %v7836_v16 = vld [vmem:[%s14377_s23 + $0xf0] sm:$0xff] }
 0x8b1   : > { %9656 = vmatpush1.bf16.msra.mxu1 %v9655_v56  ;;  %9786 = vmatprep.subr.bf16.mxu0 %v11087_v47  ;;  %v7833_v56 = vld [vmem:[%s14377_s23 + $0xd8] sm:$0xff]  ;;  %v9679_v13 = vpack.c.bf16 %v7837_v10, %v7836_v16 }
 0x8b2   : > { %9657 = vmatprep.subr.bf16.mxu1 %v11087_v47  ;;  %v9673_v15 = vpack.c.bf16 %v7833_v56, %v7832_v8  ;;  %v7929_v8 = vld [vmem:[%s14377_s23 + $0x3c0] sm:$0xff]  ;;  %v7930_v56 = vld [vmem:[%s14377_s23 + $0x3c8] sm:$0xff] }
 0x8b3   : > { %v9814_v4 = vpack.c.bf16 %v7930_v56, %v7929_v8  ;;  %v7948_v8 = vld [vmem:[%s14377_s23 + $0x450] sm:$0xff]  ;;  %v7949_v56 = vld [vmem:[%s14377_s23 + $0x458] sm:$0xff] }
 0x8b4   : > { %9788 = vmatpush1.bf16.msra.mxu0 %v9787_v36  ;;  %v7838_v36 = vld [vmem:[%s14377_s23 + $0x100] sm:$0xff] }
 0x8b5   : > { %9659 = vmatpush1.bf16.msra.mxu1 %v9658_v12  ;;  %9789 = vmatprep.subr.bf16.mxu0 %v11087_v47 }
 0x8b6   : > { %9660 = vmatprep.subr.bf16.mxu1 %v11087_v47 }
 0x8b9   : > { %9662 = vmatpush1.bf16.msra.mxu1 %v9661_v57  ;;  %v7834_v57 = vld [vmem:[%s14377_s23 + $0xe0] sm:$0xff] }
 0x8ba   : > { %9663 = vmatprep.subr.bf16.mxu1 %v11087_v47  ;;  %v9676_v3 = vpack.c.bf16 %v7835_v60, %v7834_v57  ;;  %v7934_v60 = vld [vmem:[%s14377_s23 + $0x3e8] sm:$0xff] }
 0x8bd   : > { %9665 = vmatpush1.bf16.msra.mxu1 %v9664_v59 }
 0x8be   : > { %9666 = vmatprep.subr.bf16.mxu1 %v11087_v47 }
 0x8c1   : > { %9668 = vmatpush1.bf16.msra.mxu1 %v9667_v5  ;;  %v9793_v5 = vpack.c.bf16 %v7916_v62, %v7915_v61 }
 0x8c2   : > { %9669 = vmatprep.subr.bf16.mxu1 %v11087_v47 }
 0x8c5   : > { %9671 = vmatpush1.bf16.msra.mxu1 %v9670_v26  ;;  %v9796_v26 = vpack.c.bf16 %v7918_v14, %v7917_v23  ;;  %v7856_v23 = vld [vmem:[%s14377_s23 + $0x190] sm:$0xff]  ;;  %v7857_v14 = vld [vmem:[%s14377_s23 + $0x198] sm:$0xff] }
 0x8c6   : > { %9672 = vmatprep.subr.bf16.mxu1 %v11087_v47 }
 0x8ff   : > { %v5390_v34 = vpop.f32.mrb[64].mxu1  ;;  %v5467_v17 = vpop.f32.mrb[32].mxu0 }
 0x900   : > { %v5468_v38 = vadd.f32 %v5467_v17, %v5390_v34  ;;  %v5392_v18 = vpop.f32.mrb[65].mxu1  ;;  %v5469_v20 = vpop.f32.mrb[33].mxu0  ;;  %v7839_v34 = vld [vmem:[%s14377_s23 + $0x108] sm:$0xff]  ;;  %v7919_v17 = vld [vmem:[%s14377_s23 + $0x370] sm:$0xff] }
 0x901   : > { %v5470_v52 = vadd.f32 %v5469_v20, %v5392_v18  ;;  %v9682_v18 = vpack.c.bf16 %v7839_v34, %v7838_v36  ;;  %v9709_v36 = vpack.c.bf16 %v7857_v14, %v7856_v23  ;;  %v7875_v23 = vld [vmem:[%s14377_s23 + $0x220] sm:$0xff]  ;;  %v7876_v14 = vld [vmem:[%s14377_s23 + $0x228] sm:$0xff] }
 0x903   : > { %v5396_v41 = vpop.f32.mrb[66].mxu1  ;;  %v5473_v19 = vpop.f32.mrb[34].mxu0 }
 0x904   : > { %v5474_v21 = vadd.f32 %v5473_v19, %v5396_v41  ;;  %v5398_v25 = vpop.f32.mrb[67].mxu1  ;;  %v5475_v24 = vpop.f32.mrb[35].mxu0  ;;  %v7841_v41 = vld [vmem:[%s14377_s23 + $0x118] sm:$0xff]  ;;  %v7921_v19 = vld [vmem:[%s14377_s23 + $0x380] sm:$0xff] }
 0x905   : > { %v5476_v11 = vadd.f32 %v5475_v24, %v5398_v25 }
 0x967   : > { %v5725_v32 = vpop.f32.mrb[68].mxu1 }
 0x968   : > { %v5736_v9 = vmax.f32 %v5468_v38, %v5725_v32  ;;  %v5727_v46 = vpop.f32.mrb[69].mxu1  ;;  %v7920_v38 = vld [vmem:[%s14377_s23 + $0x378] sm:$0xff] }
 0x969   : > { %v5737_v35 = vmax.f32 %v5470_v52, %v5727_v46  ;;  %v9799_v20 = vpack.c.bf16 %v7920_v38, %v7919_v17  ;;  %v7840_v52 = vld [vmem:[%s14377_s23 + $0x110] sm:$0xff]  ;;  %v7924_v32 = vld [vmem:[%s14377_s23 + $0x398] sm:$0xff]  ;;  %v7859_v17 = vld [vmem:[%s14377_s23 + $0x1a0] sm:$0xff] }
 0x96a   : > { %v5752_v37 = vadd.f32 %v5745_v27, %v5736_v9  ;;  %v9685_v25 = vpack.c.bf16 %v7841_v41, %v7840_v52  ;;  %v7844_v46 = vld [vmem:[%s14377_s23 + $0x130] sm:$0xff]  ;;  %v7860_v38 = vld [vmem:[%s14377_s23 + $0x1a8] sm:$0xff] }
 0x96b   : > { %v5753_v44 = vadd.f32 %v5749_v33, %v5737_v35  ;;  %v5731_v31 = vpop.f32.mrb[70].mxu1  ;;  %v7845_v35 = vld [vmem:[%s14377_s23 + $0x138] sm:$0xff]  ;;  %v9712_v41 = vpack.c.bf16 %v7860_v38, %v7859_v17  ;;  %v7877_v17 = vld [vmem:[%s14377_s23 + $0x230] sm:$0xff] }
 0x96c   : > { %v5756_v39 = vmax.f32 %v5752_v37, 0.0  ;;  %v5738_v6 = vmax.f32 %v5474_v21, %v5731_v31  ;;  %v5733_v1 = vpop.f32.mrb[71].mxu1  ;;  %v7922_v21 = vld [vmem:[%s14377_s23 + $0x388] sm:$0xff]  ;;  %v7925_v37 = vld [vmem:[%s14377_s23 + $0x3a0] sm:$0xff]  ;;  %v9691_v31 = vpack.c.bf16 %v7845_v35, %v7844_v46  ;;  %v7878_v38 = vld [vmem:[%s14377_s23 + $0x238] sm:$0xff] }
 0x96d   : > { %v5757_v28 = vmax.f32 %v5753_v44, 0.0  ;;  %v5739_v40 = vmax.f32 %v5476_v11, %v5733_v1  ;;  %v9802_v24 = vpack.c.bf16 %v7922_v21, %v7921_v19  ;;  %v7842_v11 = vld [vmem:[%s14377_s23 + $0x120] sm:$0xff]  ;;  %v7926_v44 = vld [vmem:[%s14377_s23 + $0x3a8] sm:$0xff] }
 0x96e   : > { %5760 = vst [vmem:[#allocation3] sm:$0xff] %v5756_v39  ;;  %v5754_v43 = vadd.f32 %v5745_v27, %v5738_v6  ;;  %v7923_v27 = vld [vmem:[%s14377_s23 + $0x390] sm:$0xff]  ;;  %v9808_v39 = vpack.c.bf16 %v7926_v44, %v7925_v37  ;;  %v7846_v6 = vld [vmem:[%s14377_s23 + $0x140] sm:$0xff]  ;;  %v7847_v1 = vld [vmem:[%s14377_s23 + $0x148] sm:$0xff] }
 0x96f   : > { %5762 = vst.msk [vmem:[#allocation3 + $0x8] sm:$0xff] %vm5761_vm15, %v5757_v28  ;;  %v5755_v55 = vadd.f32 %v5749_v33, %v5739_v40  ;;  %v9688_v33 = vpack.c.bf16 %v7843_v22, %v7842_v11  ;;  %v9805_v9 = vpack.c.bf16 %v7924_v32, %v7923_v27  ;;  %v7927_v28 = vld [vmem:[%s14377_s23 + $0x3b0] sm:$0xff]  ;;  %v7928_v40 = vld [vmem:[%s14377_s23 + $0x3b8] sm:$0xff]  ;;  %v7863_v46 = vld [vmem:[%s14377_s23 + $0x1c0] sm:$0xff] }
 0x970   : > { %v5758_v54 = vmax.f32 %v5754_v43, 0.0  ;;  %v9694_v43 = vpack.c.bf16 %v7847_v1, %v7846_v6  ;;  %v7861_v11 = vld [vmem:[%s14377_s23 + $0x1b0] sm:$0xff]  ;;  %v7862_v22 = vld [vmem:[%s14377_s23 + $0x1b8] sm:$0xff]  ;;  %v7864_v35 = vld [vmem:[%s14377_s23 + $0x1c8] sm:$0xff] }
 0x971   : > { %v5759_v45 = vmax.f32 %v5755_v55, 0.0  ;;  %v9811_v55 = vpack.c.bf16 %v7928_v40, %v7927_v28  ;;  %v7944_v37 = vld [vmem:[%s14377_s23 + $0x430] sm:$0xff]  ;;  %v7945_v44 = vld [vmem:[%s14377_s23 + $0x438] sm:$0xff]  ;;  %v7946_v28 = vld [vmem:[%s14377_s23 + $0x440] sm:$0xff] }
 0x972   : > { %5763 = vst [vmem:[#allocation3 + $0x10] sm:$0x1f] %v5758_v54  ;;  %v7848_v54 = vld [vmem:[%s14377_s23 + $0x150] sm:$0xff]  ;;  %v7866_v1 = vld [vmem:[%s14377_s23 + $0x1d8] sm:$0xff]  ;;  %v7947_v40 = vld [vmem:[%s14377_s23 + $0x448] sm:$0xff] }
 0x973   : > { %5765 = vst.msk [vmem:[#allocation3 + $0x18] sm:$0x1f] %vm5764_vm0, %v5759_v45  ;;  %v7849_v45 = vld [vmem:[%s14377_s23 + $0x158] sm:$0xff]  ;;  %v7865_v6 = vld [vmem:[%s14377_s23 + $0x1d0] sm:$0xff] }
 0x974   : > { %v9697_v2 = vpack.c.bf16 %v7849_v45, %v7848_v54  ;;  %v7867_v54 = vld [vmem:[%s14377_s23 + $0x1e0] sm:$0xff]  ;;  %v7868_v45 = vld [vmem:[%s14377_s23 + $0x1e8] sm:$0xff] }
 0x976   : > { %v5767_v12 = vld [vmem:[#allocation3] ss:$8 sm:$0x3]  ;;  %v6102_v29 = vld [vmem:[#allocation3 + $0x3] ss:$8 sm:$0x3] }
 0x977   : > { %v5798_v48 = vrot.slane %v5767_v12, %v12583_v50  ;;  %v5802_v49 = vrot.slane %v5767_v12, %v12585_v53  ;;  %v6134_v51 = vrot.slane %v6102_v29, %v12583_v50  ;;  %v6138_v30 = vrot.slane %v6102_v29, %v12585_v53  ;;  %v13057_v58 = vld [vmem:[#allocation3 + $0x1] ss:$8 sm:$0x3]  ;;  %v13059_v59 = vld [vmem:[#allocation3 + $0x4] ss:$8 sm:$0x3] }
 0x978   : > { %v5914_v42 = vrot.slane %v13057_v58, %v12585_v53  ;;  %v6250_v63 = vrot.slane %v13059_v59, %v12585_v53  ;;  %v7850_v12 = vld [vmem:[%s14377_s23 + $0x160] sm:$0xff]  ;;  %v7851_v29 = vld [vmem:[%s14377_s23 + $0x168] sm:$0xff]  ;;  %v5910_v21 = vrot.slane %v13057_v58, %v12583_v50 }
 0x979   : > { %7831 = vmatprep.mubr.msk.f32.mxu1 %vm5761_vm15, %v5802_v49  ;;  %7912 = vmatprep.mubr.msk.f32.mxu0 %vm5761_vm15, %v6138_v30  ;;  %v9700_v57 = vpack.c.bf16 %v7851_v29, %v7850_v12  ;;  %v7852_v49 = vld [vmem:[%s14377_s23 + $0x170] sm:$0xff]  ;;  %v7933_v30 = vld [vmem:[%s14377_s23 + $0x3e0] sm:$0xff]  ;;  %v7870_v29 = vld [vmem:[%s14377_s23 + $0x1f8] sm:$0xff] }
 0x97a   : > { %5871 = vmatmul.mubr.f32.vlgmr.msra.gmra.mrb[72].mxu1 %v5798_v48  ;;  %6207 = vmatmul.mubr.f32.vlgmr.msra.gmra.mrb[36].mxu0 %v6134_v51  ;;  %v7853_v51 = vld [vmem:[%s14377_s23 + $0x178] sm:$0xff]  ;;  %v9820_v62 = vpack.c.bf16 %v7934_v60, %v7933_v30  ;;  %v13246_v52 = vld [vmem:[#allocation3 + $0x2] ss:$8 sm:$0x3]  ;;  %v7869_v12 = vld [vmem:[%s14377_s23 + $0x1f0] sm:$0xff] }
 0x97b   : > { %9674 = vmatpush1.bf16.msra.mxu1 %v9673_v15  ;;  %9791 = vmatpush1.bf16.msra.mxu0 %v9790_v7  ;;  %v7931_v15 = vld [vmem:[%s14377_s23 + $0x3d0] sm:$0xff]  ;;  %v7932_v7 = vld [vmem:[%s14377_s23 + $0x3d8] sm:$0xff]  ;;  %v9703_v61 = vpack.c.bf16 %v7853_v51, %v7852_v49  ;;  %v13248_v19 = vld [vmem:[#allocation3 + $0x5] ss:$8 sm:$0x3]  ;;  %v6026_v27 = vrot.slane %v13246_v52, %v12585_v53 }
 0x97c   : > { %7858 = vmatprep.mubr.msk.f32.mxu1 %vm5761_vm15, %v5914_v42  ;;  %7939 = vmatprep.mubr.msk.f32.mxu0 %vm5761_vm15, %v6250_v63  ;;  %v9817_v48 = vpack.c.bf16 %v7932_v7, %v7931_v15  ;;  %v7854_v42 = vld [vmem:[%s14377_s23 + $0x180] sm:$0xff]  ;;  %v7855_v63 = vld [vmem:[%s14377_s23 + $0x188] sm:$0xff]  ;;  %v6362_v32 = vrot.slane %v13248_v19, %v12585_v53  ;;  %v7952_v30 = vld [vmem:[%s14377_s23 + $0x470] sm:$0xff] }
 0x97d   : > { %9675 = vmatprep.subr.bf16.mxu1 %v11087_v47  ;;  %9792 = vmatprep.subr.bf16.mxu0 %v11087_v47  ;;  %v9706_v16 = vpack.c.bf16 %v7855_v63, %v7854_v42  ;;  %v7942_v58 = vld [vmem:[%s14377_s23 + $0x420] sm:$0xff]  ;;  %v7951_v7 = vld [vmem:[%s14377_s23 + $0x468] sm:$0xff]  ;;  %v7953_v60 = vld [vmem:[%s14377_s23 + $0x478] sm:$0xff] }
 0x97e   : > { %v7950_v15 = vld [vmem:[%s14377_s23 + $0x460] sm:$0xff]  ;;  %v7872_v51 = vld [vmem:[%s14377_s23 + $0x208] sm:$0xff]  ;;  %v7873_v42 = vld [vmem:[%s14377_s23 + $0x210] sm:$0xff] }
 0x97f   : > { %9677 = vmatpush1.bf16.msra.mxu1 %v9676_v3  ;;  %9794 = vmatpush1.bf16.msra.mxu0 %v9793_v5  ;;  %v7935_v3 = vld [vmem:[%s14377_s23 + $0x3f0] sm:$0xff]  ;;  %v7936_v5 = vld [vmem:[%s14377_s23 + $0x3f8] sm:$0xff]  ;;  %v7871_v49 = vld [vmem:[%s14377_s23 + $0x200] sm:$0xff] }
 0x980   : > { %9678 = vmatprep.subr.bf16.mxu1 %v11087_v47  ;;  %9795 = vmatprep.subr.bf16.mxu0 %v11087_v47  ;;  %v9823_v10 = vpack.c.bf16 %v7936_v5, %v7935_v3  ;;  %v7874_v63 = vld [vmem:[%s14377_s23 + $0x218] sm:$0xff]  ;;  %v7954_v3 = vld [vmem:[%s14377_s23 + $0x480] sm:$0xff]  ;;  %v7955_v5 = vld [vmem:[%s14377_s23 + $0x488] sm:$0xff] }
 0x983   : > { %9680 = vmatpush1.bf16.msra.mxu1 %v9679_v13  ;;  %9797 = vmatpush1.bf16.msra.mxu0 %v9796_v26  ;;  %v7937_v13 = vld [vmem:[%s14377_s23 + $0x400] sm:$0xff]  ;;  %v7938_v26 = vld [vmem:[%s14377_s23 + $0x408] sm:$0xff] }
 0x984   : > { %9681 = vmatprep.subr.bf16.mxu1 %v11087_v47  ;;  %9798 = vmatprep.subr.bf16.mxu0 %v11087_v47  ;;  %v9826_v34 = vpack.c.bf16 %v7938_v26, %v7937_v13  ;;  %v7956_v13 = vld [vmem:[%s14377_s23 + $0x490] sm:$0xff]  ;;  %v7957_v26 = vld [vmem:[%s14377_s23 + $0x498] sm:$0xff] }
 0x987   : > { %9683 = vmatpush1.bf16.msra.mxu1 %v9682_v18  ;;  %9800 = vmatpush1.bf16.msra.mxu0 %v9799_v20  ;;  %v7940_v18 = vld [vmem:[%s14377_s23 + $0x410] sm:$0xff]  ;;  %v7941_v20 = vld [vmem:[%s14377_s23 + $0x418] sm:$0xff] }
 0x988   : > { %9684 = vmatprep.subr.bf16.mxu1 %v11087_v47  ;;  %9801 = vmatprep.subr.bf16.mxu0 %v11087_v47 }
 0x98b   : > { %9686 = vmatpush1.bf16.msra.mxu1 %v9685_v25  ;;  %9803 = vmatpush1.bf16.msra.mxu0 %v9802_v24  ;;  %v6246_v25 = vrot.slane %v13059_v59, %v12583_v50  ;;  %v9829_v24 = vpack.c.bf16 %v7941_v20, %v7940_v18  ;;  %v7943_v59 = vld [vmem:[%s14377_s23 + $0x428] sm:$0xff]  ;;  %v7958_v18 = vld [vmem:[%s14377_s23 + $0x4a0] sm:$0xff] }
 0x98c   : > { %9687 = vmatprep.subr.bf16.mxu1 %v11087_v47  ;;  %9804 = vmatprep.subr.bf16.mxu0 %v11087_v47  ;;  %v7959_v20 = vld [vmem:[%s14377_s23 + $0x4a8] sm:$0xff] }
 0x98f   : > { %9689 = vmatpush1.bf16.msra.mxu1 %v9688_v33  ;;  %9806 = vmatpush1.bf16.msra.mxu0 %v9805_v9  ;;  %v9715_v33 = vpack.c.bf16 %v7862_v22, %v7861_v11  ;;  %v9832_v9 = vpack.c.bf16 %v7943_v59, %v7942_v58  ;;  %v7960_v11 = vld [vmem:[%s14377_s23 + $0x4b0] sm:$0xff]  ;;  %v7961_v22 = vld [vmem:[%s14377_s23 + $0x4b8] sm:$0xff] }
 0x990   : > { %9690 = vmatprep.subr.bf16.mxu1 %v11087_v47  ;;  %9807 = vmatprep.subr.bf16.mxu0 %v11087_v47  ;;  %v9859_v58 = vpack.c.bf16 %v7961_v22, %v7960_v11  ;;  %v7881_v59 = vld [vmem:[%s14377_s23 + $0x250] sm:$0xff]  ;;  %v7995_v11 = vld [vmem:[%s14377_s23 + $0x5b8] sm:$0xff]  ;;  %v13537_v22 = vld [vmem:[#allocation3 + $0x7] ss:$8 sm:$0x3] }
 0x993   : > { %9692 = vmatpush1.bf16.msra.mxu1 %v9691_v31  ;;  %9809 = vmatpush1.bf16.msra.mxu0 %v9808_v39  ;;  %v9718_v31 = vpack.c.bf16 %v7864_v35, %v7863_v46  ;;  %v9835_v39 = vpack.c.bf16 %v7945_v44, %v7944_v37  ;;  %v7883_v37 = vld [vmem:[%s14377_s23 + $0x260] sm:$0xff]  ;;  %v7884_v44 = vld [vmem:[%s14377_s23 + $0x268] sm:$0xff] }
 0x994   : > { %9693 = vmatprep.subr.bf16.mxu1 %v11087_v47  ;;  %9810 = vmatprep.subr.bf16.mxu0 %v11087_v47 }
 0x997   : > { %9695 = vmatpush1.bf16.msra.mxu1 %v9694_v43  ;;  %9812 = vmatpush1.bf16.msra.mxu0 %v9811_v55  ;;  %v9721_v43 = vpack.c.bf16 %v7866_v1, %v7865_v6  ;;  %v9838_v55 = vpack.c.bf16 %v7947_v40, %v7946_v28  ;;  %v9748_v6 = vpack.c.bf16 %v7884_v44, %v7883_v37  ;;  %v7967_v28 = vld [vmem:[%s14377_s23 + $0x4e0] sm:$0xff]  ;;  %v7968_v40 = vld [vmem:[%s14377_s23 + $0x4e8] sm:$0xff] }
 0x998   : > { %9696 = vmatprep.subr.bf16.mxu1 %v11087_v47  ;;  %9813 = vmatprep.subr.bf16.mxu0 %v11087_v47  ;;  %v8000_v44 = vld [vmem:[%s14377_s23 + $0x5e0] sm:$0xff] }
 0x99b   : > { %9698 = vmatpush1.bf16.msra.mxu1 %v9697_v2  ;;  %9815 = vmatpush1.bf16.msra.mxu0 %v9814_v4  ;;  %v9724_v2 = vpack.c.bf16 %v7868_v45, %v7867_v54  ;;  %v9841_v4 = vpack.c.bf16 %v7949_v56, %v7948_v8  ;;  %v9868_v54 = vpack.c.bf16 %v7968_v40, %v7967_v28  ;;  %v7969_v8 = vld [vmem:[%s14377_s23 + $0x4f0] sm:$0xff]  ;;  %v7970_v56 = vld [vmem:[%s14377_s23 + $0x4f8] sm:$0xff]  ;;  %v8004_v40 = vld [vmem:[%s14377_s23 + $0x600] sm:$0xff] }
 0x99c   : > { %9699 = vmatprep.subr.bf16.mxu1 %v11087_v47  ;;  %9816 = vmatprep.subr.bf16.mxu0 %v11087_v47  ;;  %v6358_v45 = vrot.slane %v13248_v19, %v12583_v50  ;;  %v7971_v19 = vld [vmem:[%s14377_s23 + $0x500] sm:$0xff] }
 0x99f   : > { %9701 = vmatpush1.bf16.msra.mxu1 %v9700_v57  ;;  %9818 = vmatpush1.bf16.msra.mxu0 %v9817_v48  ;;  %v9727_v57 = vpack.c.bf16 %v7870_v29, %v7869_v12  ;;  %v9844_v48 = vpack.c.bf16 %v7951_v7, %v7950_v15  ;;  %v7973_v29 = vld [vmem:[%s14377_s23 + $0x510] sm:$0xff]  ;;  %v7974_v15 = vld [vmem:[%s14377_s23 + $0x518] sm:$0xff] }
 0x9a0   : > { %9702 = vmatprep.subr.bf16.mxu1 %v11087_v47  ;;  %9819 = vmatprep.subr.bf16.mxu0 %v11087_v47  ;;  %v9877_v7 = vpack.c.bf16 %v7974_v15, %v7973_v29  ;;  %v8012_v29 = vld [vmem:[%s14377_s23 + $0x640] sm:$0xff]  ;;  %v8013_v15 = vld [vmem:[%s14377_s23 + $0x648] sm:$0xff] }
 0x9a3   : > { %9704 = vmatpush1.bf16.msra.mxu1 %v9703_v61  ;;  %9821 = vmatpush1.bf16.msra.mxu0 %v9820_v62  ;;  %v9730_v61 = vpack.c.bf16 %v7872_v51, %v7871_v49  ;;  %v9847_v62 = vpack.c.bf16 %v7953_v60, %v7952_v30  ;;  %v7977_v51 = vld [vmem:[%s14377_s23 + $0x530] sm:$0xff]  ;;  %v7978_v30 = vld [vmem:[%s14377_s23 + $0x538] sm:$0xff] }
 0x9a4   : > { %9705 = vmatprep.subr.bf16.mxu1 %v11087_v47  ;;  %9822 = vmatprep.subr.bf16.mxu0 %v11087_v47  ;;  %v9883_v60 = vpack.c.bf16 %v7978_v30, %v7977_v51  ;;  %v8016_v51 = vld [vmem:[%s14377_s23 + $0x660] sm:$0xff]  ;;  %v8017_v30 = vld [vmem:[%s14377_s23 + $0x668] sm:$0xff] }
 0x9a7   : > { %9707 = vmatpush1.bf16.msra.mxu1 %v9706_v16  ;;  %9824 = vmatpush1.bf16.msra.mxu0 %v9823_v10  ;;  %v9733_v16 = vpack.c.bf16 %v7874_v63, %v7873_v42  ;;  %v9850_v10 = vpack.c.bf16 %v7955_v5, %v7954_v3  ;;  %v7981_v63 = vld [vmem:[%s14377_s23 + $0x550] sm:$0xff]  ;;  %v7982_v3 = vld [vmem:[%s14377_s23 + $0x558] sm:$0xff] }
 0x9a8   : > { %9708 = vmatprep.subr.bf16.mxu1 %v11087_v47  ;;  %9825 = vmatprep.subr.bf16.mxu0 %v11087_v47  ;;  %v9889_v5 = vpack.c.bf16 %v7982_v3, %v7981_v63  ;;  %v8021_v63 = vld [vmem:[%s14377_s23 + $0x680] sm:$0xff]  ;;  %v8022_v3 = vld [vmem:[%s14377_s23 + $0x688] sm:$0xff] }
 0x9ab   : > { %9710 = vmatpush1.bf16.msra.mxu1 %v9709_v36  ;;  %9827 = vmatpush1.bf16.msra.mxu0 %v9826_v34  ;;  %v9736_v36 = vpack.c.bf16 %v7876_v14, %v7875_v23  ;;  %v9853_v34 = vpack.c.bf16 %v7957_v26, %v7956_v13  ;;  %v7985_v14 = vld [vmem:[%s14377_s23 + $0x570] sm:$0xff]  ;;  %v7986_v13 = vld [vmem:[%s14377_s23 + $0x578] sm:$0xff] }
 0x9ac   : > { %9711 = vmatprep.subr.bf16.mxu1 %v11087_v47  ;;  %9828 = vmatprep.subr.bf16.mxu0 %v11087_v47  ;;  %v9895_v26 = vpack.c.bf16 %v7986_v13, %v7985_v14  ;;  %v8024_v14 = vld [vmem:[%s14377_s23 + $0x698] sm:$0xff] }
 0x9ae   : > { %5983 = vmatmul.mubr.f32.vlgmr.msra.gmra.mrb[72].mxu1 %v5910_v21  ;;  %6319 = vmatmul.mubr.f32.vlgmr.msra.gmra.mrb[36].mxu0 %v6246_v25  ;;  %v9856_v21 = vpack.c.bf16 %v7959_v20, %v7958_v18  ;;  %v7879_v25 = vld [vmem:[%s14377_s23 + $0x240] sm:$0xff]  ;;  %v7990_v18 = vld [vmem:[%s14377_s23 + $0x598] sm:$0xff] }
 0x9af   : > { %9713 = vmatpush1.bf16.msra.mxu1 %v9712_v41  ;;  %7885 = vmatprep.mubr.msk.f32.mxu1 %vm5761_vm15, %v6026_v27  ;;  %v9739_v41 = vpack.c.bf16 %v7878_v38, %v7877_v17  ;;  %v7989_v38 = vld [vmem:[%s14377_s23 + $0x590] sm:$0xff] }
 0x9b0   : > { %9830 = vmatpush1.bf16.msra.mxu0 %v9829_v24  ;;  %7966 = vmatprep.mubr.msk.f32.mxu0 %vm5761_vm15, %v6362_v32  ;;  %v7880_v24 = vld [vmem:[%s14377_s23 + $0x248] sm:$0xff]  ;;  %v7882_v32 = vld [vmem:[%s14377_s23 + $0x258] sm:$0xff]  ;;  %v9901_v20 = vpack.c.bf16 %v7990_v18, %v7989_v38  ;;  %v8027_v38 = vld [vmem:[%s14377_s23 + $0x6b0] sm:$0xff] }
 0x9b1   : > { %9714 = vmatprep.subr.bf16.mxu1 %v11087_v47  ;;  %9831 = vmatprep.subr.bf16.mxu0 %v11087_v47  ;;  %v9742_v27 = vpack.c.bf16 %v7880_v24, %v7879_v25  ;;  %v9745_v46 = vpack.c.bf16 %v7882_v32, %v7881_v59  ;;  %v7994_v24 = vld [vmem:[%s14377_s23 + $0x5b0] sm:$0xff]  ;;  %v7996_v59 = vld [vmem:[%s14377_s23 + $0x5c0] sm:$0xff]  ;;  %v7997_v32 = vld [vmem:[%s14377_s23 + $0x5c8] sm:$0xff] }
 0x9b2   : > { %v8028_v18 = vld [vmem:[%s14377_s23 + $0x6b8] sm:$0xff] }
 0x9b3   : > { %9716 = vmatpush1.bf16.msra.mxu1 %v9715_v33  ;;  %v7962_v33 = vld [vmem:[%s14377_s23 + $0x4c0] sm:$0xff] }
 0x9b4   : > { %9833 = vmatpush1.bf16.msra.mxu0 %v9832_v9  ;;  %9717 = vmatprep.subr.bf16.mxu1 %v11087_v47  ;;  %v7963_v9 = vld [vmem:[%s14377_s23 + $0x4c8] sm:$0xff] }
 0x9b5   : > { %9834 = vmatprep.subr.bf16.mxu0 %v11087_v47  ;;  %v9862_v35 = vpack.c.bf16 %v7963_v9, %v7962_v33  ;;  %v6586_v33 = vrot.slane %v13537_v22, %v12585_v53  ;;  %v9910_v9 = vpack.c.bf16 %v7997_v32, %v7996_v59  ;;  %v8035_v32 = vld [vmem:[%s14377_s23 + $0x6f0] sm:$0xff] }
 0x9b7   : > { %9719 = vmatpush1.bf16.msra.mxu1 %v9718_v31  ;;  %v7964_v31 = vld [vmem:[%s14377_s23 + $0x4d0] sm:$0xff] }
 0x9b8   : > { %9836 = vmatpush1.bf16.msra.mxu0 %v9835_v39  ;;  %9720 = vmatprep.subr.bf16.mxu1 %v11087_v47  ;;  %v7965_v39 = vld [vmem:[%s14377_s23 + $0x4d8] sm:$0xff] }
 0x9b9   : > { %9837 = vmatprep.subr.bf16.mxu0 %v11087_v47  ;;  %v9865_v1 = vpack.c.bf16 %v7965_v39, %v7964_v31  ;;  %v8001_v31 = vld [vmem:[%s14377_s23 + $0x5e8] sm:$0xff] }
 0x9ba   : > { %v9916_v39 = vpack.c.bf16 %v8001_v31, %v8000_v44  ;;  %v8039_v44 = vld [vmem:[%s14377_s23 + $0x710] sm:$0xff]  ;;  %v8040_v31 = vld [vmem:[%s14377_s23 + $0x718] sm:$0xff] }
 0x9bb   : > { %9722 = vmatpush1.bf16.msra.mxu1 %v9721_v43  ;;  %v13436_v43 = vld [vmem:[#allocation3 + $0x6] ss:$8 sm:$0x3] }
 0x9bc   : > { %9839 = vmatpush1.bf16.msra.mxu0 %v9838_v55  ;;  %9723 = vmatprep.subr.bf16.mxu1 %v11087_v47  ;;  %v6022_v55 = vrot.slane %v13246_v52, %v12583_v50  ;;  %v6474_v52 = vrot.slane %v13436_v43, %v12585_v53 }
 0x9bd   : > { %9840 = vmatprep.subr.bf16.mxu0 %v11087_v47 }
 0x9bf   : > { %9725 = vmatpush1.bf16.msra.mxu1 %v9724_v2  ;;  %v9871_v2 = vpack.c.bf16 %v7970_v56, %v7969_v8  ;;  %v8008_v56 = vld [vmem:[%s14377_s23 + $0x620] sm:$0xff] }
 0x9c0   : > { %9842 = vmatpush1.bf16.msra.mxu0 %v9841_v4  ;;  %9726 = vmatprep.subr.bf16.mxu1 %v11087_v47  ;;  %v7972_v4 = vld [vmem:[%s14377_s23 + $0x508] sm:$0xff] }
 0x9c1   : > { %9843 = vmatprep.subr.bf16.mxu0 %v11087_v47  ;;  %v9874_v12 = vpack.c.bf16 %v7972_v4, %v7971_v19  ;;  %v8010_v19 = vld [vmem:[%s14377_s23 + $0x630] sm:$0xff]  ;;  %v8011_v4 = vld [vmem:[%s14377_s23 + $0x638] sm:$0xff] }
 0x9c3   : > { %9728 = vmatpush1.bf16.msra.mxu1 %v9727_v57  ;;  %v7975_v57 = vld [vmem:[%s14377_s23 + $0x520] sm:$0xff] }
 0x9c4   : > { %9845 = vmatpush1.bf16.msra.mxu0 %v9844_v48  ;;  %9729 = vmatprep.subr.bf16.mxu1 %v11087_v47  ;;  %v7976_v48 = vld [vmem:[%s14377_s23 + $0x528] sm:$0xff] }
 0x9c5   : > { %9846 = vmatprep.subr.bf16.mxu0 %v11087_v47  ;;  %v9880_v49 = vpack.c.bf16 %v7976_v48, %v7975_v57  ;;  %v8014_v57 = vld [vmem:[%s14377_s23 + $0x650] sm:$0xff]  ;;  %v8015_v48 = vld [vmem:[%s14377_s23 + $0x658] sm:$0xff] }
 0x9c7   : > { %9731 = vmatpush1.bf16.msra.mxu1 %v9730_v61  ;;  %v7979_v61 = vld [vmem:[%s14377_s23 + $0x540] sm:$0xff] }
 0x9c8   : > { %9848 = vmatpush1.bf16.msra.mxu0 %v9847_v62  ;;  %9732 = vmatprep.subr.bf16.mxu1 %v11087_v47  ;;  %v7980_v62 = vld [vmem:[%s14377_s23 + $0x548] sm:$0xff] }
 0x9c9   : > { %9849 = vmatprep.subr.bf16.mxu0 %v11087_v47  ;;  %v9886_v42 = vpack.c.bf16 %v7980_v62, %v7979_v61  ;;  %v8018_v61 = vld [vmem:[%s14377_s23 + $0x670] sm:$0xff]  ;;  %v8019_v62 = vld [vmem:[%s14377_s23 + $0x678] sm:$0xff] }
 0x9cb   : > { %9734 = vmatpush1.bf16.msra.mxu1 %v9733_v16  ;;  %v7983_v16 = vld [vmem:[%s14377_s23 + $0x560] sm:$0xff] }
 0x9cc   : > { %9851 = vmatpush1.bf16.msra.mxu0 %v9850_v10  ;;  %9735 = vmatprep.subr.bf16.mxu1 %v11087_v47  ;;  %v7984_v10 = vld [vmem:[%s14377_s23 + $0x568] sm:$0xff] }
 0x9cd   : > { %9852 = vmatprep.subr.bf16.mxu0 %v11087_v47  ;;  %v9892_v23 = vpack.c.bf16 %v7984_v10, %v7983_v16  ;;  %v9946_v16 = vpack.c.bf16 %v8022_v3, %v8021_v63  ;;  %v6582_v10 = vrot.slane %v13537_v22, %v12583_v50  ;;  %v8058_v63 = vld [vmem:[%s14377_s23 + $0x7a0] sm:$0xff]  ;;  %v8059_v3 = vld [vmem:[%s14377_s23 + $0x7a8] sm:$0xff] }
 0x9cf   : > { %9737 = vmatpush1.bf16.msra.mxu1 %v9736_v36  ;;  %v7987_v36 = vld [vmem:[%s14377_s23 + $0x580] sm:$0xff] }
 0x9d0   : > { %9854 = vmatpush1.bf16.msra.mxu0 %v9853_v34  ;;  %9738 = vmatprep.subr.bf16.mxu1 %v11087_v47  ;;  %v7988_v34 = vld [vmem:[%s14377_s23 + $0x588] sm:$0xff] }
 0x9d1   : > { %9855 = vmatprep.subr.bf16.mxu0 %v11087_v47  ;;  %v9898_v17 = vpack.c.bf16 %v7988_v34, %v7987_v36  ;;  %v8025_v36 = vld [vmem:[%s14377_s23 + $0x6a0] sm:$0xff]  ;;  %v8026_v34 = vld [vmem:[%s14377_s23 + $0x6a8] sm:$0xff] }
 0x9d3   : > { %9740 = vmatpush1.bf16.msra.mxu1 %v9739_v41  ;;  %v7991_v41 = vld [vmem:[%s14377_s23 + $0x5a0] sm:$0xff] }
 0x9d4   : > { %9857 = vmatpush1.bf16.msra.mxu0 %v9856_v21  ;;  %9741 = vmatprep.subr.bf16.mxu1 %v11087_v47  ;;  %v7992_v21 = vld [vmem:[%s14377_s23 + $0x5a8] sm:$0xff] }
 0x9d5   : > { %9858 = vmatprep.subr.bf16.mxu0 %v11087_v47  ;;  %v9904_v25 = vpack.c.bf16 %v7992_v21, %v7991_v41  ;;  %v8029_v41 = vld [vmem:[%s14377_s23 + $0x6c0] sm:$0xff]  ;;  %v8030_v21 = vld [vmem:[%s14377_s23 + $0x6c8] sm:$0xff] }
 0x9d7   : > { %9743 = vmatpush1.bf16.msra.mxu1 %v9742_v27  ;;  %v9907_v27 = vpack.c.bf16 %v7995_v11, %v7994_v24  ;;  %v8031_v24 = vld [vmem:[%s14377_s23 + $0x6d0] sm:$0xff]  ;;  %v8032_v11 = vld [vmem:[%s14377_s23 + $0x6d8] sm:$0xff] }
 0x9d8   : > { %9860 = vmatpush1.bf16.msra.mxu0 %v9859_v58  ;;  %9744 = vmatprep.subr.bf16.mxu1 %v11087_v47  ;;  %v6470_v58 = vrot.slane %v13436_v43, %v12583_v50  ;;  %v8005_v43 = vld [vmem:[%s14377_s23 + $0x608] sm:$0xff]  ;;  %v9961_v22 = vpack.c.bf16 %v8032_v11, %v8031_v24  ;;  %v8070_v24 = vld [vmem:[%s14377_s23 + $0x800] sm:$0xff] }
 0x9d9   : > { %9861 = vmatprep.subr.bf16.mxu0 %v11087_v47  ;;  %v8071_v11 = vld [vmem:[%s14377_s23 + $0x808] sm:$0xff] }
 0x9db   : > { %9746 = vmatpush1.bf16.msra.mxu1 %v9745_v46  ;;  %v7998_v46 = vld [vmem:[%s14377_s23 + $0x5d0] sm:$0xff] }
 0x9dc   : > { %9863 = vmatpush1.bf16.msra.mxu0 %v9862_v35  ;;  %9747 = vmatprep.subr.bf16.mxu1 %v11087_v47  ;;  %v7999_v35 = vld [vmem:[%s14377_s23 + $0x5d8] sm:$0xff] }
 0x9dd   : > { %9864 = vmatprep.subr.bf16.mxu0 %v11087_v47  ;;  %v9913_v37 = vpack.c.bf16 %v7999_v35, %v7998_v46  ;;  %v8037_v46 = vld [vmem:[%s14377_s23 + $0x700] sm:$0xff]  ;;  %v8038_v35 = vld [vmem:[%s14377_s23 + $0x708] sm:$0xff] }
 0x9df   : > { %9749 = vmatpush1.bf16.msra.mxu1 %v9748_v6  ;;  %v8002_v6 = vld [vmem:[%s14377_s23 + $0x5f0] sm:$0xff] }
 0x9e0   : > { %9866 = vmatpush1.bf16.msra.mxu0 %v9865_v1  ;;  %10140 = vmatprep.subr.bf16.mxu1 %v11087_v47  ;;  %v8003_v1 = vld [vmem:[%s14377_s23 + $0x5f8] sm:$0xff] }
 0x9e1   : > { %9867 = vmatprep.subr.bf16.mxu0 %v11087_v47  ;;  %v9919_v28 = vpack.c.bf16 %v8003_v1, %v8002_v6  ;;  %v8041_v6 = vld [vmem:[%s14377_s23 + $0x720] sm:$0xff]  ;;  %v8042_v1 = vld [vmem:[%s14377_s23 + $0x728] sm:$0xff] }
 0x9e2   : > { %6095 = vmatmul.mubr.f32.vlgmr.msra.gmra.mrb[72].mxu1 %v6022_v55  ;;  %v9922_v55 = vpack.c.bf16 %v8005_v43, %v8004_v40  ;;  %v8043_v40 = vld [vmem:[%s14377_s23 + $0x730] sm:$0xff]  ;;  %v8044_v43 = vld [vmem:[%s14377_s23 + $0x738] sm:$0xff] }
 0x9e3   : > { %6431 = vmatmul.mubr.f32.vlgmr.msra.gmra.mrb[36].mxu0 %v6358_v45  ;;  %v8007_v45 = vld [vmem:[%s14377_s23 + $0x618] sm:$0xff]  ;;  %8509 = vmatprep.mubr.msk.f32.mxu1 %vm11088_vm2, %v11085_v0 }
 0x9e4   : > { %9869 = vmatpush1.bf16.msra.mxu0 %v9868_v54  ;;  %7993 = vmatprep.mubr.msk.f32.mxu0 %vm5761_vm15, %v6474_v52  ;;  %v8006_v54 = vld [vmem:[%s14377_s23 + $0x610] sm:$0xff]  ;;  %v8009_v52 = vld [vmem:[%s14377_s23 + $0x628] sm:$0xff] }
 0x9e5   : > { %9870 = vmatprep.subr.bf16.mxu0 %v11087_v47  ;;  %v9925_v8 = vpack.c.bf16 %v8007_v45, %v8006_v54  ;;  %v8045_v54 = vld [vmem:[%s14377_s23 + $0x740] sm:$0xff]  ;;  %v8046_v45 = vld [vmem:[%s14377_s23 + $0x748] sm:$0xff] }
 0x9e8   : > { %9872 = vmatpush1.bf16.msra.mxu0 %v9871_v2  ;;  %v9928_v2 = vpack.c.bf16 %v8009_v52, %v8008_v56  ;;  %v8048_v56 = vld [vmem:[%s14377_s23 + $0x750] sm:$0xff]  ;;  %v8049_v52 = vld [vmem:[%s14377_s23 + $0x758] sm:$0xff] }
 0x9e9   : > { %9873 = vmatprep.subr.bf16.mxu0 %v11087_v47 }
 0x9ec   : > { %9875 = vmatpush1.bf16.msra.mxu0 %v9874_v12  ;;  %v9931_v12 = vpack.c.bf16 %v8011_v4, %v8010_v19  ;;  %v9985_v19 = vpack.c.bf16 %v8049_v52, %v8048_v56  ;;  %v8084_v56 = vld [vmem:[%s14377_s23 + $0x868] sm:$0xff] }
 0x9ed   : > { %9876 = vmatprep.subr.bf16.mxu0 %v11087_v47 }
 0x9f0   : > { %9878 = vmatpush1.bf16.msra.mxu0 %v9877_v7  ;;  %v9934_v7 = vpack.c.bf16 %v8013_v15, %v8012_v29  ;;  %v8051_v29 = vld [vmem:[%s14377_s23 + $0x768] sm:$0xff] }
 0x9f1   : > { %9879 = vmatprep.subr.bf16.mxu0 %v11087_v47 }
 0x9f4   : > { %9881 = vmatpush1.bf16.msra.mxu0 %v9880_v49  ;;  %v9937_v49 = vpack.c.bf16 %v8015_v48, %v8014_v57  ;;  %v8052_v57 = vld [vmem:[%s14377_s23 + $0x770] sm:$0xff]  ;;  %v8053_v48 = vld [vmem:[%s14377_s23 + $0x778] sm:$0xff] }
 0x9f5   : > { %9882 = vmatprep.subr.bf16.mxu0 %v11087_v47 }
 0x9f8   : > { %9884 = vmatpush1.bf16.msra.mxu0 %v9883_v60  ;;  %v9940_v60 = vpack.c.bf16 %v8017_v30, %v8016_v51  ;;  %v8054_v51 = vld [vmem:[%s14377_s23 + $0x780] sm:$0xff]  ;;  %v8055_v30 = vld [vmem:[%s14377_s23 + $0x788] sm:$0xff] }
 0x9f9   : > { %9885 = vmatprep.subr.bf16.mxu0 %v11087_v47 }
 0x9fc   : > { %9887 = vmatpush1.bf16.msra.mxu0 %v9886_v42  ;;  %v9943_v42 = vpack.c.bf16 %v8019_v62, %v8018_v61  ;;  %v8056_v61 = vld [vmem:[%s14377_s23 + $0x790] sm:$0xff]  ;;  %v8057_v62 = vld [vmem:[%s14377_s23 + $0x798] sm:$0xff] }
 0x9fd   : > { %9888 = vmatprep.subr.bf16.mxu0 %v11087_v47 }
 0xa00   : > { %9890 = vmatpush1.bf16.msra.mxu0 %v9889_v5  ;;  %v13635_v5 = vld [vmem:[#allocation3 + $0x10] ss:$8 sm:$0x3] }
 0xa01   : > { %9891 = vmatprep.subr.bf16.mxu0 %v11087_v47  ;;  %v6698_v13 = vrot.slane %v13635_v5, %v12585_v53  ;;  %v6694_v4 = vrot.slane %v13635_v5, %v12583_v50  ;;  %v10000_v5 = vpack.c.bf16 %v8059_v3, %v8058_v63  ;;  %v7225_v63 = vld [vmem:[%s14378_s19 + $0x18] sm:$0xff]  ;;  %v8093_v3 = vld [vmem:[%s14377_s23 + $0x8b0] sm:$0xff] }
 0xa04   : > { %9893 = vmatpush1.bf16.msra.mxu0 %v9892_v23  ;;  %v8023_v23 = vld [vmem:[%s14377_s23 + $0x690] sm:$0xff] }
 0xa05   : > { %9894 = vmatprep.subr.bf16.mxu0 %v11087_v47 }
 0xa08   : > { %9896 = vmatpush1.bf16.msra.mxu0 %v9895_v26  ;;  %v9949_v26 = vpack.c.bf16 %v8024_v14, %v8023_v23  ;;  %v8062_v14 = vld [vmem:[%s14377_s23 + $0x7c0] sm:$0xff] }
 0xa09   : > { %9897 = vmatprep.subr.bf16.mxu0 %v11087_v47 }
 0xa0c   : > { %9899 = vmatpush1.bf16.msra.mxu0 %v9898_v17  ;;  %v9952_v17 = vpack.c.bf16 %v8026_v34, %v8025_v36  ;;  %v8064_v36 = vld [vmem:[%s14377_s23 + $0x7d0] sm:$0xff]  ;;  %v8065_v34 = vld [vmem:[%s14377_s23 + $0x7d8] sm:$0xff] }
 0xa0d   : > { %9900 = vmatprep.subr.bf16.mxu0 %v11087_v47 }
 0xa10   : > { %9902 = vmatpush1.bf16.msra.mxu0 %v9901_v20  ;;  %v9955_v20 = vpack.c.bf16 %v8028_v18, %v8027_v38  ;;  %v8066_v38 = vld [vmem:[%s14377_s23 + $0x7e0] sm:$0xff]  ;;  %v8067_v18 = vld [vmem:[%s14377_s23 + $0x7e8] sm:$0xff] }
 0xa11   : > { %9903 = vmatprep.subr.bf16.mxu0 %v11087_v47 }
 0xa14   : > { %9905 = vmatpush1.bf16.msra.mxu0 %v9904_v25  ;;  %v9958_v25 = vpack.c.bf16 %v8030_v21, %v8029_v41  ;;  %v8068_v41 = vld [vmem:[%s14377_s23 + $0x7f0] sm:$0xff]  ;;  %v8069_v21 = vld [vmem:[%s14377_s23 + $0x7f8] sm:$0xff] }
 0xa15   : > { %9906 = vmatprep.subr.bf16.mxu0 %v11087_v47 }
 0xa17   : > { %6543 = vmatmul.mubr.f32.vlgmr.msra.gmra.mrb[36].mxu0 %v6470_v58  ;;  %v8034_v58 = vld [vmem:[%s14377_s23 + $0x6e8] sm:$0xff] }
 0xa18   : > { %9908 = vmatpush1.bf16.msra.mxu0 %v9907_v27  ;;  %8020 = vmatprep.mubr.msk.f32.mxu0 %vm5761_vm15, %v6586_v33  ;;  %v8033_v27 = vld [vmem:[%s14377_s23 + $0x6e0] sm:$0xff]  ;;  %v8036_v33 = vld [vmem:[%s14377_s23 + $0x6f8] sm:$0xff] }
 0xa19   : > { %9909 = vmatprep.subr.bf16.mxu0 %v11087_v47  ;;  %v9964_v59 = vpack.c.bf16 %v8034_v58, %v8033_v27  ;;  %v8072_v27 = vld [vmem:[%s14377_s23 + $0x810] sm:$0xff]  ;;  %v8073_v58 = vld [vmem:[%s14377_s23 + $0x818] sm:$0xff] }
 0xa1c   : > { %9911 = vmatpush1.bf16.msra.mxu0 %v9910_v9  ;;  %v9967_v9 = vpack.c.bf16 %v8036_v33, %v8035_v32  ;;  %v8075_v32 = vld [vmem:[%s14377_s23 + $0x820] sm:$0xff]  ;;  %v8076_v33 = vld [vmem:[%s14377_s23 + $0x828] sm:$0xff] }
 0xa1d   : > { %9912 = vmatprep.subr.bf16.mxu0 %v11087_v47 }
 0xa20   : > { %9914 = vmatpush1.bf16.msra.mxu0 %v9913_v37  ;;  %v9970_v37 = vpack.c.bf16 %v8038_v35, %v8037_v46  ;;  %v10024_v46 = vpack.c.bf16 %v8076_v33, %v8075_v32  ;;  %v8102_v33 = vld [vmem:[%s14377_s23 + $0x8f0] sm:$0xff] }
 0xa21   : > { %9915 = vmatprep.subr.bf16.mxu0 %v11087_v47 }
 0xa24   : > { %9917 = vmatpush1.bf16.msra.mxu0 %v9916_v39  ;;  %v9973_v39 = vpack.c.bf16 %v8040_v31, %v8039_v44  ;;  %v8078_v44 = vld [vmem:[%s14377_s23 + $0x838] sm:$0xff] }
 0xa25   : > { %9918 = vmatprep.subr.bf16.mxu0 %v11087_v47 }
 0xa28   : > { %9920 = vmatpush1.bf16.msra.mxu0 %v9919_v28  ;;  %v9976_v28 = vpack.c.bf16 %v8042_v1, %v8041_v6  ;;  %v8079_v1 = vld [vmem:[%s14377_s23 + $0x840] sm:$0xff] }
 0xa29   : > { %9921 = vmatprep.subr.bf16.mxu0 %v11087_v47 }
 0xa2c   : > { %9923 = vmatpush1.bf16.msra.mxu0 %v9922_v55  ;;  %v9979_v55 = vpack.c.bf16 %v8044_v43, %v8043_v40 }
 0xa2d   : > { %9924 = vmatprep.subr.bf16.mxu0 %v11087_v47 }
 0xa30   : > { %9926 = vmatpush1.bf16.msra.mxu0 %v9925_v8  ;;  %v9982_v8 = vpack.c.bf16 %v8046_v45, %v8045_v54  ;;  %v8082_v54 = vld [vmem:[%s14377_s23 + $0x858] sm:$0xff] }
 0xa31   : > { %9927 = vmatprep.subr.bf16.mxu0 %v11087_v47 }
 0xa34   : > { %9929 = vmatpush1.bf16.msra.mxu0 %v9928_v2  ;;  %v13733_v2 = vld [vmem:[#allocation3 + $0x11] ss:$8 sm:$0x3] }
 0xa35   : > { %9930 = vmatprep.subr.bf16.mxu0 %v11087_v47  ;;  %v6810_v15 = vrot.slane %v13733_v2, %v12585_v53  ;;  %v6806_v35 = vrot.slane %v13733_v2, %v12583_v50  ;;  %v8085_v2 = vld [vmem:[%s14377_s23 + $0x870] sm:$0xff] }
 0xa38   : > { %9932 = vmatpush1.bf16.msra.mxu0 %v9931_v12  ;;  %v8050_v12 = vld [vmem:[%s14377_s23 + $0x760] sm:$0xff] }
 0xa39   : > { %9933 = vmatprep.subr.bf16.mxu0 %v11087_v47 }
 0xa3c   : > { %9935 = vmatpush1.bf16.msra.mxu0 %v9934_v7  ;;  %v9988_v7 = vpack.c.bf16 %v8051_v29, %v8050_v12  ;;  %v8087_v12 = vld [vmem:[%s14377_s23 + $0x880] sm:$0xff]  ;;  %v8088_v29 = vld [vmem:[%s14377_s23 + $0x888] sm:$0xff] }
 0xa3d   : > { %9936 = vmatprep.subr.bf16.mxu0 %v11087_v47 }
 0xa40   : > { %9938 = vmatpush1.bf16.msra.mxu0 %v9937_v49  ;;  %v9991_v49 = vpack.c.bf16 %v8053_v48, %v8052_v57  ;;  %v8090_v57 = vld [vmem:[%s14377_s23 + $0x898] sm:$0xff] }
 0xa41   : > { %9939 = vmatprep.subr.bf16.mxu0 %v11087_v47 }
 0xa44   : > { %9941 = vmatpush1.bf16.msra.mxu0 %v9940_v60  ;;  %v9994_v60 = vpack.c.bf16 %v8055_v30, %v8054_v51  ;;  %v8092_v51 = vld [vmem:[%s14377_s23 + $0x8a8] sm:$0xff]  ;;  %v7222_v30 = vld [vmem:[%s14378_s19] sm:$0xff] }
 0xa45   : > { %9942 = vmatprep.subr.bf16.mxu0 %v11087_v47 }
 0xa48   : > { %9944 = vmatpush1.bf16.msra.mxu0 %v9943_v42  ;;  %v9997_v42 = vpack.c.bf16 %v8057_v62, %v8056_v61  ;;  %v7224_v61 = vld [vmem:[%s14378_s19 + $0x10] sm:$0xff] }
 0xa49   : > { %9945 = vmatprep.subr.bf16.mxu0 %v11087_v47 }
 0xa4b   : > { %6655 = vmatmul.mubr.f32.vlgmr.msra.gmra.mrb[36].mxu0 %v6582_v10  ;;  %v8061_v10 = vld [vmem:[%s14377_s23 + $0x7b8] sm:$0xff] }
 0xa4c   : > { %9947 = vmatpush1.bf16.msra.mxu0 %v9946_v16  ;;  %8047 = vmatprep.mubr.msk.f32.mxu0 %vm5761_vm15, %v6698_v13  ;;  %v8060_v16 = vld [vmem:[%s14377_s23 + $0x7b0] sm:$0xff]  ;;  %v8063_v13 = vld [vmem:[%s14377_s23 + $0x7c8] sm:$0xff] }
 0xa4d   : > { %9948 = vmatprep.subr.bf16.mxu0 %v11087_v47  ;;  %v10003_v23 = vpack.c.bf16 %v8061_v10, %v8060_v16  ;;  %v10144_v16 = vpack.c.bf16 %v7225_v63, %v7224_v61  ;;  %v7226_v10 = vld [vmem:[%s14378_s19 + $0x20] sm:$0xff]  ;;  %v8122_v63 = vld [vmem:[%s14377_s23 + $0x990] sm:$0xff] }
 0xa4e   : > { %v8120_v61 = vld [vmem:[%s14377_s23 + $0x980] sm:$0xff] }
 0xa50   : > { %9950 = vmatpush1.bf16.msra.mxu0 %v9949_v26  ;;  %v10006_v26 = vpack.c.bf16 %v8063_v13, %v8062_v14  ;;  %v8095_v13 = vld [vmem:[%s14377_s23 + $0x8c0] sm:$0xff] }
 0xa51   : > { %9951 = vmatprep.subr.bf16.mxu0 %v11087_v47 }
 0xa54   : > { %9953 = vmatpush1.bf16.msra.mxu0 %v9952_v17  ;;  %v10009_v17 = vpack.c.bf16 %v8065_v34, %v8064_v36  ;;  %v7228_v34 = vld [vmem:[%s14378_s19 + $0x30] sm:$0xff] }
 0xa55   : > { %9954 = vmatprep.subr.bf16.mxu0 %v11087_v47 }
 0xa58   : > { %9956 = vmatpush1.bf16.msra.mxu0 %v9955_v20  ;;  %v10012_v20 = vpack.c.bf16 %v8067_v18, %v8066_v38  ;;  %v8097_v18 = vld [vmem:[%s14377_s23 + $0x8d0] sm:$0xff] }
 0xa59   : > { %9957 = vmatprep.subr.bf16.mxu0 %v11087_v47 }
 0xa5c   : > { %9959 = vmatpush1.bf16.msra.mxu0 %v9958_v25  ;;  %v10015_v25 = vpack.c.bf16 %v8069_v21, %v8068_v41  ;;  %v7230_v21 = vld [vmem:[%s14378_s19 + $0x40] sm:$0xff] }
 0xa5d   : > { %9960 = vmatprep.subr.bf16.mxu0 %v11087_v47 }
 0xa60   : > { %9962 = vmatpush1.bf16.msra.mxu0 %v9961_v22  ;;  %v10018_v22 = vpack.c.bf16 %v8071_v11, %v8070_v24  ;;  %v8099_v11 = vld [vmem:[%s14377_s23 + $0x8e0] sm:$0xff] }
 0xa61   : > { %9963 = vmatprep.subr.bf16.mxu0 %v11087_v47 }
 0xa64   : > { %9965 = vmatpush1.bf16.msra.mxu0 %v9964_v59  ;;  %v10021_v59 = vpack.c.bf16 %v8073_v58, %v8072_v27  ;;  %v7232_v58 = vld [vmem:[%s14378_s19 + $0x50] sm:$0xff] }
 0xa65   : > { %9966 = vmatprep.subr.bf16.mxu0 %v11087_v47 }
 0xa68   : > { %9968 = vmatpush1.bf16.msra.mxu0 %v9967_v9  ;;  %v13831_v9 = vld [vmem:[#allocation3 + $0x12] ss:$8 sm:$0x3] }
 0xa69   : > { %9969 = vmatprep.subr.bf16.mxu0 %v11087_v47  ;;  %v6922_v31 = vrot.slane %v13831_v9, %v12585_v53 }
 0xa6c   : > { %9971 = vmatpush1.bf16.msra.mxu0 %v9970_v37  ;;  %v8077_v37 = vld [vmem:[%s14377_s23 + $0x830] sm:$0xff] }
 0xa6d   : > { %9972 = vmatprep.subr.bf16.mxu0 %v11087_v47 }
 0xa70   : > { %9974 = vmatpush1.bf16.msra.mxu0 %v9973_v39  ;;  %v10027_v39 = vpack.c.bf16 %v8078_v44, %v8077_v37  ;;  %v13971_v37 = vld [vmem:[#allocation3 + $0x13] ss:$8 sm:$0x3] }
 0xa71   : > { %9975 = vmatprep.subr.bf16.mxu0 %v11087_v47 }
 0xa74   : > { %9977 = vmatpush1.bf16.msra.mxu0 %v9976_v28  ;;  %v8080_v28 = vld [vmem:[%s14377_s23 + $0x848] sm:$0xff] }
 0xa75   : > { %9978 = vmatprep.subr.bf16.mxu0 %v11087_v47  ;;  %v10030_v43 = vpack.c.bf16 %v8080_v28, %v8079_v1  ;;  %v8105_v1 = vld [vmem:[%s14377_s23 + $0x908] sm:$0xff]  ;;  %v7034_v28 = vrot.slane %v13971_v37, %v12585_v53 }
 0xa78   : > { %9980 = vmatpush1.bf16.msra.mxu0 %v9979_v55  ;;  %v8081_v55 = vld [vmem:[%s14377_s23 + $0x850] sm:$0xff] }
 0xa79   : > { %9981 = vmatprep.subr.bf16.mxu0 %v11087_v47  ;;  %v10033_v45 = vpack.c.bf16 %v8082_v54, %v8081_v55  ;;  %v8108_v54 = vld [vmem:[%s14377_s23 + $0x920] sm:$0xff] }
 0xa7c   : > { %9983 = vmatpush1.bf16.msra.mxu0 %v9982_v8  ;;  %v8083_v8 = vld [vmem:[%s14377_s23 + $0x860] sm:$0xff] }
 0xa7d   : > { %9984 = vmatprep.subr.bf16.mxu0 %v11087_v47  ;;  %v10036_v52 = vpack.c.bf16 %v8084_v56, %v8083_v8  ;;  %v8110_v56 = vld [vmem:[%s14377_s23 + $0x930] sm:$0xff] }
 0xa7f   : > { %6767 = vmatmul.mubr.f32.vlgmr.msra.gmra.mrb[36].mxu0 %v6694_v4 }
 0xa80   : > { %9986 = vmatpush1.bf16.msra.mxu0 %v9985_v19  ;;  %8074 = vmatprep.mubr.msk.f32.mxu0 %vm5761_vm15, %v6810_v15  ;;  %v8086_v19 = vld [vmem:[%s14377_s23 + $0x878] sm:$0xff]  ;;  %v10042_v15 = vpack.c.bf16 %v8088_v29, %v8087_v12  ;;  %v8114_v29 = vld [vmem:[%s14377_s23 + $0x950] sm:$0xff] }
 0xa81   : > { %9987 = vmatprep.subr.bf16.mxu0 %v11087_v47  ;;  %v10039_v4 = vpack.c.bf16 %v8086_v19, %v8085_v2  ;;  %v8112_v19 = vld [vmem:[%s14377_s23 + $0x940] sm:$0xff] }
 0xa84   : > { %9989 = vmatpush1.bf16.msra.mxu0 %v9988_v7  ;;  %v8089_v7 = vld [vmem:[%s14377_s23 + $0x890] sm:$0xff] }
 0xa85   : > { %9990 = vmatprep.subr.bf16.mxu0 %v11087_v47  ;;  %v10045_v48 = vpack.c.bf16 %v8090_v57, %v8089_v7  ;;  %v8116_v57 = vld [vmem:[%s14377_s23 + $0x960] sm:$0xff] }
 0xa88   : > { %9992 = vmatpush1.bf16.msra.mxu0 %v9991_v49  ;;  %v8091_v49 = vld [vmem:[%s14377_s23 + $0x8a0] sm:$0xff] }
 0xa89   : > { %9993 = vmatprep.subr.bf16.mxu0 %v11087_v47  ;;  %v10048_v62 = vpack.c.bf16 %v8092_v51, %v8091_v49  ;;  %v8118_v51 = vld [vmem:[%s14377_s23 + $0x970] sm:$0xff] }
 0xa8c   : > { %9995 = vmatpush1.bf16.msra.mxu0 %v9994_v60  ;;  %v7223_v60 = vld [vmem:[%s14378_s19 + $0x8] sm:$0xff] }
 0xa8d   : > { %9996 = vmatprep.subr.bf16.mxu0 %v11087_v47 }
 0xa90   : > { %9998 = vmatpush1.bf16.msra.mxu0 %v9997_v42  ;;  %v10141_v42 = vpack.c.bf16 %v7223_v60, %v7222_v30  ;;  %v8119_v30 = vld [vmem:[%s14377_s23 + $0x978] sm:$0xff] }
 0xa91   : > { %9999 = vmatprep.subr.bf16.mxu0 %v11087_v47  ;;  %v10087_v60 = vpack.c.bf16 %v8119_v30, %v8118_v51  ;;  %v5766_v30 = vld [vmem:[#allocation22] sm:$0x1] }
 0xa92   : > { %10142 = vmatpush3.bf16.msra.mxu1 %v10141_v42 }
 0xa93   : > { %10143 = vmatprep.subr.bf16.mxu1 %v11087_v47 }
 0xa94   : > { %10001 = vmatpush1.bf16.msra.mxu0 %v10000_v5  ;;  %v8094_v5 = vld [vmem:[%s14377_s23 + $0x8b8] sm:$0xff] }
 0xa95   : > { %10002 = vmatprep.subr.bf16.mxu0 %v11087_v47  ;;  %v10051_v14 = vpack.c.bf16 %v8094_v5, %v8093_v3  ;;  %v8123_v3 = vld [vmem:[%s14377_s23 + $0x998] sm:$0xff] }
 0xa96   : > { %10145 = vmatpush3.bf16.msra.mxu1 %v10144_v16  ;;  %v10093_v5 = vpack.c.bf16 %v8123_v3, %v8122_v63  ;;  %v8124_v16 = vld [vmem:[%s14377_s23 + $0x9a0] sm:$0xff] }
 0xa97   : > { %10146 = vmatprep.subr.bf16.mxu1 %v11087_v47 }
 0xa98   : > { %10004 = vmatpush1.bf16.msra.mxu0 %v10003_v23  ;;  %v7227_v23 = vld [vmem:[%s14378_s19 + $0x28] sm:$0xff] }
 0xa99   : > { %10005 = vmatprep.subr.bf16.mxu0 %v11087_v47  ;;  %v10147_v36 = vpack.c.bf16 %v7227_v23, %v7226_v10  ;;  %v8125_v10 = vld [vmem:[%s14377_s23 + $0x9a8] sm:$0xff] }
 0xa9a   : > { %v10096_v23 = vpack.c.bf16 %v8125_v10, %v8124_v16  ;;  %v7315_v10 = vld [vmem:[%s14379_s22 + $0x10] sm:$0xff] }
 0xa9b   : > { %10148 = vmatpush3.bf16.msra.mxu1 %v10147_v36  ;;  %v8129_v36 = vld [vmem:[%s14377_s23 + $0x9c0] sm:$0xff] }
 0xa9c   : > { %10007 = vmatpush1.bf16.msra.mxu0 %v10006_v26  ;;  %v8096_v26 = vld [vmem:[%s14377_s23 + $0x8c8] sm:$0xff]  ;;  %10149 = vmatprep.subr.bf16.mxu1 %v11087_v47 }
 0xa9d   : > { %10008 = vmatprep.subr.bf16.mxu0 %v11087_v47  ;;  %v10054_v38 = vpack.c.bf16 %v8096_v26, %v8095_v13  ;;  %v8127_v13 = vld [vmem:[%s14377_s23 + $0x9b8] sm:$0xff] }
 0xaa0   : > { %10010 = vmatpush1.bf16.msra.mxu0 %v10009_v17  ;;  %v7229_v17 = vld [vmem:[%s14378_s19 + $0x38] sm:$0xff] }
 0xaa1   : > { %10011 = vmatprep.subr.bf16.mxu0 %v11087_v47  ;;  %v10150_v41 = vpack.c.bf16 %v7229_v17, %v7228_v34  ;;  %v8130_v34 = vld [vmem:[%s14377_s23 + $0x9c8] sm:$0xff]  ;;  %v14071_v17 = vld [vmem:[#allocation3 + $0x14] ss:$8 sm:$0x3] }
 0xaa3   : > { %10151 = vmatpush3.bf16.msra.mxu1 %v10150_v41  ;;  %v8132_v41 = vld [vmem:[%s14377_s23 + $0x9d8] sm:$0xff] }
 0xaa4   : > { %10013 = vmatpush1.bf16.msra.mxu0 %v10012_v20  ;;  %v8098_v20 = vld [vmem:[%s14377_s23 + $0x8d8] sm:$0xff]  ;;  %10152 = vmatprep.subr.bf16.mxu1 %v11087_v47 }
 0xaa5   : > { %10014 = vmatprep.subr.bf16.mxu0 %v11087_v47  ;;  %v10057_v24 = vpack.c.bf16 %v8098_v20, %v8097_v18  ;;  %v7030_v18 = vrot.slane %v13971_v37, %v12583_v50  ;;  %v8131_v20 = vld [vmem:[%s14377_s23 + $0x9d0] sm:$0xff] }
 0xaa8   : > { %10016 = vmatpush1.bf16.msra.mxu0 %v10015_v25  ;;  %v7231_v25 = vld [vmem:[%s14378_s19 + $0x48] sm:$0xff] }
 0xaa9   : > { %10017 = vmatprep.subr.bf16.mxu0 %v11087_v47  ;;  %v10153_v27 = vpack.c.bf16 %v7231_v25, %v7230_v21  ;;  %v7146_v21 = vrot.slane %v14071_v17, %v12585_v53  ;;  %v10105_v25 = vpack.c.bf16 %v8132_v41, %v8131_v20  ;;  %v8135_v53 = vld [vmem:[%s14377_s23 + $0x9f0] sm:$0xff] }
 0xaaa   : > { %v7323_v41 = vld [vmem:[%s14379_s22 + $0x50] sm:$0xf] }
 0xaab   : > { %10154 = vmatpush3.bf16.msra.mxu1 %v10153_v27  ;;  %v8136_v27 = vld [vmem:[%s14377_s23 + $0x9f8] sm:$0xff] }
 0xaac   : > { %10019 = vmatpush1.bf16.msra.mxu0 %v10018_v22  ;;  %v8100_v22 = vld [vmem:[%s14377_s23 + $0x8e8] sm:$0xff]  ;;  %10155 = vmatprep.subr.bf16.mxu1 %v11087_v47 }
 0xaad   : > { %10020 = vmatprep.subr.bf16.mxu0 %v11087_v47  ;;  %v10060_v32 = vpack.c.bf16 %v8100_v22, %v8099_v11  ;;  %v8134_v11 = vld [vmem:[%s14377_s23 + $0x9e8] sm:$0xff] }
 0xab0   : > { %10022 = vmatpush1.bf16.msra.mxu0 %v10021_v59  ;;  %v7233_v59 = vld [vmem:[%s14378_s19 + $0x58] sm:$0xff] }
 0xab1   : > { %10023 = vmatprep.subr.bf16.mxu0 %v11087_v47 }
 0xab3   : > { %6879 = vmatmul.mubr.f32.vlgmr.msra.gmra.mrb[36].mxu0 %v6806_v35  ;;  %v10156_v35 = vpack.c.bf16 %v7233_v59, %v7232_v58  ;;  %v10111_v58 = vpack.c.bf16 %v8136_v27, %v8135_v53  ;;  %v8137_v59 = vld [vmem:[%s14377_s23 + $0xa00] sm:$0xff] }
 0xab4   : > { %10025 = vmatpush1.bf16.msra.mxu0 %v10024_v46  ;;  %8101 = vmatprep.mubr.msk.f32.mxu0 %vm5761_vm15, %v6922_v31  ;;  %v8103_v46 = vld [vmem:[%s14377_s23 + $0x8f8] sm:$0xff]  ;;  %v6918_v31 = vrot.slane %v13831_v9, %v12583_v50 }
 0xab5   : > { %v13845_v6 = vpop.f32.mrb[72].mxu1  ;;  %10026 = vmatprep.subr.bf16.mxu0 %v11087_v47  ;;  %v10063_v44 = vpack.c.bf16 %v8103_v46, %v8102_v33  ;;  %10157 = vmatpush3.bf16.msra.mxu1 %v10156_v35  ;;  %v8139_v46 = vld [vmem:[%s14377_s23 + $0xa10] sm:$0xff]  ;;  %v8140_v35 = vld [vmem:[%s14377_s23 + $0xa18] sm:$0xff] }
 0xab6   : > { %v6098_v40 = vpop.f32.mrb[73].mxu1  ;;  %10158 = vmatprep.subr.bf16.mxu1 %v11087_v47  ;;  %v10117_v37 = vpack.c.bf16 %v8140_v35, %v8139_v46 }
 0xab7   : > { %v8106_v40 = vld [vmem:[%s14377_s23 + $0x910] sm:$0xff] }
 0xab8   : > { %10028 = vmatpush1.bf16.msra.mxu0 %v10027_v39  ;;  %v8104_v39 = vld [vmem:[%s14377_s23 + $0x900] sm:$0xff] }
 0xab9   : > { %10029 = vmatprep.subr.bf16.mxu0 %v11087_v47  ;;  %v10066_v9 = vpack.c.bf16 %v8105_v1, %v8104_v39  ;;  %v8143_v1 = vld [vmem:[%s14377_s23 + $0xa30] sm:$0xff] }
 0xabc   : > { %10031 = vmatpush1.bf16.msra.mxu0 %v10030_v43  ;;  %v8107_v43 = vld [vmem:[%s14377_s23 + $0x918] sm:$0xff] }
 0xabd   : > { %10032 = vmatprep.subr.bf16.mxu0 %v11087_v47  ;;  %v10069_v55 = vpack.c.bf16 %v8107_v43, %v8106_v40  ;;  %v8145_v40 = vld [vmem:[%s14377_s23 + $0xa40] sm:$0xff]  ;;  %v8146_v43 = vld [vmem:[%s14377_s23 + $0xa48] sm:$0xff] }
 0xac0   : > { %10034 = vmatpush1.bf16.msra.mxu0 %v10033_v45  ;;  %v8109_v45 = vld [vmem:[%s14377_s23 + $0x928] sm:$0xff] }
 0xac1   : > { %10035 = vmatprep.subr.bf16.mxu0 %v11087_v47  ;;  %v10072_v8 = vpack.c.bf16 %v8109_v45, %v8108_v54  ;;  %v8147_v54 = vld [vmem:[%s14377_s23 + $0xa50] sm:$0xff]  ;;  %v8148_v45 = vld [vmem:[%s14377_s23 + $0xa58] sm:$0xff] }
 0xac4   : > { %10037 = vmatpush1.bf16.msra.mxu0 %v10036_v52  ;;  %v8111_v52 = vld [vmem:[%s14377_s23 + $0x938] sm:$0xff] }
 0xac5   : > { %10038 = vmatprep.subr.bf16.mxu0 %v11087_v47  ;;  %v10075_v2 = vpack.c.bf16 %v8111_v52, %v8110_v56  ;;  %v8149_v56 = vld [vmem:[%s14377_s23 + $0xa60] sm:$0xff]  ;;  %v8150_v52 = vld [vmem:[%s14377_s23 + $0xa68] sm:$0xff] }
 0xac8   : > { %10040 = vmatpush1.bf16.msra.mxu0 %v10039_v4  ;;  %v8113_v4 = vld [vmem:[%s14377_s23 + $0x948] sm:$0xff] }
 0xac9   : > { %10041 = vmatprep.subr.bf16.mxu0 %v11087_v47  ;;  %v10078_v12 = vpack.c.bf16 %v8113_v4, %v8112_v19  ;;  %v8151_v19 = vld [vmem:[%s14377_s23 + $0xa70] sm:$0xff]  ;;  %v8152_v4 = vld [vmem:[%s14377_s23 + $0xa78] sm:$0xff] }
 0xacc   : > { %10043 = vmatpush1.bf16.msra.mxu0 %v10042_v15  ;;  %v8115_v15 = vld [vmem:[%s14377_s23 + $0x958] sm:$0xff] }
 0xacd   : > { %10044 = vmatprep.subr.bf16.mxu0 %v11087_v47  ;;  %v10081_v7 = vpack.c.bf16 %v8115_v15, %v8114_v29  ;;  %v8153_v29 = vld [vmem:[%s14377_s23 + $0xa80] sm:$0xff]  ;;  %v8154_v15 = vld [vmem:[%s14377_s23 + $0xa88] sm:$0xff] }
 0xad0   : > { %10046 = vmatpush1.bf16.msra.mxu0 %v10045_v48  ;;  %v8117_v48 = vld [vmem:[%s14377_s23 + $0x968] sm:$0xff] }
 0xad1   : > { %10047 = vmatprep.subr.bf16.mxu0 %v11087_v47  ;;  %v10084_v49 = vpack.c.bf16 %v8117_v48, %v8116_v57  ;;  %v7142_v57 = vrot.slane %v14071_v17, %v12583_v50  ;;  %v7234_v48 = vld [vmem:[%s14378_s19 + $0x60] sm:$0xff]  ;;  %v7236_v50 = vld [vmem:[%s14378_s19 + $0x70] sm:$0xff] }
 0xad4   : > { %10049 = vmatpush1.bf16.msra.mxu0 %v10048_v62  ;;  %v8121_v62 = vld [vmem:[%s14377_s23 + $0x988] sm:$0xff] }
 0xad5   : > { %10050 = vmatprep.subr.bf16.mxu0 %v11087_v47  ;;  %v10090_v42 = vpack.c.bf16 %v8121_v62, %v8120_v61  ;;  %v7313_v61 = vld [vmem:[%s14379_s22] sm:$0xff]  ;;  %v7314_v62 = vld [vmem:[%s14379_s22 + $0x8] sm:$0xff] }
 0xad8   : > { %10052 = vmatpush1.bf16.msra.mxu0 %v10051_v14  ;;  %v8126_v14 = vld [vmem:[%s14377_s23 + $0x9b0] sm:$0xff] }
 0xad9   : > { %10053 = vmatprep.subr.bf16.mxu0 %v11087_v47  ;;  %v10099_v26 = vpack.c.bf16 %v8127_v13, %v8126_v14  ;;  %v7317_v14 = vld [vmem:[%s14379_s22 + $0x20] sm:$0xff]  ;;  %v7318_v13 = vld [vmem:[%s14379_s22 + $0x28] sm:$0xff] }
 0xadc   : > { %10055 = vmatpush1.bf16.msra.mxu0 %v10054_v38  ;;  %v10102_v38 = vpack.c.bf16 %v8130_v34, %v8129_v36  ;;  %v7319_v36 = vld [vmem:[%s14379_s22 + $0x30] sm:$0xff]  ;;  %v7320_v34 = vld [vmem:[%s14379_s22 + $0x38] sm:$0xff] }
 0xadd   : > { %10056 = vmatprep.subr.bf16.mxu0 %v11087_v47  ;;  %v10171_v17 = vpack.c.bf16 %v7320_v34, %v7319_v36 }
 0xae0   : > { %10058 = vmatpush1.bf16.msra.mxu0 %v10057_v24  ;;  %v8133_v24 = vld [vmem:[%s14377_s23 + $0x9e0] sm:$0xff] }
 0xae1   : > { %10059 = vmatprep.subr.bf16.mxu0 %v11087_v47  ;;  %v10108_v22 = vpack.c.bf16 %v8134_v11, %v8133_v24 }
 0xae4   : > { %10061 = vmatpush1.bf16.msra.mxu0 %v10060_v32  ;;  %v8138_v32 = vld [vmem:[%s14377_s23 + $0xa08] sm:$0xff] }
 0xae5   : > { %10062 = vmatprep.subr.bf16.mxu0 %v11087_v47  ;;  %v10114_v33 = vpack.c.bf16 %v8138_v32, %v8137_v59 }
 0xae7   : > { %6991 = vmatmul.mubr.f32.vlgmr.msra.gmra.mrb[36].mxu0 %v6918_v31  ;;  %v8142_v31 = vld [vmem:[%s14377_s23 + $0xa28] sm:$0xff] }
 0xae8   : > { %10064 = vmatpush1.bf16.msra.mxu0 %v10063_v44  ;;  %8128 = vmatprep.mubr.msk.f32.mxu0 %vm5761_vm15, %v7034_v28  ;;  %v8141_v44 = vld [vmem:[%s14377_s23 + $0xa20] sm:$0xff]  ;;  %v8144_v28 = vld [vmem:[%s14377_s23 + $0xa38] sm:$0xff] }
 0xae9   : > { %10065 = vmatprep.subr.bf16.mxu0 %v11087_v47  ;;  %v10120_v39 = vpack.c.bf16 %v8142_v31, %v8141_v44 }
 0xaec   : > { %10067 = vmatpush1.bf16.msra.mxu0 %v10066_v9  ;;  %v10123_v9 = vpack.c.bf16 %v8144_v28, %v8143_v1 }
 0xaed   : > { %10068 = vmatprep.subr.bf16.mxu0 %v11087_v47 }
 0xaf0   : > { %10070 = vmatpush1.bf16.msra.mxu0 %v10069_v55  ;;  %v10126_v55 = vpack.c.bf16 %v8146_v43, %v8145_v40 }
 0xaf1   : > { %10071 = vmatprep.subr.bf16.mxu0 %v11087_v47 }
 0xaf4   : > { %10073 = vmatpush1.bf16.msra.mxu0 %v10072_v8  ;;  %v10129_v8 = vpack.c.bf16 %v8148_v45, %v8147_v54 }
 0xaf5   : > { %10074 = vmatprep.subr.bf16.mxu0 %v11087_v47 }
 0xaf8   : > { %10076 = vmatpush1.bf16.msra.mxu0 %v10075_v2  ;;  %v10132_v2 = vpack.c.bf16 %v8150_v52, %v8149_v56 }
 0xaf9   : > { %10077 = vmatprep.subr.bf16.mxu0 %v11087_v47 }
 0xafc   : > { %10079 = vmatpush1.bf16.msra.mxu0 %v10078_v12  ;;  %v10135_v12 = vpack.c.bf16 %v8152_v4, %v8151_v19 }
 0xafd   : > { %10080 = vmatprep.subr.bf16.mxu0 %v11087_v47 }
 0xb00   : > { %10082 = vmatpush1.bf16.msra.mxu0 %v10081_v7  ;;  %v10138_v7 = vpack.c.bf16 %v8154_v15, %v8153_v29 }
 0xb01   : > { %10083 = vmatprep.subr.bf16.mxu0 %v11087_v47 }
 0xb04   : > { %10085 = vmatpush1.bf16.msra.mxu0 %v10084_v49  ;;  %v7235_v49 = vld [vmem:[%s14378_s19 + $0x68] sm:$0xff] }
 0xb05   : > { %10086 = vmatprep.subr.bf16.mxu0 %v11087_v47  ;;  %v10159_v51 = vpack.c.bf16 %v7235_v49, %v7234_v48 }
 0xb07   : > { %10160 = vmatpush3.bf16.msra.mxu1 %v10159_v51 }
 0xb08   : > { %10088 = vmatpush1.bf16.msra.mxu0 %v10087_v60  ;;  %8507 = vmatprep.subr.mxu1 %v11085_v0  ;;  %v10180_v60 = vadd.f32 %v13845_v6, %v5766_v30  ;;  %v7316_v6 = vld [vmem:[%s14379_s22 + $0x18] sm:$0xff] }
 0xb09   : > { %10089 = vmatprep.subr.bf16.mxu0 %v11087_v47 }
 0xb0b   : > { %8508 = vmatpush3.msra.mxu1 %v7236_v50 }
 0xb0c   : > { %10091 = vmatpush1.bf16.msra.mxu0 %v10090_v42  ;;  %10161 = vmatprep.subr.bf16.mxu1 %v11087_v47 }
 0xb0d   : > { %10092 = vmatprep.subr.bf16.mxu0 %v11087_v47 }
 0xb10   : > { %10094 = vmatpush1.bf16.msra.mxu0 %v10093_v5  ;;  %v10162_v5 = vpack.c.bf16 %v7314_v62, %v7313_v61 }
 0xb11   : > { %10095 = vmatprep.subr.bf16.mxu0 %v11087_v47 }
 0xb14   : > { %10097 = vmatpush1.bf16.msra.mxu0 %v10096_v23  ;;  %v10165_v23 = vpack.c.bf16 %v7316_v6, %v7315_v10 }
 0xb15   : > { %10098 = vmatprep.subr.bf16.mxu0 %v11087_v47 }
 0xb18   : > { %10100 = vmatpush1.bf16.msra.mxu0 %v10099_v26  ;;  %v10168_v26 = vpack.c.bf16 %v7318_v13, %v7317_v14 }
 0xb19   : > { %10101 = vmatprep.subr.bf16.mxu0 %v11087_v47 }
 0xb1b   : > { %7103 = vmatmul.mubr.f32.vlgmr.msra.gmra.mrb[36].mxu0 %v7030_v18  ;;  %v7322_v18 = vld [vmem:[%s14379_s22 + $0x48] sm:$0xff] }
 0xb1c   : > { %10103 = vmatpush1.bf16.msra.mxu0 %v10102_v38  ;;  %8155 = vmatprep.mubr.msk.f32.mxu0 %vm5761_vm15, %v7146_v21  ;;  %v7321_v38 = vld [vmem:[%s14379_s22 + $0x40] sm:$0xff] }
 0xb1d   : > { %10104 = vmatprep.subr.bf16.mxu0 %v11087_v47  ;;  %v10174_v20 = vpack.c.bf16 %v7322_v18, %v7321_v38 }
 0xb20   : > { %10106 = vmatpush1.bf16.msra.mxu0 %v10105_v25 }
 0xb21   : > { %10107 = vmatprep.subr.bf16.mxu0 %v11087_v47 }
 0xb24   : > { %10109 = vmatpush1.bf16.msra.mxu0 %v10108_v22  ;;  %v7324_v22 = vld [vmem:[#allocation25] sm:$0x1] }
 0xb25   : > { %10110 = vmatprep.subr.bf16.mxu0 %v11087_v47 }
 0xb28   : > { %10112 = vmatpush1.bf16.msra.mxu0 %v10111_v58 }
 0xb29   : > { %10113 = vmatprep.subr.bf16.mxu0 %v11087_v47 }
 0xb2c   : > { %10115 = vmatpush1.bf16.msra.mxu0 %v10114_v33 }
 0xb2d   : > { %10116 = vmatprep.subr.bf16.mxu0 %v11087_v47 }
 0xb30   : > { %10118 = vmatpush1.bf16.msra.mxu0 %v10117_v37 }
 0xb31   : > { %10119 = vmatprep.subr.bf16.mxu0 %v11087_v47 }
 0xb34   : > { %10121 = vmatpush1.bf16.msra.mxu0 %v10120_v39 }
 0xb35   : > { %10122 = vmatprep.subr.bf16.mxu0 %v11087_v47 }
 0xb38   : > { %10124 = vmatpush1.bf16.msra.mxu0 %v10123_v9 }
 0xb39   : > { %10125 = vmatprep.subr.bf16.mxu0 %v11087_v47 }
 0xb3c   : > { %10127 = vmatpush1.bf16.msra.mxu0 %v10126_v55 }
 0xb3d   : > { %10128 = vmatprep.subr.bf16.mxu0 %v11087_v47 }
 0xb40   : > { %10130 = vmatpush1.bf16.msra.mxu0 %v10129_v8 }
 0xb41   : > { %10131 = vmatprep.subr.bf16.mxu0 %v11087_v47 }
 0xb44   : > { %10133 = vmatpush1.bf16.msra.mxu0 %v10132_v2 }
 0xb45   : > { %10134 = vmatprep.subr.bf16.mxu0 %v11087_v47 }
 0xb48   : > { %10136 = vmatpush1.bf16.msra.mxu0 %v10135_v12 }
 0xb49   : > { %10137 = vmatprep.subr.bf16.mxu0 %v11087_v47 }
 0xb4c   : > { %10139 = vmatpush1.bf16.msra.mxu0 %v10138_v7 }
 0xb4f   : > { %7215 = vmatmul.mubr.f32.vlgmr.msra.gmra.mrb[36].mxu0 %v7142_v57 }
 0xc22   : > { %v7216_v42 = vpop.f32.mrb[36].mxu0 }
 0xc23   : > { %v10181_v63 = vadd.f32 %v10180_v60, %v7216_v42  ;;  %v7218_v3 = vpop.f32.mrb[37].mxu0 }
 0xc25   : > { %v7221_v16 = vmax.f32 %v10181_v63, 0.0 }
 0xc27   : > { %8510 = vmatmul.mubr.msk.f32.vlgmr.msra.gmra.mrb[74].mxu1 %vm7238_vm3, %v7221_v16 }
 0xc28   : > { %10163 = vmatpush3.bf16.msra.mxu1 %v10162_v5  ;;  %8534 = vmatprep.mubr.msk.f32.mxu1 %vm11088_vm2, %v11085_v0 }
 0xc29   : > { %10164 = vmatprep.subr.bf16.mxu1 %v11087_v47 }
 0xc2c   : > { %10166 = vmatpush3.bf16.msra.mxu1 %v10165_v23 }
 0xc2d   : > { %10167 = vmatprep.subr.bf16.mxu1 %v11087_v47 }
 0xc30   : > { %10169 = vmatpush3.bf16.msra.mxu1 %v10168_v26 }
 0xc31   : > { %10170 = vmatprep.subr.bf16.mxu1 %v11087_v47 }
 0xc34   : > { %10172 = vmatpush3.bf16.msra.mxu1 %v10171_v17 }
 0xc35   : > { %10173 = vmatprep.subr.bf16.mxu1 %v11087_v47  ;;  %v7237_v47 = vld [vmem:[#allocation24] sm:$0x1] }
 0xc38   : > { %10175 = vmatpush3.bf16.msra.mxu1 %v10174_v20 }
 0xc39   : > { %8532 = vmatprep.subr.mxu1 %v11085_v0 }
 0xc3c   : > { %8533 = vmatpush3.msk.msra.mxu1 %vm2263_vm1, %v7323_v41 }
 0xcfa   : > { %v7308_v21 = vpop.f32.mrb[74].mxu1 }
 0xcfb   : > { %v7309_v25 = vadd.f32 %v7308_v21, %v7237_v47  ;;  %v8511_v24 = vpop.f32.mrb[75].mxu1 }
 0xcfd   : > { %v7312_v11 = vmax.f32 %v7309_v25, 0.0 }
 0xcff   : > { %8535 = vmatmul.mubr.msk.f32.vlgmr.msra.gmra.mrb[76].mxu1 %vm7325_vm4, %v7312_v11 }
 0xdd2   : > { %v7398_v0 = vpop.f32.mrb[76].mxu1 }
 0xdd3   : > { %v7399_v53 = vadd.f32 %v7398_v0, %v7324_v22  ;;  %v8536_v27 = vpop.f32.mrb[77].mxu1 }
 0xdd5   : > { %7403 = vst.msk [vmem:[%s798_s4] sm:$0x1] %vm7402_vm5, %v7399_v53 }
 0xdd6   : > { %10980 = shalt.err (!%p10977_p7)
}
 0xdd7   : > { %s10981_s7 = scalar_lea.hbm %s14225_s5, 16  ;;  %s10985_s15 = scalar_lea.hbm %s14380_s2, 32 }
 0xdd8   : > { %p10982_p10 = scmp.ne.s32.totalorder %s14225_s5, %s10981_s7  ;;  %p10986_p12 = scmp.lt.u32.totalorder %s14225_s5, %s14380_s2 }
 0xdd9   : > { %p10987_p13 = scmp.lt.u32.totalorder %s10985_s15, %s10981_s7  ;;  %p10989_p6 = scmp.lt.u32.totalorder %s10981_s7, %s14225_s5 }
 0xdda   : > { %p10983_p1 = pnand %p10982_p10, %p14381_p9 }
 0xddb   : > { %p10988_p8 = por %p10987_p13, %p10986_p12 }
 0xddc   : > { %p10984_p11 = pneg %p10983_p1 }
 0xddd   : > { %p10990_p4 = por %p10989_p6, %p10988_p8 }
 0xddf   : > { %p10991_p3 = pnand %p10990_p4, %p10984_p11 }
 0xde1   : > { %10994 = shalt.err (!%p10991_p3)
}
 0xde2   : > { %10438 = dma.vmem_to_hbm [thread:$0]  (%p14381_p9), %s14227_s24, 16, %s14225_s5, %s7405_s0  }
 0xde3 PF: > { %s14382_s10 = sld [smem:[#allocation37_spill]]  ;;  %p14383_p0 = scmp.ne.s32.totalorder %s14350_s29, 0 }
 0xde4   : > { %p14384_p5 = scmp.ge.s32.totalorder %s11061_s21, 2 }
 0xde6   : > { %p10485_p2 = pnand %p14384_p5, %p14383_p0 }
 0xde9   : > { %s7429_s1 = sand.u32 1, %s14382_s10  }
 0xdea   : > { %s7430_s13 = scalar_lea.sflag [#allocation6], %s7429_s1 }
 0xdeb   : > { %11044 = dma.done.wait (!%p10485_p2), %s7430_s13, 16  }
 0xdec   : > { %11046 = vsyncadd (!%p10485_p2), %s7430_s13, 4294967280  ;;  %p39_p7 = scmp.ge.s32.totalorder %s11506_s3, 4   ;;  %s14385_s0 = smov %s11053_s30 }
 0xded   : > { %s14386_s30 = smov %s11057_s20  ;;  %s14387_s20 = smov %s11518_s9 }
 0xdee   : > { %s14388_s21 = smov %s11506_s3  ;;  %41 = sbr.rel (!%p39_p7) target bundleno = 28 (0x1c), region = 225 }
 0xdf5   :  { %7434 = vsyncpa [#allocation5], 1 }
 0xdf6   :  { %7436 = vsyncpa [#allocation5 + $0x1], 1 }
 0xdf7   :  { %7437 = vsyncpa [#allocation8], 1 }
 0xdf8   :  { %7438 = vsyncpa [#allocation11], 1 }
 0xdf9   :  { %7439 = vsyncpa [#allocation14], 1 }
 0xdfa   :  { %7440 = vsyncpa [#allocation17], 1 }
 0xdfb   :  { %7441 = vsyncpa [#allocation20], 1 }
 0xdfc   :  { %7442 = vsyncpa [#allocation23], 1 }
 0xdfd   :  { %7443 = vsyncpa [#allocation26], 1 }
 0xdfe   :  { %7444 = vsyncpa [#allocation6], 1 }
 0xdff   :  { %7446 = vsyncpa [#allocation6 + $0x1], 1 }

</bundles_post_ra>
